<compile_context>
chip_gen: v7x
topology: tpu7x:2x2x1
jax: 0.10.0
libtpu: 0.0.40
codegen_flags: <defaults>
</compile_context>

<pallas_src>
import functools
import math

import jax
import jax.numpy as jnp
from jax.experimental import pallas as pl
from jax.experimental.pallas import tpu as pltpu

CONV_KERNELS = (3, 5, 7, 9)
CONV_GROUPS = (1, 4, 8, 16)
KMAX = max(CONV_KERNELS)          # fused kernel size (9)
PAD = KMAX // 2                   # fused "same" padding (4)
_VMEM_LIMIT = 32 * 1024 * 1024


def _pick_tile_h(H, W, tile_h):
    """Row-tile height: must divide H; prefer lane-dense tiles (tile_h*W % 128 == 0)."""
    if tile_h is not None and H % tile_h == 0:
        return tile_h
    for th in (16, 8, 4, 2):
        if H % th == 0 and (th * W) % 128 == 0:
            return th
    return H


# --------------------------------------------------------------------------
# Kernel 1: fused 4-branch conv  ->  NC(HW) features + per-channel spatial sums.
# --------------------------------------------------------------------------
def fused_psa_conv(xp, w_fused, H, W, tile_h, out_dtype):
    """xp: (B, Hp, Wp, Cin) padded NHWC input; w_fused: (9, 4*Cs, 9*Cin).
    Returns feats (B, 4*Cs, H*W) [channels ordered br3,br2,br1,br0] and
    csum (B, 4*Cs, 1) = per-channel sums over all pixels (f32)."""
    B, Hp, Wp, Cin = xp.shape
    _, Cout, KCin = w_fused.shape
    TH = tile_h
    R = H // TH
    TW = TH * W

    def kernel(xp_ref, w_ref, feat_ref, csum_ref, patch_ref, acc_ref):
        r = pl.program_id(1)
        row0 = pl.multiple_of(r * TH, TH)
        # Input row band covering the full vertical halo of the 9x9 kernel.
        band = xp_ref[0, pl.ds(row0, TH + KMAX - 1), :, :]        # (TH+8, Wp, Cin)

        acc = jnp.zeros((Cout, TW), jnp.float32)
        for kh in range(KMAX):
            rows = band[kh:kh + TH]                               # (TH, Wp, Cin)
            # im2col row slab in VMEM scratch: K = 9*Cin per kh.
            for kw in range(KMAX):
                patch_ref[:, :, kw * Cin:(kw + 1) * Cin] = rows[:, kw:kw + W, :]
            patch = patch_ref[...].reshape(TW, KMAX * Cin)        # (TH*W, 9*Cin)
            # NT matmul: (Cout, K) x (TH*W, K)^T -> (Cout, TH*W)  (lane-dense N).
            acc = acc + jax.lax.dot_general(
                w_ref[kh], patch,
                dimension_numbers=(((1,), (1,)), ((), ())),
                preferred_element_type=jnp.float32)

        feat_ref[0] = acc.astype(feat_ref.dtype)

        # Per-channel spatial sums, accumulated across row tiles (SE avg-pool feed).
        part = jnp.sum(acc, axis=1, keepdims=True)                # (Cout, 1)

        @pl.when(r == 0)
        def _init():
            acc_ref[...] = jnp.zeros_like(acc_ref)

        acc_ref[...] += part

        @pl.when(r == pl.num_programs(1) - 1)
        def _flush():
            csum_ref[0] = acc_ref[...]

    feats, csum = pl.pallas_call(
        kernel,
        out_shape=(jax.ShapeDtypeStruct((B, Cout, H * W), out_dtype),
                   jax.ShapeDtypeStruct((B, Cout, 1), jnp.float32)),
        grid=(B, R),
        in_specs=[
            pl.BlockSpec((1, Hp, Wp, Cin), lambda b, r: (b, 0, 0, 0)),   # resident over r
            pl.BlockSpec((KMAX, Cout, KCin), lambda b, r: (0, 0, 0)),    # resident weight
        ],
        out_specs=(
            pl.BlockSpec((1, Cout, TW), lambda b, r: (b, 0, r)),
            pl.BlockSpec((1, Cout, 1), lambda b, r: (b, 0, 0)),
        ),
        scratch_shapes=[
            pltpu.VMEM((TH, W, KMAX * Cin), xp.dtype),   # im2col slab
            pltpu.VMEM((Cout, 1), jnp.float32),          # channel-sum accumulator
        ],
        compiler_params=pltpu.CompilerParams(
            dimension_semantics=("parallel", "arbitrary"),
            vmem_limit_bytes=_VMEM_LIMIT),
    )(xp, w_fused)
    return feats, csum


# --------------------------------------------------------------------------
# Kernel 2: spatially tiled attention re-weighting (lane-dense in & out).
# --------------------------------------------------------------------------
def psa_reweight(feats, att, tile_w, out_dtype):
    """feats: (B, 4*Cs, H*W); att: (B, 4*Cs, 1) f32.  Returns (B, 4*Cs, H*W)."""
    B, Cout, HW = feats.shape
    TW = tile_w
    R = HW // TW

    def kernel(f_ref, a_ref, o_ref):
        o_ref[0] = (f_ref[0] * a_ref[0]).astype(o_ref.dtype)

    return pl.pallas_call(
        kernel,
        out_shape=jax.ShapeDtypeStruct((B, Cout, HW), out_dtype),
        grid=(B, R),
        in_specs=[
            pl.BlockSpec((1, Cout, TW), lambda b, r: (b, 0, r)),
            pl.BlockSpec((1, Cout, 1), lambda b, r: (b, 0, 0)),
        ],
        out_specs=pl.BlockSpec((1, Cout, TW), lambda b, r: (b, 0, r)),
        compiler_params=pltpu.CompilerParams(
            dimension_semantics=("parallel", "parallel"),
            vmem_limit_bytes=_VMEM_LIMIT),
    )(feats, att)


# --------------------------------------------------------------------------
# Parameter init (deterministic, synthetic) and fused-weight packing.
# --------------------------------------------------------------------------
def init_params(key, inplans, planes, conv_kernels=CONV_KERNELS,
                conv_groups=CONV_GROUPS):
    Cs = planes // 4
    hidden = max(Cs // 16, 1)              # SEWeightModule reduction=16
    keys = jax.random.split(key, 6)

    conv_ws = []
    for j, (k, g) in enumerate(zip(conv_kernels, conv_groups)):
        fan_in = (inplans // g) * k * k
        w = jax.random.normal(keys[j], (k, k, inplans, Cs),
                              jnp.float32) / math.sqrt(fan_in)
        # group mask: exact dense-weight representation of a grouped conv
        cin_pg, cout_pg = inplans // g, Cs // g
        ci = jnp.arange(inplans)[:, None] // cin_pg
        co = jnp.arange(Cs)[None, :] // cout_pg
        mask = (ci == co).astype(jnp.float32)            # (Cin, Cs)
        conv_ws.append(w * mask[None, None, :, :])

    # Fused weight: zero-pad each kxk kernel to 9x9 (centered) and concatenate along
    # Cout in REVERSED branch order (matches the module's reversed concat), then
    # flatten to per-kh MXU LHS slabs (Cout, 9*Cin) with K index = kw*Cin + ci.
    w9 = []
    for w, k in zip(conv_ws, conv_kernels):
        p = (KMAX - k) // 2
        w9.append(jnp.pad(w, ((p, p), (p, p), (0, 0), (0, 0))))
    w_cat = jnp.concatenate(w9[::-1], axis=-1)                     # (9, 9, Cin, 4*Cs)
    w_fused = w_cat.transpose(0, 3, 1, 2).reshape(KMAX, 4 * Cs, KMAX * inplans)

    se_w1 = jax.random.normal(keys[4], (Cs, hidden), jnp.float32) / math.sqrt(Cs)
    se_b1 = jnp.full((1, hidden), 0.10, jnp.float32)
    se_w2 = jax.random.normal(keys[5], (hidden, Cs), jnp.float32) / math.sqrt(hidden)
    se_b2 = jnp.full((1, Cs), -0.05, jnp.float32)
    return dict(conv_w=conv_ws, conv_w_fused=w_fused,
                se_w1=se_w1, se_b1=se_b1, se_w2=se_w2, se_b2=se_b2)


# --------------------------------------------------------------------------
# PSA forward wrapper (NCHW in / NCHW out, PyTorch convention).
# --------------------------------------------------------------------------
def psa_forward(x_nchw, params, *, tile_h=None, compute_dtype=jnp.float32):
    B, Cin, H, W = x_nchw.shape
    Cout = params["conv_w_fused"].shape[1]
    Cs = Cout // 4
    out_dtype = x_nchw.dtype
    TH = _pick_tile_h(H, W, tile_h)

    # Single input relayout (channels onto lanes for the im2col); everything
    # downstream stays NC(HW), so no output transpose is needed.
    x = jnp.transpose(x_nchw, (0, 2, 3, 1)).astype(compute_dtype)
    xp = jnp.pad(x, ((0, 0), (PAD, PAD), (PAD, PAD), (0, 0)))
    w_fused = params["conv_w_fused"].astype(compute_dtype)

    feats, csum = fused_psa_conv(xp, w_fused, H, W, TH, compute_dtype)
    # feats: (B, 4*Cs, H*W) in [br3, br2, br1, br0] channel order; csum: (B, 4*Cs, 1)

    # SE path on the tiny pooled tensor (4*Cs scalars per image) in plain JAX.
    pooled = (csum[:, :, 0] / float(H * W)).reshape(B, 4, Cs)
    h = jax.nn.relu(pooled @ params["se_w1"] + params["se_b1"])    # (B, 4, hidden)
    se = jax.nn.sigmoid(h @ params["se_w2"] + params["se_b2"])     # (B, 4, Cs)
    att = jax.nn.softmax(se, axis=1)                               # over the 4 branches
    att = att.reshape(B, 4 * Cs, 1).astype(jnp.float32)            # matches feats order

    out_flat = psa_reweight(feats, att, TH * W, out_dtype)         # (B, 4*Cs, H*W)
    return out_flat.reshape(B, Cout, H, W)                         # free reshape -> NCHW


# --------------------------------------------------------------------------
# Pure-JAX reference (same math) for a correctness check.
# --------------------------------------------------------------------------
def psa_reference(x_nchw, params):
    x = jnp.transpose(x_nchw, (0, 2, 3, 1)).astype(jnp.float32)
    outs = []
    for j, k in enumerate(CONV_KERNELS):
        pad = k // 2
        y = jax.lax.conv_general_dilated(
            x, params["conv_w"][j], window_strides=(1, 1),
            padding=[(pad, pad), (pad, pad)],
            dimension_numbers=("NHWC", "HWIO", "NHWC"))
        outs.append(y)
    feats = jnp.stack(outs, axis=1)                       # (B, 4, H, W, Cs) [br0..br3]
    pooled = feats.mean(axis=(2, 3))                      # (B, 4, Cs)
    h = jnp.maximum(pooled @ params["se_w1"] + params["se_b1"], 0.0)
    se = jax.nn.sigmoid(h @ params["se_w2"] + params["se_b2"])
    att = jax.nn.softmax(se, axis=1)
    weighted = feats * att[:, :, None, None, :]
    out = jnp.concatenate([weighted[:, 3 - i] for i in range(4)], axis=-1)
    return jnp.transpose(out, (0, 3, 1, 2))


if __name__ == "__main__":
    B, inplans, H, W = 2, 16, 16, 16
    planes = 64                                           # split_channel Cs = 16

    key = jax.random.PRNGKey(0)
    kx, kp = jax.random.split(key)
    x = jax.random.normal(kx, (B, inplans, H, W), jnp.float32)   # NCHW input
    params = init_params(kp, inplans, planes)

    fwd = jax.jit(functools.partial(psa_forward, tile_h=8))      # 2 row tiles / image
    out = jax.block_until_ready(fwd(x, params))
    ref = jax.block_until_ready(psa_reference(x, params))

    assert out.shape == (B, planes, H, W), out.shape
    err = float(jnp.max(jnp.abs(out - ref)))
    assert jnp.allclose(out, ref, rtol=2e-3, atol=2e-3), err
    print("KERNEL_OK")
</pallas_src>

<mosaic_0001>
module attributes {stable_mosaic.version = 11 : i64} {
  func.func @kernel(%arg0: i32, %arg1: i32, %arg2: memref<1x24x24x16xf32, #tpu.memory_space<vmem>>, %arg3: memref<9x64x144xf32, #tpu.memory_space<vmem>>, %arg4: memref<1x64x128xf32, #tpu.memory_space<vmem>>, %arg5: memref<1x64x1xf32, #tpu.memory_space<vmem>>, %arg6: memref<8x16x144xf32, #tpu.memory_space<vmem>>, %arg7: memref<64x1xf32, #tpu.memory_space<vmem>>) attributes {dimension_semantics = [#tpu.dimension_semantics<parallel>, #tpu.dimension_semantics<arbitrary>], iteration_bounds = array<i64: 2, 2>, scalar_prefetch = 0 : i64, scratch_operands = 2 : i64, tpu.core_type = #tpu.core_type<tc>, window_params = [{transform_indices = @transform_0, window_bounds = array<i64: 1, 24, 24, 16>}, {pipeline_mode = #tpu.pipeline_mode<synchronous>, transform_indices = @transform_1, window_bounds = array<i64: 9, 64, 144>}, {transform_indices = @transform_2, window_bounds = array<i64: 1, 64, 128>}, {transform_indices = @transform_3, window_bounds = array<i64: 1, 64, 1>}]} {
    %c8_i32 = arith.constant 8 : i32
    %0 = arith.muli %arg1, %c8_i32 : i32
    %1 = tpu.assume_multiple %0, 8 : i32
    %c0 = arith.constant 0 : index
    %2 = arith.index_cast %1 : i32 to index
    %c0_0 = arith.constant 0 : index
    %c0_1 = arith.constant 0 : index
    %3 = vector.load %arg2[%c0, %2, %c0_0, %c0_1] : memref<1x24x24x16xf32, #tpu.memory_space<vmem>>, vector<1x16x24x16xf32>
    %4 = vector.shape_cast %3 : vector<1x16x24x16xf32> to vector<16x24x16xf32>
    %cst = arith.constant 0.000000e+00 : f32
    %5 = vector.broadcast %cst : f32 to vector<64x128xf32>
    %6 = vector.extract_strided_slice %4 {offsets = [0, 0, 0], sizes = [8, 24, 16], strides = [1, 1, 1]} : vector<16x24x16xf32> to vector<8x24x16xf32>
    %7 = vector.extract_strided_slice %6 {offsets = [0, 0, 0], sizes = [8, 16, 16], strides = [1, 1, 1]} : vector<8x24x16xf32> to vector<8x16x16xf32>
    %c0_2 = arith.constant 0 : index
    %c0_3 = arith.constant 0 : index
    %c0_4 = arith.constant 0 : index
    %8 = vector.load %arg6[%c0_2, %c0_3, %c0_4] : memref<8x16x144xf32, #tpu.memory_space<vmem>>, vector<8x16x16xf32>
    tpu.vector_store %arg6[%c0_2, %c0_3, %c0_4], %7 {strides = array<i32>} : memref<8x16x144xf32, #tpu.memory_space<vmem>>, vector<8x16x16xf32>,
    %9 = vector.extract_strided_slice %6 {offsets = [0, 1, 0], sizes = [8, 16, 16], strides = [1, 1, 1]} : vector<8x24x16xf32> to vector<8x16x16xf32>
    %c0_5 = arith.constant 0 : index
    %c0_6 = arith.constant 0 : index
    %c16 = arith.constant 16 : index
    %10 = vector.load %arg6[%c0_5, %c0_6, %c16] : memref<8x16x144xf32, #tpu.memory_space<vmem>>, vector<8x16x16xf32>
    tpu.vector_store %arg6[%c0_5, %c0_6, %c16], %9 {strides = array<i32>} : memref<8x16x144xf32, #tpu.memory_space<vmem>>, vector<8x16x16xf32>,
    %11 = vector.extract_strided_slice %6 {offsets = [0, 2, 0], sizes = [8, 16, 16], strides = [1, 1, 1]} : vector<8x24x16xf32> to vector<8x16x16xf32>
    %c0_7 = arith.constant 0 : index
    %c0_8 = arith.constant 0 : index
    %c32 = arith.constant 32 : index
    %12 = vector.load %arg6[%c0_7, %c0_8, %c32] : memref<8x16x144xf32, #tpu.memory_space<vmem>>, vector<8x16x16xf32>
    tpu.vector_store %arg6[%c0_7, %c0_8, %c32], %11 {strides = array<i32>} : memref<8x16x144xf32, #tpu.memory_space<vmem>>, vector<8x16x16xf32>,
    %13 = vector.extract_strided_slice %6 {offsets = [0, 3, 0], sizes = [8, 16, 16], strides = [1, 1, 1]} : vector<8x24x16xf32> to vector<8x16x16xf32>
    %c0_9 = arith.constant 0 : index
    %c0_10 = arith.constant 0 : index
    %c48 = arith.constant 48 : index
    %14 = vector.load %arg6[%c0_9, %c0_10, %c48] : memref<8x16x144xf32, #tpu.memory_space<vmem>>, vector<8x16x16xf32>
    tpu.vector_store %arg6[%c0_9, %c0_10, %c48], %13 {strides = array<i32>} : memref<8x16x144xf32, #tpu.memory_space<vmem>>, vector<8x16x16xf32>,
    %15 = vector.extract_strided_slice %6 {offsets = [0, 4, 0], sizes = [8, 16, 16], strides = [1, 1, 1]} : vector<8x24x16xf32> to vector<8x16x16xf32>
    %c0_11 = arith.constant 0 : index
    %c0_12 = arith.constant 0 : index
    %c64 = arith.constant 64 : index
    %16 = vector.load %arg6[%c0_11, %c0_12, %c64] : memref<8x16x144xf32, #tpu.memory_space<vmem>>, vector<8x16x16xf32>
    tpu.vector_store %arg6[%c0_11, %c0_12, %c64], %15 {strides = array<i32>} : memref<8x16x144xf32, #tpu.memory_space<vmem>>, vector<8x16x16xf32>,
    %17 = vector.extract_strided_slice %6 {offsets = [0, 5, 0], sizes = [8, 16, 16], strides = [1, 1, 1]} : vector<8x24x16xf32> to vector<8x16x16xf32>
    %c0_13 = arith.constant 0 : index
    %c0_14 = arith.constant 0 : index
    %c80 = arith.constant 80 : index
    %18 = vector.load %arg6[%c0_13, %c0_14, %c80] : memref<8x16x144xf32, #tpu.memory_space<vmem>>, vector<8x16x16xf32>
    tpu.vector_store %arg6[%c0_13, %c0_14, %c80], %17 {strides = array<i32>} : memref<8x16x144xf32, #tpu.memory_space<vmem>>, vector<8x16x16xf32>,
    %19 = vector.extract_strided_slice %6 {offsets = [0, 6, 0], sizes = [8, 16, 16], strides = [1, 1, 1]} : vector<8x24x16xf32> to vector<8x16x16xf32>
    %c0_15 = arith.constant 0 : index
    %c0_16 = arith.constant 0 : index
    %c96 = arith.constant 96 : index
    %20 = vector.load %arg6[%c0_15, %c0_16, %c96] : memref<8x16x144xf32, #tpu.memory_space<vmem>>, vector<8x16x16xf32>
    tpu.vector_store %arg6[%c0_15, %c0_16, %c96], %19 {strides = array<i32>} : memref<8x16x144xf32, #tpu.memory_space<vmem>>, vector<8x16x16xf32>,
    %21 = vector.extract_strided_slice %6 {offsets = [0, 7, 0], sizes = [8, 16, 16], strides = [1, 1, 1]} : vector<8x24x16xf32> to vector<8x16x16xf32>
    %c0_17 = arith.constant 0 : index
    %c0_18 = arith.constant 0 : index
    %c112 = arith.constant 112 : index
    %22 = vector.load %arg6[%c0_17, %c0_18, %c112] : memref<8x16x144xf32, #tpu.memory_space<vmem>>, vector<8x16x16xf32>
    tpu.vector_store %arg6[%c0_17, %c0_18, %c112], %21 {strides = array<i32>} : memref<8x16x144xf32, #tpu.memory_space<vmem>>, vector<8x16x16xf32>,
    %23 = vector.extract_strided_slice %6 {offsets = [0, 8, 0], sizes = [8, 16, 16], strides = [1, 1, 1]} : vector<8x24x16xf32> to vector<8x16x16xf32>
    %c0_19 = arith.constant 0 : index
    %c0_20 = arith.constant 0 : index
    %c128 = arith.constant 128 : index
    %24 = vector.load %arg6[%c0_19, %c0_20, %c128] : memref<8x16x144xf32, #tpu.memory_space<vmem>>, vector<8x16x16xf32>
    tpu.vector_store %arg6[%c0_19, %c0_20, %c128], %23 {strides = array<i32>} : memref<8x16x144xf32, #tpu.memory_space<vmem>>, vector<8x16x16xf32>,
    %c0_21 = arith.constant 0 : index
    %c0_22 = arith.constant 0 : index
    %c0_23 = arith.constant 0 : index
    %25 = vector.load %arg6[%c0_21, %c0_22, %c0_23] : memref<8x16x144xf32, #tpu.memory_space<vmem>>, vector<8x16x144xf32>
    %26 = vector.shape_cast %25 : vector<8x16x144xf32> to vector<128x144xf32>
    %c0_24 = arith.constant 0 : index
    %c0_25 = arith.constant 0 : index
    %c0_26 = arith.constant 0 : index
    %27 = vector.load %arg3[%c0_24, %c0_25, %c0_26] : memref<9x64x144xf32, #tpu.memory_space<vmem>>, vector<1x64x144xf32>
    %28 = vector.shape_cast %27 : vector<1x64x144xf32> to vector<64x144xf32>
    %cst_27 = arith.constant dense<0.000000e+00> : vector<64x128xf32>
    %29 = tpu.matmul %28, %26, %cst_27 {dimension_numbers = #tpu.dot_dimension_numbers<[1], [1], [0], [0], [0, 0, 1, 0], [], []>} : vector<64x144xf32>, vector<128x144xf32>, vector<64x128xf32> -> vector<64x128xf32>
    %30 = arith.addf %5, %29 : vector<64x128xf32>
    %31 = vector.extract_strided_slice %4 {offsets = [1, 0, 0], sizes = [8, 24, 16], strides = [1, 1, 1]} : vector<16x24x16xf32> to vector<8x24x16xf32>
    %32 = vector.extract_strided_slice %31 {offsets = [0, 0, 0], sizes = [8, 16, 16], strides = [1, 1, 1]} : vector<8x24x16xf32> to vector<8x16x16xf32>
    %c0_28 = arith.constant 0 : index
    %c0_29 = arith.constant 0 : index
    %c0_30 = arith.constant 0 : index
    %33 = vector.load %arg6[%c0_28, %c0_29, %c0_30] : memref<8x16x144xf32, #tpu.memory_space<vmem>>, vector<8x16x16xf32>
    tpu.vector_store %arg6[%c0_28, %c0_29, %c0_30], %32 {strides = array<i32>} : memref<8x16x144xf32, #tpu.memory_space<vmem>>, vector<8x16x16xf32>,
    %34 = vector.extract_strided_slice %31 {offsets = [0, 1, 0], sizes = [8, 16, 16], strides = [1, 1, 1]} : vector<8x24x16xf32> to vector<8x16x16xf32>
    %c0_31 = arith.constant 0 : index
    %c0_32 = arith.constant 0 : index
    %c16_33 = arith.constant 16 : index
    %35 = vector.load %arg6[%c0_31, %c0_32, %c16_33] : memref<8x16x144xf32, #tpu.memory_space<vmem>>, vector<8x16x16xf32>
    tpu.vector_store %arg6[%c0_31, %c0_32, %c16_33], %34 {strides = array<i32>} : memref<8x16x144xf32, #tpu.memory_space<vmem>>, vector<8x16x16xf32>,
    %36 = vector.extract_strided_slice %31 {offsets = [0, 2, 0], sizes = [8, 16, 16], strides = [1, 1, 1]} : vector<8x24x16xf32> to vector<8x16x16xf32>
    %c0_34 = arith.constant 0 : index
    %c0_35 = arith.constant 0 : index
    %c32_36 = arith.constant 32 : index
    %37 = vector.load %arg6[%c0_34, %c0_35, %c32_36] : memref<8x16x144xf32, #tpu.memory_space<vmem>>, vector<8x16x16xf32>
    tpu.vector_store %arg6[%c0_34, %c0_35, %c32_36], %36 {strides = array<i32>} : memref<8x16x144xf32, #tpu.memory_space<vmem>>, vector<8x16x16xf32>,
    %38 = vector.extract_strided_slice %31 {offsets = [0, 3, 0], sizes = [8, 16, 16], strides = [1, 1, 1]} : vector<8x24x16xf32> to vector<8x16x16xf32>
    %c0_37 = arith.constant 0 : index
    %c0_38 = arith.constant 0 : index
    %c48_39 = arith.constant 48 : index
    %39 = vector.load %arg6[%c0_37, %c0_38, %c48_39] : memref<8x16x144xf32, #tpu.memory_space<vmem>>, vector<8x16x16xf32>
    tpu.vector_store %arg6[%c0_37, %c0_38, %c48_39], %38 {strides = array<i32>} : memref<8x16x144xf32, #tpu.memory_space<vmem>>, vector<8x16x16xf32>,
    %40 = vector.extract_strided_slice %31 {offsets = [0, 4, 0], sizes = [8, 16, 16], strides = [1, 1, 1]} : vector<8x24x16xf32> to vector<8x16x16xf32>
    %c0_40 = arith.constant 0 : index
    %c0_41 = arith.constant 0 : index
    %c64_42 = arith.constant 64 : index
    %41 = vector.load %arg6[%c0_40, %c0_41, %c64_42] : memref<8x16x144xf32, #tpu.memory_space<vmem>>, vector<8x16x16xf32>
    tpu.vector_store %arg6[%c0_40, %c0_41, %c64_42], %40 {strides = array<i32>} : memref<8x16x144xf32, #tpu.memory_space<vmem>>, vector<8x16x16xf32>,
    %42 = vector.extract_strided_slice %31 {offsets = [0, 5, 0], sizes = [8, 16, 16], strides = [1, 1, 1]} : vector<8x24x16xf32> to vector<8x16x16xf32>
    %c0_43 = arith.constant 0 : index
    %c0_44 = arith.constant 0 : index
    %c80_45 = arith.constant 80 : index
    %43 = vector.load %arg6[%c0_43, %c0_44, %c80_45] : memref<8x16x144xf32, #tpu.memory_space<vmem>>, vector<8x16x16xf32>
    tpu.vector_store %arg6[%c0_43, %c0_44, %c80_45], %42 {strides = array<i32>} : memref<8x16x144xf32, #tpu.memory_space<vmem>>, vector<8x16x16xf32>,
    %44 = vector.extract_strided_slice %31 {offsets = [0, 6, 0], sizes = [8, 16, 16], strides = [1, 1, 1]} : vector<8x24x16xf32> to vector<8x16x16xf32>
    %c0_46 = arith.constant 0 : index
    %c0_47 = arith.constant 0 : index
    %c96_48 = arith.constant 96 : index
    %45 = vector.load %arg6[%c0_46, %c0_47, %c96_48] : memref<8x16x144xf32, #tpu.memory_space<vmem>>, vector<8x16x16xf32>
    tpu.vector_store %arg6[%c0_46, %c0_47, %c96_48], %44 {strides = array<i32>} : memref<8x16x144xf32, #tpu.memory_space<vmem>>, vector<8x16x16xf32>,
    %46 = vector.extract_strided_slice %31 {offsets = [0, 7, 0], sizes = [8, 16, 16], strides = [1, 1, 1]} : vector<8x24x16xf32> to vector<8x16x16xf32>
    %c0_49 = arith.constant 0 : index
    %c0_50 = arith.constant 0 : index
    %c112_51 = arith.constant 112 : index
    %47 = vector.load %arg6[%c0_49, %c0_50, %c112_51] : memref<8x16x144xf32, #tpu.memory_space<vmem>>, vector<8x16x16xf32>
    tpu.vector_store %arg6[%c0_49, %c0_50, %c112_51], %46 {strides = array<i32>} : memref<8x16x144xf32, #tpu.memory_space<vmem>>, vector<8x16x16xf32>,
    %48 = vector.extract_strided_slice %31 {offsets = [0, 8, 0], sizes = [8, 16, 16], strides = [1, 1, 1]} : vector<8x24x16xf32> to vector<8x16x16xf32>
    %c0_52 = arith.constant 0 : index
    %c0_53 = arith.constant 0 : index
    %c128_54 = arith.constant 128 : index
    %49 = vector.load %arg6[%c0_52, %c0_53, %c128_54] : memref<8x16x144xf32, #tpu.memory_space<vmem>>, vector<8x16x16xf32>
    tpu.vector_store %arg6[%c0_52, %c0_53, %c128_54], %48 {strides = array<i32>} : memref<8x16x144xf32, #tpu.memory_space<vmem>>, vector<8x16x16xf32>,
    %c0_55 = arith.constant 0 : index
    %c0_56 = arith.constant 0 : index
    %c0_57 = arith.constant 0 : index
    %50 = vector.load %arg6[%c0_55, %c0_56, %c0_57] : memref<8x16x144xf32, #tpu.memory_space<vmem>>, vector<8x16x144xf32>
    %51 = vector.shape_cast %50 : vector<8x16x144xf32> to vector<128x144xf32>
    %c1 = arith.constant 1 : index
    %c0_58 = arith.constant 0 : index
    %c0_59 = arith.constant 0 : index
    %52 = vector.load %arg3[%c1, %c0_58, %c0_59] : memref<9x64x144xf32, #tpu.memory_space<vmem>>, vector<1x64x144xf32>
    %53 = vector.shape_cast %52 : vector<1x64x144xf32> to vector<64x144xf32>
    %cst_60 = arith.constant dense<0.000000e+00> : vector<64x128xf32>
    %54 = tpu.matmul %53, %51, %cst_60 {dimension_numbers = #tpu.dot_dimension_numbers<[1], [1], [0], [0], [0, 0, 1, 0], [], []>} : vector<64x144xf32>, vector<128x144xf32>, vector<64x128xf32> -> vector<64x128xf32>
    %55 = arith.addf %30, %54 : vector<64x128xf32>
    %56 = vector.extract_strided_slice %4 {offsets = [2, 0, 0], sizes = [8, 24, 16], strides = [1, 1, 1]} : vector<16x24x16xf32> to vector<8x24x16xf32>
    %57 = vector.extract_strided_slice %56 {offsets = [0, 0, 0], sizes = [8, 16, 16], strides = [1, 1, 1]} : vector<8x24x16xf32> to vector<8x16x16xf32>
    %c0_61 = arith.constant 0 : index
    %c0_62 = arith.constant 0 : index
    %c0_63 = arith.constant 0 : index
    %58 = vector.load %arg6[%c0_61, %c0_62, %c0_63] : memref<8x16x144xf32, #tpu.memory_space<vmem>>, vector<8x16x16xf32>
    tpu.vector_store %arg6[%c0_61, %c0_62, %c0_63], %57 {strides = array<i32>} : memref<8x16x144xf32, #tpu.memory_space<vmem>>, vector<8x16x16xf32>,
    %59 = vector.extract_strided_slice %56 {offsets = [0, 1, 0], sizes = [8, 16, 16], strides = [1, 1, 1]} : vector<8x24x16xf32> to vector<8x16x16xf32>
    %c0_64 = arith.constant 0 : index
    %c0_65 = arith.constant 0 : index
    %c16_66 = arith.constant 16 : index
    %60 = vector.load %arg6[%c0_64, %c0_65, %c16_66] : memref<8x16x144xf32, #tpu.memory_space<vmem>>, vector<8x16x16xf32>
    tpu.vector_store %arg6[%c0_64, %c0_65, %c16_66], %59 {strides = array<i32>} : memref<8x16x144xf32, #tpu.memory_space<vmem>>, vector<8x16x16xf32>,
    %61 = vector.extract_strided_slice %56 {offsets = [0, 2, 0], sizes = [8, 16, 16], strides = [1, 1, 1]} : vector<8x24x16xf32> to vector<8x16x16xf32>
    %c0_67 = arith.constant 0 : index
    %c0_68 = arith.constant 0 : index
    %c32_69 = arith.constant 32 : index
    %62 = vector.load %arg6[%c0_67, %c0_68, %c32_69] : memref<8x16x144xf32, #tpu.memory_space<vmem>>, vector<8x16x16xf32>
    tpu.vector_store %arg6[%c0_67, %c0_68, %c32_69], %61 {strides = array<i32>} : memref<8x16x144xf32, #tpu.memory_space<vmem>>, vector<8x16x16xf32>,
    %63 = vector.extract_strided_slice %56 {offsets = [0, 3, 0], sizes = [8, 16, 16], strides = [1, 1, 1]} : vector<8x24x16xf32> to vector<8x16x16xf32>
    %c0_70 = arith.constant 0 : index
    %c0_71 = arith.constant 0 : index
    %c48_72 = arith.constant 48 : index
    %64 = vector.load %arg6[%c0_70, %c0_71, %c48_72] : memref<8x16x144xf32, #tpu.memory_space<vmem>>, vector<8x16x16xf32>
    tpu.vector_store %arg6[%c0_70, %c0_71, %c48_72], %63 {strides = array<i32>} : memref<8x16x144xf32, #tpu.memory_space<vmem>>, vector<8x16x16xf32>,
    %65 = vector.extract_strided_slice %56 {offsets = [0, 4, 0], sizes = [8, 16, 16], strides = [1, 1, 1]} : vector<8x24x16xf32> to vector<8x16x16xf32>
    %c0_73 = arith.constant 0 : index
    %c0_74 = arith.constant 0 : index
    %c64_75 = arith.constant 64 : index
    %66 = vector.load %arg6[%c0_73, %c0_74, %c64_75] : memref<8x16x144xf32, #tpu.memory_space<vmem>>, vector<8x16x16xf32>
    tpu.vector_store %arg6[%c0_73, %c0_74, %c64_75], %65 {strides = array<i32>} : memref<8x16x144xf32, #tpu.memory_space<vmem>>, vector<8x16x16xf32>,
    %67 = vector.extract_strided_slice %56 {offsets = [0, 5, 0], sizes = [8, 16, 16], strides = [1, 1, 1]} : vector<8x24x16xf32> to vector<8x16x16xf32>
    %c0_76 = arith.constant 0 : index
    %c0_77 = arith.constant 0 : index
    %c80_78 = arith.constant 80 : index
    %68 = vector.load %arg6[%c0_76, %c0_77, %c80_78] : memref<8x16x144xf32, #tpu.memory_space<vmem>>, vector<8x16x16xf32>
    tpu.vector_store %arg6[%c0_76, %c0_77, %c80_78], %67 {strides = array<i32>} : memref<8x16x144xf32, #tpu.memory_space<vmem>>, vector<8x16x16xf32>,
    %69 = vector.extract_strided_slice %56 {offsets = [0, 6, 0], sizes = [8, 16, 16], strides = [1, 1, 1]} : vector<8x24x16xf32> to vector<8x16x16xf32>
    %c0_79 = arith.constant 0 : index
    %c0_80 = arith.constant 0 : index
    %c96_81 = arith.constant 96 : index
    %70 = vector.load %arg6[%c0_79, %c0_80, %c96_81] : memref<8x16x144xf32, #tpu.memory_space<vmem>>, vector<8x16x16xf32>
    tpu.vector_store %arg6[%c0_79, %c0_80, %c96_81], %69 {strides = array<i32>} : memref<8x16x144xf32, #tpu.memory_space<vmem>>, vector<8x16x16xf32>,
    %71 = vector.extract_strided_slice %56 {offsets = [0, 7, 0], sizes = [8, 16, 16], strides = [1, 1, 1]} : vector<8x24x16xf32> to vector<8x16x16xf32>
    %c0_82 = arith.constant 0 : index
    %c0_83 = arith.constant 0 : index
    %c112_84 = arith.constant 112 : index
    %72 = vector.load %arg6[%c0_82, %c0_83, %c112_84] : memref<8x16x144xf32, #tpu.memory_space<vmem>>, vector<8x16x16xf32>
    tpu.vector_store %arg6[%c0_82, %c0_83, %c112_84], %71 {strides = array<i32>} : memref<8x16x144xf32, #tpu.memory_space<vmem>>, vector<8x16x16xf32>,
    %73 = vector.extract_strided_slice %56 {offsets = [0, 8, 0], sizes = [8, 16, 16], strides = [1, 1, 1]} : vector<8x24x16xf32> to vector<8x16x16xf32>
    %c0_85 = arith.constant 0 : index
    %c0_86 = arith.constant 0 : index
    %c128_87 = arith.constant 128 : index
    %74 = vector.load %arg6[%c0_85, %c0_86, %c128_87] : memref<8x16x144xf32, #tpu.memory_space<vmem>>, vector<8x16x16xf32>
    tpu.vector_store %arg6[%c0_85, %c0_86, %c128_87], %73 {strides = array<i32>} : memref<8x16x144xf32, #tpu.memory_space<vmem>>, vector<8x16x16xf32>,
    %c0_88 = arith.constant 0 : index
    %c0_89 = arith.constant 0 : index
    %c0_90 = arith.constant 0 : index
    %75 = vector.load %arg6[%c0_88, %c0_89, %c0_90] : memref<8x16x144xf32, #tpu.memory_space<vmem>>, vector<8x16x144xf32>
    %76 = vector.shape_cast %75 : vector<8x16x144xf32> to vector<128x144xf32>
    %c2 = arith.constant 2 : index
    %c0_91 = arith.constant 0 : index
    %c0_92 = arith.constant 0 : index
    %77 = vector.load %arg3[%c2, %c0_91, %c0_92] : memref<9x64x144xf32, #tpu.memory_space<vmem>>, vector<1x64x144xf32>
    %78 = vector.shape_cast %77 : vector<1x64x144xf32> to vector<64x144xf32>
    %cst_93 = arith.constant dense<0.000000e+00> : vector<64x128xf32>
    %79 = tpu.matmul %78, %76, %cst_93 {dimension_numbers = #tpu.dot_dimension_numbers<[1], [1], [0], [0], [0, 0, 1, 0], [], []>} : vector<64x144xf32>, vector<128x144xf32>, vector<64x128xf32> -> vector<64x128xf32>
    %80 = arith.addf %55, %79 : vector<64x128xf32>
    %81 = vector.extract_strided_slice %4 {offsets = [3, 0, 0], sizes = [8, 24, 16], strides = [1, 1, 1]} : vector<16x24x16xf32> to vector<8x24x16xf32>
    %82 = vector.extract_strided_slice %81 {offsets = [0, 0, 0], sizes = [8, 16, 16], strides = [1, 1, 1]} : vector<8x24x16xf32> to vector<8x16x16xf32>
    %c0_94 = arith.constant 0 : index
    %c0_95 = arith.constant 0 : index
    %c0_96 = arith.constant 0 : index
    %83 = vector.load %arg6[%c0_94, %c0_95, %c0_96] : memref<8x16x144xf32, #tpu.memory_space<vmem>>, vector<8x16x16xf32>
    tpu.vector_store %arg6[%c0_94, %c0_95, %c0_96], %82 {strides = array<i32>} : memref<8x16x144xf32, #tpu.memory_space<vmem>>, vector<8x16x16xf32>,
    %84 = vector.extract_strided_slice %81 {offsets = [0, 1, 0], sizes = [8, 16, 16], strides = [1, 1, 1]} : vector<8x24x16xf32> to vector<8x16x16xf32>
    %c0_97 = arith.constant 0 : index
    %c0_98 = arith.constant 0 : index
    %c16_99 = arith.constant 16 : index
    %85 = vector.load %arg6[%c0_97, %c0_98, %c16_99] : memref<8x16x144xf32, #tpu.memory_space<vmem>>, vector<8x16x16xf32>
    tpu.vector_store %arg6[%c0_97, %c0_98, %c16_99], %84 {strides = array<i32>} : memref<8x16x144xf32, #tpu.memory_space<vmem>>, vector<8x16x16xf32>,
    %86 = vector.extract_strided_slice %81 {offsets = [0, 2, 0], sizes = [8, 16, 16], strides = [1, 1, 1]} : vector<8x24x16xf32> to vector<8x16x16xf32>
    %c0_100 = arith.constant 0 : index
    %c0_101 = arith.constant 0 : index
    %c32_102 = arith.constant 32 : index
    %87 = vector.load %arg6[%c0_100, %c0_101, %c32_102] : memref<8x16x144xf32, #tpu.memory_space<vmem>>, vector<8x16x16xf32>
    tpu.vector_store %arg6[%c0_100, %c0_101, %c32_102], %86 {strides = array<i32>} : memref<8x16x144xf32, #tpu.memory_space<vmem>>, vector<8x16x16xf32>,
    %88 = vector.extract_strided_slice %81 {offsets = [0, 3, 0], sizes = [8, 16, 16], strides = [1, 1, 1]} : vector<8x24x16xf32> to vector<8x16x16xf32>
    %c0_103 = arith.constant 0 : index
    %c0_104 = arith.constant 0 : index
    %c48_105 = arith.constant 48 : index
    %89 = vector.load %arg6[%c0_103, %c0_104, %c48_105] : memref<8x16x144xf32, #tpu.memory_space<vmem>>, vector<8x16x16xf32>
    tpu.vector_store %arg6[%c0_103, %c0_104, %c48_105], %88 {strides = array<i32>} : memref<8x16x144xf32, #tpu.memory_space<vmem>>, vector<8x16x16xf32>,
    %90 = vector.extract_strided_slice %81 {offsets = [0, 4, 0], sizes = [8, 16, 16], strides = [1, 1, 1]} : vector<8x24x16xf32> to vector<8x16x16xf32>
    %c0_106 = arith.constant 0 : index
    %c0_107 = arith.constant 0 : index
    %c64_108 = arith.constant 64 : index
    %91 = vector.load %arg6[%c0_106, %c0_107, %c64_108] : memref<8x16x144xf32, #tpu.memory_space<vmem>>, vector<8x16x16xf32>
    tpu.vector_store %arg6[%c0_106, %c0_107, %c64_108], %90 {strides = array<i32>} : memref<8x16x144xf32, #tpu.memory_space<vmem>>, vector<8x16x16xf32>,
    %92 = vector.extract_strided_slice %81 {offsets = [0, 5, 0], sizes = [8, 16, 16], strides = [1, 1, 1]} : vector<8x24x16xf32> to vector<8x16x16xf32>
    %c0_109 = arith.constant 0 : index
    %c0_110 = arith.constant 0 : index
    %c80_111 = arith.constant 80 : index
    %93 = vector.load %arg6[%c0_109, %c0_110, %c80_111] : memref<8x16x144xf32, #tpu.memory_space<vmem>>, vector<8x16x16xf32>
    tpu.vector_store %arg6[%c0_109, %c0_110, %c80_111], %92 {strides = array<i32>} : memref<8x16x144xf32, #tpu.memory_space<vmem>>, vector<8x16x16xf32>,
    %94 = vector.extract_strided_slice %81 {offsets = [0, 6, 0], sizes = [8, 16, 16], strides = [1, 1, 1]} : vector<8x24x16xf32> to vector<8x16x16xf32>
    %c0_112 = arith.constant 0 : index
    %c0_113 = arith.constant 0 : index
    %c96_114 = arith.constant 96 : index
    %95 = vector.load %arg6[%c0_112, %c0_113, %c96_114] : memref<8x16x144xf32, #tpu.memory_space<vmem>>, vector<8x16x16xf32>
    tpu.vector_store %arg6[%c0_112, %c0_113, %c96_114], %94 {strides = array<i32>} : memref<8x16x144xf32, #tpu.memory_space<vmem>>, vector<8x16x16xf32>,
    %96 = vector.extract_strided_slice %81 {offsets = [0, 7, 0], sizes = [8, 16, 16], strides = [1, 1, 1]} : vector<8x24x16xf32> to vector<8x16x16xf32>
    %c0_115 = arith.constant 0 : index
    %c0_116 = arith.constant 0 : index
    %c112_117 = arith.constant 112 : index
    %97 = vector.load %arg6[%c0_115, %c0_116, %c112_117] : memref<8x16x144xf32, #tpu.memory_space<vmem>>, vector<8x16x16xf32>
    tpu.vector_store %arg6[%c0_115, %c0_116, %c112_117], %96 {strides = array<i32>} : memref<8x16x144xf32, #tpu.memory_space<vmem>>, vector<8x16x16xf32>,
    %98 = vector.extract_strided_slice %81 {offsets = [0, 8, 0], sizes = [8, 16, 16], strides = [1, 1, 1]} : vector<8x24x16xf32> to vector<8x16x16xf32>
    %c0_118 = arith.constant 0 : index
    %c0_119 = arith.constant 0 : index
    %c128_120 = arith.constant 128 : index
    %99 = vector.load %arg6[%c0_118, %c0_119, %c128_120] : memref<8x16x144xf32, #tpu.memory_space<vmem>>, vector<8x16x16xf32>
    tpu.vector_store %arg6[%c0_118, %c0_119, %c128_120], %98 {strides = array<i32>} : memref<8x16x144xf32, #tpu.memory_space<vmem>>, vector<8x16x16xf32>,
    %c0_121 = arith.constant 0 : index
    %c0_122 = arith.constant 0 : index
    %c0_123 = arith.constant 0 : index
    %100 = vector.load %arg6[%c0_121, %c0_122, %c0_123] : memref<8x16x144xf32, #tpu.memory_space<vmem>>, vector<8x16x144xf32>
    %101 = vector.shape_cast %100 : vector<8x16x144xf32> to vector<128x144xf32>
    %c3 = arith.constant 3 : index
    %c0_124 = arith.constant 0 : index
    %c0_125 = arith.constant 0 : index
    %102 = vector.load %arg3[%c3, %c0_124, %c0_125] : memref<9x64x144xf32, #tpu.memory_space<vmem>>, vector<1x64x144xf32>
    %103 = vector.shape_cast %102 : vector<1x64x144xf32> to vector<64x144xf32>
    %cst_126 = arith.constant dense<0.000000e+00> : vector<64x128xf32>
    %104 = tpu.matmul %103, %101, %cst_126 {dimension_numbers = #tpu.dot_dimension_numbers<[1], [1], [0], [0], [0, 0, 1, 0], [], []>} : vector<64x144xf32>, vector<128x144xf32>, vector<64x128xf32> -> vector<64x128xf32>
    %105 = arith.addf %80, %104 : vector<64x128xf32>
    %106 = vector.extract_strided_slice %4 {offsets = [4, 0, 0], sizes = [8, 24, 16], strides = [1, 1, 1]} : vector<16x24x16xf32> to vector<8x24x16xf32>
    %107 = vector.extract_strided_slice %106 {offsets = [0, 0, 0], sizes = [8, 16, 16], strides = [1, 1, 1]} : vector<8x24x16xf32> to vector<8x16x16xf32>
    %c0_127 = arith.constant 0 : index
    %c0_128 = arith.constant 0 : index
    %c0_129 = arith.constant 0 : index
    %108 = vector.load %arg6[%c0_127, %c0_128, %c0_129] : memref<8x16x144xf32, #tpu.memory_space<vmem>>, vector<8x16x16xf32>
    tpu.vector_store %arg6[%c0_127, %c0_128, %c0_129], %107 {strides = array<i32>} : memref<8x16x144xf32, #tpu.memory_space<vmem>>, vector<8x16x16xf32>,
    %109 = vector.extract_strided_slice %106 {offsets = [0, 1, 0], sizes = [8, 16, 16], strides = [1, 1, 1]} : vector<8x24x16xf32> to vector<8x16x16xf32>
    %c0_130 = arith.constant 0 : index
    %c0_131 = arith.constant 0 : index
    %c16_132 = arith.constant 16 : index
    %110 = vector.load %arg6[%c0_130, %c0_131, %c16_132] : memref<8x16x144xf32, #tpu.memory_space<vmem>>, vector<8x16x16xf32>
    tpu.vector_store %arg6[%c0_130, %c0_131, %c16_132], %109 {strides = array<i32>} : memref<8x16x144xf32, #tpu.memory_space<vmem>>, vector<8x16x16xf32>,
    %111 = vector.extract_strided_slice %106 {offsets = [0, 2, 0], sizes = [8, 16, 16], strides = [1, 1, 1]} : vector<8x24x16xf32> to vector<8x16x16xf32>
    %c0_133 = arith.constant 0 : index
    %c0_134 = arith.constant 0 : index
    %c32_135 = arith.constant 32 : index
    %112 = vector.load %arg6[%c0_133, %c0_134, %c32_135] : memref<8x16x144xf32, #tpu.memory_space<vmem>>, vector<8x16x16xf32>
    tpu.vector_store %arg6[%c0_133, %c0_134, %c32_135], %111 {strides = array<i32>} : memref<8x16x144xf32, #tpu.memory_space<vmem>>, vector<8x16x16xf32>,
    %113 = vector.extract_strided_slice %106 {offsets = [0, 3, 0], sizes = [8, 16, 16], strides = [1, 1, 1]} : vector<8x24x16xf32> to vector<8x16x16xf32>
    %c0_136 = arith.constant 0 : index
    %c0_137 = arith.constant 0 : index
    %c48_138 = arith.constant 48 : index
    %114 = vector.load %arg6[%c0_136, %c0_137, %c48_138] : memref<8x16x144xf32, #tpu.memory_space<vmem>>, vector<8x16x16xf32>
    tpu.vector_store %arg6[%c0_136, %c0_137, %c48_138], %113 {strides = array<i32>} : memref<8x16x144xf32, #tpu.memory_space<vmem>>, vector<8x16x16xf32>,
    %115 = vector.extract_strided_slice %106 {offsets = [0, 4, 0], sizes = [8, 16, 16], strides = [1, 1, 1]} : vector<8x24x16xf32> to vector<8x16x16xf32>
    %c0_139 = arith.constant 0 : index
    %c0_140 = arith.constant 0 : index
    %c64_141 = arith.constant 64 : index
    %116 = vector.load %arg6[%c0_139, %c0_140, %c64_141] : memref<8x16x144xf32, #tpu.memory_space<vmem>>, vector<8x16x16xf32>
    tpu.vector_store %arg6[%c0_139, %c0_140, %c64_141], %115 {strides = array<i32>} : memref<8x16x144xf32, #tpu.memory_space<vmem>>, vector<8x16x16xf32>,
    %117 = vector.extract_strided_slice %106 {offsets = [0, 5, 0], sizes = [8, 16, 16], strides = [1, 1, 1]} : vector<8x24x16xf32> to vector<8x16x16xf32>
    %c0_142 = arith.constant 0 : index
    %c0_143 = arith.constant 0 : index
    %c80_144 = arith.constant 80 : index
    %118 = vector.load %arg6[%c0_142, %c0_143, %c80_144] : memref<8x16x144xf32, #tpu.memory_space<vmem>>, vector<8x16x16xf32>
    tpu.vector_store %arg6[%c0_142, %c0_143, %c80_144], %117 {strides = array<i32>} : memref<8x16x144xf32, #tpu.memory_space<vmem>>, vector<8x16x16xf32>,
    %119 = vector.extract_strided_slice %106 {offsets = [0, 6, 0], sizes = [8, 16, 16], strides = [1, 1, 1]} : vector<8x24x16xf32> to vector<8x16x16xf32>
    %c0_145 = arith.constant 0 : index
    %c0_146 = arith.constant 0 : index
    %c96_147 = arith.constant 96 : index
    %120 = vector.load %arg6[%c0_145, %c0_146, %c96_147] : memref<8x16x144xf32, #tpu.memory_space<vmem>>, vector<8x16x16xf32>
    tpu.vector_store %arg6[%c0_145, %c0_146, %c96_147], %119 {strides = array<i32>} : memref<8x16x144xf32, #tpu.memory_space<vmem>>, vector<8x16x16xf32>,
    %121 = vector.extract_strided_slice %106 {offsets = [0, 7, 0], sizes = [8, 16, 16], strides = [1, 1, 1]} : vector<8x24x16xf32> to vector<8x16x16xf32>
    %c0_148 = arith.constant 0 : index
    %c0_149 = arith.constant 0 : index
    %c112_150 = arith.constant 112 : index
    %122 = vector.load %arg6[%c0_148, %c0_149, %c112_150] : memref<8x16x144xf32, #tpu.memory_space<vmem>>, vector<8x16x16xf32>
    tpu.vector_store %arg6[%c0_148, %c0_149, %c112_150], %121 {strides = array<i32>} : memref<8x16x144xf32, #tpu.memory_space<vmem>>, vector<8x16x16xf32>,
    %123 = vector.extract_strided_slice %106 {offsets = [0, 8, 0], sizes = [8, 16, 16], strides = [1, 1, 1]} : vector<8x24x16xf32> to vector<8x16x16xf32>
    %c0_151 = arith.constant 0 : index
    %c0_152 = arith.constant 0 : index
    %c128_153 = arith.constant 128 : index
    %124 = vector.load %arg6[%c0_151, %c0_152, %c128_153] : memref<8x16x144xf32, #tpu.memory_space<vmem>>, vector<8x16x16xf32>
    tpu.vector_store %arg6[%c0_151, %c0_152, %c128_153], %123 {strides = array<i32>} : memref<8x16x144xf32, #tpu.memory_space<vmem>>, vector<8x16x16xf32>,
    %c0_154 = arith.constant 0 : index
    %c0_155 = arith.constant 0 : index
    %c0_156 = arith.constant 0 : index
    %125 = vector.load %arg6[%c0_154, %c0_155, %c0_156] : memref<8x16x144xf32, #tpu.memory_space<vmem>>, vector<8x16x144xf32>
    %126 = vector.shape_cast %125 : vector<8x16x144xf32> to vector<128x144xf32>
    %c4 = arith.constant 4 : index
    %c0_157 = arith.constant 0 : index
    %c0_158 = arith.constant 0 : index
    %127 = vector.load %arg3[%c4, %c0_157, %c0_158] : memref<9x64x144xf32, #tpu.memory_space<vmem>>, vector<1x64x144xf32>
    %128 = vector.shape_cast %127 : vector<1x64x144xf32> to vector<64x144xf32>
    %cst_159 = arith.constant dense<0.000000e+00> : vector<64x128xf32>
    %129 = tpu.matmul %128, %126, %cst_159 {dimension_numbers = #tpu.dot_dimension_numbers<[1], [1], [0], [0], [0, 0, 1, 0], [], []>} : vector<64x144xf32>, vector<128x144xf32>, vector<64x128xf32> -> vector<64x128xf32>
    %130 = arith.addf %105, %129 : vector<64x128xf32>
    %131 = vector.extract_strided_slice %4 {offsets = [5, 0, 0], sizes = [8, 24, 16], strides = [1, 1, 1]} : vector<16x24x16xf32> to vector<8x24x16xf32>
    %132 = vector.extract_strided_slice %131 {offsets = [0, 0, 0], sizes = [8, 16, 16], strides = [1, 1, 1]} : vector<8x24x16xf32> to vector<8x16x16xf32>
    %c0_160 = arith.constant 0 : index
    %c0_161 = arith.constant 0 : index
    %c0_162 = arith.constant 0 : index
    %133 = vector.load %arg6[%c0_160, %c0_161, %c0_162] : memref<8x16x144xf32, #tpu.memory_space<vmem>>, vector<8x16x16xf32>
    tpu.vector_store %arg6[%c0_160, %c0_161, %c0_162], %132 {strides = array<i32>} : memref<8x16x144xf32, #tpu.memory_space<vmem>>, vector<8x16x16xf32>,
    %134 = vector.extract_strided_slice %131 {offsets = [0, 1, 0], sizes = [8, 16, 16], strides = [1, 1, 1]} : vector<8x24x16xf32> to vector<8x16x16xf32>
    %c0_163 = arith.constant 0 : index
    %c0_164 = arith.constant 0 : index
    %c16_165 = arith.constant 16 : index
    %135 = vector.load %arg6[%c0_163, %c0_164, %c16_165] : memref<8x16x144xf32, #tpu.memory_space<vmem>>, vector<8x16x16xf32>
    tpu.vector_store %arg6[%c0_163, %c0_164, %c16_165], %134 {strides = array<i32>} : memref<8x16x144xf32, #tpu.memory_space<vmem>>, vector<8x16x16xf32>,
    %136 = vector.extract_strided_slice %131 {offsets = [0, 2, 0], sizes = [8, 16, 16], strides = [1, 1, 1]} : vector<8x24x16xf32> to vector<8x16x16xf32>
    %c0_166 = arith.constant 0 : index
    %c0_167 = arith.constant 0 : index
    %c32_168 = arith.constant 32 : index
    %137 = vector.load %arg6[%c0_166, %c0_167, %c32_168] : memref<8x16x144xf32, #tpu.memory_space<vmem>>, vector<8x16x16xf32>
    tpu.vector_store %arg6[%c0_166, %c0_167, %c32_168], %136 {strides = array<i32>} : memref<8x16x144xf32, #tpu.memory_space<vmem>>, vector<8x16x16xf32>,
    %138 = vector.extract_strided_slice %131 {offsets = [0, 3, 0], sizes = [8, 16, 16], strides = [1, 1, 1]} : vector<8x24x16xf32> to vector<8x16x16xf32>
    %c0_169 = arith.constant 0 : index
    %c0_170 = arith.constant 0 : index
    %c48_171 = arith.constant 48 : index
    %139 = vector.load %arg6[%c0_169, %c0_170, %c48_171] : memref<8x16x144xf32, #tpu.memory_space<vmem>>, vector<8x16x16xf32>
    tpu.vector_store %arg6[%c0_169, %c0_170, %c48_171], %138 {strides = array<i32>} : memref<8x16x144xf32, #tpu.memory_space<vmem>>, vector<8x16x16xf32>,
    %140 = vector.extract_strided_slice %131 {offsets = [0, 4, 0], sizes = [8, 16, 16], strides = [1, 1, 1]} : vector<8x24x16xf32> to vector<8x16x16xf32>
    %c0_172 = arith.constant 0 : index
    %c0_173 = arith.constant 0 : index
    %c64_174 = arith.constant 64 : index
    %141 = vector.load %arg6[%c0_172, %c0_173, %c64_174] : memref<8x16x144xf32, #tpu.memory_space<vmem>>, vector<8x16x16xf32>
    tpu.vector_store %arg6[%c0_172, %c0_173, %c64_174], %140 {strides = array<i32>} : memref<8x16x144xf32, #tpu.memory_space<vmem>>, vector<8x16x16xf32>,
    %142 = vector.extract_strided_slice %131 {offsets = [0, 5, 0], sizes = [8, 16, 16], strides = [1, 1, 1]} : vector<8x24x16xf32> to vector<8x16x16xf32>
    %c0_175 = arith.constant 0 : index
    %c0_176 = arith.constant 0 : index
    %c80_177 = arith.constant 80 : index
    %143 = vector.load %arg6[%c0_175, %c0_176, %c80_177] : memref<8x16x144xf32, #tpu.memory_space<vmem>>, vector<8x16x16xf32>
    tpu.vector_store %arg6[%c0_175, %c0_176, %c80_177], %142 {strides = array<i32>} : memref<8x16x144xf32, #tpu.memory_space<vmem>>, vector<8x16x16xf32>,
    %144 = vector.extract_strided_slice %131 {offsets = [0, 6, 0], sizes = [8, 16, 16], strides = [1, 1, 1]} : vector<8x24x16xf32> to vector<8x16x16xf32>
    %c0_178 = arith.constant 0 : index
    %c0_179 = arith.constant 0 : index
    %c96_180 = arith.constant 96 : index
    %145 = vector.load %arg6[%c0_178, %c0_179, %c96_180] : memref<8x16x144xf32, #tpu.memory_space<vmem>>, vector<8x16x16xf32>
    tpu.vector_store %arg6[%c0_178, %c0_179, %c96_180], %144 {strides = array<i32>} : memref<8x16x144xf32, #tpu.memory_space<vmem>>, vector<8x16x16xf32>,
    %146 = vector.extract_strided_slice %131 {offsets = [0, 7, 0], sizes = [8, 16, 16], strides = [1, 1, 1]} : vector<8x24x16xf32> to vector<8x16x16xf32>
    %c0_181 = arith.constant 0 : index
    %c0_182 = arith.constant 0 : index
    %c112_183 = arith.constant 112 : index
    %147 = vector.load %arg6[%c0_181, %c0_182, %c112_183] : memref<8x16x144xf32, #tpu.memory_space<vmem>>, vector<8x16x16xf32>
    tpu.vector_store %arg6[%c0_181, %c0_182, %c112_183], %146 {strides = array<i32>} : memref<8x16x144xf32, #tpu.memory_space<vmem>>, vector<8x16x16xf32>,
    %148 = vector.extract_strided_slice %131 {offsets = [0, 8, 0], sizes = [8, 16, 16], strides = [1, 1, 1]} : vector<8x24x16xf32> to vector<8x16x16xf32>
    %c0_184 = arith.constant 0 : index
    %c0_185 = arith.constant 0 : index
    %c128_186 = arith.constant 128 : index
    %149 = vector.load %arg6[%c0_184, %c0_185, %c128_186] : memref<8x16x144xf32, #tpu.memory_space<vmem>>, vector<8x16x16xf32>
    tpu.vector_store %arg6[%c0_184, %c0_185, %c128_186], %148 {strides = array<i32>} : memref<8x16x144xf32, #tpu.memory_space<vmem>>, vector<8x16x16xf32>,
    %c0_187 = arith.constant 0 : index
    %c0_188 = arith.constant 0 : index
    %c0_189 = arith.constant 0 : index
    %150 = vector.load %arg6[%c0_187, %c0_188, %c0_189] : memref<8x16x144xf32, #tpu.memory_space<vmem>>, vector<8x16x144xf32>
    %151 = vector.shape_cast %150 : vector<8x16x144xf32> to vector<128x144xf32>
    %c5 = arith.constant 5 : index
    %c0_190 = arith.constant 0 : index
    %c0_191 = arith.constant 0 : index
    %152 = vector.load %arg3[%c5, %c0_190, %c0_191] : memref<9x64x144xf32, #tpu.memory_space<vmem>>, vector<1x64x144xf32>
    %153 = vector.shape_cast %152 : vector<1x64x144xf32> to vector<64x144xf32>
    %cst_192 = arith.constant dense<0.000000e+00> : vector<64x128xf32>
    %154 = tpu.matmul %153, %151, %cst_192 {dimension_numbers = #tpu.dot_dimension_numbers<[1], [1], [0], [0], [0, 0, 1, 0], [], []>} : vector<64x144xf32>, vector<128x144xf32>, vector<64x128xf32> -> vector<64x128xf32>
    %155 = arith.addf %130, %154 : vector<64x128xf32>
    %156 = vector.extract_strided_slice %4 {offsets = [6, 0, 0], sizes = [8, 24, 16], strides = [1, 1, 1]} : vector<16x24x16xf32> to vector<8x24x16xf32>
    %157 = vector.extract_strided_slice %156 {offsets = [0, 0, 0], sizes = [8, 16, 16], strides = [1, 1, 1]} : vector<8x24x16xf32> to vector<8x16x16xf32>
    %c0_193 = arith.constant 0 : index
    %c0_194 = arith.constant 0 : index
    %c0_195 = arith.constant 0 : index
    %158 = vector.load %arg6[%c0_193, %c0_194, %c0_195] : memref<8x16x144xf32, #tpu.memory_space<vmem>>, vector<8x16x16xf32>
    tpu.vector_store %arg6[%c0_193, %c0_194, %c0_195], %157 {strides = array<i32>} : memref<8x16x144xf32, #tpu.memory_space<vmem>>, vector<8x16x16xf32>,
    %159 = vector.extract_strided_slice %156 {offsets = [0, 1, 0], sizes = [8, 16, 16], strides = [1, 1, 1]} : vector<8x24x16xf32> to vector<8x16x16xf32>
    %c0_196 = arith.constant 0 : index
    %c0_197 = arith.constant 0 : index
    %c16_198 = arith.constant 16 : index
    %160 = vector.load %arg6[%c0_196, %c0_197, %c16_198] : memref<8x16x144xf32, #tpu.memory_space<vmem>>, vector<8x16x16xf32>
    tpu.vector_store %arg6[%c0_196, %c0_197, %c16_198], %159 {strides = array<i32>} : memref<8x16x144xf32, #tpu.memory_space<vmem>>, vector<8x16x16xf32>,
    %161 = vector.extract_strided_slice %156 {offsets = [0, 2, 0], sizes = [8, 16, 16], strides = [1, 1, 1]} : vector<8x24x16xf32> to vector<8x16x16xf32>
    %c0_199 = arith.constant 0 : index
    %c0_200 = arith.constant 0 : index
    %c32_201 = arith.constant 32 : index
    %162 = vector.load %arg6[%c0_199, %c0_200, %c32_201] : memref<8x16x144xf32, #tpu.memory_space<vmem>>, vector<8x16x16xf32>
    tpu.vector_store %arg6[%c0_199, %c0_200, %c32_201], %161 {strides = array<i32>} : memref<8x16x144xf32, #tpu.memory_space<vmem>>, vector<8x16x16xf32>,
    %163 = vector.extract_strided_slice %156 {offsets = [0, 3, 0], sizes = [8, 16, 16], strides = [1, 1, 1]} : vector<8x24x16xf32> to vector<8x16x16xf32>
    %c0_202 = arith.constant 0 : index
    %c0_203 = arith.constant 0 : index
    %c48_204 = arith.constant 48 : index
    %164 = vector.load %arg6[%c0_202, %c0_203, %c48_204] : memref<8x16x144xf32, #tpu.memory_space<vmem>>, vector<8x16x16xf32>
    tpu.vector_store %arg6[%c0_202, %c0_203, %c48_204], %163 {strides = array<i32>} : memref<8x16x144xf32, #tpu.memory_space<vmem>>, vector<8x16x16xf32>,
    %165 = vector.extract_strided_slice %156 {offsets = [0, 4, 0], sizes = [8, 16, 16], strides = [1, 1, 1]} : vector<8x24x16xf32> to vector<8x16x16xf32>
    %c0_205 = arith.constant 0 : index
    %c0_206 = arith.constant 0 : index
    %c64_207 = arith.constant 64 : index
    %166 = vector.load %arg6[%c0_205, %c0_206, %c64_207] : memref<8x16x144xf32, #tpu.memory_space<vmem>>, vector<8x16x16xf32>
    tpu.vector_store %arg6[%c0_205, %c0_206, %c64_207], %165 {strides = array<i32>} : memref<8x16x144xf32, #tpu.memory_space<vmem>>, vector<8x16x16xf32>,
    %167 = vector.extract_strided_slice %156 {offsets = [0, 5, 0], sizes = [8, 16, 16], strides = [1, 1, 1]} : vector<8x24x16xf32> to vector<8x16x16xf32>
    %c0_208 = arith.constant 0 : index
    %c0_209 = arith.constant 0 : index
    %c80_210 = arith.constant 80 : index
    %168 = vector.load %arg6[%c0_208, %c0_209, %c80_210] : memref<8x16x144xf32, #tpu.memory_space<vmem>>, vector<8x16x16xf32>
    tpu.vector_store %arg6[%c0_208, %c0_209, %c80_210], %167 {strides = array<i32>} : memref<8x16x144xf32, #tpu.memory_space<vmem>>, vector<8x16x16xf32>,
    %169 = vector.extract_strided_slice %156 {offsets = [0, 6, 0], sizes = [8, 16, 16], strides = [1, 1, 1]} : vector<8x24x16xf32> to vector<8x16x16xf32>
    %c0_211 = arith.constant 0 : index
    %c0_212 = arith.constant 0 : index
    %c96_213 = arith.constant 96 : index
    %170 = vector.load %arg6[%c0_211, %c0_212, %c96_213] : memref<8x16x144xf32, #tpu.memory_space<vmem>>, vector<8x16x16xf32>
    tpu.vector_store %arg6[%c0_211, %c0_212, %c96_213], %169 {strides = array<i32>} : memref<8x16x144xf32, #tpu.memory_space<vmem>>, vector<8x16x16xf32>,
    %171 = vector.extract_strided_slice %156 {offsets = [0, 7, 0], sizes = [8, 16, 16], strides = [1, 1, 1]} : vector<8x24x16xf32> to vector<8x16x16xf32>
    %c0_214 = arith.constant 0 : index
    %c0_215 = arith.constant 0 : index
    %c112_216 = arith.constant 112 : index
    %172 = vector.load %arg6[%c0_214, %c0_215, %c112_216] : memref<8x16x144xf32, #tpu.memory_space<vmem>>, vector<8x16x16xf32>
    tpu.vector_store %arg6[%c0_214, %c0_215, %c112_216], %171 {strides = array<i32>} : memref<8x16x144xf32, #tpu.memory_space<vmem>>, vector<8x16x16xf32>,
    %173 = vector.extract_strided_slice %156 {offsets = [0, 8, 0], sizes = [8, 16, 16], strides = [1, 1, 1]} : vector<8x24x16xf32> to vector<8x16x16xf32>
    %c0_217 = arith.constant 0 : index
    %c0_218 = arith.constant 0 : index
    %c128_219 = arith.constant 128 : index
    %174 = vector.load %arg6[%c0_217, %c0_218, %c128_219] : memref<8x16x144xf32, #tpu.memory_space<vmem>>, vector<8x16x16xf32>
    tpu.vector_store %arg6[%c0_217, %c0_218, %c128_219], %173 {strides = array<i32>} : memref<8x16x144xf32, #tpu.memory_space<vmem>>, vector<8x16x16xf32>,
    %c0_220 = arith.constant 0 : index
    %c0_221 = arith.constant 0 : index
    %c0_222 = arith.constant 0 : index
    %175 = vector.load %arg6[%c0_220, %c0_221, %c0_222] : memref<8x16x144xf32, #tpu.memory_space<vmem>>, vector<8x16x144xf32>
    %176 = vector.shape_cast %175 : vector<8x16x144xf32> to vector<128x144xf32>
    %c6 = arith.constant 6 : index
    %c0_223 = arith.constant 0 : index
    %c0_224 = arith.constant 0 : index
    %177 = vector.load %arg3[%c6, %c0_223, %c0_224] : memref<9x64x144xf32, #tpu.memory_space<vmem>>, vector<1x64x144xf32>
    %178 = vector.shape_cast %177 : vector<1x64x144xf32> to vector<64x144xf32>
    %cst_225 = arith.constant dense<0.000000e+00> : vector<64x128xf32>
    %179 = tpu.matmul %178, %176, %cst_225 {dimension_numbers = #tpu.dot_dimension_numbers<[1], [1], [0], [0], [0, 0, 1, 0], [], []>} : vector<64x144xf32>, vector<128x144xf32>, vector<64x128xf32> -> vector<64x128xf32>
    %180 = arith.addf %155, %179 : vector<64x128xf32>
    %181 = vector.extract_strided_slice %4 {offsets = [7, 0, 0], sizes = [8, 24, 16], strides = [1, 1, 1]} : vector<16x24x16xf32> to vector<8x24x16xf32>
    %182 = vector.extract_strided_slice %181 {offsets = [0, 0, 0], sizes = [8, 16, 16], strides = [1, 1, 1]} : vector<8x24x16xf32> to vector<8x16x16xf32>
    %c0_226 = arith.constant 0 : index
    %c0_227 = arith.constant 0 : index
    %c0_228 = arith.constant 0 : index
    %183 = vector.load %arg6[%c0_226, %c0_227, %c0_228] : memref<8x16x144xf32, #tpu.memory_space<vmem>>, vector<8x16x16xf32>
    tpu.vector_store %arg6[%c0_226, %c0_227, %c0_228], %182 {strides = array<i32>} : memref<8x16x144xf32, #tpu.memory_space<vmem>>, vector<8x16x16xf32>,
    %184 = vector.extract_strided_slice %181 {offsets = [0, 1, 0], sizes = [8, 16, 16], strides = [1, 1, 1]} : vector<8x24x16xf32> to vector<8x16x16xf32>
    %c0_229 = arith.constant 0 : index
    %c0_230 = arith.constant 0 : index
    %c16_231 = arith.constant 16 : index
    %185 = vector.load %arg6[%c0_229, %c0_230, %c16_231] : memref<8x16x144xf32, #tpu.memory_space<vmem>>, vector<8x16x16xf32>
    tpu.vector_store %arg6[%c0_229, %c0_230, %c16_231], %184 {strides = array<i32>} : memref<8x16x144xf32, #tpu.memory_space<vmem>>, vector<8x16x16xf32>,
    %186 = vector.extract_strided_slice %181 {offsets = [0, 2, 0], sizes = [8, 16, 16], strides = [1, 1, 1]} : vector<8x24x16xf32> to vector<8x16x16xf32>
    %c0_232 = arith.constant 0 : index
    %c0_233 = arith.constant 0 : index
    %c32_234 = arith.constant 32 : index
    %187 = vector.load %arg6[%c0_232, %c0_233, %c32_234] : memref<8x16x144xf32, #tpu.memory_space<vmem>>, vector<8x16x16xf32>
    tpu.vector_store %arg6[%c0_232, %c0_233, %c32_234], %186 {strides = array<i32>} : memref<8x16x144xf32, #tpu.memory_space<vmem>>, vector<8x16x16xf32>,
    %188 = vector.extract_strided_slice %181 {offsets = [0, 3, 0], sizes = [8, 16, 16], strides = [1, 1, 1]} : vector<8x24x16xf32> to vector<8x16x16xf32>
    %c0_235 = arith.constant 0 : index
    %c0_236 = arith.constant 0 : index
    %c48_237 = arith.constant 48 : index
    %189 = vector.load %arg6[%c0_235, %c0_236, %c48_237] : memref<8x16x144xf32, #tpu.memory_space<vmem>>, vector<8x16x16xf32>
    tpu.vector_store %arg6[%c0_235, %c0_236, %c48_237], %188 {strides = array<i32>} : memref<8x16x144xf32, #tpu.memory_space<vmem>>, vector<8x16x16xf32>,
    %190 = vector.extract_strided_slice %181 {offsets = [0, 4, 0], sizes = [8, 16, 16], strides = [1, 1, 1]} : vector<8x24x16xf32> to vector<8x16x16xf32>
    %c0_238 = arith.constant 0 : index
    %c0_239 = arith.constant 0 : index
    %c64_240 = arith.constant 64 : index
    %191 = vector.load %arg6[%c0_238, %c0_239, %c64_240] : memref<8x16x144xf32, #tpu.memory_space<vmem>>, vector<8x16x16xf32>
    tpu.vector_store %arg6[%c0_238, %c0_239, %c64_240], %190 {strides = array<i32>} : memref<8x16x144xf32, #tpu.memory_space<vmem>>, vector<8x16x16xf32>,
    %192 = vector.extract_strided_slice %181 {offsets = [0, 5, 0], sizes = [8, 16, 16], strides = [1, 1, 1]} : vector<8x24x16xf32> to vector<8x16x16xf32>
    %c0_241 = arith.constant 0 : index
    %c0_242 = arith.constant 0 : index
    %c80_243 = arith.constant 80 : index
    %193 = vector.load %arg6[%c0_241, %c0_242, %c80_243] : memref<8x16x144xf32, #tpu.memory_space<vmem>>, vector<8x16x16xf32>
    tpu.vector_store %arg6[%c0_241, %c0_242, %c80_243], %192 {strides = array<i32>} : memref<8x16x144xf32, #tpu.memory_space<vmem>>, vector<8x16x16xf32>,
    %194 = vector.extract_strided_slice %181 {offsets = [0, 6, 0], sizes = [8, 16, 16], strides = [1, 1, 1]} : vector<8x24x16xf32> to vector<8x16x16xf32>
    %c0_244 = arith.constant 0 : index
    %c0_245 = arith.constant 0 : index
    %c96_246 = arith.constant 96 : index
    %195 = vector.load %arg6[%c0_244, %c0_245, %c96_246] : memref<8x16x144xf32, #tpu.memory_space<vmem>>, vector<8x16x16xf32>
    tpu.vector_store %arg6[%c0_244, %c0_245, %c96_246], %194 {strides = array<i32>} : memref<8x16x144xf32, #tpu.memory_space<vmem>>, vector<8x16x16xf32>,
    %196 = vector.extract_strided_slice %181 {offsets = [0, 7, 0], sizes = [8, 16, 16], strides = [1, 1, 1]} : vector<8x24x16xf32> to vector<8x16x16xf32>
    %c0_247 = arith.constant 0 : index
    %c0_248 = arith.constant 0 : index
    %c112_249 = arith.constant 112 : index
    %197 = vector.load %arg6[%c0_247, %c0_248, %c112_249] : memref<8x16x144xf32, #tpu.memory_space<vmem>>, vector<8x16x16xf32>
    tpu.vector_store %arg6[%c0_247, %c0_248, %c112_249], %196 {strides = array<i32>} : memref<8x16x144xf32, #tpu.memory_space<vmem>>, vector<8x16x16xf32>,
    %198 = vector.extract_strided_slice %181 {offsets = [0, 8, 0], sizes = [8, 16, 16], strides = [1, 1, 1]} : vector<8x24x16xf32> to vector<8x16x16xf32>
    %c0_250 = arith.constant 0 : index
    %c0_251 = arith.constant 0 : index
    %c128_252 = arith.constant 128 : index
    %199 = vector.load %arg6[%c0_250, %c0_251, %c128_252] : memref<8x16x144xf32, #tpu.memory_space<vmem>>, vector<8x16x16xf32>
    tpu.vector_store %arg6[%c0_250, %c0_251, %c128_252], %198 {strides = array<i32>} : memref<8x16x144xf32, #tpu.memory_space<vmem>>, vector<8x16x16xf32>,
    %c0_253 = arith.constant 0 : index
    %c0_254 = arith.constant 0 : index
    %c0_255 = arith.constant 0 : index
    %200 = vector.load %arg6[%c0_253, %c0_254, %c0_255] : memref<8x16x144xf32, #tpu.memory_space<vmem>>, vector<8x16x144xf32>
    %201 = vector.shape_cast %200 : vector<8x16x144xf32> to vector<128x144xf32>
    %c7 = arith.constant 7 : index
    %c0_256 = arith.constant 0 : index
    %c0_257 = arith.constant 0 : index
    %202 = vector.load %arg3[%c7, %c0_256, %c0_257] : memref<9x64x144xf32, #tpu.memory_space<vmem>>, vector<1x64x144xf32>
    %203 = vector.shape_cast %202 : vector<1x64x144xf32> to vector<64x144xf32>
    %cst_258 = arith.constant dense<0.000000e+00> : vector<64x128xf32>
    %204 = tpu.matmul %203, %201, %cst_258 {dimension_numbers = #tpu.dot_dimension_numbers<[1], [1], [0], [0], [0, 0, 1, 0], [], []>} : vector<64x144xf32>, vector<128x144xf32>, vector<64x128xf32> -> vector<64x128xf32>
    %205 = arith.addf %180, %204 : vector<64x128xf32>
    %206 = vector.extract_strided_slice %4 {offsets = [8, 0, 0], sizes = [8, 24, 16], strides = [1, 1, 1]} : vector<16x24x16xf32> to vector<8x24x16xf32>
    %207 = vector.extract_strided_slice %206 {offsets = [0, 0, 0], sizes = [8, 16, 16], strides = [1, 1, 1]} : vector<8x24x16xf32> to vector<8x16x16xf32>
    %c0_259 = arith.constant 0 : index
    %c0_260 = arith.constant 0 : index
    %c0_261 = arith.constant 0 : index
    %208 = vector.load %arg6[%c0_259, %c0_260, %c0_261] : memref<8x16x144xf32, #tpu.memory_space<vmem>>, vector<8x16x16xf32>
    tpu.vector_store %arg6[%c0_259, %c0_260, %c0_261], %207 {strides = array<i32>} : memref<8x16x144xf32, #tpu.memory_space<vmem>>, vector<8x16x16xf32>,
    %209 = vector.extract_strided_slice %206 {offsets = [0, 1, 0], sizes = [8, 16, 16], strides = [1, 1, 1]} : vector<8x24x16xf32> to vector<8x16x16xf32>
    %c0_262 = arith.constant 0 : index
    %c0_263 = arith.constant 0 : index
    %c16_264 = arith.constant 16 : index
    %210 = vector.load %arg6[%c0_262, %c0_263, %c16_264] : memref<8x16x144xf32, #tpu.memory_space<vmem>>, vector<8x16x16xf32>
    tpu.vector_store %arg6[%c0_262, %c0_263, %c16_264], %209 {strides = array<i32>} : memref<8x16x144xf32, #tpu.memory_space<vmem>>, vector<8x16x16xf32>,
    %211 = vector.extract_strided_slice %206 {offsets = [0, 2, 0], sizes = [8, 16, 16], strides = [1, 1, 1]} : vector<8x24x16xf32> to vector<8x16x16xf32>
    %c0_265 = arith.constant 0 : index
    %c0_266 = arith.constant 0 : index
    %c32_267 = arith.constant 32 : index
    %212 = vector.load %arg6[%c0_265, %c0_266, %c32_267] : memref<8x16x144xf32, #tpu.memory_space<vmem>>, vector<8x16x16xf32>
    tpu.vector_store %arg6[%c0_265, %c0_266, %c32_267], %211 {strides = array<i32>} : memref<8x16x144xf32, #tpu.memory_space<vmem>>, vector<8x16x16xf32>,
    %213 = vector.extract_strided_slice %206 {offsets = [0, 3, 0], sizes = [8, 16, 16], strides = [1, 1, 1]} : vector<8x24x16xf32> to vector<8x16x16xf32>
    %c0_268 = arith.constant 0 : index
    %c0_269 = arith.constant 0 : index
    %c48_270 = arith.constant 48 : index
    %214 = vector.load %arg6[%c0_268, %c0_269, %c48_270] : memref<8x16x144xf32, #tpu.memory_space<vmem>>, vector<8x16x16xf32>
    tpu.vector_store %arg6[%c0_268, %c0_269, %c48_270], %213 {strides = array<i32>} : memref<8x16x144xf32, #tpu.memory_space<vmem>>, vector<8x16x16xf32>,
    %215 = vector.extract_strided_slice %206 {offsets = [0, 4, 0], sizes = [8, 16, 16], strides = [1, 1, 1]} : vector<8x24x16xf32> to vector<8x16x16xf32>
    %c0_271 = arith.constant 0 : index
    %c0_272 = arith.constant 0 : index
    %c64_273 = arith.constant 64 : index
    %216 = vector.load %arg6[%c0_271, %c0_272, %c64_273] : memref<8x16x144xf32, #tpu.memory_space<vmem>>, vector<8x16x16xf32>
    tpu.vector_store %arg6[%c0_271, %c0_272, %c64_273], %215 {strides = array<i32>} : memref<8x16x144xf32, #tpu.memory_space<vmem>>, vector<8x16x16xf32>,
    %217 = vector.extract_strided_slice %206 {offsets = [0, 5, 0], sizes = [8, 16, 16], strides = [1, 1, 1]} : vector<8x24x16xf32> to vector<8x16x16xf32>
    %c0_274 = arith.constant 0 : index
    %c0_275 = arith.constant 0 : index
    %c80_276 = arith.constant 80 : index
    %218 = vector.load %arg6[%c0_274, %c0_275, %c80_276] : memref<8x16x144xf32, #tpu.memory_space<vmem>>, vector<8x16x16xf32>
    tpu.vector_store %arg6[%c0_274, %c0_275, %c80_276], %217 {strides = array<i32>} : memref<8x16x144xf32, #tpu.memory_space<vmem>>, vector<8x16x16xf32>,
    %219 = vector.extract_strided_slice %206 {offsets = [0, 6, 0], sizes = [8, 16, 16], strides = [1, 1, 1]} : vector<8x24x16xf32> to vector<8x16x16xf32>
    %c0_277 = arith.constant 0 : index
    %c0_278 = arith.constant 0 : index
    %c96_279 = arith.constant 96 : index
    %220 = vector.load %arg6[%c0_277, %c0_278, %c96_279] : memref<8x16x144xf32, #tpu.memory_space<vmem>>, vector<8x16x16xf32>
    tpu.vector_store %arg6[%c0_277, %c0_278, %c96_279], %219 {strides = array<i32>} : memref<8x16x144xf32, #tpu.memory_space<vmem>>, vector<8x16x16xf32>,
    %221 = vector.extract_strided_slice %206 {offsets = [0, 7, 0], sizes = [8, 16, 16], strides = [1, 1, 1]} : vector<8x24x16xf32> to vector<8x16x16xf32>
    %c0_280 = arith.constant 0 : index
    %c0_281 = arith.constant 0 : index
    %c112_282 = arith.constant 112 : index
    %222 = vector.load %arg6[%c0_280, %c0_281, %c112_282] : memref<8x16x144xf32, #tpu.memory_space<vmem>>, vector<8x16x16xf32>
    tpu.vector_store %arg6[%c0_280, %c0_281, %c112_282], %221 {strides = array<i32>} : memref<8x16x144xf32, #tpu.memory_space<vmem>>, vector<8x16x16xf32>,
    %223 = vector.extract_strided_slice %206 {offsets = [0, 8, 0], sizes = [8, 16, 16], strides = [1, 1, 1]} : vector<8x24x16xf32> to vector<8x16x16xf32>
    %c0_283 = arith.constant 0 : index
    %c0_284 = arith.constant 0 : index
    %c128_285 = arith.constant 128 : index
    %224 = vector.load %arg6[%c0_283, %c0_284, %c128_285] : memref<8x16x144xf32, #tpu.memory_space<vmem>>, vector<8x16x16xf32>
    tpu.vector_store %arg6[%c0_283, %c0_284, %c128_285], %223 {strides = array<i32>} : memref<8x16x144xf32, #tpu.memory_space<vmem>>, vector<8x16x16xf32>,
    %c0_286 = arith.constant 0 : index
    %c0_287 = arith.constant 0 : index
    %c0_288 = arith.constant 0 : index
    %225 = vector.load %arg6[%c0_286, %c0_287, %c0_288] : memref<8x16x144xf32, #tpu.memory_space<vmem>>, vector<8x16x144xf32>
    %226 = vector.shape_cast %225 : vector<8x16x144xf32> to vector<128x144xf32>
    %c8 = arith.constant 8 : index
    %c0_289 = arith.constant 0 : index
    %c0_290 = arith.constant 0 : index
    %227 = vector.load %arg3[%c8, %c0_289, %c0_290] : memref<9x64x144xf32, #tpu.memory_space<vmem>>, vector<1x64x144xf32>
    %228 = vector.shape_cast %227 : vector<1x64x144xf32> to vector<64x144xf32>
    %cst_291 = arith.constant dense<0.000000e+00> : vector<64x128xf32>
    %229 = tpu.matmul %228, %226, %cst_291 {dimension_numbers = #tpu.dot_dimension_numbers<[1], [1], [0], [0], [0, 0, 1, 0], [], []>} : vector<64x144xf32>, vector<128x144xf32>, vector<64x128xf32> -> vector<64x128xf32>
    %230 = arith.addf %205, %229 : vector<64x128xf32>
    %c0_292 = arith.constant 0 : index
    %c0_293 = arith.constant 0 : index
    %c0_294 = arith.constant 0 : index
    %231 = vector.load %arg4[%c0_292, %c0_293, %c0_294] : memref<1x64x128xf32, #tpu.memory_space<vmem>>, vector<1x64x128xf32>
    %232 = vector.shape_cast %231 : vector<1x64x128xf32> to vector<64x128xf32>
    %233 = vector.shape_cast %230 : vector<64x128xf32> to vector<1x64x128xf32>
    tpu.vector_store %arg4[%c0_292, %c0_293, %c0_294], %233 {strides = array<i32>} : memref<1x64x128xf32, #tpu.memory_space<vmem>>, vector<1x64x128xf32>,
    %cst_295 = arith.constant dense<0.000000e+00> : vector<64xf32>
    %234 = vector.multi_reduction <add>, %230, %cst_295 [1] : vector<64x128xf32> to vector<64xf32>
    %235 = vector.shape_cast %234 : vector<64xf32> to vector<64x1xf32>
    %c0_i32 = arith.constant 0 : i32
    %236 = arith.cmpi eq, %arg1, %c0_i32 : i32
    %237 = arith.extui %236 : i1 to i32
    %c0_i32_296 = arith.constant 0 : i32
    %238 = arith.cmpi ne, %237, %c0_i32_296 : i32
    scf.if %238 {
      %cst_302 = arith.constant 0.000000e+00 : f32
      %245 = vector.broadcast %cst_302 : f32 to vector<64x1xf32>
      %c0_303 = arith.constant 0 : index
      %c0_304 = arith.constant 0 : index
      %246 = vector.load %arg7[%c0_303, %c0_304] : memref<64x1xf32, #tpu.memory_space<vmem>>, vector<64x1xf32>
      tpu.vector_store %arg7[%c0_303, %c0_304], %245 {strides = array<i32>} : memref<64x1xf32, #tpu.memory_space<vmem>>, vector<64x1xf32>,
    } else {
    }
    %c0_297 = arith.constant 0 : index
    %c0_298 = arith.constant 0 : index
    %239 = vector.load %arg7[%c0_297, %c0_298] : memref<64x1xf32, #tpu.memory_space<vmem>>, vector<64x1xf32>
    %240 = arith.addf %239, %235 : vector<64x1xf32>
    %c0_299 = arith.constant 0 : index
    %c0_300 = arith.constant 0 : index
    %241 = vector.load %arg7[%c0_299, %c0_300] : memref<64x1xf32, #tpu.memory_space<vmem>>, vector<64x1xf32>
    tpu.vector_store %arg7[%c0_299, %c0_300], %240 {strides = array<i32>} : memref<64x1xf32, #tpu.memory_space<vmem>>, vector<64x1xf32>,
    %c1_i32 = arith.constant 1 : i32
    %242 = arith.cmpi eq, %arg1, %c1_i32 : i32
    %243 = arith.extui %242 : i1 to i32
    %c0_i32_301 = arith.constant 0 : i32
    %244 = arith.cmpi ne, %243, %c0_i32_301 : i32
    scf.if %244 {
      %c0_302 = arith.constant 0 : index
      %c0_303 = arith.constant 0 : index
      %245 = vector.load %arg7[%c0_302, %c0_303] : memref<64x1xf32, #tpu.memory_space<vmem>>, vector<64x1xf32>
      %c0_304 = arith.constant 0 : index
      %c0_305 = arith.constant 0 : index
      %c0_306 = arith.constant 0 : index
      %246 = vector.load %arg5[%c0_304, %c0_305, %c0_306] : memref<1x64x1xf32, #tpu.memory_space<vmem>>, vector<1x64x1xf32>
      %247 = vector.shape_cast %246 : vector<1x64x1xf32> to vector<64x1xf32>
      %248 = vector.shape_cast %245 : vector<64x1xf32> to vector<1x64x1xf32>
      tpu.vector_store %arg5[%c0_304, %c0_305, %c0_306], %248 {strides = array<i32>} : memref<1x64x1xf32, #tpu.memory_space<vmem>>, vector<1x64x1xf32>,
    } else {
    }
    return
  }
  func.func @transform_0(%arg0: i32, %arg1: i32) -> (i32, i32, i32, i32) {
    %c0_i32 = arith.constant 0 : i32
    %c0_i32_0 = arith.constant 0 : i32
    %c0_i32_1 = arith.constant 0 : i32
    %c0_i32_2 = arith.constant 0 : i32
    return %arg0, %c0_i32, %c0_i32_0, %c0_i32_1 : i32, i32, i32, i32
  }
  func.func @transform_1(%arg0: i32, %arg1: i32) -> (i32, i32, i32) {
    %c0_i32 = arith.constant 0 : i32
    %c0_i32_0 = arith.constant 0 : i32
    %c0_i32_1 = arith.constant 0 : i32
    %c0_i32_2 = arith.constant 0 : i32
    return %c0_i32, %c0_i32_0, %c0_i32_1 : i32, i32, i32
  }
  func.func @transform_2(%arg0: i32, %arg1: i32) -> (i32, i32, i32) {
    %c0_i32 = arith.constant 0 : i32
    %c0_i32_0 = arith.constant 0 : i32
    return %arg0, %c0_i32, %arg1 : i32, i32, i32
  }
  func.func @transform_3(%arg0: i32, %arg1: i32) -> (i32, i32, i32) {
    %c0_i32 = arith.constant 0 : i32
    %c0_i32_0 = arith.constant 0 : i32
    %c0_i32_1 = arith.constant 0 : i32
    return %arg0, %c0_i32, %c0_i32_0 : i32, i32, i32
  }
}

module attributes {stable_mosaic.version = 11 : i64} {
  func.func @kernel(%arg0: i32, %arg1: i32, %arg2: memref<1x64x128xf32, #tpu.memory_space<vmem>>, %arg3: memref<1x64x1xf32, #tpu.memory_space<vmem>>, %arg4: memref<1x64x128xf32, #tpu.memory_space<vmem>>) attributes {dimension_semantics = [#tpu.dimension_semantics<parallel>, #tpu.dimension_semantics<parallel>], iteration_bounds = array<i64: 2, 2>, scalar_prefetch = 0 : i64, scratch_operands = 0 : i64, tpu.core_type = #tpu.core_type<tc>, window_params = [{transform_indices = @transform_0, window_bounds = array<i64: 1, 64, 128>}, {transform_indices = @transform_1, window_bounds = array<i64: 1, 64, 1>}, {transform_indices = @transform_2, window_bounds = array<i64: 1, 64, 128>}]} {
    %c0 = arith.constant 0 : index
    %c0_0 = arith.constant 0 : index
    %c0_1 = arith.constant 0 : index
    %0 = vector.load %arg2[%c0, %c0_0, %c0_1] : memref<1x64x128xf32, #tpu.memory_space<vmem>>, vector<1x64x128xf32>
    %1 = vector.shape_cast %0 : vector<1x64x128xf32> to vector<64x128xf32>
    %c0_2 = arith.constant 0 : index
    %c0_3 = arith.constant 0 : index
    %c0_4 = arith.constant 0 : index
    %2 = vector.load %arg3[%c0_2, %c0_3, %c0_4] : memref<1x64x1xf32, #tpu.memory_space<vmem>>, vector<1x64x1xf32>
    %3 = vector.shape_cast %2 : vector<1x64x1xf32> to vector<64x1xf32>
    %4 = vector.broadcast %3 : vector<64x1xf32> to vector<64x128xf32>
    %5 = arith.mulf %1, %4 : vector<64x128xf32>
    %c0_5 = arith.constant 0 : index
    %c0_6 = arith.constant 0 : index
    %c0_7 = arith.constant 0 : index
    %6 = vector.load %arg4[%c0_5, %c0_6, %c0_7] : memref<1x64x128xf32, #tpu.memory_space<vmem>>, vector<1x64x128xf32>
    %7 = vector.shape_cast %6 : vector<1x64x128xf32> to vector<64x128xf32>
    %8 = vector.shape_cast %5 : vector<64x128xf32> to vector<1x64x128xf32>
    tpu.vector_store %arg4[%c0_5, %c0_6, %c0_7], %8 {strides = array<i32>} : memref<1x64x128xf32, #tpu.memory_space<vmem>>, vector<1x64x128xf32>,
    return
  }
  func.func @transform_0(%arg0: i32, %arg1: i32) -> (i32, i32, i32) {
    %c0_i32 = arith.constant 0 : i32
    %c0_i32_0 = arith.constant 0 : i32
    return %arg0, %c0_i32, %arg1 : i32, i32, i32
  }
  func.func @transform_1(%arg0: i32, %arg1: i32) -> (i32, i32, i32) {
    %c0_i32 = arith.constant 0 : i32
    %c0_i32_0 = arith.constant 0 : i32
    %c0_i32_1 = arith.constant 0 : i32
    return %arg0, %c0_i32, %c0_i32_0 : i32, i32, i32
  }
  func.func @transform_2(%arg0: i32, %arg1: i32) -> (i32, i32, i32) {
    %c0_i32 = arith.constant 0 : i32
    %c0_i32_0 = arith.constant 0 : i32
    return %arg0, %c0_i32, %arg1 : i32, i32, i32
  }
}

</mosaic_0001>

<bundles_post_ra>
// kernel: psa_forward.3
= control target key start
LH: loop header
LB: loop body
LE: loop exit
PB: predicated region body
PF: predicated region fallthrough
CT: control target
= control target key end

     0   :  { %s614_s9 = smov 0   ;;  %s616_s10 = smov 0   ;;  %s733_s0 = inlined_call_operand.vmem [shape: f32[2,64,256], index: 0, kind: input, shape index: {}]   ;;  %s734_s1 = inlined_call_operand.vmem [shape: f32[2,64,1], index: 1, kind: input, shape index: {}]   ;;  %s735_s2 = inlined_call_operand.vmem [shape: f32[2,64,256], index: 2, kind: output, shape index: {}]  }
   0x1   :  { %s618_s11 = smov 0   ;;  %s620_s12 = smov 0  }
   0x2   :  { %s622_s13 = smov 0   ;;  %s624_s14 = smov 0  }
   0x3   :  { %s626_s15 = smov 0  }
   0x4 LB: > { %s21_s16 = sadd.s32 1, %s588_s13  ;;  %s24_s17 = sadd.s32 1, %s592_s14  ;;  %s596_s15 = sphi %s626_s15, %s12_s15   ;;  %s592_s14 = sphi %s624_s14, %s742_s14   ;;  %s588_s13 = sphi %s622_s13, %s741_s13   ;;  %s584_s12 = sphi %s620_s12, %s740_s12   ;;  %s580_s11 = sphi %s618_s11, %s739_s11   ;;  %s576_s10 = sphi %s616_s10, %s738_s10   ;;  %s572_s9 = sphi %s614_s9, %s737_s9  }
   0x5   : > { %p22_p0 = scmp.ge.s32.totalorder %s21_s16, 2  ;;  %s465_s18 = sadd.s32 4294967295, %s596_s15  }
   0x6   : > { %p40_p1 = scmp.ne.s32.totalorder %s576_s10, %s572_s9  ;;  %p41_p2 = scmp.eq.s32.totalorder %s596_s15, 0 }
   0x7   : > { %s744_s16 = smov (%p22_p0, %s21_s16), 0  ;;  %s746_s17 = smov (!%p22_p0, %s24_s17), %s592_s14 }
   0x8   : > { %p26_p3 = scmp.ge.s32.totalorder %s746_s17, 2  ;;  %p98_p4 = scmp.eq.s32.totalorder %s465_s18, 3 }
   0x9   : > { %s29_s19 = ssub.s32 %s588_s13, %s744_s16  ;;  %p42_p5 = por %p41_p2, %p40_p1 }
   0xa   : > { %s748_s17 = smov (%p26_p3, %s746_s17), 0  ;;  %p662_p6 = por %p98_p4, %p40_p1 }
   0xb   : > { %s28_s21 = ssub.s32 %s592_s14, %s748_s17  ;;  %s33_s23 = sadd.s32 1, %s576_s10 }
   0xc   : > { %s30_s22 = sor.u32 %s29_s19, %s28_s21  ;;  %p468_p8 = scmp.ge.s32.totalorder %s596_s15, 4 }
   0xd   : > { %p31_p7 = scmp.eq.s32.totalorder %s30_s22, 0 }
   0xe   : > { %120 = sbr.rel (%p468_p8) target bundleno = 31 (0x1f), region = 16 }
   0xf   : > { %s670_s24 = scalar_select %p31_p7, %s576_s10, %s33_s23  }
  0x15   : > { %123 = sbr.rel (!%p42_p5) target bundleno = 31 (0x1f), region = 20  ;;  %s125_s25 = sand.u32 (%p42_p5), 1, %s576_s10  }
  0x16   : > { %s470_s26 = sshll.u32 (%p42_p5), %s592_s14, 4  ;;  %s469_s27 = sshll.u32 (%p42_p5), %s125_s25, 6 }
  0x17   : > { %s129_s28 = sadd.s32 (%p42_p5), %s588_s13, %s470_s26  ;;  %s127_s5 = scalar_lea.vmem (%p42_p5), [#allocation2], %s469_s27 }
  0x18   : > { %s471_s29 = sshll.u32 (%p42_p5), %s129_s28, 3 }
  0x19   : > { %s131_s4 = scalar_lea.vmem (%p42_p5), %s733_s0, %s471_s29 }
  0x1a   : > { %v173_v0 = vld [vmem:[%s131_s4] sm:$0xff] (%p42_p5)  ;;  %v175_v1 = vld [vmem:[%s131_s4 + $0x10] sm:$0xff] (%p42_p5) }
  0x1b   : > { %v177_v2 = vld [vmem:[%s131_s4 + $0x20] sm:$0xff] (%p42_p5)  ;;  %174 = vst [vmem:[%s127_s5] sm:$0xff] (%p42_p5), %v173_v0  ;;  %176 = vst [vmem:[%s127_s5 + $0x8] sm:$0xff] (%p42_p5), %v175_v1  ;;  %v179_v3 = vld [vmem:[%s131_s4 + $0x30] sm:$0xff] (%p42_p5) }
  0x1c   : > { %178 = vst [vmem:[%s127_s5 + $0x10] sm:$0xff] %v177_v2  ;;  %v181_v4 = vld [vmem:[%s131_s4 + $0x40] sm:$0xff]  ;;  %v183_v5 = vld [vmem:[%s131_s4 + $0x50] sm:$0xff]  ;;  %180 = vst [vmem:[%s127_s5 + $0x18] sm:$0xff] %v179_v3 }
  0x1d   : > { %182 = vst [vmem:[%s127_s5 + $0x20] sm:$0xff] %v181_v4  ;;  %184 = vst [vmem:[%s127_s5 + $0x28] sm:$0xff] %v183_v5  ;;  %v185_v6 = vld [vmem:[%s131_s4 + $0x60] sm:$0xff]  ;;  %v187_v7 = vld [vmem:[%s131_s4 + $0x70] sm:$0xff] }
  0x1e   : > { %186 = vst [vmem:[%s127_s5 + $0x30] sm:$0xff] %v185_v6  ;;  %188 = vst [vmem:[%s127_s5 + $0x38] sm:$0xff] %v187_v7 }
  0x1f PF: > { %p472_p9 = scmp.ge.s32.totalorder %s596_s15, 1  ;;  %p201_p10 = scmp.lt.s32.totalorder %s596_s15, 5 }
  0x21   : > { %p202_p11 = pnand %p472_p9, %p201_p10 }
  0x22   : > { %p233_p12 = scmp.lt.s32.totalorder (!%p202_p11), %s584_s12, 1  ;;  %v598_v8 = vmov (!%p202_p11), 0   ;;  %s208_s21 = sand.u32 (!%p202_p11), 1, %s572_s9  }
  0x23   : > { %205 = sbr.rel (%p202_p11) target bundleno = 198 (0xc6), region = 62  ;;  %541 = vset.pattern.permute.xlu1 (!%p202_p11), %v598_v8  ;;  %540 = vset.pattern.permute.xlu0 (!%p202_p11), %v598_v8  ;;  %s473_s22 = sshll.u32 (!%p202_p11), %s208_s21, 6 }
  0x24   : > { %s210_s23 = scalar_lea.vmem (!%p202_p11), [#allocation2], %s473_s22  ;;  %s687_s25 = scalar_lea.vmem (!%p202_p11), [#allocation3], %s473_s22 }
  0x25   : > { %v240_v17 = vld [vmem:[%s210_s23 + $0x10] sm:$0xff] (!%p202_p11)  ;;  %v238_v18 = vld [vmem:[%s210_s23] sm:$0xff] (!%p202_p11)  ;;  %v241_v23 = vld [vmem:[%s210_s23 + $0x18] sm:$0xff] (!%p202_p11) }
  0x26   : > { %v239_v24 = vld [vmem:[%s210_s23 + $0x8] sm:$0xff] (!%p202_p11)  ;;  %v242_v30 = vld [vmem:[%s210_s23 + $0x20] sm:$0xff] (!%p202_p11)  ;;  %v245_v35 = vld [vmem:[%s210_s23 + $0x38] sm:$0xff] (!%p202_p11) }
  0x27   : > { %v243_v29 = vld [vmem:[%s210_s23 + $0x28] sm:$0xff] (!%p202_p11)  ;;  %v244_v36 = vld [vmem:[%s210_s23 + $0x30] sm:$0xff] (!%p202_p11) }
  0x2a   : > { %s234_s6 = scalar_select %p233_p12, %s584_s12, 1 }
  0x2b   : > { %s478_s9 = sshll.u32 (%p662_p6), %s584_s12, 4 }
  0x2c   : > { %s482_s7 = sshll.u32 %s234_s6, 6  ;;  %s318_s26 = sadd.s32 (%p662_p6), %s580_s11, %s478_s9 }
  0x2d   : > { %s237_s19 = scalar_lea.vmem %s734_s1, %s482_s7  ;;  %s479_s20 = sshll.u32 (%p662_p6), %s318_s26, 3 }
  0x2e   : > { %v248_v9 = vld [vmem:[%s237_s19 + $0x10] sm:$0xff]  ;;  %v246_v10 = vld [vmem:[%s237_s19] sm:$0xff]  ;;  %v249_v11 = vld [vmem:[%s237_s19 + $0x18] sm:$0xff]  ;;  %s320_s29 = scalar_lea.vmem (%p662_p6), %s735_s2, %s479_s20 }
  0x2f   : > { %266 = vperm.xlu1 %541, %v248_v9   ;;  %256 = vperm.xlu0 %540, %v246_v10   ;;  %v247_v12 = vld [vmem:[%s237_s19 + $0x8] sm:$0xff]  ;;  %v250_v14 = vld [vmem:[%s237_s19 + $0x20] sm:$0xff]  ;;  %v253_v15 = vld [vmem:[%s237_s19 + $0x38] sm:$0xff] }
  0x30   : > { %v251_v13 = vld [vmem:[%s237_s19 + $0x28] sm:$0xff]  ;;  %v252_v16 = vld [vmem:[%s237_s19 + $0x30] sm:$0xff] }
  0x33   : > { %271 = vperm.xlu1 %541, %v249_v11   ;;  %261 = vperm.xlu0 %540, %v247_v12  }
  0x37   : > { %281 = vperm.xlu1 %541, %v251_v13   ;;  %276 = vperm.xlu0 %540, %v250_v14  }
  0x3b   : > { %291 = vperm.xlu1 %541, %v253_v15   ;;  %286 = vperm.xlu0 %540, %v252_v16  }
  0xae   : > { %v267_v19 = vpop.permute.xlu1 %266  ;;  %v257_v20 = vpop.permute.xlu0 %256 }
  0xaf   : > { %v296_v21 = vmul.f32 %v267_v19, %v240_v17  ;;  %v294_v22 = vmul.f32 %v257_v20, %v238_v18 }
  0xb1   : > { %304 = vst [vmem:[%s687_s25 + $0x10] sm:$0xff] %v296_v21  ;;  %302 = vst [vmem:[%s687_s25] sm:$0xff] %v294_v22 }
  0xb2   : > { %v272_v25 = vpop.permute.xlu1 %271  ;;  %v262_v26 = vpop.permute.xlu0 %261 }
  0xb3   : > { %v297_v27 = vmul.f32 %v272_v25, %v241_v23  ;;  %v295_v28 = vmul.f32 %v262_v26, %v239_v24 }
  0xb5   : > { %305 = vst [vmem:[%s687_s25 + $0x18] sm:$0xff] %v297_v27  ;;  %303 = vst [vmem:[%s687_s25 + $0x8] sm:$0xff] %v295_v28 }
  0xb6   : > { %v282_v31 = vpop.permute.xlu1 %281  ;;  %v277_v32 = vpop.permute.xlu0 %276 }
  0xb7   : > { %v299_v33 = vmul.f32 %v282_v31, %v243_v29  ;;  %v298_v34 = vmul.f32 %v277_v32, %v242_v30  ;;  %316 = sbr.rel (!%p662_p6) target bundleno = 198 (0xc6), region = 70 }
  0xb8   : > { %v362_v41 = vld [vmem:[%s687_s25] sm:$0xff] (%p662_p6)  ;;  %v366_v43 = vld [vmem:[%s687_s25 + $0x10] sm:$0xff] (%p662_p6) }
  0xb9   : > { %307 = vst [vmem:[%s687_s25 + $0x28] sm:$0xff] %v299_v33  ;;  %306 = vst [vmem:[%s687_s25 + $0x20] sm:$0xff] %v298_v34 }
  0xba   : > { %v292_v37 = vpop.permute.xlu1 %291  ;;  %v287_v38 = vpop.permute.xlu0 %286  ;;  %363 = vst [vmem:[%s320_s29] sm:$0xff] (%p662_p6), %v362_v41  ;;  %367 = vst [vmem:[%s320_s29 + $0x20] sm:$0xff] (%p662_p6), %v366_v43 }
  0xbb   : > { %v301_v39 = vmul.f32 %v292_v37, %v245_v35  ;;  %v300_v40 = vmul.f32 %v287_v38, %v244_v36 }
  0xbc   : > { %v364_v42 = vld [vmem:[%s687_s25 + $0x8] sm:$0xff] (%p662_p6)  ;;  %v368_v44 = vld [vmem:[%s687_s25 + $0x18] sm:$0xff] (%p662_p6) }
  0xbd   : > { %309 = vst [vmem:[%s687_s25 + $0x38] sm:$0xff] %v301_v39  ;;  %308 = vst [vmem:[%s687_s25 + $0x30] sm:$0xff] %v300_v40 }
  0xbe   : > { %365 = vst [vmem:[%s320_s29 + $0x10] sm:$0xff] %v364_v42  ;;  %369 = vst [vmem:[%s320_s29 + $0x30] sm:$0xff] %v368_v44 }
  0xc0   : > { %v370_v45 = vld [vmem:[%s687_s25 + $0x20] sm:$0xff]  ;;  %v372_v46 = vld [vmem:[%s687_s25 + $0x28] sm:$0xff] }
  0xc1   : > { %371 = vst [vmem:[%s320_s29 + $0x40] sm:$0xff] %v370_v45  ;;  %373 = vst [vmem:[%s320_s29 + $0x50] sm:$0xff] %v372_v46 }
  0xc4   : > { %v374_v47 = vld [vmem:[%s687_s25 + $0x30] sm:$0xff]  ;;  %v376_v48 = vld [vmem:[%s687_s25 + $0x38] sm:$0xff] }
  0xc5   : > { %375 = vst [vmem:[%s320_s29 + $0x60] sm:$0xff] %v374_v47  ;;  %377 = vst [vmem:[%s320_s29 + $0x70] sm:$0xff] %v376_v48 }
  0xc6 PF: > { %s12_s15 = sadd.s32 1, %s596_s15   ;;  %s737_s9 = smov %s576_s10 }
  0xc7   : > { %p9_p13 = scmp.ge.s32.totalorder %s12_s15, 6   ;;  %s738_s10 = smov %s670_s24 }
  0xc8   : > { %s739_s11 = smov %s588_s13  ;;  %s740_s12 = smov %s592_s14 }
  0xc9   : > { %s741_s13 = smov %s744_s16  ;;  %s742_s14 = smov %s748_s17 }
  0xca   :  { %11 = sbr.rel (!%p9_p13) target bundleno = 4 (0x4), region = 142 }

// kernel: psa_forward.2
= control target key start
LH: loop header
LB: loop body
LE: loop exit
PB: predicated region body
PF: predicated region fallthrough
CT: control target
= control target key end

     0   :  { %s6179_s12 = smov 0   ;;  %s6181_s13 = smov 0   ;;  %s10795_s0 = inlined_call_operand.vmem [shape: f32[2,24,24,16], index: 0, kind: input, shape index: {}]   ;;  %s10796_s1 = inlined_call_operand.vmem [shape: f32[9,64,144], index: 1, kind: input, shape index: {}]   ;;  %s10797_s2 = inlined_call_operand.vmem [shape: f32[2,64,256], index: 2, kind: output, shape index: {0}]   ;;  %s10798_s3 = inlined_call_operand.vmem [shape: f32[2,64,1], index: 3, kind: output, shape index: {1}]  }
   0x1   :  { %s6183_s14 = smov 0   ;;  %s6185_s15 = smov 0  }
   0x2   :  { %s6187_s16 = smov 0   ;;  %s6189_s17 = smov 0  }
   0x3   :  { %s6191_s18 = smov 0  }
   0x4 LB: > { %s23_s19 = sadd.s32 1, %s6141_s16  ;;  %s26_s20 = sadd.s32 1, %s6145_s17  ;;  %s6149_s18 = sphi %s6191_s18, %s14_s18   ;;  %s6145_s17 = sphi %s6189_s17, %s11208_s17   ;;  %s6141_s16 = sphi %s6187_s16, %s11207_s16   ;;  %s6137_s15 = sphi %s6185_s15, %s11206_s15   ;;  %s6133_s14 = sphi %s6183_s14, %s11205_s14   ;;  %s6129_s13 = sphi %s6181_s13, %s11204_s13   ;;  %s6125_s12 = sphi %s6179_s12, %s11203_s12  }
   0x5   : > { %p24_p0 = scmp.ge.s32.totalorder %s23_s19, 2  ;;  %s5175_s21 = sadd.s32 4294967295, %s6149_s18  }
   0x6   : > { %p92_p1 = scmp.ne.s32.totalorder %s6129_s13, %s6125_s12  ;;  %p93_p2 = scmp.eq.s32.totalorder %s5175_s21, 3 }
   0x7   : > { %s11210_s19 = smov (%p24_p0, %s23_s19), 0  ;;  %s11212_s20 = smov (!%p24_p0, %s26_s20), %s6145_s17 }
   0x8   : > { %s78_s22 = ssub.s32 %s6141_s16, %s11210_s19  ;;  %p28_p3 = scmp.ge.s32.totalorder %s11212_s20, 2 }
   0x9   : > { %p5179_p4 = scmp.ge.s32.totalorder %s6149_s18, 1  ;;  %p6225_p5 = por %p93_p2, %p92_p1 }
   0xa   : > { %p154_p6 = scmp.lt.s32.totalorder %s6149_s18, 5  ;;  %s11214_s20 = smov (%p28_p3, %s11212_s20), 0 }
   0xb   : > { %s77_s24 = ssub.s32 %s6145_s17, %s11214_s20  ;;  %s82_s26 = sadd.s32 1, %s6129_s13 }
   0xc   : > { %p155_p7 = pnand %p5179_p4, %p154_p6  ;;  %s79_s25 = sor.u32 %s78_s22, %s77_s24 }
   0xd   : > { %p80_p8 = scmp.eq.s32.totalorder %s79_s25, 0 }
   0xe   : > { %158 = sbr.rel (%p155_p7) target bundleno = 1446 (0x5a6), region = 28 }
   0xf   : > { %s6236_s27 = scalar_select %p80_p8, %s6129_s13, %s82_s26  }
  0x15   : > { %p182_p9 = scmp.lt.s32.totalorder %s6137_s15, 1  ;;  %s5185_s29 = smul.u32 192, %s6133_s14  ;;  %vm243_vm0 = vcmask 130048   ;;  %vm390_vm1 = vcmask 1045504   ;;  %vm284_vm2 = vcmask 1046528   ;;  %vm496_vm3 = vcmask 1044480  }
  0x16   : > { %s6151_s21 = smov 32   ;;  %s6152_s22 = smov 16   ;;  %vm602_vm4 = vcmask 1043456   ;;  %vm708_vm5 = vcmask 1042432   ;;  %vm814_vm6 = vcmask 1041408   ;;  %vm920_vm7 = vcmask 1040384   ;;  %vm6483_vm8 = vmpackc.low %vm243_vm0, %vm243_vm0 }
  0x17   : > { %s183_s28 = scalar_select %p182_p9, %s6137_s15, 1  ;;  %vm373_vm9 = vcmask 261248   ;;  %vm479_vm10 = vcmask 392448   ;;  %vm585_vm11 = vcmask 523648   ;;  %vm691_vm12 = vcmask 654848  }
  0x18   : > { %s6153_s24 = smov 48   ;;  %s6154_s25 = smov 64   ;;  %vm797_vm13 = vcmask 786048   ;;  %vm903_vm14 = vcmask 917248   ;;  %vm1009_vm15 = vcmask 1048448  }
  0x19   : > { %s6030_s30 = smul.u32 576, %s183_s28  ;;  %s5537_s4 = sshll.u32 %s183_s28, 6 }
  0x1a   : > { %s6244_s7 = scalar_lea.vmem %s10798_s3, %s5537_s4  ;;  %s6155_s26 = smov 80  }
  0x1b   : > { %s186_s10 = scalar_lea.vmem %s10795_s0, %s6030_s30  ;;  %s6156_s28 = smov 96  }
  0x1c   : > { %s6249_s11 = scalar_lea.vmem %s186_s10, %s5185_s29  ;;  %s6157_s29 = smov 112  }
  0x1d   : > { %v6252_v0 = vld [vmem:[%s6249_s11] sm:$0xff]  ;;  %v6255_v1 = vld [vmem:[%s6249_s11 + $0x8] sm:$0xff]  ;;  %v6258_v2 = vld [vmem:[%s6249_s11 + $0x10] sm:$0xff]  ;;  %s172_s9 = sand.u32 1, %s6125_s12   ;;  %p5530_p10 = scmp.ne.s32.totalorder %s6133_s14, 0 }
  0x1e   : > { %v391_v3 = vrot.slane %v6252_v0, 2  ;;  %v392_v4 = vrot.slane %v6255_v1, 2  ;;  %v285_v5 = vrot.slane %v6252_v0, 1  ;;  %v286_v6 = vrot.slane %v6255_v1, 1  ;;  %v6265_v7 = vld [vmem:[%s6249_s11 + $0x20] sm:$0xff]  ;;  %v6268_v8 = vld [vmem:[%s6249_s11 + $0x28] sm:$0xff] }
  0x1f   : > { %244 = vst.msk [vmem:[#allocation2] sm:$0xff] %vm243_vm0, %v6252_v0  ;;  %245 = vst.msk [vmem:[#allocation2 + $0x10] sm:$0xff] %vm243_vm0, %v6255_v1  ;;  %v394_v9 = vrot.slane %v6258_v2, 2  ;;  %v288_v10 = vrot.slane %v6258_v2, 1  ;;  %v6281_v11 = vld [vmem:[%s6249_s11 + $0x18] sm:$0xff]  ;;  %v6295_v15 = vld [vmem:[%s6249_s11 + $0x40] sm:$0xff] }
  0x20   : > { %1026 = vst.msk [vmem:[#allocation2 + $0x8] sm:$0xff] %vm243_vm0, %v6255_v1  ;;  %1027 = vst.msk [vmem:[#allocation2 + $0x18] sm:$0xff] %vm243_vm0, %v6258_v2  ;;  %v6284_v12 = vld [vmem:[%s6249_s11 + $0x38] sm:$0xff]  ;;  %v393_v13 = vsel %vm390_vm1, %v391_v3, %v392_v4  ;;  %v287_v14 = vsel %vm284_vm2, %v285_v5, %v286_v6  ;;  %v6298_v16 = vld [vmem:[%s6249_s11 + $0x30] sm:$0xff]  ;;  %v498_v18 = vrot.slane %v6255_v1, 3  ;;  %v500_v23 = vrot.slane %v6258_v2, 3 }
  0x21   : > { %247 = vst.msk [vmem:[#allocation2 + $0x30] sm:$0xff] %vm243_vm0, %v6265_v7  ;;  %1028 = vst.msk [vmem:[#allocation2 + $0x28] sm:$0xff] %vm243_vm0, %v6265_v7  ;;  %v6301_v17 = vld [vmem:[%s6249_s11 + $0x50] sm:$0xff]  ;;  %431 = vrot.lane.b32.xlu1 %v393_v13, %s6151_s21  ;;  %325 = vrot.lane.b32.xlu0 %v287_v14, %s6152_s22  ;;  %v6313_v19 = vld [vmem:[%s6249_s11 + $0x58] sm:$0xff]  ;;  %v395_v21 = vsel %vm390_vm1, %v392_v4, %v394_v9  ;;  %v289_v22 = vsel %vm284_vm2, %v286_v6, %v288_v10  ;;  %v497_v24 = vrot.slane %v6252_v0, 3  ;;  %s5180_s10 = sshll.u32 %s172_s9, 6 }
  0x22   : > { %1029 = vst.msk [vmem:[#allocation2 + $0x38] sm:$0xff] %vm243_vm0, %v6268_v8  ;;  %246 = vst.msk [vmem:[#allocation2 + $0x20] sm:$0xff] %vm243_vm0, %v6281_v11  ;;  %v6316_v20 = vld [vmem:[%s6249_s11 + $0x48] sm:$0xff]  ;;  %v6334_v26 = vld [vmem:[%s6249_s11 + $0x70] sm:$0xff]  ;;  %v604_v28 = vrot.slane %v6255_v1, 4  ;;  %v501_v29 = vsel %vm496_vm3, %v498_v18, %v500_v23  ;;  %v606_v31 = vrot.slane %v6258_v2, 4 }
  0x23   : > { %249 = vst.msk [vmem:[#allocation2 + $0x50] sm:$0xff] %vm243_vm0, %v6284_v12  ;;  %1030 = vst.msk [vmem:[#allocation2 + $0x48] sm:$0xff] %vm243_vm0, %v6284_v12  ;;  %v6331_v25 = vld [vmem:[%s6249_s11 + $0x68] sm:$0xff]  ;;  %v6337_v27 = vld [vmem:[%s6249_s11 + $0x60] sm:$0xff]  ;;  %v499_v30 = vsel %vm496_vm3, %v497_v24, %v498_v18  ;;  %v603_v32 = vrot.slane %v6252_v0, 4  ;;  %v710_v33 = vrot.slane %v6255_v1, 5 }
  0x24   : > { %248 = vst.msk [vmem:[#allocation2 + $0x40] sm:$0xff] %vm243_vm0, %v6298_v16  ;;  %251 = vst.msk [vmem:[#allocation2 + $0x70] sm:$0xff] %vm243_vm0, %v6301_v17  ;;  %v6362_v34 = vld [vmem:[%s6249_s11 + $0x80] sm:$0xff]  ;;  %v6365_v35 = vld [vmem:[%s6249_s11 + $0x88] sm:$0xff]  ;;  %v607_v36 = vsel %vm602_vm4, %v604_v28, %v606_v31  ;;  %v712_v38 = vrot.slane %v6258_v2, 5  ;;  %v709_v39 = vrot.slane %v6252_v0, 5 }
  0x25   : > { %1031 = vst.msk [vmem:[#allocation2 + $0x58] sm:$0xff] %vm243_vm0, %v6295_v15  ;;  %1032 = vst.msk [vmem:[#allocation2 + $0x68] sm:$0xff] %vm243_vm0, %v6301_v17  ;;  %433 = vrot.lane.b32.xlu1 %v395_v21, %s6151_s21  ;;  %327 = vrot.lane.b32.xlu0 %v289_v22, %s6152_s22  ;;  %v605_v37 = vsel %vm602_vm4, %v603_v32, %v604_v28  ;;  %v6378_v40 = vld [vmem:[%s6249_s11 + $0x78] sm:$0xff]  ;;  %v816_v41 = vrot.slane %v6255_v1, 6  ;;  %v818_v44 = vrot.slane %v6258_v2, 6  ;;  %v815_v45 = vrot.slane %v6252_v0, 6 }
  0x26   : > { %250 = vst.msk [vmem:[#allocation2 + $0x60] sm:$0xff] %vm243_vm0, %v6316_v20  ;;  %1033 = vst.msk [vmem:[#allocation2 + $0x78] sm:$0xff] %vm243_vm0, %v6313_v19  ;;  %v713_v42 = vsel %vm708_vm5, %v710_v33, %v712_v38  ;;  %v711_v43 = vsel %vm708_vm5, %v709_v39, %v710_v33  ;;  %v922_v46 = vrot.slane %v6255_v1, 7  ;;  %v924_v49 = vrot.slane %v6258_v2, 7  ;;  %v6428_v10 = vld [vmem:[%s6249_s11 + $0x98] sm:$0xff]  ;;  %v6431_v13 = vld [vmem:[%s6249_s11 + $0xa0] sm:$0xff] }
  0x27   : > { %252 = vst.msk [vmem:[#allocation2 + $0x80] sm:$0xff] %vm243_vm0, %v6337_v27  ;;  %253 = vst.msk [vmem:[#allocation2 + $0x90] sm:$0xff] %vm243_vm0, %v6331_v25  ;;  %v819_v47 = vsel %vm814_vm6, %v816_v41, %v818_v44  ;;  %v817_v48 = vsel %vm814_vm6, %v815_v45, %v816_v41  ;;  %v921_v50 = vrot.slane %v6252_v0, 7  ;;  %v291_v51 = vrot.slane %v6265_v7, 1  ;;  %v6444_v23 = vld [vmem:[%s6249_s11 + $0x90] sm:$0xff]  ;;  %v6446_v24 = vld [vmem:[#allocation2 + $0x8] sm:$0xff] }
  0x28   : > { %1034 = vst.msk [vmem:[#allocation2 + $0x88] sm:$0xff] %vm243_vm0, %v6331_v25  ;;  %1035 = vst.msk [vmem:[#allocation2 + $0x98] sm:$0xff] %vm243_vm0, %v6334_v26  ;;  %v925_v52 = vsel %vm920_vm7, %v922_v46, %v924_v49  ;;  %v293_v54 = vrot.slane %v6268_v8, 1  ;;  %v290_v55 = vrot.slane %v6281_v11, 1  ;;  %v397_v56 = vrot.slane %v6265_v7, 2  ;;  %v6448_v28 = vld [vmem:[#allocation2 + $0x18] sm:$0xff] }
  0x29   : > { %539 = vrot.lane.b32.xlu1 %v501_v29, %s6153_s24  ;;  %537 = vrot.lane.b32.xlu0 %v499_v30, %s6153_s24  ;;  %255 = vst.msk [vmem:[#allocation2 + $0xb0] sm:$0xff] %vm243_vm0, %v6362_v34  ;;  %1036 = vst.msk [vmem:[#allocation2 + $0xa8] sm:$0xff] %vm243_vm0, %v6362_v34  ;;  %v923_v53 = vsel %vm920_vm7, %v921_v50, %v922_v46  ;;  %v399_v59 = vrot.slane %v6268_v8, 2  ;;  %v396_v60 = vrot.slane %v6281_v11, 2  ;;  %v503_v61 = vrot.slane %v6265_v7, 3  ;;  %s10723_s30 = scalar_lea.vmem [#allocation4], %s5180_s10 }
  0x2a   : > { %1037 = vst.msk [vmem:[#allocation2 + $0xb8] sm:$0xff] %vm243_vm0, %v6365_v35  ;;  %254 = vst.msk [vmem:[#allocation2 + $0xa0] sm:$0xff] %vm243_vm0, %v6378_v40  ;;  %v294_v57 = vsel %vm284_vm2, %v291_v51, %v293_v54  ;;  %v292_v58 = vsel %vm284_vm2, %v290_v55, %v291_v51  ;;  %v505_v0 = vrot.slane %v6268_v8, 3  ;;  %v502_v1 = vrot.slane %v6281_v11, 3 }
  0x2b   : > { %v400_v62 = vsel %vm390_vm1, %v397_v56, %v399_v59  ;;  %v398_v63 = vsel %vm390_vm1, %v396_v60, %v397_v56  ;;  %v609_v2 = vrot.slane %v6265_v7, 4  ;;  %v611_v5 = vrot.slane %v6268_v8, 4  ;;  %257 = vst.msk [vmem:[#allocation2 + $0xd0] sm:$0xff] %vm243_vm0, %v6428_v10  ;;  %1038 = vst.msk [vmem:[#allocation2 + $0xc8] sm:$0xff] %vm243_vm0, %v6428_v10 }
  0x2c   : > { %v506_v3 = vsel %vm496_vm3, %v503_v61, %v505_v0  ;;  %v504_v4 = vsel %vm496_vm3, %v502_v1, %v503_v61  ;;  %v608_v6 = vrot.slane %v6281_v11, 4  ;;  %v715_v9 = vrot.slane %v6265_v7, 5  ;;  %1039 = vst.msk [vmem:[#allocation2 + $0xd8] sm:$0xff] %vm243_vm0, %v6431_v13  ;;  %256 = vst.msk [vmem:[#allocation2 + $0xc0] sm:$0xff] %vm243_vm0, %v6444_v23 }
  0x2d   : > { %645 = vrot.lane.b32.xlu1 %v607_v36, %s6154_s25  ;;  %643 = vrot.lane.b32.xlu0 %v605_v37, %s6154_s25  ;;  %v612_v14 = vsel %vm602_vm4, %v609_v2, %v611_v5  ;;  %v717_v21 = vrot.slane %v6268_v8, 5  ;;  %v714_v22 = vrot.slane %v6281_v11, 5  ;;  %1298 = vst.msk [vmem:[#allocation2 + $0x8] sm:$0xff] %vm243_vm0, %v6265_v7  ;;  %1299 = vst.msk [vmem:[#allocation2 + $0x18] sm:$0xff] %vm243_vm0, %v6268_v8  ;;  %v821_v29 = vrot.slane %v6265_v7, 6 }
  0x2e   : > { %v610_v18 = vsel %vm602_vm4, %v608_v6, %v609_v2  ;;  %v823_v32 = vrot.slane %v6268_v8, 6  ;;  %v820_v33 = vrot.slane %v6281_v11, 6  ;;  %v927_v36 = vrot.slane %v6265_v7, 7 }
  0x2f   : > { %v718_v30 = vsel %vm708_vm5, %v715_v9, %v717_v21  ;;  %v716_v31 = vsel %vm708_vm5, %v714_v22, %v715_v9  ;;  %v929_v39 = vrot.slane %v6268_v8, 7  ;;  %v926_v41 = vrot.slane %v6281_v11, 7  ;;  %v6532_v21 = vld [vmem:[%s6249_s11 + $0xa8] sm:$0xff] }
  0x30   : > { %v824_v37 = vsel %vm814_vm6, %v821_v29, %v823_v32  ;;  %v822_v38 = vsel %vm814_vm6, %v820_v33, %v821_v29  ;;  %v296_v44 = vrot.slane %v6284_v12, 1  ;;  %v298_v46 = vrot.slane %v6295_v15, 1  ;;  %258 = vst.msk [vmem:[#allocation2 + $0xe0] sm:$0xff] %vm243_vm0, %v6532_v21  ;;  %v6542_v22 = vld [vmem:[#allocation2 + $0x28] sm:$0xff]  ;;  %v6544_v29 = vld [vmem:[#allocation2 + $0x38] sm:$0xff] }
  0x31   : > { %751 = vrot.lane.b32.xlu1 %v713_v42, %s6155_s26  ;;  %749 = vrot.lane.b32.xlu0 %v711_v43, %s6155_s26  ;;  %v930_v45 = vsel %vm920_vm7, %v927_v36, %v929_v39  ;;  %v928_v8 = vsel %vm920_vm7, %v926_v41, %v927_v36  ;;  %v402_v50 = vrot.slane %v6284_v12, 2  ;;  %v401_v54 = vrot.slane %v6298_v16, 2  ;;  %1300 = vst.msk [vmem:[#allocation2 + $0x28] sm:$0xff] %vm243_vm0, %v6284_v12 }
  0x32   : > { %v299_v51 = vsel %vm284_vm2, %v296_v44, %v298_v46  ;;  %v510_v60 = vrot.slane %v6295_v15, 3  ;;  %v507_v61 = vrot.slane %v6298_v16, 3  ;;  %v616_v1 = vrot.slane %v6295_v15, 4  ;;  %1301 = vst.msk [vmem:[#allocation2 + $0x38] sm:$0xff] %vm243_vm0, %v6295_v15 }
  0x33   : > { %v403_v59 = vsel %vm390_vm1, %v401_v54, %v402_v50  ;;  %v613_v2 = vrot.slane %v6298_v16, 4  ;;  %v722_v6 = vrot.slane %v6295_v15, 5  ;;  %v719_v9 = vrot.slane %v6298_v16, 5 }
  0x34   : > { %v1315_v42 = vld [vmem:[#allocation2 + $0x8] sm:$0xff]  ;;  %v1317_v43 = vld [vmem:[#allocation2 + $0x18] sm:$0xff]  ;;  %v828_v33 = vrot.slane %v6295_v15, 6  ;;  %v825_v36 = vrot.slane %v6298_v16, 6  ;;  %v934_v41 = vrot.slane %v6295_v15, 7  ;;  %v406_v54 = vrot.slane %v6316_v20, 2 }
  0x35   : > { %857 = vrot.lane.b32.xlu1 %v819_v47, %s6156_s28  ;;  %855 = vrot.lane.b32.xlu0 %v817_v48, %s6156_s28  ;;  %1925 = vst.msk [vmem:[#allocation2 + $0x8] sm:$0xff] %vm243_vm0, %v6284_v12  ;;  %1926 = vst.msk [vmem:[#allocation2 + $0x18] sm:$0xff] %vm243_vm0, %v6295_v15  ;;  %v295_v47 = vrot.slane %v6298_v16, 1  ;;  %v5538_v49 = vpack.c.bf16 %v1317_v43, %v1315_v42  ;;  %v931_v42 = vrot.slane %v6298_v16, 7  ;;  %v5495_v48 = vld [vmem:[%s10796_s1 + $0x428] sm:$0xff] }
  0x37   : > { %5540 = vmatprep.subr.msk.bf16.mxu1 %vm6483_vm8, %v5538_v49  ;;  %v300_v49 = vrot.slane %v6316_v20, 1 }
  0x38   : > { %v6564_v43 = vld [vmem:[#allocation2 + $0x28] sm:$0xff] }
  0x39   : > { %963 = vrot.lane.b32.xlu1 %v925_v52, %s6157_s29  ;;  %961 = vrot.lane.b32.xlu0 %v923_v53, %s6157_s29  ;;  %v297_v52 = vsel %vm284_vm2, %v295_v47, %v296_v44  ;;  %v404_v53 = vrot.slane %v6295_v15, 2  ;;  %v6566_v44 = vld [vmem:[#allocation2 + $0x38] sm:$0xff]  ;;  %1927 = vst.msk [vmem:[#allocation2 + $0x28] sm:$0xff] %vm243_vm0, %v6301_v17  ;;  %v301_v15 = vrot.slane %v6301_v17, 1  ;;  %v303_v47 = vrot.slane %v6313_v19, 1 }
  0x3a   : > { %1928 = vst.msk [vmem:[#allocation2 + $0x38] sm:$0xff] %vm243_vm0, %v6313_v19 }
  0x3c   : > { %v6496_v55 = vld [vmem:[#allocation2 + $0x8] sm:$0xff]  ;;  %v6498_v56 = vld [vmem:[#allocation2 + $0x18] sm:$0xff] }
  0x3d   : > { %331 = vrot.lane.b32.xlu1 %v294_v57, %s6152_s22  ;;  %329 = vrot.lane.b32.xlu0 %v292_v58, %s6152_s22  ;;  %10877 = vst [vmem:[#allocation5_spill] sm:$0xff] %v6496_v55  ;;  %10878 = vst [vmem:[#allocation6_spill] sm:$0xff] %v6498_v56  ;;  %v508_v57 = vrot.slane %v6284_v12, 3  ;;  %v405_v58 = vsel %vm390_vm1, %v402_v50, %v404_v53  ;;  %v407_v50 = vrot.slane %v6301_v17, 2  ;;  %v409_v53 = vrot.slane %v6313_v19, 2 }
  0x3e   : > { %2383 = vst.msk [vmem:[#allocation2 + $0x8] sm:$0xff] %vm243_vm0, %v6301_v17  ;;  %2384 = vst.msk [vmem:[#allocation2 + $0x18] sm:$0xff] %vm243_vm0, %v6313_v19 }
  0x3f   : > { %v509_v0 = vsel %vm496_vm3, %v507_v61, %v508_v57  ;;  %v408_v61 = vsel %vm390_vm1, %v406_v54, %v407_v50  ;;  %v308_v54 = vrot.slane %v6334_v26, 1 }
  0x41   : > { %437 = vrot.lane.b32.xlu1 %v400_v62, %s6151_s21  ;;  %435 = vrot.lane.b32.xlu0 %v398_v63, %s6151_s21  ;;  %v614_v62 = vrot.slane %v6284_v12, 4  ;;  %v511_v63 = vsel %vm496_vm3, %v508_v57, %v510_v60  ;;  %v6588_v57 = vld [vmem:[#allocation2 + $0x28] sm:$0xff]  ;;  %v410_v60 = vsel %vm390_vm1, %v407_v50, %v409_v53 }
  0x42   : > { %10879 = vst [vmem:[#allocation7_spill] sm:$0xff] %v6588_v57  ;;  %2385 = vst.msk [vmem:[#allocation2 + $0x28] sm:$0xff] %vm243_vm0, %v6331_v25 }
  0x43   : > { %v615_v5 = vsel %vm602_vm4, %v613_v2, %v614_v62 }
  0x45   : > { %543 = vrot.lane.b32.xlu1 %v506_v3, %s6153_s24  ;;  %541 = vrot.lane.b32.xlu0 %v504_v4, %s6153_s24  ;;  %v720_v3 = vrot.slane %v6284_v12, 5  ;;  %v617_v4 = vsel %vm602_vm4, %v614_v62, %v616_v1  ;;  %v515_v62 = vrot.slane %v6313_v19, 3 }
  0x47   : > { %v721_v32 = vsel %vm708_vm5, %v719_v9, %v720_v3 }
  0x49   : > { %649 = vrot.lane.b32.xlu1 %v612_v14, %s6154_s25  ;;  %647 = vrot.lane.b32.xlu0 %v610_v18, %s6154_s25  ;;  %v6526_v14 = vld [vmem:[%s6249_s11 + $0xb0] sm:$0xff]  ;;  %v6529_v18 = vld [vmem:[%s6249_s11 + $0xb8] sm:$0xff] }
  0x4a   : > { %259 = vst.msk [vmem:[#allocation2 + $0xf0] sm:$0xff] %vm243_vm0, %v6526_v14  ;;  %1040 = vst.msk [vmem:[#allocation2 + $0xe8] sm:$0xff] %vm243_vm0, %v6526_v14 }
  0x4b   : > { %1041 = vst.msk [vmem:[#allocation2 + $0xf8] sm:$0xff] %vm243_vm0, %v6529_v18 }
  0x4d   : > { %755 = vrot.lane.b32.xlu1 %v718_v30, %s6155_s26  ;;  %753 = vrot.lane.b32.xlu0 %v716_v31, %s6155_s26  ;;  %v826_v30 = vrot.slane %v6284_v12, 6  ;;  %v723_v31 = vsel %vm708_vm5, %v720_v3, %v722_v6  ;;  %v621_v3 = vrot.slane %v6313_v19, 4 }
  0x4f   : > { %v827_v39 = vsel %vm814_vm6, %v825_v36, %v826_v30  ;;  %v831_v36 = vrot.slane %v6301_v17, 6 }
  0x51   : > { %861 = vrot.lane.b32.xlu1 %v824_v37, %s6156_s28  ;;  %859 = vrot.lane.b32.xlu0 %v822_v38, %s6156_s28  ;;  %v932_v37 = vrot.slane %v6284_v12, 7  ;;  %v829_v38 = vsel %vm814_vm6, %v826_v30, %v828_v33  ;;  %v727_v30 = vrot.slane %v6313_v19, 5  ;;  %v6619_v33 = vld [vmem:[#allocation2 + $0x58] sm:$0xff] }
  0x52   : > { %1303 = vst.msk [vmem:[#allocation2 + $0x58] sm:$0xff] %vm243_vm0, %v6313_v19 }
  0x53   : > { %v933_v46 = vsel %vm920_vm7, %v931_v42, %v932_v37  ;;  %v937_v42 = vrot.slane %v6301_v17, 7 }
  0x55   : > { %967 = vrot.lane.b32.xlu1 %v930_v45, %s6157_s29  ;;  %965 = vrot.lane.b32.xlu0 %v928_v8, %s6157_s29  ;;  %v935_v8 = vsel %vm920_vm7, %v932_v37, %v934_v41  ;;  %v830_v41 = vrot.slane %v6316_v20, 6 }
  0x59   : > { %335 = vrot.lane.b32.xlu1 %v299_v51, %s6152_s22  ;;  %333 = vrot.lane.b32.xlu0 %v297_v52, %s6152_s22  ;;  %v304_v51 = vsel %vm284_vm2, %v301_v15, %v303_v47  ;;  %v302_v52 = vsel %vm284_vm2, %v300_v49, %v301_v15  ;;  %v936_v47 = vrot.slane %v6316_v20, 7  ;;  %v6641_v50 = vld [vmem:[#allocation2 + $0x58] sm:$0xff] }
  0x5a   : > { %1930 = vst.msk [vmem:[#allocation2 + $0x58] sm:$0xff] %vm243_vm0, %v6334_v26 }
  0x5b   : > { %v938_v53 = vsel %vm920_vm7, %v936_v47, %v937_v42 }
  0x5d   : > { %441 = vrot.lane.b32.xlu1 %v405_v58, %s6151_s21  ;;  %439 = vrot.lane.b32.xlu0 %v403_v59, %s6151_s21  ;;  %v6590_v58 = vld [vmem:[#allocation2 + $0x38] sm:$0xff]  ;;  %v513_v59 = vrot.slane %v6301_v17, 3 }
  0x5e   : > { %10880 = vst [vmem:[#allocation8_spill] sm:$0xff] %v6590_v58  ;;  %2386 = vst.msk [vmem:[#allocation2 + $0x38] sm:$0xff] %vm243_vm0, %v6334_v26  ;;  %v7178_v58 = vld [vmem:[%s6249_s11 + $0xc0] sm:$0xff] }
  0x5f   : > { %v516_v1 = vsel %vm496_vm3, %v513_v59, %v515_v62  ;;  %v1163_v57 = vrot.slane %v7178_v58, 3 }
  0x61   : > { %547 = vrot.lane.b32.xlu1 %v511_v63, %s6153_s24  ;;  %545 = vrot.lane.b32.xlu0 %v509_v0, %s6153_s24  ;;  %v512_v63 = vrot.slane %v6316_v20, 3  ;;  %v619_v0 = vrot.slane %v6301_v17, 4 }
  0x63   : > { %v514_v2 = vsel %vm496_vm3, %v512_v63, %v513_v59  ;;  %v622_v6 = vsel %vm602_vm4, %v619_v0, %v621_v3  ;;  %v305_v59 = vrot.slane %v6337_v27, 1  ;;  %v414_v63 = vrot.slane %v6334_v26, 2 }
  0x64   : > { %v518_v3 = vrot.slane %v6331_v25, 3 }
  0x65   : > { %653 = vrot.lane.b32.xlu1 %v617_v4, %s6154_s25  ;;  %651 = vrot.lane.b32.xlu0 %v615_v5, %s6154_s25  ;;  %v618_v4 = vrot.slane %v6316_v20, 4  ;;  %v725_v5 = vrot.slane %v6301_v17, 5 }
  0x67   : > { %v620_v9 = vsel %vm602_vm4, %v618_v4, %v619_v0  ;;  %v728_v37 = vsel %vm708_vm5, %v725_v5, %v727_v30  ;;  %v411_v0 = vrot.slane %v6337_v27, 2 }
  0x69   : > { %759 = vrot.lane.b32.xlu1 %v723_v31, %s6155_s26  ;;  %757 = vrot.lane.b32.xlu0 %v721_v32, %s6155_s26  ;;  %v724_v31 = vrot.slane %v6316_v20, 5  ;;  %v6617_v32 = vld [vmem:[#allocation2 + $0x48] sm:$0xff] }
  0x6a   : > { %1302 = vst.msk [vmem:[#allocation2 + $0x48] sm:$0xff] %vm243_vm0, %v6301_v17 }
  0x6d   : > { %865 = vrot.lane.b32.xlu1 %v829_v38, %s6156_s28  ;;  %863 = vrot.lane.b32.xlu0 %v827_v39, %s6156_s28  ;;  %v726_v38 = vsel %vm708_vm5, %v724_v31, %v725_v5  ;;  %v833_v39 = vrot.slane %v6313_v19, 6 }
  0x6f   : > { %v834_v15 = vsel %vm814_vm6, %v831_v36, %v833_v39  ;;  %v626_v39 = vrot.slane %v6334_v26, 4 }
  0x71   : > { %971 = vrot.lane.b32.xlu1 %v935_v8, %s6157_s29  ;;  %969 = vrot.lane.b32.xlu0 %v933_v46, %s6157_s29  ;;  %v832_v8 = vsel %vm814_vm6, %v830_v41, %v831_v36  ;;  %v939_v46 = vrot.slane %v6313_v19, 7  ;;  %v6639_v49 = vld [vmem:[#allocation2 + $0x48] sm:$0xff]  ;;  %v306_v19 = vrot.slane %v6331_v25, 1  ;;  %v624_v36 = vrot.slane %v6331_v25, 4 }
  0x72   : > { %1929 = vst.msk [vmem:[#allocation2 + $0x48] sm:$0xff] %vm243_vm0, %v6331_v25  ;;  %v623_v41 = vrot.slane %v6337_v27, 4 }
  0x73   : > { %v307_v62 = vsel %vm284_vm2, %v305_v59, %v306_v19  ;;  %v627_v47 = vsel %vm602_vm4, %v624_v36, %v626_v39  ;;  %v6698_v59 = vld [vmem:[#allocation2 + $0x8] sm:$0xff] }
  0x74   : > { %10883 = vst [vmem:[#allocation11_spill] sm:$0xff] %v6698_v59  ;;  %2841 = vst.msk [vmem:[#allocation2 + $0x8] sm:$0xff] %vm243_vm0, %v6331_v25 }
  0x75   : > { %339 = vrot.lane.b32.xlu1 %v304_v51, %s6152_s22  ;;  %337 = vrot.lane.b32.xlu0 %v302_v52, %s6152_s22  ;;  %v940_v52 = vsel %vm920_vm7, %v937_v42, %v939_v46  ;;  %v732_v46 = vrot.slane %v6334_v26, 5  ;;  %v633_v51 = vrot.slane %v6444_v23, 4 }
  0x79   : > { %445 = vrot.lane.b32.xlu1 %v410_v60, %s6151_s21  ;;  %443 = vrot.lane.b32.xlu0 %v408_v61, %s6151_s21  ;;  %v412_v60 = vrot.slane %v6331_v25, 2  ;;  %v309_v61 = vsel %vm284_vm2, %v306_v19, %v308_v54  ;;  %v625_v19 = vsel %vm602_vm4, %v623_v41, %v624_v36 }
  0x7b   : > { %v415_v4 = vsel %vm390_vm1, %v412_v60, %v414_v63  ;;  %v413_v5 = vsel %vm390_vm1, %v411_v0, %v412_v60  ;;  %v6700_v60 = vld [vmem:[#allocation2 + $0x18] sm:$0xff] }
  0x7c   : > { %10884 = vst [vmem:[#allocation12_spill] sm:$0xff] %v6700_v60  ;;  %2842 = vst.msk [vmem:[#allocation2 + $0x18] sm:$0xff] %vm243_vm0, %v6334_v26  ;;  %v6711_v63 = vld [vmem:[#allocation2 + $0x78] sm:$0xff] }
  0x7d   : > { %551 = vrot.lane.b32.xlu1 %v516_v1, %s6153_s24  ;;  %549 = vrot.lane.b32.xlu0 %v514_v2, %s6153_s24  ;;  %v6663_v1 = vld [vmem:[#allocation2 + $0x48] sm:$0xff]  ;;  %v6665_v2 = vld [vmem:[#allocation2 + $0x58] sm:$0xff]  ;;  %10886 = vst [vmem:[#allocation14_spill] sm:$0xff] %v6711_v63  ;;  %1305 = vst.msk [vmem:[#allocation2 + $0x78] sm:$0xff] %vm243_vm0, %v6334_v26 }
  0x7e   : > { %10881 = vst [vmem:[#allocation9_spill] sm:$0xff] %v6663_v1  ;;  %10882 = vst [vmem:[#allocation10_spill] sm:$0xff] %v6665_v2 }
  0x7f   : > { %2387 = vst.msk [vmem:[#allocation2 + $0x48] sm:$0xff] %vm243_vm0, %v6362_v34  ;;  %2388 = vst.msk [vmem:[#allocation2 + $0x58] sm:$0xff] %vm243_vm0, %v6365_v35 }
  0x81   : > { %657 = vrot.lane.b32.xlu1 %v622_v6, %s6154_s25  ;;  %655 = vrot.lane.b32.xlu0 %v620_v9, %s6154_s25  ;;  %v520_v6 = vrot.slane %v6334_v26, 3  ;;  %v517_v9 = vrot.slane %v6337_v27, 3 }
  0x85   : > { %763 = vrot.lane.b32.xlu1 %v728_v37, %s6155_s26  ;;  %761 = vrot.lane.b32.xlu0 %v726_v38, %s6155_s26  ;;  %v521_v37 = vsel %vm496_vm3, %v518_v3, %v520_v6  ;;  %v519_v38 = vsel %vm496_vm3, %v517_v9, %v518_v3  ;;  %v836_v3 = vrot.slane %v6331_v25, 6 }
  0x89   : > { %869 = vrot.lane.b32.xlu1 %v834_v15, %s6156_s28  ;;  %867 = vrot.lane.b32.xlu0 %v832_v8, %s6156_s28  ;;  %v730_v8 = vrot.slane %v6331_v25, 5 }
  0x8d   : > { %975 = vrot.lane.b32.xlu1 %v940_v52, %s6157_s29  ;;  %973 = vrot.lane.b32.xlu0 %v938_v53, %s6157_s29  ;;  %v729_v52 = vrot.slane %v6337_v27, 5 }
  0x8f   : > { %v731_v0 = vsel %vm708_vm5, %v729_v52, %v730_v8 }
  0x91   : > { %343 = vrot.lane.b32.xlu1 %v309_v61, %s6152_s22  ;;  %341 = vrot.lane.b32.xlu0 %v307_v62, %s6152_s22  ;;  %v6702_v61 = vld [vmem:[#allocation2 + $0x68] sm:$0xff]  ;;  %v733_v62 = vsel %vm708_vm5, %v730_v8, %v732_v46  ;;  %v311_v46 = vrot.slane %v6362_v34, 1 }
  0x92   : > { %10885 = vst [vmem:[#allocation13_spill] sm:$0xff] %v6702_v61  ;;  %1304 = vst.msk [vmem:[#allocation2 + $0x68] sm:$0xff] %vm243_vm0, %v6331_v25 }
  0x93   : > { %v432_v30 = vpop.permute.xlu1 %431  ;;  %v326_v31 = vpop.permute.xlu0 %325 }
  0x94   : > { %374 = vst.msk [vmem:[#allocation2] sm:$0xff] %vm373_vm9, %v326_v31  ;;  %v944_v31 = vrot.slane %v6334_v26, 7 }
  0x95   : > { %449 = vrot.lane.b32.xlu1 %v415_v4, %s6151_s21  ;;  %447 = vrot.lane.b32.xlu0 %v413_v5, %s6151_s21  ;;  %480 = vst.msk [vmem:[#allocation2] sm:$0xff] %vm479_vm10, %v432_v30  ;;  %v838_v4 = vrot.slane %v6334_v26, 6  ;;  %v835_v5 = vrot.slane %v6337_v27, 6  ;;  %v942_v30 = vrot.slane %v6331_v25, 7 }
  0x97   : > { %v434_v42 = vpop.permute.xlu1 %433  ;;  %v328_v15 = vpop.permute.xlu0 %327  ;;  %v839_v36 = vsel %vm814_vm6, %v836_v3, %v838_v4  ;;  %v945_v26 = vsel %vm920_vm7, %v942_v30, %v944_v31  ;;  %v417_v4 = vrot.slane %v6362_v34, 2 }
  0x98   : > { %375 = vst.msk [vmem:[#allocation2 + $0x10] sm:$0xff] %vm373_vm9, %v328_v15  ;;  %v2860_v15 = vld [vmem:[#allocation2 + $0x18] sm:$0xff] }
  0x99   : > { %555 = vrot.lane.b32.xlu1 %v521_v37, %s6153_s24  ;;  %553 = vrot.lane.b32.xlu0 %v519_v38, %s6153_s24  ;;  %481 = vst.msk [vmem:[#allocation2 + $0x10] sm:$0xff] %vm479_vm10, %v434_v42  ;;  %v837_v37 = vsel %vm814_vm6, %v835_v5, %v836_v3  ;;  %v941_v38 = vrot.slane %v6337_v27, 7  ;;  %v2858_v42 = vld [vmem:[#allocation2 + $0x8] sm:$0xff] }
  0x9a   : > { %v6732_v8 = vld [vmem:[#allocation2 + $0x68] sm:$0xff]  ;;  %3299 = vst.msk [vmem:[#allocation2 + $0x8] sm:$0xff] %vm243_vm0, %v6362_v34  ;;  %3300 = vst.msk [vmem:[#allocation2 + $0x18] sm:$0xff] %vm243_vm0, %v6365_v35 }
  0x9b   : > { %v540_v53 = vpop.permute.xlu1 %539  ;;  %v538_v54 = vpop.permute.xlu0 %537  ;;  %1931 = vst.msk [vmem:[#allocation2 + $0x68] sm:$0xff] %vm243_vm0, %v6362_v34  ;;  %v943_v52 = vsel %vm920_vm7, %v941_v38, %v942_v30  ;;  %v416_v30 = vrot.slane %v6378_v40, 2  ;;  %v523_v38 = vrot.slane %v6362_v34, 3 }
  0x9c   : > { %587 = vst.msk [vmem:[#allocation2 + $0x10] sm:$0xff] %vm585_vm11, %v540_v53  ;;  %586 = vst.msk [vmem:[#allocation2] sm:$0xff] %vm585_vm11, %v538_v54  ;;  %v313_v53 = vrot.slane %v6365_v35, 1  ;;  %v310_v54 = vrot.slane %v6378_v40, 1 }
  0x9d   : > { %661 = vrot.lane.b32.xlu1 %v627_v47, %s6154_s25  ;;  %659 = vrot.lane.b32.xlu0 %v625_v19, %s6154_s25  ;;  %v5698_v47 = vpack.c.bf16 %v2860_v15, %v2858_v42  ;;  %v6742_v19 = vld [vmem:[#allocation2 + $0x78] sm:$0xff]  ;;  %v418_v42 = vsel %vm390_vm1, %v416_v30, %v417_v4  ;;  %v525_v15 = vrot.slane %v6365_v35, 3 }
  0x9e   : > { %1932 = vst.msk [vmem:[#allocation2 + $0x78] sm:$0xff] %vm243_vm0, %v6365_v35  ;;  %v314_v5 = vsel %vm284_vm2, %v311_v46, %v313_v53 }
  0x9f   : > { %v646_v6 = vpop.permute.xlu1 %645  ;;  %v644_v9 = vpop.permute.xlu0 %643  ;;  %5700 = vmatprep.subr.msk.bf16.mxu0 %vm6483_vm8, %v5698_v47  ;;  %v526_v53 = vsel %vm496_vm3, %v523_v38, %v525_v15  ;;  %v841_v15 = vrot.slane %v6362_v34, 6 }
  0xa0   : > { %693 = vst.msk [vmem:[#allocation2 + $0x10] sm:$0xff] %vm691_vm12, %v646_v6  ;;  %692 = vst.msk [vmem:[#allocation2] sm:$0xff] %vm691_vm12, %v644_v9  ;;  %v312_v6 = vsel %vm284_vm2, %v310_v54, %v311_v46  ;;  %v419_v9 = vrot.slane %v6365_v35, 2 }
  0xa1   : > { %767 = vrot.lane.b32.xlu1 %v733_v62, %s6155_s26  ;;  %765 = vrot.lane.b32.xlu0 %v731_v0, %s6155_s26 }
  0xa3   : > { %v752_v39 = vpop.permute.xlu1 %751  ;;  %v750_v41 = vpop.permute.xlu0 %749 }
  0xa4   : > { %799 = vst.msk [vmem:[#allocation2 + $0x10] sm:$0xff] %vm797_vm13, %v752_v39  ;;  %798 = vst.msk [vmem:[#allocation2] sm:$0xff] %vm797_vm13, %v750_v41  ;;  %v420_v41 = vsel %vm390_vm1, %v417_v4, %v419_v9 }
  0xa5   : > { %873 = vrot.lane.b32.xlu1 %v839_v36, %s6156_s28  ;;  %871 = vrot.lane.b32.xlu0 %v837_v37, %s6156_s28  ;;  %v6766_v37 = vld [vmem:[#allocation2 + $0x68] sm:$0xff]  ;;  %v6771_v39 = vld [vmem:[#allocation2 + $0x78] sm:$0xff] }
  0xa6   : > { %10887 = vst [vmem:[#allocation15_spill] sm:$0xff] %v6766_v37  ;;  %10888 = vst [vmem:[#allocation16_spill] sm:$0xff] %v6771_v39 }
  0xa7   : > { %v858_v0 = vpop.permute.xlu1 %857  ;;  %v856_v3 = vpop.permute.xlu0 %855  ;;  %2389 = vst.msk [vmem:[#allocation2 + $0x68] sm:$0xff] %vm243_vm0, %v6428_v10  ;;  %2390 = vst.msk [vmem:[#allocation2 + $0x78] sm:$0xff] %vm243_vm0, %v6431_v13 }
  0xa8   : > { %905 = vst.msk [vmem:[#allocation2 + $0x10] sm:$0xff] %vm903_vm14, %v858_v0  ;;  %904 = vst.msk [vmem:[#allocation2] sm:$0xff] %vm903_vm14, %v856_v3  ;;  %v631_v0 = vrot.slane %v6365_v35, 4  ;;  %v628_v3 = vrot.slane %v6378_v40, 4 }
  0xa9   : > { %979 = vrot.lane.b32.xlu1 %v945_v26, %s6157_s29  ;;  %977 = vrot.lane.b32.xlu0 %v943_v52, %s6157_s29  ;;  %v522_v26 = vrot.slane %v6378_v40, 3  ;;  %v629_v52 = vrot.slane %v6362_v34, 4 }
  0xab   : > { %v964_v31 = vpop.permute.xlu1 %963  ;;  %v962_v36 = vpop.permute.xlu0 %961  ;;  %v524_v54 = vsel %vm496_vm3, %v522_v26, %v523_v38  ;;  %v734_v38 = vrot.slane %v6378_v40, 5  ;;  %v6820_v26 = vld [vmem:[#allocation2 + $0x88] sm:$0xff] }
  0xac   : > { %1011 = vst.msk [vmem:[#allocation2 + $0x10] sm:$0xff] %vm1009_vm15, %v964_v31  ;;  %1010 = vst.msk [vmem:[#allocation2] sm:$0xff] %vm1009_vm15, %v962_v36  ;;  %v630_v31 = vsel %vm602_vm4, %v628_v3, %v629_v52  ;;  %v737_v36 = vrot.slane %v6365_v35, 5  ;;  %v6834_v3 = vld [vmem:[#allocation2 + $0x38] sm:$0xff] }
  0xad   : > { %347 = vrot.lane.b32.xlu1 %v314_v5, %s6152_s22  ;;  %345 = vrot.lane.b32.xlu0 %v312_v6, %s6152_s22  ;;  %10889 = vst [vmem:[#allocation17_spill] sm:$0xff] %v6820_v26  ;;  %1306 = vst.msk [vmem:[#allocation2 + $0x88] sm:$0xff] %vm243_vm0, %v6362_v34 }
  0xae   : > { %10892 = vst [vmem:[#allocation20_spill] sm:$0xff] %v6834_v3  ;;  %2844 = vst.msk [vmem:[#allocation2 + $0x38] sm:$0xff] %vm243_vm0, %v6365_v35 }
  0xaf   : > { %v332_v46 = vpop.permute.xlu1 %331  ;;  %v330_v47 = vpop.permute.xlu0 %329 }
  0xb0   : > { %377 = vst.msk [vmem:[#allocation2 + $0x30] sm:$0xff] %vm373_vm9, %v332_v46  ;;  %376 = vst.msk [vmem:[#allocation2 + $0x20] sm:$0xff] %vm373_vm9, %v330_v47 }
  0xb1   : > { %453 = vrot.lane.b32.xlu1 %v420_v41, %s6151_s21  ;;  %451 = vrot.lane.b32.xlu0 %v418_v42, %s6151_s21 }
  0xb3   : > { %v6790_v4 = vld [vmem:[#allocation2 + $0x10] sm:$0xff]  ;;  %v6792_v5 = vld [vmem:[#allocation2] sm:$0xff]  ;;  %v438_v6 = vpop.permute.xlu1 %437  ;;  %v436_v9 = vpop.permute.xlu0 %435 }
  0xb4   : > { %1091 = vst.msk [vmem:[#allocation2 + $0x10] sm:$0xff] %vm243_vm0, %v6265_v7  ;;  %1090 = vst.msk [vmem:[#allocation2] sm:$0xff] %vm243_vm0, %v6281_v11  ;;  %v735_v7 = vrot.slane %v6362_v34, 5  ;;  %v632_v11 = vsel %vm602_vm4, %v629_v52, %v631_v0  ;;  %v840_v0 = vrot.slane %v6378_v40, 6 }
  0xb5   : > { %483 = vst.msk [vmem:[#allocation2 + $0x30] sm:$0xff] %vm479_vm10, %v438_v6  ;;  %482 = vst.msk [vmem:[#allocation2 + $0x20] sm:$0xff] %vm479_vm10, %v436_v9  ;;  %559 = vrot.lane.b32.xlu1 %v526_v53, %s6153_s24  ;;  %557 = vrot.lane.b32.xlu0 %v524_v54, %s6153_s24  ;;  %v843_v54 = vrot.slane %v6365_v35, 6 }
  0xb6   : > { %1121 = vst.msk [vmem:[#allocation2 + $0x10] sm:$0xff] %vm373_vm9, %v332_v46  ;;  %1120 = vst.msk [vmem:[#allocation2] sm:$0xff] %vm373_vm9, %v330_v47  ;;  %v6822_v46 = vld [vmem:[#allocation2 + $0x98] sm:$0xff]  ;;  %v6824_v47 = vld [vmem:[#allocation2 + $0x28] sm:$0xff]  ;;  %v738_v52 = vsel %vm708_vm5, %v735_v7, %v737_v36  ;;  %v736_v53 = vsel %vm708_vm5, %v734_v38, %v735_v7  ;;  %v947_v7 = vrot.slane %v6362_v34, 7  ;;  %v842_v36 = vsel %vm814_vm6, %v840_v0, %v841_v15 }
  0xb7   : > { %1148 = vst.msk [vmem:[#allocation2 + $0x10] sm:$0xff] %vm479_vm10, %v438_v6  ;;  %1147 = vst.msk [vmem:[#allocation2] sm:$0xff] %vm479_vm10, %v436_v9  ;;  %v544_v41 = vpop.permute.xlu1 %543  ;;  %v542_v42 = vpop.permute.xlu0 %541  ;;  %v946_v38 = vrot.slane %v6378_v40, 7 }
  0xb8   : > { %589 = vst.msk [vmem:[#allocation2 + $0x30] sm:$0xff] %vm585_vm11, %v544_v41  ;;  %1175 = vst.msk [vmem:[#allocation2 + $0x10] sm:$0xff] %vm585_vm11, %v544_v41 }
  0xb9   : > { %588 = vst.msk [vmem:[#allocation2 + $0x20] sm:$0xff] %vm585_vm11, %v542_v42  ;;  %1174 = vst.msk [vmem:[#allocation2] sm:$0xff] %vm585_vm11, %v542_v42  ;;  %665 = vrot.lane.b32.xlu1 %v632_v11, %s6154_s25  ;;  %663 = vrot.lane.b32.xlu0 %v630_v31, %s6154_s25  ;;  %v949_v11 = vrot.slane %v6365_v35, 7  ;;  %v844_v31 = vsel %vm814_vm6, %v841_v15, %v843_v54  ;;  %v316_v15 = vrot.slane %v6428_v10, 1 }
  0xba   : > { %10890 = vst [vmem:[#allocation18_spill] sm:$0xff] %v6822_v46  ;;  %10891 = vst [vmem:[#allocation19_spill] sm:$0xff] %v6824_v47  ;;  %v948_v0 = vsel %vm920_vm7, %v946_v38, %v947_v7  ;;  %v424_v38 = vrot.slane %v6431_v13, 2 }
  0xbb   : > { %1307 = vst.msk [vmem:[#allocation2 + $0x98] sm:$0xff] %vm243_vm0, %v6365_v35  ;;  %2843 = vst.msk [vmem:[#allocation2 + $0x28] sm:$0xff] %vm243_vm0, %v6362_v34  ;;  %v650_v6 = vpop.permute.xlu1 %649  ;;  %v648_v9 = vpop.permute.xlu0 %647  ;;  %v950_v35 = vsel %vm920_vm7, %v947_v7, %v949_v11  ;;  %v6874_v11 = vld [vmem:[#allocation2 + $0x38] sm:$0xff] }
  0xbc   : > { %695 = vst.msk [vmem:[#allocation2 + $0x30] sm:$0xff] %vm691_vm12, %v650_v6  ;;  %1202 = vst.msk [vmem:[#allocation2 + $0x10] sm:$0xff] %vm691_vm12, %v650_v6  ;;  %v318_v6 = vrot.slane %v6431_v13, 1 }
  0xbd   : > { %694 = vst.msk [vmem:[#allocation2 + $0x20] sm:$0xff] %vm691_vm12, %v648_v9  ;;  %1201 = vst.msk [vmem:[#allocation2] sm:$0xff] %vm691_vm12, %v648_v9  ;;  %771 = vrot.lane.b32.xlu1 %v738_v52, %s6155_s26  ;;  %769 = vrot.lane.b32.xlu0 %v736_v53, %s6155_s26  ;;  %v6859_v52 = vld [vmem:[#allocation2 + $0x88] sm:$0xff]  ;;  %v315_v9 = vrot.slane %v6444_v23, 1 }
  0xbe   : > { %1933 = vst.msk [vmem:[#allocation2 + $0x88] sm:$0xff] %vm243_vm0, %v6428_v10  ;;  %3302 = vst.msk [vmem:[#allocation2 + $0x38] sm:$0xff] %vm243_vm0, %v6431_v13 }
  0xbf   : > { %v756_v41 = vpop.permute.xlu1 %755  ;;  %v754_v42 = vpop.permute.xlu0 %753  ;;  %v317_v30 = vsel %vm284_vm2, %v315_v9, %v316_v15 }
  0xc0   : > { %801 = vst.msk [vmem:[#allocation2 + $0x30] sm:$0xff] %vm797_vm13, %v756_v41  ;;  %1229 = vst.msk [vmem:[#allocation2 + $0x10] sm:$0xff] %vm797_vm13, %v756_v41  ;;  %v422_v41 = vrot.slane %v6428_v10, 2 }
  0xc1   : > { %800 = vst.msk [vmem:[#allocation2 + $0x20] sm:$0xff] %vm797_vm13, %v754_v42  ;;  %1228 = vst.msk [vmem:[#allocation2] sm:$0xff] %vm797_vm13, %v754_v42  ;;  %877 = vrot.lane.b32.xlu1 %v844_v31, %s6156_s28  ;;  %875 = vrot.lane.b32.xlu0 %v842_v36, %s6156_s28  ;;  %v319_v42 = vsel %vm284_vm2, %v316_v15, %v318_v6  ;;  %v421_v31 = vrot.slane %v6444_v23, 2 }
  0xc2   : > { %v6861_v53 = vld [vmem:[#allocation2 + $0x98] sm:$0xff]  ;;  %v6863_v54 = vld [vmem:[#allocation2 + $0x28] sm:$0xff]  ;;  %v425_v6 = vsel %vm390_vm1, %v422_v41, %v424_v38 }
  0xc3   : > { %1934 = vst.msk [vmem:[#allocation2 + $0x98] sm:$0xff] %vm243_vm0, %v6431_v13  ;;  %3301 = vst.msk [vmem:[#allocation2 + $0x28] sm:$0xff] %vm243_vm0, %v6428_v10  ;;  %v862_v36 = vpop.permute.xlu1 %861  ;;  %v860_v7 = vpop.permute.xlu0 %859  ;;  %v423_v9 = vsel %vm390_vm1, %v421_v31, %v422_v41  ;;  %v634_v31 = vrot.slane %v6428_v10, 4 }
  0xc4   : > { %907 = vst.msk [vmem:[#allocation2 + $0x30] sm:$0xff] %vm903_vm14, %v862_v36  ;;  %1256 = vst.msk [vmem:[#allocation2 + $0x10] sm:$0xff] %vm903_vm14, %v862_v36 }
  0xc5   : > { %906 = vst.msk [vmem:[#allocation2 + $0x20] sm:$0xff] %vm903_vm14, %v860_v7  ;;  %1255 = vst.msk [vmem:[#allocation2] sm:$0xff] %vm903_vm14, %v860_v7  ;;  %983 = vrot.lane.b32.xlu1 %v950_v35, %s6157_s29  ;;  %981 = vrot.lane.b32.xlu0 %v948_v0, %s6157_s29  ;;  %v528_v35 = vrot.slane %v6428_v10, 3  ;;  %v6900_v15 = vld [vmem:[#allocation2 + $0x88] sm:$0xff]  ;;  %v527_v7 = vrot.slane %v6444_v23, 3 }
  0xc6   : > { %10893 = vst [vmem:[#allocation21_spill] sm:$0xff] %v6900_v15  ;;  %2391 = vst.msk [vmem:[#allocation2 + $0x88] sm:$0xff] %vm243_vm0, %v6526_v14 }
  0xc7   : > { %v968_v62 = vpop.permute.xlu1 %967  ;;  %v966_v36 = vpop.permute.xlu0 %965  ;;  %v529_v41 = vsel %vm496_vm3, %v527_v7, %v528_v35 }
  0xc8   : > { %1013 = vst.msk [vmem:[#allocation2 + $0x30] sm:$0xff] %vm1009_vm15, %v968_v62  ;;  %1283 = vst.msk [vmem:[#allocation2 + $0x10] sm:$0xff] %vm1009_vm15, %v968_v62  ;;  %v530_v62 = vrot.slane %v6431_v13, 3 }
  0xc9   : > { %1012 = vst.msk [vmem:[#allocation2 + $0x20] sm:$0xff] %vm1009_vm15, %v966_v36  ;;  %1282 = vst.msk [vmem:[#allocation2] sm:$0xff] %vm1009_vm15, %v966_v36  ;;  %351 = vrot.lane.b32.xlu1 %v319_v42, %s6152_s22  ;;  %349 = vrot.lane.b32.xlu0 %v317_v30, %s6152_s22  ;;  %v636_v36 = vrot.slane %v6431_v13, 4 }
  0xca   : > { %v6902_v0 = vld [vmem:[#allocation2 + $0x98] sm:$0xff]  ;;  %v531_v38 = vsel %vm496_vm3, %v528_v35, %v530_v62  ;;  %v740_v62 = vrot.slane %v6428_v10, 5 }
  0xcb   : > { %10894 = vst [vmem:[#allocation22_spill] sm:$0xff] %v6902_v0  ;;  %2392 = vst.msk [vmem:[#allocation2 + $0x98] sm:$0xff] %vm243_vm0, %v6529_v18  ;;  %v336_v30 = vpop.permute.xlu1 %335  ;;  %v334_v42 = vpop.permute.xlu0 %333  ;;  %v637_v7 = vsel %vm602_vm4, %v634_v31, %v636_v36  ;;  %v846_v36 = vrot.slane %v6428_v10, 6  ;;  %v532_v0 = vrot.slane %v6532_v21, 3 }
  0xcc   : > { %379 = vst.msk [vmem:[#allocation2 + $0x50] sm:$0xff] %vm373_vm9, %v336_v30  ;;  %378 = vst.msk [vmem:[#allocation2 + $0x40] sm:$0xff] %vm373_vm9, %v334_v42 }
  0xcd   : > { %457 = vrot.lane.b32.xlu1 %v425_v6, %s6151_s21  ;;  %455 = vrot.lane.b32.xlu0 %v423_v9, %s6151_s21  ;;  %v429_v6 = vrot.slane %v6529_v18, 2 }
  0xcf   : > { %v6921_v45 = vld [vmem:[#allocation2 + $0x30] sm:$0xff]  ;;  %v442_v47 = vpop.permute.xlu1 %441  ;;  %v440_v60 = vpop.permute.xlu0 %439 }
  0xd0   : > { %10895 = vst [vmem:[#allocation23_spill] sm:$0xff] %v6921_v45  ;;  %v6923_v3 = vld [vmem:[#allocation2 + $0x20] sm:$0xff]  ;;  %1093 = vst.msk [vmem:[#allocation2 + $0x30] sm:$0xff] %vm243_vm0, %v6284_v12  ;;  %v1316_v35 = vld [vmem:[#allocation2 + $0x10] sm:$0xff] }
  0xd1   : > { %10896 = vst [vmem:[#allocation24_spill] sm:$0xff] %v6923_v3  ;;  %v1314_v59 = vld [vmem:[#allocation2] sm:$0xff]  ;;  %1092 = vst.msk [vmem:[#allocation2 + $0x20] sm:$0xff] %vm243_vm0, %v6298_v16  ;;  %563 = vrot.lane.b32.xlu1 %v531_v38, %s6153_s24  ;;  %561 = vrot.lane.b32.xlu0 %v529_v41, %s6153_s24 }
  0xd2   : > { %485 = vst.msk [vmem:[#allocation2 + $0x50] sm:$0xff] %vm479_vm10, %v442_v47  ;;  %484 = vst.msk [vmem:[#allocation2 + $0x40] sm:$0xff] %vm479_vm10, %v440_v60  ;;  %v5541_v9 = vpack.c.bf16 %v1316_v35, %v1314_v59  ;;  %v635_v59 = vsel %vm602_vm4, %v633_v51, %v634_v31  ;;  %v10897_v51 = vpack.c.bf16 %v6566_v44, %v6564_v43  ;;  %v6970_v31 = vld [vmem:[#allocation2 + $0x48] sm:$0xff]  ;;  %v848_v43 = vrot.slane %v6431_v13, 6  ;;  %v6980_v35 = vld [vmem:[#allocation2 + $0x58] sm:$0xff] }
  0xd3   : > { %1717 = vst.msk [vmem:[#allocation2] sm:$0xff] %vm243_vm0, %v6298_v16  ;;  %1718 = vst.msk [vmem:[#allocation2 + $0x10] sm:$0xff] %vm243_vm0, %v6284_v12  ;;  %v742_v16 = vrot.slane %v6431_v13, 5  ;;  %v739_v12 = vrot.slane %v6444_v23, 5  ;;  %v546_v38 = vpop.permute.xlu0 %545  ;;  %v845_v44 = vrot.slane %v6444_v23, 6 }
  0xd4   : > { %1123 = vst.msk [vmem:[#allocation2 + $0x30] sm:$0xff] %vm373_vm9, %v336_v30  ;;  %1122 = vst.msk [vmem:[#allocation2 + $0x20] sm:$0xff] %vm373_vm9, %v334_v42  ;;  %5542 = vmatpush1.bf16.xpose.msra.mxu1 %v5541_v9 }
  0xd5   : > { %1747 = vst.msk [vmem:[#allocation2] sm:$0xff] %vm373_vm9, %v334_v42  ;;  %1748 = vst.msk [vmem:[#allocation2 + $0x10] sm:$0xff] %vm373_vm9, %v336_v30  ;;  %v548_v42 = vpop.permute.xlu1 %547  ;;  %5545 = vmatprep.subr.msk.bf16.mxu1 %vm6483_vm8, %v10897_v51  ;;  %669 = vrot.lane.b32.xlu1 %v637_v7, %s6154_s25  ;;  %v6968_v30 = vld [vmem:[#allocation2 + $0xb8] sm:$0xff]  ;;  %v741_v41 = vsel %vm708_vm5, %v739_v12, %v740_v62  ;;  %v954_v7 = vrot.slane %v6431_v13, 7  ;;  %v849_v12 = vsel %vm814_vm6, %v846_v36, %v848_v43 }
  0xd6   : > { %1150 = vst.msk [vmem:[#allocation2 + $0x30] sm:$0xff] %vm479_vm10, %v442_v47  ;;  %1149 = vst.msk [vmem:[#allocation2 + $0x20] sm:$0xff] %vm479_vm10, %v440_v60  ;;  %667 = vrot.lane.b32.xlu0 %v635_v59, %s6154_s25  ;;  %v951_v59 = vrot.slane %v6444_v23, 7 }
  0xd7   : > { %1774 = vst.msk [vmem:[#allocation2] sm:$0xff] %vm479_vm10, %v440_v60  ;;  %1775 = vst.msk [vmem:[#allocation2 + $0x10] sm:$0xff] %vm479_vm10, %v442_v47  ;;  %v743_v60 = vsel %vm708_vm5, %v740_v62, %v742_v16  ;;  %v6966_v47 = vld [vmem:[#allocation2 + $0xa8] sm:$0xff]  ;;  %v652_v16 = vpop.permute.xlu0 %651  ;;  %v952_v62 = vrot.slane %v6428_v10, 7 }
  0xd8   : > { %591 = vst.msk [vmem:[#allocation2 + $0x50] sm:$0xff] %vm585_vm11, %v548_v42  ;;  %1177 = vst.msk [vmem:[#allocation2 + $0x30] sm:$0xff] %vm585_vm11, %v548_v42 }
  0xd9   : > { %1802 = vst.msk [vmem:[#allocation2 + $0x10] sm:$0xff] %vm585_vm11, %v548_v42  ;;  %590 = vst.msk [vmem:[#allocation2 + $0x40] sm:$0xff] %vm585_vm11, %v546_v38  ;;  %v654_v9 = vpop.permute.xlu1 %653  ;;  %775 = vrot.lane.b32.xlu1 %v743_v60, %s6155_s26  ;;  %v847_v42 = vsel %vm814_vm6, %v845_v44, %v846_v36  ;;  %v955_v60 = vsel %vm920_vm7, %v952_v62, %v954_v7 }
  0xda   : > { %1176 = vst.msk [vmem:[#allocation2 + $0x20] sm:$0xff] %vm585_vm11, %v546_v38  ;;  %1801 = vst.msk [vmem:[#allocation2] sm:$0xff] %vm585_vm11, %v546_v38  ;;  %773 = vrot.lane.b32.xlu0 %v741_v41, %s6155_s26  ;;  %v953_v41 = vsel %vm920_vm7, %v951_v59, %v952_v62 }
  0xdb   : > { %10898 = vst [vmem:[#allocation25_spill] sm:$0xff] %v6966_v47  ;;  %10899 = vst [vmem:[#allocation26_spill] sm:$0xff] %v6968_v30  ;;  %v758_v51 = vpop.permute.xlu0 %757 }
  0xdc   : > { %10900 = vst [vmem:[#allocation27_spill] sm:$0xff] %v6970_v31  ;;  %1308 = vst.msk [vmem:[#allocation2 + $0xa8] sm:$0xff] %vm243_vm0, %v6428_v10 }
  0xdd   : > { %1309 = vst.msk [vmem:[#allocation2 + $0xb8] sm:$0xff] %vm243_vm0, %v6431_v13  ;;  %10901 = vst [vmem:[#allocation28_spill] sm:$0xff] %v6980_v35  ;;  %v760_v38 = vpop.permute.xlu1 %759  ;;  %881 = vrot.lane.b32.xlu1 %v849_v12, %s6156_s28  ;;  %v426_v12 = vrot.slane %v6532_v21, 2 }
  0xde   : > { %2845 = vst.msk [vmem:[#allocation2 + $0x48] sm:$0xff] %vm243_vm0, %v6428_v10  ;;  %2846 = vst.msk [vmem:[#allocation2 + $0x58] sm:$0xff] %vm243_vm0, %v6431_v13  ;;  %879 = vrot.lane.b32.xlu0 %v847_v42, %s6156_s28 }
  0xdf   : > { %697 = vst.msk [vmem:[#allocation2 + $0x50] sm:$0xff] %vm691_vm12, %v654_v9  ;;  %1204 = vst.msk [vmem:[#allocation2 + $0x30] sm:$0xff] %vm691_vm12, %v654_v9  ;;  %v864_v59 = vpop.permute.xlu0 %863 }
  0xe0   : > { %1829 = vst.msk [vmem:[#allocation2 + $0x10] sm:$0xff] %vm691_vm12, %v654_v9  ;;  %696 = vst.msk [vmem:[#allocation2 + $0x40] sm:$0xff] %vm691_vm12, %v652_v16  ;;  %v321_v9 = vrot.slane %v6526_v14, 1 }
  0xe1   : > { %1203 = vst.msk [vmem:[#allocation2 + $0x20] sm:$0xff] %vm691_vm12, %v652_v16  ;;  %1828 = vst.msk [vmem:[#allocation2] sm:$0xff] %vm691_vm12, %v652_v16  ;;  %v323_v16 = vrot.slane %v6529_v18, 1  ;;  %v866_v7 = vpop.permute.xlu1 %865  ;;  %987 = vrot.lane.b32.xlu1 %v955_v60, %s6157_s29  ;;  %v7052_v60 = vld [vmem:[%s6249_s11 + $0xc8] sm:$0xff] }
  0xe2   : > { %803 = vst.msk [vmem:[#allocation2 + $0x50] sm:$0xff] %vm797_vm13, %v760_v38  ;;  %1231 = vst.msk [vmem:[#allocation2 + $0x30] sm:$0xff] %vm797_vm13, %v760_v38  ;;  %985 = vrot.lane.b32.xlu0 %v953_v41, %s6157_s29 }
  0xe3   : > { %1856 = vst.msk [vmem:[#allocation2 + $0x10] sm:$0xff] %vm797_vm13, %v760_v38  ;;  %802 = vst.msk [vmem:[#allocation2 + $0x40] sm:$0xff] %vm797_vm13, %v758_v51  ;;  %v7009_v36 = vld [vmem:[#allocation2 + $0xa8] sm:$0xff]  ;;  %v320_v38 = vrot.slane %v6532_v21, 1  ;;  %v324_v42 = vsel %vm284_vm2, %v321_v9, %v323_v16  ;;  %v970_v31 = vpop.permute.xlu0 %969 }
  0xe4   : > { %1230 = vst.msk [vmem:[#allocation2 + $0x20] sm:$0xff] %vm797_vm13, %v758_v51  ;;  %1855 = vst.msk [vmem:[#allocation2] sm:$0xff] %vm797_vm13, %v758_v51  ;;  %v7011_v43 = vld [vmem:[#allocation2 + $0xb8] sm:$0xff]  ;;  %v427_v51 = vrot.slane %v6526_v14, 2 }
  0xe5   : > { %v7013_v44 = vld [vmem:[#allocation2 + $0x48] sm:$0xff]  ;;  %1935 = vst.msk [vmem:[#allocation2 + $0xa8] sm:$0xff] %vm243_vm0, %v6526_v14  ;;  %1936 = vst.msk [vmem:[#allocation2 + $0xb8] sm:$0xff] %vm243_vm0, %v6529_v18  ;;  %v7024_v62 = vld [vmem:[#allocation2 + $0x58] sm:$0xff]  ;;  %v972_v35 = vpop.permute.xlu1 %971  ;;  %355 = vrot.lane.b32.xlu1 %v324_v42, %s6152_s22 }
  0xe6   : > { %3303 = vst.msk [vmem:[#allocation2 + $0x48] sm:$0xff] %vm243_vm0, %v6526_v14  ;;  %3304 = vst.msk [vmem:[#allocation2 + $0x58] sm:$0xff] %vm243_vm0, %v6529_v18  ;;  %v430_v41 = vsel %vm390_vm1, %v427_v51, %v429_v6 }
  0xe7   : > { %909 = vst.msk [vmem:[#allocation2 + $0x50] sm:$0xff] %vm903_vm14, %v866_v7  ;;  %1258 = vst.msk [vmem:[#allocation2 + $0x30] sm:$0xff] %vm903_vm14, %v866_v7  ;;  %v338_v42 = vpop.permute.xlu0 %337 }
  0xe8   : > { %1883 = vst.msk [vmem:[#allocation2 + $0x10] sm:$0xff] %vm903_vm14, %v866_v7  ;;  %908 = vst.msk [vmem:[#allocation2 + $0x40] sm:$0xff] %vm903_vm14, %v864_v59  ;;  %v322_v7 = vsel %vm284_vm2, %v320_v38, %v321_v9  ;;  %v7058_v9 = vld [vmem:[%s6249_s11 + $0xd0] sm:$0xff] }
  0xe9   : > { %1257 = vst.msk [vmem:[#allocation2 + $0x20] sm:$0xff] %vm903_vm14, %v864_v59  ;;  %1882 = vst.msk [vmem:[#allocation2] sm:$0xff] %vm903_vm14, %v864_v59  ;;  %353 = vrot.lane.b32.xlu0 %v322_v7, %s6152_s22  ;;  %v533_v59 = vrot.slane %v6526_v14, 3  ;;  %v340_v6 = vpop.permute.xlu1 %339  ;;  %461 = vrot.lane.b32.xlu1 %v430_v41, %s6151_s21  ;;  %v1220_v46 = vrot.slane %v7058_v9, 5 }
  0xea   : > { %1015 = vst.msk [vmem:[#allocation2 + $0x50] sm:$0xff] %vm1009_vm15, %v972_v35  ;;  %1285 = vst.msk [vmem:[#allocation2 + $0x30] sm:$0xff] %vm1009_vm15, %v972_v35 }
  0xeb   : > { %1910 = vst.msk [vmem:[#allocation2 + $0x10] sm:$0xff] %vm1009_vm15, %v972_v35  ;;  %1014 = vst.msk [vmem:[#allocation2 + $0x40] sm:$0xff] %vm1009_vm15, %v970_v31  ;;  %v428_v35 = vsel %vm390_vm1, %v426_v12, %v427_v51  ;;  %v639_v12 = vrot.slane %v6526_v14, 4  ;;  %v641_v51 = vrot.slane %v6529_v18, 4  ;;  %v444_v41 = vpop.permute.xlu0 %443 }
  0xec   : > { %1284 = vst.msk [vmem:[#allocation2 + $0x20] sm:$0xff] %vm1009_vm15, %v970_v31  ;;  %1909 = vst.msk [vmem:[#allocation2] sm:$0xff] %vm1009_vm15, %v970_v31  ;;  %v7060_v16 = vld [vmem:[#allocation2 + $0xa8] sm:$0xff]  ;;  %v7062_v38 = vld [vmem:[#allocation2 + $0xb8] sm:$0xff]  ;;  %v535_v31 = vrot.slane %v6529_v18, 3 }
  0xed   : > { %10902 = vst [vmem:[#allocation29_spill] sm:$0xff] %v7060_v16  ;;  %10903 = vst [vmem:[#allocation30_spill] sm:$0xff] %v7062_v38  ;;  %459 = vrot.lane.b32.xlu0 %v428_v35, %s6151_s21  ;;  %v534_v38 = vsel %vm496_vm3, %v532_v0, %v533_v59  ;;  %v638_v16 = vrot.slane %v6532_v21, 4  ;;  %v446_v2 = vpop.permute.xlu1 %445 }
  0xee   : > { %2393 = vst.msk [vmem:[#allocation2 + $0xa8] sm:$0xff] %vm243_vm0, %v7052_v60  ;;  %2394 = vst.msk [vmem:[#allocation2 + $0xb8] sm:$0xff] %vm243_vm0, %v7058_v9  ;;  %v536_v7 = vsel %vm496_vm3, %v533_v59, %v535_v31  ;;  %v642_v31 = vsel %vm602_vm4, %v639_v12, %v641_v51  ;;  %v744_v51 = vrot.slane %v6532_v21, 5 }
  0xef   : > { %381 = vst.msk [vmem:[#allocation2 + $0x70] sm:$0xff] %vm373_vm9, %v340_v6  ;;  %380 = vst.msk [vmem:[#allocation2 + $0x60] sm:$0xff] %vm373_vm9, %v338_v42  ;;  %567 = vrot.lane.b32.xlu1 %v536_v7, %s6153_s24 }
  0xf0   : > { %487 = vst.msk [vmem:[#allocation2 + $0x70] sm:$0xff] %vm479_vm10, %v446_v2  ;;  %486 = vst.msk [vmem:[#allocation2 + $0x60] sm:$0xff] %vm479_vm10, %v444_v41 }
  0xf1   : > { %v7081_v15 = vld [vmem:[#allocation2 + $0x50] sm:$0xff]  ;;  %565 = vrot.lane.b32.xlu0 %v534_v38, %s6153_s24  ;;  %v747_v38 = vrot.slane %v6529_v18, 5  ;;  %v552_v7 = vpop.permute.xlu1 %551 }
  0xf2   : > { %10904 = vst [vmem:[#allocation31_spill] sm:$0xff] %v7081_v15  ;;  %v7083_v39 = vld [vmem:[#allocation2 + $0x10] sm:$0xff]  ;;  %v7085_v37 = vld [vmem:[#allocation2 + $0x40] sm:$0xff]  ;;  %1095 = vst.msk [vmem:[#allocation2 + $0x50] sm:$0xff] %vm243_vm0, %v6301_v17 }
  0xf3   : > { %10905 = vst [vmem:[#allocation32_spill] sm:$0xff] %v7083_v39  ;;  %10906 = vst [vmem:[#allocation33_spill] sm:$0xff] %v7085_v37  ;;  %v7093_v0 = vld [vmem:[#allocation2] sm:$0xff]  ;;  %v1320_v59 = vld [vmem:[#allocation2 + $0x30] sm:$0xff]  ;;  %673 = vrot.lane.b32.xlu1 %v642_v31, %s6154_s25  ;;  %v1217_v37 = vrot.slane %v7178_v58, 5 }
  0xf4   : > { %2176 = vst.msk [vmem:[#allocation2 + $0x10] sm:$0xff] %vm243_vm0, %v6301_v17  ;;  %1094 = vst.msk [vmem:[#allocation2 + $0x40] sm:$0xff] %vm243_vm0, %v6316_v20  ;;  %v1318_v35 = vld [vmem:[#allocation2 + $0x20] sm:$0xff] }
  0xf5   : > { %10907 = vst [vmem:[#allocation34_spill] sm:$0xff] %v7093_v0  ;;  %2175 = vst.msk [vmem:[#allocation2] sm:$0xff] %vm243_vm0, %v6316_v20  ;;  %v5546_v1 = vpack.c.bf16 %v1320_v59, %v1318_v35  ;;  %v550_v35 = vpop.permute.xlu0 %549  ;;  %v7156_v59 = vld [vmem:[#allocation2 + $0x78] sm:$0xff]  ;;  %v658_v31 = vpop.permute.xlu1 %657 }
  0xf6   : > { %1125 = vst.msk [vmem:[#allocation2 + $0x50] sm:$0xff] %vm373_vm9, %v340_v6  ;;  %2206 = vst.msk [vmem:[#allocation2 + $0x10] sm:$0xff] %vm373_vm9, %v340_v6 }
  0xf7   : > { %1124 = vst.msk [vmem:[#allocation2 + $0x40] sm:$0xff] %vm373_vm9, %v338_v42  ;;  %2205 = vst.msk [vmem:[#allocation2] sm:$0xff] %vm373_vm9, %v338_v42  ;;  %5547 = vmatpush1.bf16.xpose.msra.mxu1 %v5546_v1  ;;  %v10908_v1 = vpack.c.bf16 %v6641_v50, %v6639_v49  ;;  %v850_v50 = vrot.slane %v6532_v21, 6 }
  0xf8   : > { %1719 = vst.msk [vmem:[#allocation2 + $0x20] sm:$0xff] %vm243_vm0, %v6316_v20  ;;  %1720 = vst.msk [vmem:[#allocation2 + $0x30] sm:$0xff] %vm243_vm0, %v6301_v17  ;;  %v640_v20 = vsel %vm602_vm4, %v638_v16, %v639_v12  ;;  %v745_v17 = vrot.slane %v6526_v14, 5  ;;  %v853_v16 = vrot.slane %v6529_v18, 6  ;;  %v7147_v12 = vld [vmem:[#allocation2 + $0x68] sm:$0xff] }
  0xf9   : > { %1152 = vst.msk [vmem:[#allocation2 + $0x50] sm:$0xff] %vm479_vm10, %v446_v2  ;;  %2233 = vst.msk [vmem:[#allocation2 + $0x10] sm:$0xff] %vm479_vm10, %v446_v2  ;;  %5550 = vmatprep.subr.msk.bf16.mxu1 %vm6483_vm8, %v10908_v1  ;;  %671 = vrot.lane.b32.xlu0 %v640_v20, %s6154_s25  ;;  %v656_v20 = vpop.permute.xlu0 %655  ;;  %v764_v1 = vpop.permute.xlu1 %763 }
  0xfa   : > { %1151 = vst.msk [vmem:[#allocation2 + $0x40] sm:$0xff] %vm479_vm10, %v444_v41  ;;  %2232 = vst.msk [vmem:[#allocation2] sm:$0xff] %vm479_vm10, %v444_v41  ;;  %v746_v49 = vsel %vm708_vm5, %v744_v51, %v745_v17  ;;  %v957_v51 = vrot.slane %v6526_v14, 7 }
  0xfb   : > { %1749 = vst.msk [vmem:[#allocation2 + $0x20] sm:$0xff] %vm373_vm9, %v338_v42  ;;  %1750 = vst.msk [vmem:[#allocation2 + $0x30] sm:$0xff] %vm373_vm9, %v340_v6  ;;  %v7143_v6 = vld [vmem:[#allocation2 + $0xc8] sm:$0xff]  ;;  %v7145_v42 = vld [vmem:[#allocation2 + $0xd8] sm:$0xff] }
  0xfc   : > { %1776 = vst.msk [vmem:[#allocation2 + $0x20] sm:$0xff] %vm479_vm10, %v444_v41  ;;  %1777 = vst.msk [vmem:[#allocation2 + $0x30] sm:$0xff] %vm479_vm10, %v446_v2  ;;  %v851_v2 = vrot.slane %v6526_v14, 6  ;;  %v748_v41 = vsel %vm708_vm5, %v745_v17, %v747_v38 }
  0xfd   : > { %593 = vst.msk [vmem:[#allocation2 + $0x70] sm:$0xff] %vm585_vm11, %v552_v7  ;;  %1179 = vst.msk [vmem:[#allocation2 + $0x50] sm:$0xff] %vm585_vm11, %v552_v7  ;;  %779 = vrot.lane.b32.xlu1 %v748_v41, %s6155_s26  ;;  %777 = vrot.lane.b32.xlu0 %v746_v49, %s6155_s26 }
  0xfe   : > { %1804 = vst.msk [vmem:[#allocation2 + $0x30] sm:$0xff] %vm585_vm11, %v552_v7  ;;  %2260 = vst.msk [vmem:[#allocation2 + $0x10] sm:$0xff] %vm585_vm11, %v552_v7  ;;  %v854_v17 = vsel %vm814_vm6, %v851_v2, %v853_v16  ;;  %v852_v38 = vsel %vm814_vm6, %v850_v50, %v851_v2  ;;  %v959_v7 = vrot.slane %v6529_v18, 7  ;;  %v1110_v2 = vrot.slane %v7052_v60, 1 }
  0xff   : > { %592 = vst.msk [vmem:[#allocation2 + $0x60] sm:$0xff] %vm585_vm11, %v550_v35  ;;  %1178 = vst.msk [vmem:[#allocation2 + $0x40] sm:$0xff] %vm585_vm11, %v550_v35  ;;  %v1112_v16 = vrot.slane %v7058_v9, 1 }
 0x100   : > { %1803 = vst.msk [vmem:[#allocation2 + $0x20] sm:$0xff] %vm585_vm11, %v550_v35  ;;  %2259 = vst.msk [vmem:[#allocation2] sm:$0xff] %vm585_vm11, %v550_v35  ;;  %v956_v35 = vrot.slane %v6532_v21, 7 }
 0x101   : > { %10909 = vst [vmem:[#allocation35_spill] sm:$0xff] %v7143_v6  ;;  %10910 = vst [vmem:[#allocation36_spill] sm:$0xff] %v7145_v42  ;;  %885 = vrot.lane.b32.xlu1 %v854_v17, %s6156_s28  ;;  %883 = vrot.lane.b32.xlu0 %v852_v38, %s6156_s28  ;;  %v1137_v17 = vrot.slane %v7052_v60, 2 }
 0x102   : > { %10911 = vst [vmem:[#allocation37_spill] sm:$0xff] %v7147_v12  ;;  %1310 = vst.msk [vmem:[#allocation2 + $0xc8] sm:$0xff] %vm243_vm0, %v6526_v14  ;;  %v1136_v12 = vrot.slane %v7178_v58, 2 }
 0x103   : > { %1311 = vst.msk [vmem:[#allocation2 + $0xd8] sm:$0xff] %vm243_vm0, %v6529_v18  ;;  %10912 = vst [vmem:[#allocation38_spill] sm:$0xff] %v7156_v59  ;;  %v870_v59 = vpop.permute.xlu1 %869 }
 0x104   : > { %2847 = vst.msk [vmem:[#allocation2 + $0x68] sm:$0xff] %vm243_vm0, %v6526_v14  ;;  %2848 = vst.msk [vmem:[#allocation2 + $0x78] sm:$0xff] %vm243_vm0, %v6529_v18 }
 0x105   : > { %699 = vst.msk [vmem:[#allocation2 + $0x70] sm:$0xff] %vm691_vm12, %v658_v31  ;;  %1206 = vst.msk [vmem:[#allocation2 + $0x50] sm:$0xff] %vm691_vm12, %v658_v31 }
 0x106   : > { %1831 = vst.msk [vmem:[#allocation2 + $0x30] sm:$0xff] %vm691_vm12, %v658_v31  ;;  %2287 = vst.msk [vmem:[#allocation2 + $0x10] sm:$0xff] %vm691_vm12, %v658_v31  ;;  %v762_v31 = vpop.permute.xlu0 %761 }
 0x107   : > { %698 = vst.msk [vmem:[#allocation2 + $0x60] sm:$0xff] %vm691_vm12, %v656_v20  ;;  %1205 = vst.msk [vmem:[#allocation2 + $0x40] sm:$0xff] %vm691_vm12, %v656_v20  ;;  %v976_v0 = vpop.permute.xlu1 %975 }
 0x108   : > { %1830 = vst.msk [vmem:[#allocation2 + $0x20] sm:$0xff] %vm691_vm12, %v656_v20  ;;  %2286 = vst.msk [vmem:[#allocation2] sm:$0xff] %vm691_vm12, %v656_v20  ;;  %v960_v20 = vsel %vm920_vm7, %v957_v51, %v959_v7 }
 0x109   : > { %805 = vst.msk [vmem:[#allocation2 + $0x70] sm:$0xff] %vm797_vm13, %v764_v1  ;;  %1233 = vst.msk [vmem:[#allocation2 + $0x50] sm:$0xff] %vm797_vm13, %v764_v1  ;;  %v7192_v41 = vld [vmem:[#allocation2 + $0xc8] sm:$0xff]  ;;  %991 = vrot.lane.b32.xlu1 %v960_v20, %s6157_s29  ;;  %v1166_v20 = vrot.slane %v7058_v9, 3 }
 0x10a   : > { %1858 = vst.msk [vmem:[#allocation2 + $0x30] sm:$0xff] %vm797_vm13, %v764_v1  ;;  %2314 = vst.msk [vmem:[#allocation2 + $0x10] sm:$0xff] %vm797_vm13, %v764_v1  ;;  %v7194_v49 = vld [vmem:[#allocation2 + $0xd8] sm:$0xff]  ;;  %v958_v1 = vsel %vm920_vm7, %v956_v35, %v957_v51  ;;  %v868_v7 = vpop.permute.xlu0 %867  ;;  %v1113_v35 = vsel %vm284_vm2, %v1110_v2, %v1112_v16  ;;  %v1164_v16 = vrot.slane %v7052_v60, 3 }
 0x10b   : > { %804 = vst.msk [vmem:[#allocation2 + $0x60] sm:$0xff] %vm797_vm13, %v762_v31  ;;  %1232 = vst.msk [vmem:[#allocation2 + $0x40] sm:$0xff] %vm797_vm13, %v762_v31  ;;  %v7196_v50 = vld [vmem:[#allocation2 + $0x68] sm:$0xff]  ;;  %v7207_v38 = vld [vmem:[#allocation2 + $0x78] sm:$0xff]  ;;  %989 = vrot.lane.b32.xlu0 %v958_v1, %s6157_s29 }
 0x10c   : > { %1857 = vst.msk [vmem:[#allocation2 + $0x20] sm:$0xff] %vm797_vm13, %v762_v31  ;;  %2313 = vst.msk [vmem:[#allocation2] sm:$0xff] %vm797_vm13, %v762_v31  ;;  %v1109_v31 = vrot.slane %v7178_v58, 1  ;;  %v7246_v1 = vld [vmem:[%s6249_s11 + $0xe8] sm:$0xff] }
 0x10d   : > { %1937 = vst.msk [vmem:[#allocation2 + $0xc8] sm:$0xff] %vm243_vm0, %v7052_v60  ;;  %1938 = vst.msk [vmem:[#allocation2 + $0xd8] sm:$0xff] %vm243_vm0, %v7058_v9  ;;  %1116 = vrot.lane.b32.xlu1 %v1113_v35, %s6152_s22  ;;  %v1766_v26 = vrot.slane %v7246_v1, 2  ;;  %v1847_v61 = vrot.slane %v7246_v1, 5 }
 0x10e   : > { %3305 = vst.msk [vmem:[#allocation2 + $0x68] sm:$0xff] %vm243_vm0, %v7052_v60  ;;  %3306 = vst.msk [vmem:[#allocation2 + $0x78] sm:$0xff] %vm243_vm0, %v7058_v9  ;;  %v1111_v51 = vsel %vm284_vm2, %v1109_v31, %v1110_v2  ;;  %v974_v39 = vpop.permute.xlu0 %973  ;;  %v7239_v2 = vld [vmem:[%s6249_s11 + $0xe0] sm:$0xff] }
 0x10f   : > { %911 = vst.msk [vmem:[#allocation2 + $0x70] sm:$0xff] %vm903_vm14, %v870_v59  ;;  %1260 = vst.msk [vmem:[#allocation2 + $0x50] sm:$0xff] %vm903_vm14, %v870_v59  ;;  %1114 = vrot.lane.b32.xlu0 %v1111_v51, %s6152_s22  ;;  %v344_v51 = vpop.permute.xlu1 %343  ;;  %v1845_v63 = vrot.slane %v7239_v2, 5 }
 0x110   : > { %1885 = vst.msk [vmem:[#allocation2 + $0x30] sm:$0xff] %vm903_vm14, %v870_v59  ;;  %2341 = vst.msk [vmem:[#allocation2 + $0x10] sm:$0xff] %vm903_vm14, %v870_v59  ;;  %v1139_v59 = vrot.slane %v7058_v9, 2 }
 0x111   : > { %910 = vst.msk [vmem:[#allocation2 + $0x60] sm:$0xff] %vm903_vm14, %v868_v7  ;;  %1259 = vst.msk [vmem:[#allocation2 + $0x40] sm:$0xff] %vm903_vm14, %v868_v7 }
 0x112   : > { %1884 = vst.msk [vmem:[#allocation2 + $0x20] sm:$0xff] %vm903_vm14, %v868_v7  ;;  %2340 = vst.msk [vmem:[#allocation2] sm:$0xff] %vm903_vm14, %v868_v7  ;;  %v1140_v7 = vsel %vm390_vm1, %v1137_v17, %v1139_v59  ;;  %v342_v35 = vpop.permute.xlu0 %341  ;;  %v1191_v59 = vrot.slane %v7052_v60, 4 }
 0x113   : > { %1017 = vst.msk [vmem:[#allocation2 + $0x70] sm:$0xff] %vm1009_vm15, %v976_v0  ;;  %1287 = vst.msk [vmem:[#allocation2 + $0x50] sm:$0xff] %vm1009_vm15, %v976_v0  ;;  %1143 = vrot.lane.b32.xlu1 %v1140_v7, %s6151_s21  ;;  %v450_v6 = vpop.permute.xlu1 %449 }
 0x114   : > { %1912 = vst.msk [vmem:[#allocation2 + $0x30] sm:$0xff] %vm1009_vm15, %v976_v0  ;;  %2368 = vst.msk [vmem:[#allocation2 + $0x10] sm:$0xff] %vm1009_vm15, %v976_v0  ;;  %v7248_v0 = vld [vmem:[#allocation2 + $0xc8] sm:$0xff]  ;;  %v7250_v31 = vld [vmem:[#allocation2 + $0xd8] sm:$0xff] }
 0x115   : > { %1016 = vst.msk [vmem:[#allocation2 + $0x60] sm:$0xff] %vm1009_vm15, %v974_v39  ;;  %1286 = vst.msk [vmem:[#allocation2 + $0x40] sm:$0xff] %vm1009_vm15, %v974_v39 }
 0x116   : > { %1911 = vst.msk [vmem:[#allocation2 + $0x20] sm:$0xff] %vm1009_vm15, %v974_v39  ;;  %2367 = vst.msk [vmem:[#allocation2] sm:$0xff] %vm1009_vm15, %v974_v39  ;;  %v1138_v39 = vsel %vm390_vm1, %v1136_v12, %v1137_v17  ;;  %v1167_v12 = vsel %vm496_vm3, %v1164_v16, %v1166_v20  ;;  %v1165_v17 = vsel %vm496_vm3, %v1163_v57, %v1164_v16  ;;  %v448_v7 = vpop.permute.xlu0 %447 }
 0x117   : > { %10913 = vst [vmem:[#allocation39_spill] sm:$0xff] %v7248_v0  ;;  %10914 = vst [vmem:[#allocation40_spill] sm:$0xff] %v7250_v31  ;;  %1141 = vrot.lane.b32.xlu0 %v1138_v39, %s6151_s21  ;;  %v1193_v31 = vrot.slane %v7058_v9, 4  ;;  %v1190_v0 = vrot.slane %v7178_v58, 4  ;;  %v1218_v39 = vrot.slane %v7052_v60, 5  ;;  %1170 = vrot.lane.b32.xlu1 %v1167_v12, %s6153_s24 }
 0x118   : > { %2395 = vst.msk [vmem:[#allocation2 + $0xc8] sm:$0xff] %vm243_vm0, %v7239_v2  ;;  %2396 = vst.msk [vmem:[#allocation2 + $0xd8] sm:$0xff] %vm243_vm0, %v7246_v1 }
 0x119   : > { %383 = vst.msk [vmem:[#allocation2 + $0x90] sm:$0xff] %vm373_vm9, %v344_v51  ;;  %382 = vst.msk [vmem:[#allocation2 + $0x80] sm:$0xff] %vm373_vm9, %v342_v35  ;;  %v1192_v15 = vsel %vm602_vm4, %v1190_v0, %v1191_v59  ;;  %v7344_v0 = vld [vmem:[#allocation2 + $0x88] sm:$0xff] }
 0x11a   : > { %v7268_v56 = vld [vmem:[#allocation2 + $0x70] sm:$0xff]  ;;  %489 = vst.msk [vmem:[#allocation2 + $0x90] sm:$0xff] %vm479_vm10, %v450_v6  ;;  %488 = vst.msk [vmem:[#allocation2 + $0x80] sm:$0xff] %vm479_vm10, %v448_v7 }
 0x11b   : > { %10915 = vst [vmem:[#allocation41_spill] sm:$0xff] %v7268_v56  ;;  %v7270_v55 = vld [vmem:[#allocation2 + $0x30] sm:$0xff]  ;;  %1097 = vst.msk [vmem:[#allocation2 + $0x70] sm:$0xff] %vm243_vm0, %v6331_v25  ;;  %1168 = vrot.lane.b32.xlu0 %v1165_v17, %s6153_s24  ;;  %v1194_v17 = vsel %vm602_vm4, %v1191_v59, %v1193_v31  ;;  %v1219_v31 = vsel %vm708_vm5, %v1217_v37, %v1218_v39  ;;  %v1244_v59 = vrot.slane %v7178_v58, 6 }
 0x11c   : > { %10916 = vst [vmem:[#allocation42_spill] sm:$0xff] %v7270_v55  ;;  %v7272_v42 = vld [vmem:[#allocation2 + $0x10] sm:$0xff]  ;;  %2178 = vst.msk [vmem:[#allocation2 + $0x30] sm:$0xff] %vm243_vm0, %v6331_v25  ;;  %v7280_v57 = vld [vmem:[#allocation2 + $0x60] sm:$0xff]  ;;  %1197 = vrot.lane.b32.xlu1 %v1194_v17, %s6154_s25 }
 0x11d   : > { %10917 = vst [vmem:[#allocation43_spill] sm:$0xff] %v7272_v42  ;;  %2634 = vst.msk [vmem:[#allocation2 + $0x10] sm:$0xff] %vm243_vm0, %v6331_v25  ;;  %v7282_v16 = vld [vmem:[#allocation2 + $0x20] sm:$0xff]  ;;  %v1324_v47 = vld [vmem:[#allocation2 + $0x50] sm:$0xff] }
 0x11e   : > { %10918 = vst [vmem:[#allocation44_spill] sm:$0xff] %v7280_v57  ;;  %10919 = vst [vmem:[#allocation45_spill] sm:$0xff] %v7282_v16  ;;  %v7284_v20 = vld [vmem:[#allocation2] sm:$0xff] }
 0x11f   : > { %10920 = vst [vmem:[#allocation46_spill] sm:$0xff] %v7284_v20  ;;  %1096 = vst.msk [vmem:[#allocation2 + $0x60] sm:$0xff] %vm243_vm0, %v6337_v27  ;;  %v1322_v30 = vld [vmem:[#allocation2 + $0x40] sm:$0xff]  ;;  %1195 = vrot.lane.b32.xlu0 %v1192_v15, %s6154_s25  ;;  %v1793_v20 = vrot.slane %v7246_v1, 3 }
 0x120   : > { %2177 = vst.msk [vmem:[#allocation2 + $0x20] sm:$0xff] %vm243_vm0, %v6337_v27  ;;  %2633 = vst.msk [vmem:[#allocation2] sm:$0xff] %vm243_vm0, %v6337_v27  ;;  %v5551_v12 = vpack.c.bf16 %v1324_v47, %v1322_v30  ;;  %v554_v47 = vpop.permute.xlu0 %553  ;;  %v7340_v30 = vld [vmem:[#allocation2 + $0xe8] sm:$0xff] }
 0x121   : > { %1127 = vst.msk [vmem:[#allocation2 + $0x70] sm:$0xff] %vm373_vm9, %v344_v51  ;;  %2208 = vst.msk [vmem:[#allocation2 + $0x30] sm:$0xff] %vm373_vm9, %v344_v51 }
 0x122   : > { %2664 = vst.msk [vmem:[#allocation2 + $0x10] sm:$0xff] %vm373_vm9, %v344_v51  ;;  %1126 = vst.msk [vmem:[#allocation2 + $0x60] sm:$0xff] %vm373_vm9, %v342_v35  ;;  %5552 = vmatpush1.bf16.xpose.msra.mxu1 %v5551_v12 }
 0x123   : > { %2207 = vst.msk [vmem:[#allocation2 + $0x20] sm:$0xff] %vm373_vm9, %v342_v35  ;;  %2663 = vst.msk [vmem:[#allocation2] sm:$0xff] %vm373_vm9, %v342_v35  ;;  %1222 = vrot.lane.b32.xlu0 %v1219_v31, %s6155_s26 }
 0x124   : > { %1154 = vst.msk [vmem:[#allocation2 + $0x70] sm:$0xff] %vm479_vm10, %v450_v6  ;;  %2235 = vst.msk [vmem:[#allocation2 + $0x30] sm:$0xff] %vm479_vm10, %v450_v6  ;;  %v660_v15 = vpop.permute.xlu0 %659 }
 0x125   : > { %2691 = vst.msk [vmem:[#allocation2 + $0x10] sm:$0xff] %vm479_vm10, %v450_v6  ;;  %1153 = vst.msk [vmem:[#allocation2 + $0x60] sm:$0xff] %vm479_vm10, %v448_v7 }
 0x126   : > { %1721 = vst.msk [vmem:[#allocation2 + $0x40] sm:$0xff] %vm243_vm0, %v6337_v27  ;;  %1722 = vst.msk [vmem:[#allocation2 + $0x50] sm:$0xff] %vm243_vm0, %v6331_v25  ;;  %v556_v27 = vpop.permute.xlu1 %555  ;;  %v1221_v25 = vsel %vm708_vm5, %v1218_v39, %v1220_v46  ;;  %v7359_v46 = vld [vmem:[#allocation2 + $0x98] sm:$0xff]  ;;  %v1271_v39 = vrot.slane %v7178_v58, 7 }
 0x127   : > { %2234 = vst.msk [vmem:[#allocation2 + $0x20] sm:$0xff] %vm479_vm10, %v448_v7  ;;  %2690 = vst.msk [vmem:[#allocation2] sm:$0xff] %vm479_vm10, %v448_v7  ;;  %1224 = vrot.lane.b32.xlu1 %v1221_v25, %s6155_s26 }
 0x128   : > { %1751 = vst.msk [vmem:[#allocation2 + $0x40] sm:$0xff] %vm373_vm9, %v342_v35  ;;  %1752 = vst.msk [vmem:[#allocation2 + $0x50] sm:$0xff] %vm373_vm9, %v344_v51  ;;  %v1245_v51 = vrot.slane %v7052_v60, 6  ;;  %v1247_v35 = vrot.slane %v7058_v9, 6 }
 0x129   : > { %1778 = vst.msk [vmem:[#allocation2 + $0x40] sm:$0xff] %vm479_vm10, %v448_v7  ;;  %1779 = vst.msk [vmem:[#allocation2 + $0x50] sm:$0xff] %vm479_vm10, %v450_v6  ;;  %v7342_v6 = vld [vmem:[#allocation2 + $0xf8] sm:$0xff]  ;;  %v10924_v7 = vpack.c.bf16 %v6742_v19, %v6732_v8  ;;  %v1272_v8 = vrot.slane %v7052_v60, 7  ;;  %v1274_v19 = vrot.slane %v7058_v9, 7 }
 0x12a   : > { %595 = vst.msk [vmem:[#allocation2 + $0x90] sm:$0xff] %vm585_vm11, %v556_v27  ;;  %1181 = vst.msk [vmem:[#allocation2 + $0x70] sm:$0xff] %vm585_vm11, %v556_v27  ;;  %v662_v37 = vpop.permute.xlu1 %661  ;;  %v1248_v12 = vsel %vm814_vm6, %v1245_v51, %v1247_v35  ;;  %v1246_v17 = vsel %vm814_vm6, %v1244_v59, %v1245_v51 }
 0x12b   : > { %2262 = vst.msk [vmem:[#allocation2 + $0x30] sm:$0xff] %vm585_vm11, %v556_v27  ;;  %2718 = vst.msk [vmem:[#allocation2 + $0x10] sm:$0xff] %vm585_vm11, %v556_v27  ;;  %5555 = vmatprep.subr.msk.bf16.mxu1 %vm6483_vm8, %v10924_v7  ;;  %v7383_v7 = vld [vmem:[%s6249_s11 + $0xd8] sm:$0xff]  ;;  %1251 = vrot.lane.b32.xlu1 %v1248_v12, %s6156_s28  ;;  %v1275_v25 = vsel %vm920_vm7, %v1272_v8, %v1274_v19  ;;  %v1273_v31 = vsel %vm920_vm7, %v1271_v39, %v1272_v8 }
 0x12c   : > { %594 = vst.msk [vmem:[#allocation2 + $0x80] sm:$0xff] %vm585_vm11, %v554_v47  ;;  %1180 = vst.msk [vmem:[#allocation2 + $0x60] sm:$0xff] %vm585_vm11, %v554_v47  ;;  %1249 = vrot.lane.b32.xlu0 %v1246_v17, %s6156_s28  ;;  %v1763_v12 = vrot.slane %v7383_v7, 2  ;;  %v1844_v3 = vrot.slane %v7383_v7, 5 }
 0x12d   : > { %2261 = vst.msk [vmem:[#allocation2 + $0x20] sm:$0xff] %vm585_vm11, %v554_v47  ;;  %2717 = vst.msk [vmem:[#allocation2] sm:$0xff] %vm585_vm11, %v554_v47 }
 0x12e   : > { %1806 = vst.msk [vmem:[#allocation2 + $0x50] sm:$0xff] %vm585_vm11, %v556_v27  ;;  %1805 = vst.msk [vmem:[#allocation2 + $0x40] sm:$0xff] %vm585_vm11, %v554_v47  ;;  %v768_v27 = vpop.permute.xlu1 %767  ;;  %v766_v47 = vpop.permute.xlu0 %765 }
 0x12f   : > { %10921 = vst [vmem:[#allocation47_spill] sm:$0xff] %v7340_v30  ;;  %10922 = vst [vmem:[#allocation48_spill] sm:$0xff] %v7342_v6  ;;  %1278 = vrot.lane.b32.xlu1 %v1275_v25, %s6157_s29  ;;  %v7450_v25 = vld [vmem:[%s6249_s11 + $0xf8] sm:$0xff] }
 0x130   : > { %10923 = vst [vmem:[#allocation49_spill] sm:$0xff] %v7344_v0  ;;  %1312 = vst.msk [vmem:[#allocation2 + $0xe8] sm:$0xff] %vm243_vm0, %v7052_v60  ;;  %1276 = vrot.lane.b32.xlu0 %v1273_v31, %s6157_s29  ;;  %v7453_v31 = vld [vmem:[%s6249_s11 + $0x100] sm:$0xff] }
 0x131   : > { %1313 = vst.msk [vmem:[#allocation2 + $0xf8] sm:$0xff] %vm243_vm0, %v7058_v9  ;;  %10925 = vst [vmem:[#allocation50_spill] sm:$0xff] %v7359_v46 }
 0x132   : > { %2849 = vst.msk [vmem:[#allocation2 + $0x88] sm:$0xff] %vm243_vm0, %v7052_v60  ;;  %2850 = vst.msk [vmem:[#allocation2 + $0x98] sm:$0xff] %vm243_vm0, %v7058_v9  ;;  %v874_v19 = vpop.permute.xlu1 %873  ;;  %v872_v39 = vpop.permute.xlu0 %871 }
 0x133   : > { %701 = vst.msk [vmem:[#allocation2 + $0x90] sm:$0xff] %vm691_vm12, %v662_v37  ;;  %1208 = vst.msk [vmem:[#allocation2 + $0x70] sm:$0xff] %vm691_vm12, %v662_v37 }
 0x134   : > { %1833 = vst.msk [vmem:[#allocation2 + $0x50] sm:$0xff] %vm691_vm12, %v662_v37  ;;  %2289 = vst.msk [vmem:[#allocation2 + $0x30] sm:$0xff] %vm691_vm12, %v662_v37 }
 0x135   : > { %2745 = vst.msk [vmem:[#allocation2 + $0x10] sm:$0xff] %vm691_vm12, %v662_v37  ;;  %700 = vst.msk [vmem:[#allocation2 + $0x80] sm:$0xff] %vm691_vm12, %v660_v15  ;;  %v1737_v37 = vrot.slane %v7239_v2, 1 }
 0x136   : > { %1207 = vst.msk [vmem:[#allocation2 + $0x60] sm:$0xff] %vm691_vm12, %v660_v15  ;;  %1832 = vst.msk [vmem:[#allocation2 + $0x40] sm:$0xff] %vm691_vm12, %v660_v15  ;;  %v980_v46 = vpop.permute.xlu1 %979  ;;  %v978_v0 = vpop.permute.xlu0 %977 }
 0x137   : > { %2288 = vst.msk [vmem:[#allocation2 + $0x20] sm:$0xff] %vm691_vm12, %v660_v15  ;;  %2744 = vst.msk [vmem:[#allocation2] sm:$0xff] %vm691_vm12, %v660_v15  ;;  %v7399_v51 = vld [vmem:[#allocation2 + $0xe8] sm:$0xff]  ;;  %v1739_v15 = vrot.slane %v7246_v1, 1 }
 0x138   : > { %807 = vst.msk [vmem:[#allocation2 + $0x90] sm:$0xff] %vm797_vm13, %v768_v27  ;;  %1235 = vst.msk [vmem:[#allocation2 + $0x70] sm:$0xff] %vm797_vm13, %v768_v27  ;;  %v7401_v35 = vld [vmem:[#allocation2 + $0xf8] sm:$0xff] }
 0x139   : > { %1860 = vst.msk [vmem:[#allocation2 + $0x50] sm:$0xff] %vm797_vm13, %v768_v27  ;;  %2316 = vst.msk [vmem:[#allocation2 + $0x30] sm:$0xff] %vm797_vm13, %v768_v27  ;;  %v7403_v59 = vld [vmem:[#allocation2 + $0x88] sm:$0xff]  ;;  %v7414_v8 = vld [vmem:[#allocation2 + $0x98] sm:$0xff] }
 0x13a   : > { %2772 = vst.msk [vmem:[#allocation2 + $0x10] sm:$0xff] %vm797_vm13, %v768_v27  ;;  %806 = vst.msk [vmem:[#allocation2 + $0x80] sm:$0xff] %vm797_vm13, %v766_v47  ;;  %v1736_v27 = vrot.slane %v7383_v7, 1 }
 0x13b   : > { %1234 = vst.msk [vmem:[#allocation2 + $0x60] sm:$0xff] %vm797_vm13, %v766_v47  ;;  %1859 = vst.msk [vmem:[#allocation2 + $0x40] sm:$0xff] %vm797_vm13, %v766_v47 }
 0x13c   : > { %2315 = vst.msk [vmem:[#allocation2 + $0x20] sm:$0xff] %vm797_vm13, %v766_v47  ;;  %2771 = vst.msk [vmem:[#allocation2] sm:$0xff] %vm797_vm13, %v766_v47  ;;  %v1764_v47 = vrot.slane %v7239_v2, 2  ;;  %v1738_v17 = vsel %vm284_vm2, %v1736_v27, %v1737_v37  ;;  %v5187_v27 = vld [vmem:[%s10796_s1 + $0x88] sm:$0xff] }
 0x13d   : > { %1939 = vst.msk [vmem:[#allocation2 + $0xe8] sm:$0xff] %vm243_vm0, %v7239_v2  ;;  %1940 = vst.msk [vmem:[#allocation2 + $0xf8] sm:$0xff] %vm243_vm0, %v7246_v1  ;;  %1741 = vrot.lane.b32.xlu0 %v1738_v17, %s6152_s22  ;;  %5218 = vmatprep.mubr.msk.f32.mxu1 %vm243_vm0, %v5187_v27  ;;  %v346_v17 = vpop.permute.xlu0 %345 }
 0x13e   : > { %3307 = vst.msk [vmem:[#allocation2 + $0x88] sm:$0xff] %vm243_vm0, %v7239_v2  ;;  %3308 = vst.msk [vmem:[#allocation2 + $0x98] sm:$0xff] %vm243_vm0, %v7246_v1 }
 0x13f   : > { %913 = vst.msk [vmem:[#allocation2 + $0x90] sm:$0xff] %vm903_vm14, %v874_v19  ;;  %1262 = vst.msk [vmem:[#allocation2 + $0x70] sm:$0xff] %vm903_vm14, %v874_v19 }
 0x140   : > { %1887 = vst.msk [vmem:[#allocation2 + $0x50] sm:$0xff] %vm903_vm14, %v874_v19  ;;  %2343 = vst.msk [vmem:[#allocation2 + $0x30] sm:$0xff] %vm903_vm14, %v874_v19 }
 0x141   : > { %2799 = vst.msk [vmem:[#allocation2 + $0x10] sm:$0xff] %vm903_vm14, %v874_v19  ;;  %912 = vst.msk [vmem:[#allocation2 + $0x80] sm:$0xff] %vm903_vm14, %v872_v39  ;;  %v1740_v19 = vsel %vm284_vm2, %v1737_v37, %v1739_v15  ;;  %v452_v6 = vpop.permute.xlu0 %451 }
 0x142   : > { %1261 = vst.msk [vmem:[#allocation2 + $0x60] sm:$0xff] %vm903_vm14, %v872_v39  ;;  %1886 = vst.msk [vmem:[#allocation2 + $0x40] sm:$0xff] %vm903_vm14, %v872_v39  ;;  %1743 = vrot.lane.b32.xlu1 %v1740_v19, %s6152_s22  ;;  %v1790_v19 = vrot.slane %v7383_v7, 3 }
 0x143   : > { %2342 = vst.msk [vmem:[#allocation2 + $0x20] sm:$0xff] %vm903_vm14, %v872_v39  ;;  %2798 = vst.msk [vmem:[#allocation2] sm:$0xff] %vm903_vm14, %v872_v39  ;;  %v1791_v39 = vrot.slane %v7239_v2, 3 }
 0x144   : > { %1019 = vst.msk [vmem:[#allocation2 + $0x90] sm:$0xff] %vm1009_vm15, %v980_v46  ;;  %1289 = vst.msk [vmem:[#allocation2 + $0x70] sm:$0xff] %vm1009_vm15, %v980_v46  ;;  %v7458_v37 = vld [vmem:[#allocation2 + $0xe8] sm:$0xff]  ;;  %v7460_v15 = vld [vmem:[#allocation2 + $0xf8] sm:$0xff] }
 0x145   : > { %1914 = vst.msk [vmem:[#allocation2 + $0x50] sm:$0xff] %vm1009_vm15, %v980_v46  ;;  %2370 = vst.msk [vmem:[#allocation2 + $0x30] sm:$0xff] %vm1009_vm15, %v980_v46  ;;  %v1794_v42 = vsel %vm496_vm3, %v1791_v39, %v1793_v20  ;;  %v1792_v27 = vsel %vm496_vm3, %v1790_v19, %v1791_v39 }
 0x146   : > { %2826 = vst.msk [vmem:[#allocation2 + $0x10] sm:$0xff] %vm1009_vm15, %v980_v46  ;;  %1018 = vst.msk [vmem:[#allocation2 + $0x80] sm:$0xff] %vm1009_vm15, %v978_v0  ;;  %v1767_v46 = vsel %vm390_vm1, %v1764_v47, %v1766_v26  ;;  %v7474_v26 = vpop.permute.xlu1 %347 }
 0x147   : > { %1288 = vst.msk [vmem:[#allocation2 + $0x60] sm:$0xff] %vm1009_vm15, %v978_v0  ;;  %1913 = vst.msk [vmem:[#allocation2 + $0x40] sm:$0xff] %vm1009_vm15, %v978_v0  ;;  %1770 = vrot.lane.b32.xlu1 %v1767_v46, %s6151_s21  ;;  %v1817_v46 = vrot.slane %v7383_v7, 4 }
 0x148   : > { %2369 = vst.msk [vmem:[#allocation2 + $0x20] sm:$0xff] %vm1009_vm15, %v978_v0  ;;  %2825 = vst.msk [vmem:[#allocation2] sm:$0xff] %vm1009_vm15, %v978_v0  ;;  %v1765_v0 = vsel %vm390_vm1, %v1763_v12, %v1764_v47  ;;  %v1818_v12 = vrot.slane %v7239_v2, 4  ;;  %v1820_v47 = vrot.slane %v7246_v1, 4 }
 0x149   : > { %10926 = vst [vmem:[#allocation51_spill] sm:$0xff] %v7458_v37  ;;  %10927 = vst [vmem:[#allocation52_spill] sm:$0xff] %v7460_v15  ;;  %1768 = vrot.lane.b32.xlu0 %v1765_v0, %s6151_s21 }
 0x14a   : > { %2397 = vst.msk [vmem:[#allocation2 + $0xe8] sm:$0xff] %vm243_vm0, %v7450_v25  ;;  %2398 = vst.msk [vmem:[#allocation2 + $0xf8] sm:$0xff] %vm243_vm0, %v7453_v31  ;;  %v7491_v55 = vpop.permute.xlu1 %453  ;;  %v1821_v56 = vsel %vm602_vm4, %v1818_v12, %v1820_v47  ;;  %v1819_v45 = vsel %vm602_vm4, %v1817_v46, %v1818_v12  ;;  %v1871_v12 = vrot.slane %v7383_v7, 6  ;;  %v10935_v46 = vpack.c.bf16 %v6874_v11, %v6863_v54 }
 0x14b   : > { %385 = vst.msk [vmem:[#allocation2 + $0xb0] sm:$0xff] %vm373_vm9, %v7474_v26  ;;  %384 = vst.msk [vmem:[#allocation2 + $0xa0] sm:$0xff] %vm373_vm9, %v346_v17  ;;  %v7485_v15 = vld [vmem:[#allocation2 + $0x90] sm:$0xff]  ;;  %1797 = vrot.lane.b32.xlu1 %v1794_v42, %s6153_s24 }
 0x14c   : > { %v7487_v37 = vld [vmem:[#allocation2 + $0x50] sm:$0xff]  ;;  %1099 = vst.msk [vmem:[#allocation2 + $0x90] sm:$0xff] %vm243_vm0, %v6362_v34 }
 0x14d   : > { %10928 = vst [vmem:[#allocation53_spill] sm:$0xff] %v7487_v37  ;;  %v7489_v16 = vld [vmem:[#allocation2 + $0x30] sm:$0xff]  ;;  %2180 = vst.msk [vmem:[#allocation2 + $0x50] sm:$0xff] %vm243_vm0, %v6362_v34  ;;  %v7500_v20 = vld [vmem:[#allocation2 + $0x80] sm:$0xff]  ;;  %1795 = vrot.lane.b32.xlu0 %v1792_v27, %s6153_s24 }
 0x14e   : > { %10929 = vst [vmem:[#allocation54_spill] sm:$0xff] %v7489_v16  ;;  %2636 = vst.msk [vmem:[#allocation2 + $0x30] sm:$0xff] %vm243_vm0, %v6362_v34  ;;  %v7502_v0 = vld [vmem:[#allocation2 + $0x40] sm:$0xff]  ;;  %v1328_v30 = vld [vmem:[#allocation2 + $0x70] sm:$0xff] }
 0x14f   : > { %10930 = vst [vmem:[#allocation55_spill] sm:$0xff] %v7502_v0  ;;  %v7504_v39 = vld [vmem:[#allocation2 + $0x20] sm:$0xff]  ;;  %491 = vst.msk [vmem:[#allocation2 + $0xb0] sm:$0xff] %vm479_vm10, %v7491_v55  ;;  %v2859_v47 = vld [vmem:[#allocation2 + $0x10] sm:$0xff]  ;;  %1824 = vrot.lane.b32.xlu1 %v1821_v56, %s6154_s25 }
 0x150   : > { %10931 = vst [vmem:[#allocation56_spill] sm:$0xff] %v7504_v39  ;;  %490 = vst.msk [vmem:[#allocation2 + $0xa0] sm:$0xff] %vm479_vm10, %v452_v6  ;;  %v1326_v19 = vld [vmem:[#allocation2 + $0x60] sm:$0xff] }
 0x151   : > { %1098 = vst.msk [vmem:[#allocation2 + $0x80] sm:$0xff] %vm243_vm0, %v6378_v40  ;;  %2179 = vst.msk [vmem:[#allocation2 + $0x40] sm:$0xff] %vm243_vm0, %v6378_v40  ;;  %v2857_v57 = vld [vmem:[#allocation2] sm:$0xff]  ;;  %v5556_v42 = vpack.c.bf16 %v1328_v30, %v1326_v19  ;;  %v560_v30 = vpop.permute.xlu1 %559  ;;  %v558_v19 = vpop.permute.xlu0 %557  ;;  %1822 = vrot.lane.b32.xlu0 %v1819_v45, %s6154_s25 }
 0x152   : > { %2635 = vst.msk [vmem:[#allocation2 + $0x20] sm:$0xff] %vm243_vm0, %v6378_v40  ;;  %1723 = vst.msk [vmem:[#allocation2 + $0x60] sm:$0xff] %vm243_vm0, %v6378_v40 }
 0x153   : > { %1129 = vst.msk [vmem:[#allocation2 + $0x90] sm:$0xff] %vm373_vm9, %v7474_v26  ;;  %2210 = vst.msk [vmem:[#allocation2 + $0x50] sm:$0xff] %vm373_vm9, %v7474_v26  ;;  %5557 = vmatpush1.bf16.xpose.msra.mxu1 %v5556_v42  ;;  %v1898_v42 = vrot.slane %v7383_v7, 7 }
 0x154   : > { %2666 = vst.msk [vmem:[#allocation2 + $0x30] sm:$0xff] %vm373_vm9, %v7474_v26  ;;  %1128 = vst.msk [vmem:[#allocation2 + $0x80] sm:$0xff] %vm373_vm9, %v346_v17 }
 0x155   : > { %2209 = vst.msk [vmem:[#allocation2 + $0x40] sm:$0xff] %vm373_vm9, %v346_v17  ;;  %2665 = vst.msk [vmem:[#allocation2 + $0x20] sm:$0xff] %vm373_vm9, %v346_v17  ;;  %v666_v56 = vpop.permute.xlu1 %665  ;;  %v664_v45 = vpop.permute.xlu0 %663 }
 0x156   : > { %1156 = vst.msk [vmem:[#allocation2 + $0x90] sm:$0xff] %vm479_vm10, %v7491_v55  ;;  %2237 = vst.msk [vmem:[#allocation2 + $0x50] sm:$0xff] %vm479_vm10, %v7491_v55 }
 0x157   : > { %2693 = vst.msk [vmem:[#allocation2 + $0x30] sm:$0xff] %vm479_vm10, %v7491_v55  ;;  %1155 = vst.msk [vmem:[#allocation2 + $0x80] sm:$0xff] %vm479_vm10, %v452_v6 }
 0x158   : > { %1724 = vst.msk [vmem:[#allocation2 + $0x70] sm:$0xff] %vm243_vm0, %v6362_v34  ;;  %3091 = vst.msk [vmem:[#allocation2] sm:$0xff] %vm243_vm0, %v6378_v40  ;;  %v5701_v40 = vpack.c.bf16 %v2859_v47, %v2857_v57  ;;  %v7580_v57 = vld [vmem:[#allocation2 + $0xb8] sm:$0xff]  ;;  %v7635_v47 = vld [vmem:[%s6249_s11 + $0xf0] sm:$0xff] }
 0x159   : > { %2236 = vst.msk [vmem:[#allocation2 + $0x40] sm:$0xff] %vm479_vm10, %v452_v6  ;;  %2692 = vst.msk [vmem:[#allocation2 + $0x20] sm:$0xff] %vm479_vm10, %v452_v6  ;;  %v770_v54 = vpop.permute.xlu0 %769 }
 0x15a   : > { %1753 = vst.msk [vmem:[#allocation2 + $0x60] sm:$0xff] %vm373_vm9, %v346_v17  ;;  %1754 = vst.msk [vmem:[#allocation2 + $0x70] sm:$0xff] %vm373_vm9, %v7474_v26  ;;  %5702 = vmatpush1.bf16.xpose.msra.mxu0 %v5701_v40 }
 0x15b   : > { %3092 = vst.msk [vmem:[#allocation2 + $0x10] sm:$0xff] %vm243_vm0, %v6362_v34  ;;  %v7578_v34 = vld [vmem:[#allocation2 + $0xa8] sm:$0xff]  ;;  %10933 = vst [vmem:[#allocation58_spill] sm:$0xff] %v7580_v57  ;;  %5705 = vmatprep.subr.msk.bf16.mxu0 %vm6483_vm8, %v10935_v46  ;;  %v2222_v46 = vrot.slane %v7450_v25, 2  ;;  %v2303_v57 = vrot.slane %v7450_v25, 5 }
 0x15c   : > { %3121 = vst.msk [vmem:[#allocation2] sm:$0xff] %vm373_vm9, %v346_v17  ;;  %3122 = vst.msk [vmem:[#allocation2 + $0x10] sm:$0xff] %vm373_vm9, %v7474_v26  ;;  %v1874_v26 = vrot.slane %v7246_v1, 6  ;;  %v10934_v17 = vpack.c.bf16 %v6861_v53, %v6859_v52  ;;  %v1901_v52 = vrot.slane %v7246_v1, 7  ;;  %v772_v53 = vpop.permute.xlu1 %771 }
 0x15d   : > { %1780 = vst.msk [vmem:[#allocation2 + $0x60] sm:$0xff] %vm479_vm10, %v452_v6  ;;  %1781 = vst.msk [vmem:[#allocation2 + $0x70] sm:$0xff] %vm479_vm10, %v7491_v55 }
 0x15e   : > { %3148 = vst.msk [vmem:[#allocation2] sm:$0xff] %vm479_vm10, %v452_v6  ;;  %3149 = vst.msk [vmem:[#allocation2 + $0x10] sm:$0xff] %vm479_vm10, %v7491_v55  ;;  %v1848_v6 = vsel %vm708_vm5, %v1845_v63, %v1847_v61  ;;  %v1872_v55 = vrot.slane %v7239_v2, 6  ;;  %5560 = vmatprep.subr.msk.bf16.mxu1 %vm6483_vm8, %v10934_v17  ;;  %v1846_v61 = vsel %vm708_vm5, %v1844_v3, %v1845_v63  ;;  %v1899_v3 = vrot.slane %v7239_v2, 7 }
 0x15f   : > { %597 = vst.msk [vmem:[#allocation2 + $0xb0] sm:$0xff] %vm585_vm11, %v560_v30  ;;  %1183 = vst.msk [vmem:[#allocation2 + $0x90] sm:$0xff] %vm585_vm11, %v560_v30  ;;  %1851 = vrot.lane.b32.xlu1 %v1848_v6, %s6155_s26  ;;  %1849 = vrot.lane.b32.xlu0 %v1846_v61, %s6155_s26  ;;  %v2195_v6 = vrot.slane %v7450_v25, 1  ;;  %v2194_v61 = vrot.slane %v7635_v47, 1 }
 0x160   : > { %2264 = vst.msk [vmem:[#allocation2 + $0x50] sm:$0xff] %vm585_vm11, %v560_v30  ;;  %2720 = vst.msk [vmem:[#allocation2 + $0x30] sm:$0xff] %vm585_vm11, %v560_v30  ;;  %v1875_v63 = vsel %vm814_vm6, %v1872_v55, %v1874_v26  ;;  %v1873_v11 = vsel %vm814_vm6, %v1871_v12, %v1872_v55  ;;  %v2197_v55 = vrot.slane %v7453_v31, 1  ;;  %v878_v17 = vpop.permute.xlu1 %877 }
 0x161   : > { %596 = vst.msk [vmem:[#allocation2 + $0xa0] sm:$0xff] %vm585_vm11, %v558_v19  ;;  %1182 = vst.msk [vmem:[#allocation2 + $0x80] sm:$0xff] %vm585_vm11, %v558_v19 }
 0x162   : > { %2263 = vst.msk [vmem:[#allocation2 + $0x40] sm:$0xff] %vm585_vm11, %v558_v19  ;;  %2719 = vst.msk [vmem:[#allocation2 + $0x20] sm:$0xff] %vm585_vm11, %v558_v19  ;;  %v2198_v12 = vsel %vm284_vm2, %v2195_v6, %v2197_v55 }
 0x163   : > { %1808 = vst.msk [vmem:[#allocation2 + $0x70] sm:$0xff] %vm585_vm11, %v560_v30  ;;  %1807 = vst.msk [vmem:[#allocation2 + $0x60] sm:$0xff] %vm585_vm11, %v558_v19  ;;  %1878 = vrot.lane.b32.xlu1 %v1875_v63, %s6156_s28  ;;  %1876 = vrot.lane.b32.xlu0 %v1873_v11, %s6156_s28  ;;  %v2224_v63 = vrot.slane %v7453_v31, 2 }
 0x164   : > { %3175 = vst.msk [vmem:[#allocation2] sm:$0xff] %vm585_vm11, %v558_v19  ;;  %10932 = vst [vmem:[#allocation57_spill] sm:$0xff] %v7578_v34  ;;  %v1902_v19 = vsel %vm920_vm7, %v1899_v3, %v1901_v52 }
 0x165   : > { %3176 = vst.msk [vmem:[#allocation2 + $0x10] sm:$0xff] %vm585_vm11, %v560_v30  ;;  %v2225_v11 = vsel %vm390_vm1, %v2222_v46, %v2224_v63 }
 0x166   : > { %2851 = vst.msk [vmem:[#allocation2 + $0xa8] sm:$0xff] %vm243_vm0, %v7239_v2  ;;  %2852 = vst.msk [vmem:[#allocation2 + $0xb8] sm:$0xff] %vm243_vm0, %v7246_v1 }
 0x167   : > { %703 = vst.msk [vmem:[#allocation2 + $0xb0] sm:$0xff] %vm691_vm12, %v666_v56  ;;  %1210 = vst.msk [vmem:[#allocation2 + $0x90] sm:$0xff] %vm691_vm12, %v666_v56  ;;  %1905 = vrot.lane.b32.xlu1 %v1902_v19, %s6157_s29  ;;  %v2251_v19 = vrot.slane %v7453_v31, 3 }
 0x168   : > { %1835 = vst.msk [vmem:[#allocation2 + $0x70] sm:$0xff] %vm691_vm12, %v666_v56  ;;  %2291 = vst.msk [vmem:[#allocation2 + $0x50] sm:$0xff] %vm691_vm12, %v666_v56 }
 0x169   : > { %2747 = vst.msk [vmem:[#allocation2 + $0x30] sm:$0xff] %vm691_vm12, %v666_v56  ;;  %3203 = vst.msk [vmem:[#allocation2 + $0x10] sm:$0xff] %vm691_vm12, %v666_v56  ;;  %v876_v56 = vpop.permute.xlu0 %875 }
 0x16a   : > { %702 = vst.msk [vmem:[#allocation2 + $0xa0] sm:$0xff] %vm691_vm12, %v664_v45  ;;  %1209 = vst.msk [vmem:[#allocation2 + $0x80] sm:$0xff] %vm691_vm12, %v664_v45 }
 0x16b   : > { %1834 = vst.msk [vmem:[#allocation2 + $0x60] sm:$0xff] %vm691_vm12, %v664_v45  ;;  %2290 = vst.msk [vmem:[#allocation2 + $0x40] sm:$0xff] %vm691_vm12, %v664_v45  ;;  %2201 = vrot.lane.b32.xlu1 %v2198_v12, %s6152_s22  ;;  %v2278_v12 = vrot.slane %v7453_v31, 4 }
 0x16c   : > { %2746 = vst.msk [vmem:[#allocation2 + $0x20] sm:$0xff] %vm691_vm12, %v664_v45  ;;  %3202 = vst.msk [vmem:[#allocation2] sm:$0xff] %vm691_vm12, %v664_v45  ;;  %v1900_v45 = vsel %vm920_vm7, %v1898_v42, %v1899_v3  ;;  %v984_v3 = vpop.permute.xlu1 %983  ;;  %v2249_v42 = vrot.slane %v7450_v25, 3 }
 0x16d   : > { %809 = vst.msk [vmem:[#allocation2 + $0xb0] sm:$0xff] %vm797_vm13, %v772_v53  ;;  %1237 = vst.msk [vmem:[#allocation2 + $0x90] sm:$0xff] %vm797_vm13, %v772_v53  ;;  %v7638_v40 = vld [vmem:[#allocation2 + $0xa8] sm:$0xff]  ;;  %v7640_v30 = vld [vmem:[#allocation2 + $0xb8] sm:$0xff]  ;;  %1903 = vrot.lane.b32.xlu0 %v1900_v45, %s6157_s29  ;;  %v982_v52 = vpop.permute.xlu0 %981 }
 0x16e   : > { %1862 = vst.msk [vmem:[#allocation2 + $0x70] sm:$0xff] %vm797_vm13, %v772_v53  ;;  %2318 = vst.msk [vmem:[#allocation2 + $0x50] sm:$0xff] %vm797_vm13, %v772_v53  ;;  %v2252_v45 = vsel %vm496_vm3, %v2249_v42, %v2251_v19 }
 0x16f   : > { %2774 = vst.msk [vmem:[#allocation2 + $0x30] sm:$0xff] %vm797_vm13, %v772_v53  ;;  %3230 = vst.msk [vmem:[#allocation2 + $0x10] sm:$0xff] %vm797_vm13, %v772_v53  ;;  %v2196_v53 = vsel %vm284_vm2, %v2194_v61, %v2195_v6  ;;  %2228 = vrot.lane.b32.xlu1 %v2225_v11, %s6151_s21  ;;  %v2276_v61 = vrot.slane %v7450_v25, 4  ;;  %v2275_v11 = vrot.slane %v7635_v47, 4 }
 0x170   : > { %808 = vst.msk [vmem:[#allocation2 + $0xa0] sm:$0xff] %vm797_vm13, %v770_v54  ;;  %1236 = vst.msk [vmem:[#allocation2 + $0x80] sm:$0xff] %vm797_vm13, %v770_v54  ;;  %v7690_v6 = vpop.permute.xlu1 %351 }
 0x171   : > { %1861 = vst.msk [vmem:[#allocation2 + $0x60] sm:$0xff] %vm797_vm13, %v770_v54  ;;  %2317 = vst.msk [vmem:[#allocation2 + $0x40] sm:$0xff] %vm797_vm13, %v770_v54  ;;  %2199 = vrot.lane.b32.xlu0 %v2196_v53, %s6152_s22  ;;  %v7692_v55 = vpop.permute.xlu0 %349  ;;  %v2279_v34 = vsel %vm602_vm4, %v2276_v61, %v2278_v12 }
 0x172   : > { %2773 = vst.msk [vmem:[#allocation2 + $0x20] sm:$0xff] %vm797_vm13, %v770_v54  ;;  %3229 = vst.msk [vmem:[#allocation2] sm:$0xff] %vm797_vm13, %v770_v54  ;;  %v2221_v54 = vrot.slane %v7635_v47, 2 }
 0x173   : > { %3309 = vst.msk [vmem:[#allocation2 + $0xa8] sm:$0xff] %vm243_vm0, %v7450_v25  ;;  %3310 = vst.msk [vmem:[#allocation2 + $0xb8] sm:$0xff] %vm243_vm0, %v7453_v31  ;;  %2255 = vrot.lane.b32.xlu1 %v2252_v45, %s6153_s24 }
 0x174   : > { %915 = vst.msk [vmem:[#allocation2 + $0xb0] sm:$0xff] %vm903_vm14, %v878_v17  ;;  %1889 = vst.msk [vmem:[#allocation2 + $0x70] sm:$0xff] %vm903_vm14, %v878_v17 }
 0x175   : > { %2345 = vst.msk [vmem:[#allocation2 + $0x50] sm:$0xff] %vm903_vm14, %v878_v17  ;;  %3257 = vst.msk [vmem:[#allocation2 + $0x10] sm:$0xff] %vm903_vm14, %v878_v17  ;;  %v7713_v53 = vpop.permute.xlu0 %455 }
 0x176   : > { %1264 = vst.msk [vmem:[#allocation2 + $0x90] sm:$0xff] %vm903_vm14, %v878_v17  ;;  %2801 = vst.msk [vmem:[#allocation2 + $0x30] sm:$0xff] %vm903_vm14, %v878_v17  ;;  %v2223_v17 = vsel %vm390_vm1, %v2221_v54, %v2222_v46 }
 0x177   : > { %914 = vst.msk [vmem:[#allocation2 + $0xa0] sm:$0xff] %vm903_vm14, %v876_v56  ;;  %1888 = vst.msk [vmem:[#allocation2 + $0x60] sm:$0xff] %vm903_vm14, %v876_v56  ;;  %2226 = vrot.lane.b32.xlu0 %v2223_v17, %s6151_s21  ;;  %2282 = vrot.lane.b32.xlu1 %v2279_v34, %s6154_s25  ;;  %v10943_v34 = vpack.c.bf16 %v7011_v43, %v7009_v36  ;;  %v2329_v36 = vrot.slane %v7635_v47, 6  ;;  %v10945_v43 = vpack.c.bf16 %v7024_v62, %v7013_v44 }
 0x178   : > { %2344 = vst.msk [vmem:[#allocation2 + $0x40] sm:$0xff] %vm903_vm14, %v876_v56  ;;  %3256 = vst.msk [vmem:[#allocation2] sm:$0xff] %vm903_vm14, %v876_v56  ;;  %v2357_v62 = vrot.slane %v7450_v25, 7 }
 0x179   : > { %1263 = vst.msk [vmem:[#allocation2 + $0x80] sm:$0xff] %vm903_vm14, %v876_v56  ;;  %2800 = vst.msk [vmem:[#allocation2 + $0x20] sm:$0xff] %vm903_vm14, %v876_v56  ;;  %v2248_v56 = vrot.slane %v7635_v47, 3 }
 0x17a   : > { %1021 = vst.msk [vmem:[#allocation2 + $0xb0] sm:$0xff] %vm1009_vm15, %v984_v3  ;;  %1916 = vst.msk [vmem:[#allocation2 + $0x70] sm:$0xff] %vm1009_vm15, %v984_v3 }
 0x17b   : > { %2372 = vst.msk [vmem:[#allocation2 + $0x50] sm:$0xff] %vm1009_vm15, %v984_v3  ;;  %3284 = vst.msk [vmem:[#allocation2 + $0x10] sm:$0xff] %vm1009_vm15, %v984_v3  ;;  %v2250_v54 = vsel %vm496_vm3, %v2248_v56, %v2249_v42 }
 0x17c   : > { %1291 = vst.msk [vmem:[#allocation2 + $0x90] sm:$0xff] %vm1009_vm15, %v984_v3  ;;  %2828 = vst.msk [vmem:[#allocation2 + $0x30] sm:$0xff] %vm1009_vm15, %v984_v3  ;;  %2253 = vrot.lane.b32.xlu0 %v2250_v54, %s6153_s24 }
 0x17d   : > { %1020 = vst.msk [vmem:[#allocation2 + $0xa0] sm:$0xff] %vm1009_vm15, %v982_v52  ;;  %1915 = vst.msk [vmem:[#allocation2 + $0x60] sm:$0xff] %vm1009_vm15, %v982_v52 }
 0x17e   : > { %2371 = vst.msk [vmem:[#allocation2 + $0x40] sm:$0xff] %vm1009_vm15, %v982_v52  ;;  %3283 = vst.msk [vmem:[#allocation2] sm:$0xff] %vm1009_vm15, %v982_v52 }
 0x17f   : > { %1290 = vst.msk [vmem:[#allocation2 + $0x80] sm:$0xff] %vm1009_vm15, %v982_v52  ;;  %2827 = vst.msk [vmem:[#allocation2 + $0x20] sm:$0xff] %vm1009_vm15, %v982_v52  ;;  %v7711_v52 = vpop.permute.xlu1 %457 }
 0x180   : > { %387 = vst.msk [vmem:[#allocation2 + $0xd0] sm:$0xff] %vm373_vm9, %v7690_v6  ;;  %386 = vst.msk [vmem:[#allocation2 + $0xc0] sm:$0xff] %vm373_vm9, %v7692_v55 }
 0x181   : > { %v7705_v63 = vld [vmem:[#allocation2 + $0xb0] sm:$0xff]  ;;  %493 = vst.msk [vmem:[#allocation2 + $0xd0] sm:$0xff] %vm479_vm10, %v7711_v52  ;;  %492 = vst.msk [vmem:[#allocation2 + $0xc0] sm:$0xff] %vm479_vm10, %v7713_v53 }
 0x182   : > { %v7707_v46 = vld [vmem:[#allocation2 + $0x70] sm:$0xff]  ;;  %1101 = vst.msk [vmem:[#allocation2 + $0xb0] sm:$0xff] %vm243_vm0, %v6428_v10 }
 0x183   : > { %10936 = vst [vmem:[#allocation59_spill] sm:$0xff] %v7707_v46  ;;  %v7709_v3 = vld [vmem:[#allocation2 + $0x50] sm:$0xff]  ;;  %2182 = vst.msk [vmem:[#allocation2 + $0x70] sm:$0xff] %vm243_vm0, %v6428_v10  ;;  %v564_v54 = vpop.permute.xlu1 %563 }
 0x184   : > { %10937 = vst [vmem:[#allocation60_spill] sm:$0xff] %v7709_v3  ;;  %2638 = vst.msk [vmem:[#allocation2 + $0x50] sm:$0xff] %vm243_vm0, %v6428_v10  ;;  %v7723_v19 = vld [vmem:[#allocation2 + $0xa0] sm:$0xff]  ;;  %v1332_v56 = vld [vmem:[#allocation2 + $0x90] sm:$0xff]  ;;  %v2302_v3 = vrot.slane %v7635_v47, 5 }
 0x185   : > { %v7725_v17 = vld [vmem:[#allocation2 + $0x60] sm:$0xff]  ;;  %1100 = vst.msk [vmem:[#allocation2 + $0xa0] sm:$0xff] %vm243_vm0, %v6444_v23  ;;  %1726 = vst.msk [vmem:[#allocation2 + $0x90] sm:$0xff] %vm243_vm0, %v6428_v10  ;;  %v2863_v39 = vld [vmem:[#allocation2 + $0x30] sm:$0xff] }
 0x186   : > { %10938 = vst [vmem:[#allocation61_spill] sm:$0xff] %v7725_v17  ;;  %v7727_v27 = vld [vmem:[#allocation2 + $0x40] sm:$0xff]  ;;  %2181 = vst.msk [vmem:[#allocation2 + $0x60] sm:$0xff] %vm243_vm0, %v6444_v23  ;;  %v7792_v17 = vld [vmem:[#allocation2 + $0x10] sm:$0xff] }
 0x187   : > { %10939 = vst [vmem:[#allocation62_spill] sm:$0xff] %v7727_v27  ;;  %2637 = vst.msk [vmem:[#allocation2 + $0x40] sm:$0xff] %vm243_vm0, %v6444_v23  ;;  %v1330_v42 = vld [vmem:[#allocation2 + $0x80] sm:$0xff]  ;;  %v2305_v27 = vrot.slane %v7453_v31, 5 }
 0x188   : > { %1131 = vst.msk [vmem:[#allocation2 + $0xb0] sm:$0xff] %vm373_vm9, %v7690_v6  ;;  %2212 = vst.msk [vmem:[#allocation2 + $0x70] sm:$0xff] %vm373_vm9, %v7690_v6  ;;  %v2861_v26 = vld [vmem:[#allocation2 + $0x20] sm:$0xff]  ;;  %v5561_v45 = vpack.c.bf16 %v1332_v56, %v1330_v42  ;;  %v562_v42 = vpop.permute.xlu0 %561  ;;  %v2277_v56 = vsel %vm602_vm4, %v2275_v11, %v2276_v61  ;;  %v2330_v61 = vrot.slane %v7450_v25, 6  ;;  %v2332_v11 = vrot.slane %v7453_v31, 6 }
 0x189   : > { %2668 = vst.msk [vmem:[#allocation2 + $0x50] sm:$0xff] %vm373_vm9, %v7690_v6  ;;  %1130 = vst.msk [vmem:[#allocation2 + $0xa0] sm:$0xff] %vm373_vm9, %v7692_v55  ;;  %v5706_v12 = vpack.c.bf16 %v2863_v39, %v2861_v26  ;;  %v7790_v16 = vld [vmem:[#allocation2] sm:$0xff]  ;;  %v7822_v26 = vld [vmem:[#allocation2 + $0xc8] sm:$0xff]  ;;  %2280 = vrot.lane.b32.xlu0 %v2277_v56, %s6154_s25 }
 0x18a   : > { %2211 = vst.msk [vmem:[#allocation2 + $0x60] sm:$0xff] %vm373_vm9, %v7692_v55  ;;  %2667 = vst.msk [vmem:[#allocation2 + $0x40] sm:$0xff] %vm373_vm9, %v7692_v55  ;;  %5562 = vmatpush1.bf16.xpose.msra.mxu1 %v5561_v45  ;;  %v2304_v45 = vsel %vm708_vm5, %v2302_v3, %v2303_v57  ;;  %v2333_v44 = vsel %vm814_vm6, %v2330_v61, %v2332_v11  ;;  %v7897_v56 = vld [vmem:[%s6249_s11 + $0x108] sm:$0xff] }
 0x18b   : > { %1158 = vst.msk [vmem:[#allocation2 + $0xb0] sm:$0xff] %vm479_vm10, %v7711_v52  ;;  %2239 = vst.msk [vmem:[#allocation2 + $0x70] sm:$0xff] %vm479_vm10, %v7711_v52  ;;  %5707 = vmatpush1.bf16.xpose.msra.mxu0 %v5706_v12  ;;  %5565 = vmatprep.subr.msk.bf16.mxu1 %vm6483_vm8, %v10943_v34  ;;  %v2356_v12 = vrot.slane %v7635_v47, 7  ;;  %v2679_v39 = vrot.slane %v7897_v56, 2 }
 0x18c   : > { %2695 = vst.msk [vmem:[#allocation2 + $0x50] sm:$0xff] %vm479_vm10, %v7711_v52  ;;  %1157 = vst.msk [vmem:[#allocation2 + $0xa0] sm:$0xff] %vm479_vm10, %v7713_v53  ;;  %5710 = vmatprep.subr.msk.bf16.mxu0 %vm6483_vm8, %v10945_v43  ;;  %v2652_v43 = vrot.slane %v7897_v56, 1 }
 0x18d   : > { %1725 = vst.msk [vmem:[#allocation2 + $0x80] sm:$0xff] %vm243_vm0, %v6444_v23  ;;  %3093 = vst.msk [vmem:[#allocation2 + $0x20] sm:$0xff] %vm243_vm0, %v6444_v23  ;;  %2307 = vrot.lane.b32.xlu0 %v2304_v45, %s6155_s26 }
 0x18e   : > { %2238 = vst.msk [vmem:[#allocation2 + $0x60] sm:$0xff] %vm479_vm10, %v7713_v53  ;;  %2694 = vst.msk [vmem:[#allocation2 + $0x40] sm:$0xff] %vm479_vm10, %v7713_v53 }
 0x18f   : > { %1755 = vst.msk [vmem:[#allocation2 + $0x80] sm:$0xff] %vm373_vm9, %v7692_v55  ;;  %1756 = vst.msk [vmem:[#allocation2 + $0x90] sm:$0xff] %vm373_vm9, %v7690_v6 }
 0x190   : > { %3094 = vst.msk [vmem:[#allocation2 + $0x30] sm:$0xff] %vm243_vm0, %v6428_v10  ;;  %10940 = vst [vmem:[#allocation63_spill] sm:$0xff] %v7790_v16 }
 0x191   : > { %3123 = vst.msk [vmem:[#allocation2 + $0x20] sm:$0xff] %vm373_vm9, %v7692_v55  ;;  %10941 = vst [vmem:[#allocation64_spill] sm:$0xff] %v7792_v17  ;;  %v2760_v17 = vrot.slane %v7897_v56, 5 }
 0x192   : > { %1782 = vst.msk [vmem:[#allocation2 + $0x80] sm:$0xff] %vm479_vm10, %v7713_v53  ;;  %1783 = vst.msk [vmem:[#allocation2 + $0x90] sm:$0xff] %vm479_vm10, %v7711_v52 }
 0x193   : > { %3124 = vst.msk [vmem:[#allocation2 + $0x30] sm:$0xff] %vm373_vm9, %v7690_v6  ;;  %10942 = vst [vmem:[#allocation65_spill] sm:$0xff] %v7822_v26 }
 0x194   : > { %3150 = vst.msk [vmem:[#allocation2 + $0x20] sm:$0xff] %vm479_vm10, %v7713_v53  ;;  %3151 = vst.msk [vmem:[#allocation2 + $0x30] sm:$0xff] %vm479_vm10, %v7711_v52 }
 0x195   : > { %599 = vst.msk [vmem:[#allocation2 + $0xd0] sm:$0xff] %vm585_vm11, %v564_v54  ;;  %1185 = vst.msk [vmem:[#allocation2 + $0xb0] sm:$0xff] %vm585_vm11, %v564_v54 }
 0x196   : > { %2266 = vst.msk [vmem:[#allocation2 + $0x70] sm:$0xff] %vm585_vm11, %v564_v54  ;;  %2722 = vst.msk [vmem:[#allocation2 + $0x50] sm:$0xff] %vm585_vm11, %v564_v54 }
 0x197   : > { %598 = vst.msk [vmem:[#allocation2 + $0xc0] sm:$0xff] %vm585_vm11, %v562_v42  ;;  %1184 = vst.msk [vmem:[#allocation2 + $0xa0] sm:$0xff] %vm585_vm11, %v562_v42 }
 0x198   : > { %2265 = vst.msk [vmem:[#allocation2 + $0x60] sm:$0xff] %vm585_vm11, %v562_v42  ;;  %2721 = vst.msk [vmem:[#allocation2 + $0x40] sm:$0xff] %vm585_vm11, %v562_v42 }
 0x199   : > { %3549 = vst.msk [vmem:[#allocation2] sm:$0xff] %vm243_vm0, %v6444_v23  ;;  %3550 = vst.msk [vmem:[#allocation2 + $0x10] sm:$0xff] %vm243_vm0, %v6428_v10  ;;  %v2306_v23 = vsel %vm708_vm5, %v2303_v57, %v2305_v27  ;;  %v670_v27 = vpop.permute.xlu1 %669  ;;  %v2359_v57 = vrot.slane %v7453_v31, 7 }
 0x19a   : > { %1810 = vst.msk [vmem:[#allocation2 + $0x90] sm:$0xff] %vm585_vm11, %v564_v54  ;;  %1809 = vst.msk [vmem:[#allocation2 + $0x80] sm:$0xff] %vm585_vm11, %v562_v42  ;;  %2309 = vrot.lane.b32.xlu1 %v2306_v23, %s6155_s26 }
 0x19b   : > { %3177 = vst.msk [vmem:[#allocation2 + $0x20] sm:$0xff] %vm585_vm11, %v562_v42  ;;  %3178 = vst.msk [vmem:[#allocation2 + $0x30] sm:$0xff] %vm585_vm11, %v564_v54 }
 0x19c   : > { %3579 = vst.msk [vmem:[#allocation2] sm:$0xff] %vm373_vm9, %v7692_v55  ;;  %3580 = vst.msk [vmem:[#allocation2 + $0x10] sm:$0xff] %vm373_vm9, %v7690_v6  ;;  %v7838_v55 = vld [vmem:[#allocation2 + $0xd8] sm:$0xff]  ;;  %v668_v6 = vpop.permute.xlu0 %667 }
 0x19d   : > { %10944 = vst [vmem:[#allocation66_spill] sm:$0xff] %v7838_v55  ;;  %2853 = vst.msk [vmem:[#allocation2 + $0xc8] sm:$0xff] %vm243_vm0, %v7450_v25  ;;  %v776_v3 = vpop.permute.xlu1 %775  ;;  %v2733_v55 = vrot.slane %v7897_v56, 4 }
 0x19e   : > { %3606 = vst.msk [vmem:[#allocation2] sm:$0xff] %vm479_vm10, %v7713_v53  ;;  %3607 = vst.msk [vmem:[#allocation2 + $0x10] sm:$0xff] %vm479_vm10, %v7711_v52  ;;  %v2331_v53 = vsel %vm814_vm6, %v2329_v36, %v2330_v61  ;;  %2336 = vrot.lane.b32.xlu1 %v2333_v44, %s6156_s28  ;;  %v2360_v61 = vsel %vm920_vm7, %v2357_v62, %v2359_v57  ;;  %v2358_v36 = vsel %vm920_vm7, %v2356_v12, %v2357_v62 }
 0x19f   : > { %2854 = vst.msk [vmem:[#allocation2 + $0xd8] sm:$0xff] %vm243_vm0, %v7453_v31  ;;  %2334 = vrot.lane.b32.xlu0 %v2331_v53, %s6156_s28 }
 0x1a0   : > { %3633 = vst.msk [vmem:[#allocation2] sm:$0xff] %vm585_vm11, %v562_v42  ;;  %3634 = vst.msk [vmem:[#allocation2 + $0x10] sm:$0xff] %vm585_vm11, %v564_v54  ;;  %v774_v52 = vpop.permute.xlu0 %773  ;;  %v7879_v54 = vld [vmem:[%s6249_s11 + $0x110] sm:$0xff]  ;;  %v7882_v42 = vld [vmem:[%s6249_s11 + $0x118] sm:$0xff] }
 0x1a1   : > { %705 = vst.msk [vmem:[#allocation2 + $0xd0] sm:$0xff] %vm691_vm12, %v670_v27  ;;  %1837 = vst.msk [vmem:[#allocation2 + $0x90] sm:$0xff] %vm691_vm12, %v670_v27  ;;  %v2653_v11 = vrot.slane %v7879_v54, 1  ;;  %v2655_v34 = vrot.slane %v7882_v42, 1  ;;  %v2680_v57 = vrot.slane %v7879_v54, 2  ;;  %v2763_v0 = vrot.slane %v7882_v42, 5 }
 0x1a2   : > { %2293 = vst.msk [vmem:[#allocation2 + $0x70] sm:$0xff] %vm691_vm12, %v670_v27  ;;  %3205 = vst.msk [vmem:[#allocation2 + $0x30] sm:$0xff] %vm691_vm12, %v670_v27  ;;  %2363 = vrot.lane.b32.xlu1 %v2360_v61, %s6157_s29 }
 0x1a3   : > { %1212 = vst.msk [vmem:[#allocation2 + $0xb0] sm:$0xff] %vm691_vm12, %v670_v27  ;;  %2749 = vst.msk [vmem:[#allocation2 + $0x50] sm:$0xff] %vm691_vm12, %v670_v27  ;;  %2361 = vrot.lane.b32.xlu0 %v2358_v36, %s6157_s29  ;;  %v2656_v62 = vsel %vm284_vm2, %v2653_v11, %v2655_v34  ;;  %v2654_v12 = vsel %vm284_vm2, %v2652_v43, %v2653_v11  ;;  %v2707_v11 = vrot.slane %v7879_v54, 3  ;;  %v2709_v34 = vrot.slane %v7882_v42, 3 }
 0x1a4   : > { %704 = vst.msk [vmem:[#allocation2 + $0xc0] sm:$0xff] %vm691_vm12, %v668_v6  ;;  %1836 = vst.msk [vmem:[#allocation2 + $0x80] sm:$0xff] %vm691_vm12, %v668_v6  ;;  %v7902_v23 = vld [vmem:[#allocation2 + $0xc8] sm:$0xff]  ;;  %v880_v45 = vpop.permute.xlu0 %879  ;;  %v2681_v36 = vsel %vm390_vm1, %v2679_v39, %v2680_v57  ;;  %v2706_v43 = vrot.slane %v7897_v56, 3 }
 0x1a5   : > { %2292 = vst.msk [vmem:[#allocation2 + $0x60] sm:$0xff] %vm691_vm12, %v668_v6  ;;  %3204 = vst.msk [vmem:[#allocation2 + $0x20] sm:$0xff] %vm691_vm12, %v668_v6 }
 0x1a6   : > { %1211 = vst.msk [vmem:[#allocation2 + $0xa0] sm:$0xff] %vm691_vm12, %v668_v6  ;;  %2748 = vst.msk [vmem:[#allocation2 + $0x40] sm:$0xff] %vm691_vm12, %v668_v6  ;;  %2659 = vrot.lane.b32.xlu1 %v2656_v62, %s6152_s22  ;;  %v2734_v62 = vrot.slane %v7879_v54, 4 }
 0x1a7   : > { %3660 = vst.msk [vmem:[#allocation2] sm:$0xff] %vm691_vm12, %v668_v6  ;;  %3661 = vst.msk [vmem:[#allocation2 + $0x10] sm:$0xff] %vm691_vm12, %v670_v27  ;;  %v7908_v27 = vld [vmem:[#allocation2 + $0xd8] sm:$0xff]  ;;  %v882_v6 = vpop.permute.xlu1 %881  ;;  %2657 = vrot.lane.b32.xlu0 %v2654_v12, %s6152_s22 }
 0x1a8   : > { %811 = vst.msk [vmem:[#allocation2 + $0xd0] sm:$0xff] %vm797_vm13, %v776_v3  ;;  %1864 = vst.msk [vmem:[#allocation2 + $0x90] sm:$0xff] %vm797_vm13, %v776_v3  ;;  %v986_v53 = vpop.permute.xlu0 %985  ;;  %v2735_v37 = vsel %vm602_vm4, %v2733_v55, %v2734_v62 }
 0x1a9   : > { %2320 = vst.msk [vmem:[#allocation2 + $0x70] sm:$0xff] %vm797_vm13, %v776_v3  ;;  %3232 = vst.msk [vmem:[#allocation2 + $0x30] sm:$0xff] %vm797_vm13, %v776_v3 }
 0x1aa   : > { %1239 = vst.msk [vmem:[#allocation2 + $0xb0] sm:$0xff] %vm797_vm13, %v776_v3  ;;  %2776 = vst.msk [vmem:[#allocation2 + $0x50] sm:$0xff] %vm797_vm13, %v776_v3 }
 0x1ab   : > { %810 = vst.msk [vmem:[#allocation2 + $0xc0] sm:$0xff] %vm797_vm13, %v774_v52  ;;  %1863 = vst.msk [vmem:[#allocation2 + $0x80] sm:$0xff] %vm797_vm13, %v774_v52  ;;  %2684 = vrot.lane.b32.xlu0 %v2681_v36, %s6151_s21 }
 0x1ac   : > { %2319 = vst.msk [vmem:[#allocation2 + $0x60] sm:$0xff] %vm797_vm13, %v774_v52  ;;  %3231 = vst.msk [vmem:[#allocation2 + $0x20] sm:$0xff] %vm797_vm13, %v774_v52 }
 0x1ad   : > { %1238 = vst.msk [vmem:[#allocation2 + $0xa0] sm:$0xff] %vm797_vm13, %v774_v52  ;;  %2775 = vst.msk [vmem:[#allocation2 + $0x40] sm:$0xff] %vm797_vm13, %v774_v52 }
 0x1ae   : > { %3687 = vst.msk [vmem:[#allocation2] sm:$0xff] %vm797_vm13, %v774_v52  ;;  %3688 = vst.msk [vmem:[#allocation2 + $0x10] sm:$0xff] %vm797_vm13, %v776_v3  ;;  %v2682_v3 = vrot.slane %v7882_v42, 2  ;;  %v988_v52 = vpop.permute.xlu1 %987 }
 0x1af   : > { %3311 = vst.msk [vmem:[#allocation2 + $0xc8] sm:$0xff] %vm243_vm0, %v7879_v54  ;;  %3312 = vst.msk [vmem:[#allocation2 + $0xd8] sm:$0xff] %vm243_vm0, %v7882_v42 }
 0x1b0   : > { %917 = vst.msk [vmem:[#allocation2 + $0xd0] sm:$0xff] %vm903_vm14, %v882_v6  ;;  %1891 = vst.msk [vmem:[#allocation2 + $0x90] sm:$0xff] %vm903_vm14, %v882_v6  ;;  %v2683_v61 = vsel %vm390_vm1, %v2680_v57, %v2682_v3  ;;  %v2736_v3 = vrot.slane %v7882_v42, 4 }
 0x1b1   : > { %2347 = vst.msk [vmem:[#allocation2 + $0x70] sm:$0xff] %vm903_vm14, %v882_v6  ;;  %1266 = vst.msk [vmem:[#allocation2 + $0xb0] sm:$0xff] %vm903_vm14, %v882_v6  ;;  %2686 = vrot.lane.b32.xlu1 %v2683_v61, %s6151_s21  ;;  %v2708_v61 = vsel %vm496_vm3, %v2706_v43, %v2707_v11 }
 0x1b2   : > { %2803 = vst.msk [vmem:[#allocation2 + $0x50] sm:$0xff] %vm903_vm14, %v882_v6  ;;  %3259 = vst.msk [vmem:[#allocation2 + $0x30] sm:$0xff] %vm903_vm14, %v882_v6  ;;  %v2737_v16 = vsel %vm602_vm4, %v2734_v62, %v2736_v3  ;;  %2711 = vrot.lane.b32.xlu0 %v2708_v61, %s6153_s24  ;;  %v8103_v62 = vld [vmem:[#allocation2 + $0xe8] sm:$0xff] }
 0x1b3   : > { %916 = vst.msk [vmem:[#allocation2 + $0xc0] sm:$0xff] %vm903_vm14, %v880_v45  ;;  %1890 = vst.msk [vmem:[#allocation2 + $0x80] sm:$0xff] %vm903_vm14, %v880_v45 }
 0x1b4   : > { %2346 = vst.msk [vmem:[#allocation2 + $0x60] sm:$0xff] %vm903_vm14, %v880_v45  ;;  %1265 = vst.msk [vmem:[#allocation2 + $0xa0] sm:$0xff] %vm903_vm14, %v880_v45 }
 0x1b5   : > { %2802 = vst.msk [vmem:[#allocation2 + $0x40] sm:$0xff] %vm903_vm14, %v880_v45  ;;  %3258 = vst.msk [vmem:[#allocation2 + $0x20] sm:$0xff] %vm903_vm14, %v880_v45 }
 0x1b6   : > { %3714 = vst.msk [vmem:[#allocation2] sm:$0xff] %vm903_vm14, %v880_v45  ;;  %3715 = vst.msk [vmem:[#allocation2 + $0x10] sm:$0xff] %vm903_vm14, %v882_v6  ;;  %v7958_v6 = vpop.permute.xlu1 %355  ;;  %v7960_v45 = vpop.permute.xlu0 %353  ;;  %2738 = vrot.lane.b32.xlu0 %v2735_v37, %s6154_s25 }
 0x1b7   : > { %1023 = vst.msk [vmem:[#allocation2 + $0xd0] sm:$0xff] %vm1009_vm15, %v988_v52  ;;  %1918 = vst.msk [vmem:[#allocation2 + $0x90] sm:$0xff] %vm1009_vm15, %v988_v52 }
 0x1b8   : > { %2374 = vst.msk [vmem:[#allocation2 + $0x70] sm:$0xff] %vm1009_vm15, %v988_v52  ;;  %1293 = vst.msk [vmem:[#allocation2 + $0xb0] sm:$0xff] %vm1009_vm15, %v988_v52 }
 0x1b9   : > { %2830 = vst.msk [vmem:[#allocation2 + $0x50] sm:$0xff] %vm1009_vm15, %v988_v52  ;;  %3286 = vst.msk [vmem:[#allocation2 + $0x30] sm:$0xff] %vm1009_vm15, %v988_v52 }
 0x1ba   : > { %1022 = vst.msk [vmem:[#allocation2 + $0xc0] sm:$0xff] %vm1009_vm15, %v986_v53  ;;  %1917 = vst.msk [vmem:[#allocation2 + $0x80] sm:$0xff] %vm1009_vm15, %v986_v53  ;;  %v7979_v12 = vpop.permute.xlu1 %461  ;;  %v7981_v44 = vpop.permute.xlu0 %459 }
 0x1bb   : > { %2373 = vst.msk [vmem:[#allocation2 + $0x60] sm:$0xff] %vm1009_vm15, %v986_v53  ;;  %1292 = vst.msk [vmem:[#allocation2 + $0xa0] sm:$0xff] %vm1009_vm15, %v986_v53 }
 0x1bc   : > { %2829 = vst.msk [vmem:[#allocation2 + $0x40] sm:$0xff] %vm1009_vm15, %v986_v53  ;;  %3285 = vst.msk [vmem:[#allocation2 + $0x20] sm:$0xff] %vm1009_vm15, %v986_v53 }
 0x1bd   : > { %3741 = vst.msk [vmem:[#allocation2] sm:$0xff] %vm1009_vm15, %v986_v53  ;;  %3742 = vst.msk [vmem:[#allocation2 + $0x10] sm:$0xff] %vm1009_vm15, %v988_v52  ;;  %v2710_v52 = vsel %vm496_vm3, %v2707_v11, %v2709_v34 }
 0x1be   : > { %389 = vst.msk [vmem:[#allocation2 + $0xf0] sm:$0xff] %vm373_vm9, %v7958_v6  ;;  %388 = vst.msk [vmem:[#allocation2 + $0xe0] sm:$0xff] %vm373_vm9, %v7960_v45  ;;  %v7973_v53 = vld [vmem:[#allocation2 + $0xd0] sm:$0xff]  ;;  %2713 = vrot.lane.b32.xlu1 %v2710_v52, %s6153_s24 }
 0x1bf   : > { %v7975_v39 = vld [vmem:[#allocation2 + $0x90] sm:$0xff]  ;;  %1103 = vst.msk [vmem:[#allocation2 + $0xd0] sm:$0xff] %vm243_vm0, %v6526_v14  ;;  %10954 = vst [vmem:[#allocation75_spill] sm:$0xff] %v8103_v62 }
 0x1c0   : > { %10946 = vst [vmem:[#allocation67_spill] sm:$0xff] %v7975_v39  ;;  %v7977_v57 = vld [vmem:[#allocation2 + $0x70] sm:$0xff]  ;;  %2184 = vst.msk [vmem:[#allocation2 + $0x90] sm:$0xff] %vm243_vm0, %v6526_v14 }
 0x1c1   : > { %10947 = vst [vmem:[#allocation68_spill] sm:$0xff] %v7977_v57  ;;  %2640 = vst.msk [vmem:[#allocation2 + $0x70] sm:$0xff] %vm243_vm0, %v6526_v14  ;;  %v7991_v34 = vld [vmem:[#allocation2 + $0xc0] sm:$0xff]  ;;  %v1336_v43 = vld [vmem:[#allocation2 + $0xb0] sm:$0xff] }
 0x1c2   : > { %v7993_v36 = vld [vmem:[#allocation2 + $0x80] sm:$0xff]  ;;  %495 = vst.msk [vmem:[#allocation2 + $0xf0] sm:$0xff] %vm479_vm10, %v7979_v12  ;;  %494 = vst.msk [vmem:[#allocation2 + $0xe0] sm:$0xff] %vm479_vm10, %v7981_v44  ;;  %v2867_v52 = vld [vmem:[#allocation2 + $0x50] sm:$0xff]  ;;  %2740 = vrot.lane.b32.xlu1 %v2737_v16, %s6154_s25 }
 0x1c3   : > { %10948 = vst [vmem:[#allocation69_spill] sm:$0xff] %v7993_v36  ;;  %v7995_v26 = vld [vmem:[#allocation2 + $0x60] sm:$0xff]  ;;  %1102 = vst.msk [vmem:[#allocation2 + $0xc0] sm:$0xff] %vm243_vm0, %v6532_v21  ;;  %v8062_v57 = vld [vmem:[#allocation2 + $0x30] sm:$0xff] }
 0x1c4   : > { %10949 = vst [vmem:[#allocation70_spill] sm:$0xff] %v7995_v26  ;;  %2183 = vst.msk [vmem:[#allocation2 + $0x80] sm:$0xff] %vm243_vm0, %v6532_v21  ;;  %v1334_v11 = vld [vmem:[#allocation2 + $0xa0] sm:$0xff]  ;;  %v8092_v55 = vld [vmem:[#allocation2 + $0x10] sm:$0xff] }
 0x1c5   : > { %2639 = vst.msk [vmem:[#allocation2 + $0x60] sm:$0xff] %vm243_vm0, %v6532_v21  ;;  %v2865_v46 = vld [vmem:[#allocation2 + $0x40] sm:$0xff]  ;;  %v5566_v3 = vpack.c.bf16 %v1336_v43, %v1334_v11  ;;  %1727 = vst.msk [vmem:[#allocation2 + $0xa0] sm:$0xff] %vm243_vm0, %v6532_v21  ;;  %v8056_v11 = vpop.permute.xlu1 %567  ;;  %v566_v43 = vpop.permute.xlu0 %565 }
 0x1c6   : > { %1133 = vst.msk [vmem:[#allocation2 + $0xd0] sm:$0xff] %vm373_vm9, %v7958_v6  ;;  %2214 = vst.msk [vmem:[#allocation2 + $0x90] sm:$0xff] %vm373_vm9, %v7958_v6  ;;  %v5711_v61 = vpack.c.bf16 %v2867_v52, %v2865_v46  ;;  %v8060_v26 = vld [vmem:[#allocation2 + $0x20] sm:$0xff]  ;;  %v2788_v52 = vrot.slane %v7879_v54, 6  ;;  %v10957_v46 = vpack.c.bf16 %v7194_v49, %v7192_v41 }
 0x1c7   : > { %2670 = vst.msk [vmem:[#allocation2 + $0x70] sm:$0xff] %vm373_vm9, %v7958_v6  ;;  %1132 = vst.msk [vmem:[#allocation2 + $0xc0] sm:$0xff] %vm373_vm9, %v7960_v45  ;;  %v8064_v36 = vld [vmem:[#allocation2] sm:$0xff]  ;;  %5567 = vmatpush1.bf16.xpose.msra.mxu1 %v5566_v3  ;;  %v8105_v3 = vld [vmem:[#allocation2 + $0xf8] sm:$0xff] }
 0x1c8   : > { %2213 = vst.msk [vmem:[#allocation2 + $0x80] sm:$0xff] %vm373_vm9, %v7960_v45  ;;  %2669 = vst.msk [vmem:[#allocation2 + $0x60] sm:$0xff] %vm373_vm9, %v7960_v45  ;;  %5712 = vmatpush1.bf16.xpose.msra.mxu0 %v5711_v61  ;;  %v2790_v61 = vrot.slane %v7882_v42, 6  ;;  %5570 = vmatprep.subr.msk.bf16.mxu1 %vm6483_vm8, %v10957_v46  ;;  %v2787_v46 = vrot.slane %v7897_v56, 6 }
 0x1c9   : > { %2241 = vst.msk [vmem:[#allocation2 + $0x90] sm:$0xff] %vm479_vm10, %v7979_v12  ;;  %1160 = vst.msk [vmem:[#allocation2 + $0xd0] sm:$0xff] %vm479_vm10, %v7979_v12  ;;  %v674_v41 = vpop.permute.xlu1 %673  ;;  %v672_v49 = vpop.permute.xlu0 %671 }
 0x1ca   : > { %2697 = vst.msk [vmem:[#allocation2 + $0x70] sm:$0xff] %vm479_vm10, %v7979_v12  ;;  %2240 = vst.msk [vmem:[#allocation2 + $0x80] sm:$0xff] %vm479_vm10, %v7981_v44 }
 0x1cb   : > { %1728 = vst.msk [vmem:[#allocation2 + $0xb0] sm:$0xff] %vm243_vm0, %v6526_v14  ;;  %3095 = vst.msk [vmem:[#allocation2 + $0x40] sm:$0xff] %vm243_vm0, %v6532_v21 }
 0x1cc   : > { %1159 = vst.msk [vmem:[#allocation2 + $0xc0] sm:$0xff] %vm479_vm10, %v7981_v44  ;;  %2696 = vst.msk [vmem:[#allocation2 + $0x60] sm:$0xff] %vm479_vm10, %v7981_v44 }
 0x1cd   : > { %1757 = vst.msk [vmem:[#allocation2 + $0xa0] sm:$0xff] %vm373_vm9, %v7960_v45  ;;  %1758 = vst.msk [vmem:[#allocation2 + $0xb0] sm:$0xff] %vm373_vm9, %v7958_v6 }
 0x1ce   : > { %3096 = vst.msk [vmem:[#allocation2 + $0x50] sm:$0xff] %vm243_vm0, %v6526_v14  ;;  %10950 = vst [vmem:[#allocation71_spill] sm:$0xff] %v8060_v26 }
 0x1cf   : > { %3125 = vst.msk [vmem:[#allocation2 + $0x40] sm:$0xff] %vm373_vm9, %v7960_v45  ;;  %10951 = vst [vmem:[#allocation72_spill] sm:$0xff] %v8062_v57 }
 0x1d0   : > { %10952 = vst [vmem:[#allocation73_spill] sm:$0xff] %v8064_v36  ;;  %1784 = vst.msk [vmem:[#allocation2 + $0xa0] sm:$0xff] %vm479_vm10, %v7981_v44 }
 0x1d1   : > { %1785 = vst.msk [vmem:[#allocation2 + $0xb0] sm:$0xff] %vm479_vm10, %v7979_v12  ;;  %3152 = vst.msk [vmem:[#allocation2 + $0x40] sm:$0xff] %vm479_vm10, %v7981_v44 }
 0x1d2   : > { %3126 = vst.msk [vmem:[#allocation2 + $0x50] sm:$0xff] %vm373_vm9, %v7958_v6  ;;  %10953 = vst [vmem:[#allocation74_spill] sm:$0xff] %v8092_v55 }
 0x1d3   : > { %601 = vst.msk [vmem:[#allocation2 + $0xf0] sm:$0xff] %vm585_vm11, %v8056_v11  ;;  %2268 = vst.msk [vmem:[#allocation2 + $0x90] sm:$0xff] %vm585_vm11, %v8056_v11 }
 0x1d4   : > { %1187 = vst.msk [vmem:[#allocation2 + $0xd0] sm:$0xff] %vm585_vm11, %v8056_v11  ;;  %2724 = vst.msk [vmem:[#allocation2 + $0x70] sm:$0xff] %vm585_vm11, %v8056_v11 }
 0x1d5   : > { %600 = vst.msk [vmem:[#allocation2 + $0xe0] sm:$0xff] %vm585_vm11, %v566_v43  ;;  %2267 = vst.msk [vmem:[#allocation2 + $0x80] sm:$0xff] %vm585_vm11, %v566_v43 }
 0x1d6   : > { %1186 = vst.msk [vmem:[#allocation2 + $0xc0] sm:$0xff] %vm585_vm11, %v566_v43  ;;  %2723 = vst.msk [vmem:[#allocation2 + $0x60] sm:$0xff] %vm585_vm11, %v566_v43 }
 0x1d7   : > { %3551 = vst.msk [vmem:[#allocation2 + $0x20] sm:$0xff] %vm243_vm0, %v6532_v21  ;;  %3552 = vst.msk [vmem:[#allocation2 + $0x30] sm:$0xff] %vm243_vm0, %v6526_v14 }
 0x1d8   : > { %4007 = vst.msk [vmem:[#allocation2] sm:$0xff] %vm243_vm0, %v6532_v21  ;;  %10955 = vst [vmem:[#allocation76_spill] sm:$0xff] %v8105_v3  ;;  %v10956_v21 = vrot.slane %v7879_v54, 5 }
 0x1d9   : > { %3153 = vst.msk [vmem:[#allocation2 + $0x50] sm:$0xff] %vm479_vm10, %v7979_v12 }
 0x1da   : > { %1812 = vst.msk [vmem:[#allocation2 + $0xb0] sm:$0xff] %vm585_vm11, %v8056_v11  ;;  %1811 = vst.msk [vmem:[#allocation2 + $0xa0] sm:$0xff] %vm585_vm11, %v566_v43  ;;  %v2764_v16 = vsel %vm708_vm5, %v10956_v21, %v2763_v0  ;;  %v10958_v0 = vmov %v10956_v21  ;;  %v10959_v21 = vpack.c.bf16 %v7207_v38, %v7196_v50  ;;  %v2791_v50 = vsel %vm814_vm6, %v2788_v52, %v2790_v61 }
 0x1db   : > { %3179 = vst.msk [vmem:[#allocation2 + $0x40] sm:$0xff] %vm585_vm11, %v566_v43  ;;  %3180 = vst.msk [vmem:[#allocation2 + $0x50] sm:$0xff] %vm585_vm11, %v8056_v11  ;;  %2767 = vrot.lane.b32.xlu1 %v2764_v16, %s6155_s26  ;;  %v2815_v38 = vrot.slane %v7879_v54, 7  ;;  %v8186_v16 = vld [vmem:[%s6249_s11 + $0x130] sm:$0xff] }
 0x1dc   : > { %3581 = vst.msk [vmem:[#allocation2 + $0x20] sm:$0xff] %vm373_vm9, %v7960_v45  ;;  %3582 = vst.msk [vmem:[#allocation2 + $0x30] sm:$0xff] %vm373_vm9, %v7958_v6  ;;  %5715 = vmatprep.subr.msk.bf16.mxu0 %vm6483_vm8, %v10959_v21 }
 0x1dd   : > { %4008 = vst.msk [vmem:[#allocation2 + $0x10] sm:$0xff] %vm243_vm0, %v6526_v14  ;;  %2855 = vst.msk [vmem:[#allocation2 + $0xe8] sm:$0xff] %vm243_vm0, %v7879_v54 }
 0x1de   : > { %4037 = vst.msk [vmem:[#allocation2] sm:$0xff] %vm373_vm9, %v7960_v45  ;;  %4038 = vst.msk [vmem:[#allocation2 + $0x10] sm:$0xff] %vm373_vm9, %v7958_v6  ;;  %v2762_v45 = vsel %vm708_vm5, %v2760_v17, %v10958_v0  ;;  %v2817_v17 = vrot.slane %v7882_v42, 7  ;;  %v778_v6 = vpop.permute.xlu0 %777 }
 0x1df   : > { %2856 = vst.msk [vmem:[#allocation2 + $0xf8] sm:$0xff] %vm243_vm0, %v7882_v42  ;;  %2765 = vrot.lane.b32.xlu0 %v2762_v45, %s6155_s26  ;;  %2794 = vrot.lane.b32.xlu1 %v2791_v50, %s6156_s28  ;;  %v3113_v45 = vrot.slane %v8186_v16, 1 }
 0x1e0   : > { %3608 = vst.msk [vmem:[#allocation2 + $0x20] sm:$0xff] %vm479_vm10, %v7981_v44  ;;  %3609 = vst.msk [vmem:[#allocation2 + $0x30] sm:$0xff] %vm479_vm10, %v7979_v12 }
 0x1e1   : > { %4064 = vst.msk [vmem:[#allocation2] sm:$0xff] %vm479_vm10, %v7981_v44  ;;  %4065 = vst.msk [vmem:[#allocation2 + $0x10] sm:$0xff] %vm479_vm10, %v7979_v12  ;;  %v780_v44 = vpop.permute.xlu1 %779  ;;  %v2789_v12 = vsel %vm814_vm6, %v2787_v46, %v2788_v52  ;;  %v8201_v52 = vld [vmem:[%s6249_s11 + $0x120] sm:$0xff] }
 0x1e2   : > { %3635 = vst.msk [vmem:[#allocation2 + $0x20] sm:$0xff] %vm585_vm11, %v566_v43  ;;  %3636 = vst.msk [vmem:[#allocation2 + $0x30] sm:$0xff] %vm585_vm11, %v8056_v11  ;;  %v884_v50 = vpop.permute.xlu0 %883  ;;  %v3137_v3 = vrot.slane %v8201_v52, 2 }
 0x1e3   : > { %4091 = vst.msk [vmem:[#allocation2] sm:$0xff] %vm585_vm11, %v566_v43  ;;  %4092 = vst.msk [vmem:[#allocation2 + $0x10] sm:$0xff] %vm585_vm11, %v8056_v11  ;;  %v2814_v11 = vrot.slane %v7897_v56, 7  ;;  %v8183_v43 = vld [vmem:[%s6249_s11 + $0x128] sm:$0xff]  ;;  %2792 = vrot.lane.b32.xlu0 %v2789_v12, %s6156_s28  ;;  %v3140_v12 = vrot.slane %v8186_v16, 2 }
 0x1e4   : > { %707 = vst.msk [vmem:[#allocation2 + $0xf0] sm:$0xff] %vm691_vm12, %v674_v41  ;;  %1839 = vst.msk [vmem:[#allocation2 + $0xb0] sm:$0xff] %vm691_vm12, %v674_v41  ;;  %v8208_v61 = vld [vmem:[#allocation2 + $0xe8] sm:$0xff]  ;;  %v3111_v0 = vrot.slane %v8183_v43, 1  ;;  %v10966_v26 = vrot.slane %v8183_v43, 4 }
 0x1e5   : > { %2295 = vst.msk [vmem:[#allocation2 + $0x90] sm:$0xff] %vm691_vm12, %v674_v41  ;;  %1214 = vst.msk [vmem:[#allocation2 + $0xd0] sm:$0xff] %vm691_vm12, %v674_v41  ;;  %v886_v21 = vpop.permute.xlu1 %885 }
 0x1e6   : > { %2751 = vst.msk [vmem:[#allocation2 + $0x70] sm:$0xff] %vm691_vm12, %v674_v41  ;;  %3207 = vst.msk [vmem:[#allocation2 + $0x50] sm:$0xff] %vm691_vm12, %v674_v41  ;;  %v990_v37 = vpop.permute.xlu0 %989 }
 0x1e7   : > { %706 = vst.msk [vmem:[#allocation2 + $0xe0] sm:$0xff] %vm691_vm12, %v672_v49  ;;  %1838 = vst.msk [vmem:[#allocation2 + $0xa0] sm:$0xff] %vm691_vm12, %v672_v49 }
 0x1e8   : > { %2294 = vst.msk [vmem:[#allocation2 + $0x80] sm:$0xff] %vm691_vm12, %v672_v49  ;;  %1213 = vst.msk [vmem:[#allocation2 + $0xc0] sm:$0xff] %vm691_vm12, %v672_v49 }
 0x1e9   : > { %2750 = vst.msk [vmem:[#allocation2 + $0x60] sm:$0xff] %vm691_vm12, %v672_v49  ;;  %3206 = vst.msk [vmem:[#allocation2 + $0x40] sm:$0xff] %vm691_vm12, %v672_v49 }
 0x1ea   : > { %3662 = vst.msk [vmem:[#allocation2 + $0x20] sm:$0xff] %vm691_vm12, %v672_v49  ;;  %3663 = vst.msk [vmem:[#allocation2 + $0x30] sm:$0xff] %vm691_vm12, %v674_v41 }
 0x1eb   : > { %4118 = vst.msk [vmem:[#allocation2] sm:$0xff] %vm691_vm12, %v672_v49  ;;  %4119 = vst.msk [vmem:[#allocation2 + $0x10] sm:$0xff] %vm691_vm12, %v674_v41  ;;  %v8210_v41 = vld [vmem:[#allocation2 + $0xf8] sm:$0xff]  ;;  %v2818_v49 = vsel %vm920_vm7, %v2815_v38, %v2817_v17  ;;  %v3138_v17 = vrot.slane %v8183_v43, 2 }
 0x1ec   : > { %813 = vst.msk [vmem:[#allocation2 + $0xf0] sm:$0xff] %vm797_vm13, %v780_v44  ;;  %1866 = vst.msk [vmem:[#allocation2 + $0xb0] sm:$0xff] %vm797_vm13, %v780_v44  ;;  %2821 = vrot.lane.b32.xlu1 %v2818_v49, %s6157_s29  ;;  %v8252_v49 = vld [vmem:[#allocation2 + $0x18] sm:$0xff] }
 0x1ed   : > { %2322 = vst.msk [vmem:[#allocation2 + $0x90] sm:$0xff] %vm797_vm13, %v780_v44  ;;  %1241 = vst.msk [vmem:[#allocation2 + $0xd0] sm:$0xff] %vm797_vm13, %v780_v44 }
 0x1ee   : > { %2778 = vst.msk [vmem:[#allocation2 + $0x70] sm:$0xff] %vm797_vm13, %v780_v44  ;;  %3234 = vst.msk [vmem:[#allocation2 + $0x50] sm:$0xff] %vm797_vm13, %v780_v44 }
 0x1ef   : > { %812 = vst.msk [vmem:[#allocation2 + $0xe0] sm:$0xff] %vm797_vm13, %v778_v6  ;;  %1865 = vst.msk [vmem:[#allocation2 + $0xa0] sm:$0xff] %vm797_vm13, %v778_v6 }
 0x1f0   : > { %2321 = vst.msk [vmem:[#allocation2 + $0x80] sm:$0xff] %vm797_vm13, %v778_v6  ;;  %1240 = vst.msk [vmem:[#allocation2 + $0xc0] sm:$0xff] %vm797_vm13, %v778_v6 }
 0x1f1   : > { %2777 = vst.msk [vmem:[#allocation2 + $0x60] sm:$0xff] %vm797_vm13, %v778_v6  ;;  %3233 = vst.msk [vmem:[#allocation2 + $0x40] sm:$0xff] %vm797_vm13, %v778_v6 }
 0x1f2   : > { %3689 = vst.msk [vmem:[#allocation2 + $0x20] sm:$0xff] %vm797_vm13, %v778_v6  ;;  %3690 = vst.msk [vmem:[#allocation2 + $0x30] sm:$0xff] %vm797_vm13, %v780_v44 }
 0x1f3   : > { %4145 = vst.msk [vmem:[#allocation2] sm:$0xff] %vm797_vm13, %v778_v6  ;;  %4146 = vst.msk [vmem:[#allocation2 + $0x10] sm:$0xff] %vm797_vm13, %v780_v44  ;;  %v2816_v44 = vsel %vm920_vm7, %v2814_v11, %v2815_v38  ;;  %v3110_v6 = vrot.slane %v8201_v52, 1  ;;  %v3114_v38 = vsel %vm284_vm2, %v3111_v0, %v3113_v45  ;;  %v992_v11 = vpop.permute.xlu1 %991  ;;  %v3141_v45 = vsel %vm390_vm1, %v3138_v17, %v3140_v12 }
 0x1f4   : > { %3313 = vst.msk [vmem:[#allocation2 + $0xe8] sm:$0xff] %vm243_vm0, %v8183_v43  ;;  %3314 = vst.msk [vmem:[#allocation2 + $0xf8] sm:$0xff] %vm243_vm0, %v8186_v16  ;;  %2819 = vrot.lane.b32.xlu0 %v2816_v44, %s6157_s29  ;;  %3117 = vrot.lane.b32.xlu1 %v3114_v38, %s6152_s22  ;;  %v3165_v44 = vrot.slane %v8183_v43, 3  ;;  %v3194_v12 = vrot.slane %v8186_v16, 4  ;;  %v3191_v38 = vrot.slane %v8201_v52, 4 }
 0x1f5   : > { %919 = vst.msk [vmem:[#allocation2 + $0xf0] sm:$0xff] %vm903_vm14, %v886_v21  ;;  %1893 = vst.msk [vmem:[#allocation2 + $0xb0] sm:$0xff] %vm903_vm14, %v886_v21  ;;  %v3112_v46 = vsel %vm284_vm2, %v3110_v6, %v3111_v0 }
 0x1f6   : > { %2349 = vst.msk [vmem:[#allocation2 + $0x90] sm:$0xff] %vm903_vm14, %v886_v21  ;;  %1268 = vst.msk [vmem:[#allocation2 + $0xd0] sm:$0xff] %vm903_vm14, %v886_v21  ;;  %v3195_v39 = vsel %vm602_vm4, %v10966_v26, %v3194_v12 }
 0x1f7   : > { %2805 = vst.msk [vmem:[#allocation2 + $0x70] sm:$0xff] %vm903_vm14, %v886_v21  ;;  %3261 = vst.msk [vmem:[#allocation2 + $0x50] sm:$0xff] %vm903_vm14, %v886_v21  ;;  %v8282_v6 = vpop.permute.xlu1 %1116 }
 0x1f8   : > { %918 = vst.msk [vmem:[#allocation2 + $0xe0] sm:$0xff] %vm903_vm14, %v884_v50  ;;  %1892 = vst.msk [vmem:[#allocation2 + $0xa0] sm:$0xff] %vm903_vm14, %v884_v50  ;;  %3115 = vrot.lane.b32.xlu0 %v3112_v46, %s6152_s22  ;;  %3144 = vrot.lane.b32.xlu1 %v3141_v45, %s6151_s21 }
 0x1f9   : > { %2348 = vst.msk [vmem:[#allocation2 + $0x80] sm:$0xff] %vm903_vm14, %v884_v50  ;;  %1267 = vst.msk [vmem:[#allocation2 + $0xc0] sm:$0xff] %vm903_vm14, %v884_v50 }
 0x1fa   : > { %2804 = vst.msk [vmem:[#allocation2 + $0x60] sm:$0xff] %vm903_vm14, %v884_v50  ;;  %3260 = vst.msk [vmem:[#allocation2 + $0x40] sm:$0xff] %vm903_vm14, %v884_v50 }
 0x1fb   : > { %3716 = vst.msk [vmem:[#allocation2 + $0x20] sm:$0xff] %vm903_vm14, %v884_v50  ;;  %3717 = vst.msk [vmem:[#allocation2 + $0x30] sm:$0xff] %vm903_vm14, %v886_v21  ;;  %v8299_v36 = vpop.permute.xlu1 %1143 }
 0x1fc   : > { %4172 = vst.msk [vmem:[#allocation2] sm:$0xff] %vm903_vm14, %v884_v50  ;;  %4173 = vst.msk [vmem:[#allocation2 + $0x10] sm:$0xff] %vm903_vm14, %v886_v21  ;;  %v5331_v21 = vld [vmem:[%s10796_s1 + $0x208] sm:$0xff] }
 0x1fd   : > { %v8250_v50 = vld [vmem:[#allocation2 + $0x8] sm:$0xff]  ;;  %10961 = vst [vmem:[#allocation78_spill] sm:$0xff] %v8252_v49  ;;  %1025 = vst.msk [vmem:[#allocation2 + $0xf0] sm:$0xff] %vm1009_vm15, %v992_v11  ;;  %5362 = vmatprep.mubr.msk.f32.mxu0 %vm243_vm0, %v5331_v21  ;;  %v3139_v21 = vsel %vm390_vm1, %v3137_v3, %v3138_v17 }
 0x1fe   : > { %10960 = vst [vmem:[#allocation77_spill] sm:$0xff] %v8250_v50  ;;  %1920 = vst.msk [vmem:[#allocation2 + $0xb0] sm:$0xff] %vm1009_vm15, %v992_v11  ;;  %3142 = vrot.lane.b32.xlu0 %v3139_v21, %s6151_s21 }
 0x1ff   : > { %2376 = vst.msk [vmem:[#allocation2 + $0x90] sm:$0xff] %vm1009_vm15, %v992_v11  ;;  %1295 = vst.msk [vmem:[#allocation2 + $0xd0] sm:$0xff] %vm1009_vm15, %v992_v11  ;;  %v8376_v12 = vpop.permute.xlu1 %1170 }
 0x200   : > { %2832 = vst.msk [vmem:[#allocation2 + $0x70] sm:$0xff] %vm1009_vm15, %v992_v11  ;;  %3288 = vst.msk [vmem:[#allocation2 + $0x50] sm:$0xff] %vm1009_vm15, %v992_v11 }
 0x201   : > { %1024 = vst.msk [vmem:[#allocation2 + $0xe0] sm:$0xff] %vm1009_vm15, %v990_v37  ;;  %1919 = vst.msk [vmem:[#allocation2 + $0xa0] sm:$0xff] %vm1009_vm15, %v990_v37 }
 0x202   : > { %2375 = vst.msk [vmem:[#allocation2 + $0x80] sm:$0xff] %vm1009_vm15, %v990_v37  ;;  %1294 = vst.msk [vmem:[#allocation2 + $0xc0] sm:$0xff] %vm1009_vm15, %v990_v37 }
 0x203   : > { %2831 = vst.msk [vmem:[#allocation2 + $0x60] sm:$0xff] %vm1009_vm15, %v990_v37  ;;  %3287 = vst.msk [vmem:[#allocation2 + $0x40] sm:$0xff] %vm1009_vm15, %v990_v37 }
 0x204   : > { %3757 = vst.msk [vmem:[#allocation2 + $0x8] sm:$0xff] %vm243_vm0, %v6428_v10  ;;  %3758 = vst.msk [vmem:[#allocation2 + $0x18] sm:$0xff] %vm243_vm0, %v6431_v13  ;;  %v3167_v10 = vrot.slane %v8186_v16, 3  ;;  %v8284_v13 = vpop.permute.xlu0 %1114 }
 0x205   : > { %3743 = vst.msk [vmem:[#allocation2 + $0x20] sm:$0xff] %vm1009_vm15, %v990_v37  ;;  %3744 = vst.msk [vmem:[#allocation2 + $0x30] sm:$0xff] %vm1009_vm15, %v992_v11  ;;  %v8295_v0 = vld [vmem:[#allocation2 + $0xb0] sm:$0xff] }
 0x206   : > { %4199 = vst.msk [vmem:[#allocation2] sm:$0xff] %vm1009_vm15, %v990_v37  ;;  %4200 = vst.msk [vmem:[#allocation2 + $0x10] sm:$0xff] %vm1009_vm15, %v992_v11  ;;  %v3164_v37 = vrot.slane %v8201_v52, 3  ;;  %v3168_v46 = vsel %vm496_vm3, %v3165_v44, %v3167_v10  ;;  %v8293_v11 = vld [vmem:[#allocation2 + $0xf0] sm:$0xff] }
 0x207   : > { %10962 = vst [vmem:[#allocation79_spill] sm:$0xff] %v8295_v0  ;;  %v8297_v62 = vld [vmem:[#allocation2 + $0x90] sm:$0xff]  ;;  %1105 = vst.msk [vmem:[#allocation2 + $0xf0] sm:$0xff] %vm243_vm0, %v7052_v60  ;;  %3171 = vrot.lane.b32.xlu1 %v3168_v46, %s6153_s24 }
 0x208   : > { %10963 = vst [vmem:[#allocation80_spill] sm:$0xff] %v8297_v62  ;;  %v8301_v3 = vpop.permute.xlu0 %1141  ;;  %v3166_v17 = vsel %vm496_vm3, %v3164_v37, %v3165_v44  ;;  %2186 = vst.msk [vmem:[#allocation2 + $0xb0] sm:$0xff] %vm243_vm0, %v7052_v60  ;;  %v8310_v45 = vld [vmem:[#allocation2 + $0xe0] sm:$0xff]  ;;  %v1340_v37 = vld [vmem:[#allocation2 + $0xd0] sm:$0xff] }
 0x209   : > { %2642 = vst.msk [vmem:[#allocation2 + $0x90] sm:$0xff] %vm243_vm0, %v7052_v60  ;;  %v8312_v10 = vld [vmem:[#allocation2 + $0xa0] sm:$0xff]  ;;  %1104 = vst.msk [vmem:[#allocation2 + $0xe0] sm:$0xff] %vm243_vm0, %v7178_v58  ;;  %v2871_v57 = vld [vmem:[#allocation2 + $0x70] sm:$0xff]  ;;  %3169 = vrot.lane.b32.xlu0 %v3166_v17, %s6153_s24 }
 0x20a   : > { %10964 = vst [vmem:[#allocation81_spill] sm:$0xff] %v8312_v10  ;;  %v8314_v21 = vld [vmem:[#allocation2 + $0x80] sm:$0xff]  ;;  %1135 = vst.msk [vmem:[#allocation2 + $0xf0] sm:$0xff] %vm373_vm9, %v8282_v6  ;;  %v8360_v62 = vld [vmem:[#allocation2 + $0x38] sm:$0xff] }
 0x20b   : > { %10965 = vst [vmem:[#allocation82_spill] sm:$0xff] %v8314_v21  ;;  %2216 = vst.msk [vmem:[#allocation2 + $0xb0] sm:$0xff] %vm373_vm9, %v8282_v6  ;;  %v1338_v44 = vld [vmem:[#allocation2 + $0xc0] sm:$0xff]  ;;  %v8358_v21 = vld [vmem:[#allocation2 + $0x28] sm:$0xff]  ;;  %3198 = vrot.lane.b32.xlu1 %v3195_v39, %s6154_s25 }
 0x20c   : > { %2672 = vst.msk [vmem:[#allocation2 + $0x90] sm:$0xff] %vm373_vm9, %v8282_v6  ;;  %v2869_v55 = vld [vmem:[#allocation2 + $0x60] sm:$0xff]  ;;  %1134 = vst.msk [vmem:[#allocation2 + $0xe0] sm:$0xff] %vm373_vm9, %v8284_v13  ;;  %v5571_v46 = vpack.c.bf16 %v1340_v37, %v1338_v44  ;;  %v8378_v17 = vpop.permute.xlu0 %1168  ;;  %v3221_v37 = vrot.slane %v8186_v16, 5  ;;  %v3218_v44 = vrot.slane %v8201_v52, 5  ;;  %v8430_v49 = vld [vmem:[#allocation2 + $0x30] sm:$0xff] }
 0x20d   : > { %2185 = vst.msk [vmem:[#allocation2 + $0xa0] sm:$0xff] %vm243_vm0, %v7178_v58  ;;  %2641 = vst.msk [vmem:[#allocation2 + $0x80] sm:$0xff] %vm243_vm0, %v7178_v58  ;;  %v5716_v26 = vpack.c.bf16 %v2871_v57, %v2869_v55  ;;  %v8388_v57 = vld [vmem:[#allocation2 + $0x40] sm:$0xff]  ;;  %v8390_v55 = vld [vmem:[#allocation2 + $0x50] sm:$0xff] }
 0x20e   : > { %2215 = vst.msk [vmem:[#allocation2 + $0xa0] sm:$0xff] %vm373_vm9, %v8284_v13  ;;  %2671 = vst.msk [vmem:[#allocation2 + $0x80] sm:$0xff] %vm373_vm9, %v8284_v13  ;;  %v8392_v0 = vld [vmem:[#allocation2] sm:$0xff]  ;;  %5572 = vmatpush1.bf16.xpose.msra.mxu1 %v5571_v46  ;;  %v10970_v46 = vrot.slane %v8183_v43, 4 }
 0x20f   : > { %2243 = vst.msk [vmem:[#allocation2 + $0xb0] sm:$0xff] %vm479_vm10, %v8299_v36  ;;  %1162 = vst.msk [vmem:[#allocation2 + $0xf0] sm:$0xff] %vm479_vm10, %v8299_v36  ;;  %v8428_v50 = vld [vmem:[#allocation2 + $0x20] sm:$0xff]  ;;  %5717 = vmatpush1.bf16.xpose.msra.mxu0 %v5716_v26 }
 0x210   : > { %2699 = vst.msk [vmem:[#allocation2 + $0x90] sm:$0xff] %vm479_vm10, %v8299_v36  ;;  %10967 = vst [vmem:[#allocation83_spill] sm:$0xff] %v8358_v21  ;;  %v3193_v10 = vsel %vm602_vm4, %v3191_v38, %v10970_v46  ;;  %v10974_v38 = vpack.c.bf16 %v7401_v35, %v7399_v51  ;;  %v10975_v35 = vpack.c.bf16 %v7414_v8, %v7403_v59  ;;  %v1196_v59 = vpop.permute.xlu0 %1195  ;;  %v10976_v8 = vrot.slane %v8183_v43, 5  ;;  %v8489_v51 = vld [vmem:[#allocation2 + $0x58] sm:$0xff]  ;;  %v8572_v21 = vld [vmem:[#allocation2 + $0x68] sm:$0xff] }
 0x211   : > { %1729 = vst.msk [vmem:[#allocation2 + $0xc0] sm:$0xff] %vm243_vm0, %v7178_v58  ;;  %1730 = vst.msk [vmem:[#allocation2 + $0xd0] sm:$0xff] %vm243_vm0, %v7052_v60  ;;  %3196 = vrot.lane.b32.xlu0 %v3193_v10, %s6154_s25  ;;  %v3246_v46 = vrot.slane %v8183_v43, 6 }
 0x212   : > { %3097 = vst.msk [vmem:[#allocation2 + $0x60] sm:$0xff] %vm243_vm0, %v7178_v58  ;;  %10968 = vst [vmem:[#allocation84_spill] sm:$0xff] %v8360_v62  ;;  %v8424_v62 = vld [vmem:[#allocation2 + $0x10] sm:$0xff]  ;;  %5575 = vmatprep.subr.msk.bf16.mxu1 %vm6483_vm8, %v10974_v38  ;;  %5720 = vmatprep.subr.msk.bf16.mxu0 %vm6483_vm8, %v10975_v35  ;;  %v3222_v39 = vsel %vm708_vm5, %v10976_v8, %v3221_v37  ;;  %v3248_v38 = vrot.slane %v8186_v16, 6  ;;  %v8487_v35 = vld [vmem:[#allocation2 + $0x48] sm:$0xff] }
 0x213   : > { %2242 = vst.msk [vmem:[#allocation2 + $0xa0] sm:$0xff] %vm479_vm10, %v8301_v3  ;;  %1161 = vst.msk [vmem:[#allocation2 + $0xe0] sm:$0xff] %vm479_vm10, %v8301_v3  ;;  %3225 = vrot.lane.b32.xlu1 %v3222_v39, %s6155_s26  ;;  %v8556_v39 = vld [vmem:[%s6249_s11 + $0x148] sm:$0xff] }
 0x214   : > { %2698 = vst.msk [vmem:[#allocation2 + $0x80] sm:$0xff] %vm479_vm10, %v8301_v3  ;;  %10969 = vst [vmem:[#allocation85_spill] sm:$0xff] %v8392_v0  ;;  %v3249_v37 = vsel %vm814_vm6, %v3246_v46, %v3248_v38  ;;  %v8565_v38 = vld [vmem:[%s6249_s11 + $0x138] sm:$0xff]  ;;  %v3571_v26 = vrot.slane %v8556_v39, 1  ;;  %v8632_v0 = vld [vmem:[#allocation2 + $0x88] sm:$0xff] }
 0x215   : > { %1759 = vst.msk [vmem:[#allocation2 + $0xc0] sm:$0xff] %vm373_vm9, %v8284_v13  ;;  %1760 = vst.msk [vmem:[#allocation2 + $0xd0] sm:$0xff] %vm373_vm9, %v8282_v6 }
 0x216   : > { %3098 = vst.msk [vmem:[#allocation2 + $0x70] sm:$0xff] %vm243_vm0, %v7052_v60  ;;  %3759 = vst.msk [vmem:[#allocation2 + $0x28] sm:$0xff] %vm243_vm0, %v6526_v14 }
 0x217   : > { %3127 = vst.msk [vmem:[#allocation2 + $0x60] sm:$0xff] %vm373_vm9, %v8284_v13  ;;  %3128 = vst.msk [vmem:[#allocation2 + $0x70] sm:$0xff] %vm373_vm9, %v8282_v6  ;;  %3252 = vrot.lane.b32.xlu1 %v3249_v37, %s6156_s28  ;;  %v3598_v37 = vrot.slane %v8556_v39, 2 }
 0x218   : > { %3760 = vst.msk [vmem:[#allocation2 + $0x38] sm:$0xff] %vm243_vm0, %v6529_v18  ;;  %3553 = vst.msk [vmem:[#allocation2 + $0x40] sm:$0xff] %vm243_vm0, %v7178_v58 }
 0x219   : > { %1786 = vst.msk [vmem:[#allocation2 + $0xc0] sm:$0xff] %vm479_vm10, %v8301_v3  ;;  %1787 = vst.msk [vmem:[#allocation2 + $0xd0] sm:$0xff] %vm479_vm10, %v8299_v36 }
 0x21a   : > { %3154 = vst.msk [vmem:[#allocation2 + $0x60] sm:$0xff] %vm479_vm10, %v8301_v3  ;;  %10971 = vst [vmem:[#allocation86_spill] sm:$0xff] %v8424_v62  ;;  %v8634_v62 = vld [vmem:[#allocation2 + $0x98] sm:$0xff] }
 0x21b   : > { %2270 = vst.msk [vmem:[#allocation2 + $0xb0] sm:$0xff] %vm585_vm11, %v8376_v12  ;;  %1189 = vst.msk [vmem:[#allocation2 + $0xf0] sm:$0xff] %vm585_vm11, %v8376_v12 }
 0x21c   : > { %2726 = vst.msk [vmem:[#allocation2 + $0x90] sm:$0xff] %vm585_vm11, %v8376_v12  ;;  %2269 = vst.msk [vmem:[#allocation2 + $0xa0] sm:$0xff] %vm585_vm11, %v8378_v17 }
 0x21d   : > { %1188 = vst.msk [vmem:[#allocation2 + $0xe0] sm:$0xff] %vm585_vm11, %v8378_v17  ;;  %2725 = vst.msk [vmem:[#allocation2 + $0x80] sm:$0xff] %vm585_vm11, %v8378_v17 }
 0x21e   : > { %3554 = vst.msk [vmem:[#allocation2 + $0x50] sm:$0xff] %vm243_vm0, %v7052_v60  ;;  %4465 = vst.msk [vmem:[#allocation2] sm:$0xff] %vm243_vm0, %v7178_v58 }
 0x21f   : > { %10972 = vst [vmem:[#allocation87_spill] sm:$0xff] %v8428_v50  ;;  %10973 = vst [vmem:[#allocation88_spill] sm:$0xff] %v8430_v49  ;;  %v3649_v49 = vrot.slane %v8565_v38, 4 }
 0x220   : > { %3155 = vst.msk [vmem:[#allocation2 + $0x70] sm:$0xff] %vm479_vm10, %v8299_v36  ;;  %10978 = vst [vmem:[#allocation89_spill] sm:$0xff] %v8572_v21 }
 0x221   : > { %1814 = vst.msk [vmem:[#allocation2 + $0xd0] sm:$0xff] %vm585_vm11, %v8376_v12  ;;  %1813 = vst.msk [vmem:[#allocation2 + $0xc0] sm:$0xff] %vm585_vm11, %v8378_v17 }
 0x222   : > { %3181 = vst.msk [vmem:[#allocation2 + $0x60] sm:$0xff] %vm585_vm11, %v8378_v17  ;;  %3182 = vst.msk [vmem:[#allocation2 + $0x70] sm:$0xff] %vm585_vm11, %v8376_v12 }
 0x223   : > { %3583 = vst.msk [vmem:[#allocation2 + $0x40] sm:$0xff] %vm373_vm9, %v8284_v13  ;;  %3584 = vst.msk [vmem:[#allocation2 + $0x50] sm:$0xff] %vm373_vm9, %v8282_v6 }
 0x224   : > { %4466 = vst.msk [vmem:[#allocation2 + $0x10] sm:$0xff] %vm243_vm0, %v7052_v60  ;;  %4009 = vst.msk [vmem:[#allocation2 + $0x20] sm:$0xff] %vm243_vm0, %v7178_v58  ;;  %v1198_v58 = vpop.permute.xlu1 %1197 }
 0x225   : > { %4495 = vst.msk [vmem:[#allocation2] sm:$0xff] %vm373_vm9, %v8284_v13  ;;  %4496 = vst.msk [vmem:[#allocation2 + $0x10] sm:$0xff] %vm373_vm9, %v8282_v6 }
 0x226   : > { %4010 = vst.msk [vmem:[#allocation2 + $0x30] sm:$0xff] %vm243_vm0, %v7052_v60  ;;  %3761 = vst.msk [vmem:[#allocation2 + $0x48] sm:$0xff] %vm243_vm0, %v7052_v60 }
 0x227   : > { %3610 = vst.msk [vmem:[#allocation2 + $0x40] sm:$0xff] %vm479_vm10, %v8301_v3  ;;  %3611 = vst.msk [vmem:[#allocation2 + $0x50] sm:$0xff] %vm479_vm10, %v8299_v36 }
 0x228   : > { %4522 = vst.msk [vmem:[#allocation2] sm:$0xff] %vm479_vm10, %v8301_v3  ;;  %4523 = vst.msk [vmem:[#allocation2 + $0x10] sm:$0xff] %vm479_vm10, %v8299_v36  ;;  %v1225_v10 = vpop.permute.xlu1 %1224 }
 0x229   : > { %4039 = vst.msk [vmem:[#allocation2 + $0x20] sm:$0xff] %vm373_vm9, %v8284_v13  ;;  %4040 = vst.msk [vmem:[#allocation2 + $0x30] sm:$0xff] %vm373_vm9, %v8282_v6  ;;  %v3245_v13 = vrot.slane %v8201_v52, 6 }
 0x22a   : > { %3637 = vst.msk [vmem:[#allocation2 + $0x40] sm:$0xff] %vm585_vm11, %v8378_v17  ;;  %3638 = vst.msk [vmem:[#allocation2 + $0x50] sm:$0xff] %vm585_vm11, %v8376_v12 }
 0x22b   : > { %4549 = vst.msk [vmem:[#allocation2] sm:$0xff] %vm585_vm11, %v8378_v17  ;;  %4550 = vst.msk [vmem:[#allocation2 + $0x10] sm:$0xff] %vm585_vm11, %v8376_v12 }
 0x22c   : > { %4066 = vst.msk [vmem:[#allocation2 + $0x20] sm:$0xff] %vm479_vm10, %v8301_v3  ;;  %4067 = vst.msk [vmem:[#allocation2 + $0x30] sm:$0xff] %vm479_vm10, %v8299_v36  ;;  %v10977_v36 = vmov %v10976_v8  ;;  %v8553_v8 = vld [vmem:[%s6249_s11 + $0x140] sm:$0xff]  ;;  %v8574_v3 = vld [vmem:[#allocation2 + $0x78] sm:$0xff] }
 0x22d   : > { %1841 = vst.msk [vmem:[#allocation2 + $0xd0] sm:$0xff] %vm691_vm12, %v1198_v58  ;;  %2297 = vst.msk [vmem:[#allocation2 + $0xb0] sm:$0xff] %vm691_vm12, %v1198_v58  ;;  %v3220_v6 = vsel %vm708_vm5, %v3218_v44, %v10977_v36  ;;  %v1223_v44 = vpop.permute.xlu0 %1222 }
 0x22e   : > { %3209 = vst.msk [vmem:[#allocation2 + $0x70] sm:$0xff] %vm691_vm12, %v1198_v58  ;;  %1216 = vst.msk [vmem:[#allocation2 + $0xf0] sm:$0xff] %vm691_vm12, %v1198_v58  ;;  %3223 = vrot.lane.b32.xlu0 %v3220_v6, %s6155_s26 }
 0x22f   : > { %2753 = vst.msk [vmem:[#allocation2 + $0x90] sm:$0xff] %vm691_vm12, %v1198_v58  ;;  %1840 = vst.msk [vmem:[#allocation2 + $0xc0] sm:$0xff] %vm691_vm12, %v1196_v59 }
 0x230   : > { %2296 = vst.msk [vmem:[#allocation2 + $0xa0] sm:$0xff] %vm691_vm12, %v1196_v59  ;;  %3208 = vst.msk [vmem:[#allocation2 + $0x60] sm:$0xff] %vm691_vm12, %v1196_v59 }
 0x231   : > { %1215 = vst.msk [vmem:[#allocation2 + $0xe0] sm:$0xff] %vm691_vm12, %v1196_v59  ;;  %2752 = vst.msk [vmem:[#allocation2 + $0x80] sm:$0xff] %vm691_vm12, %v1196_v59  ;;  %v1250_v36 = vpop.permute.xlu0 %1249 }
 0x232   : > { %3762 = vst.msk [vmem:[#allocation2 + $0x58] sm:$0xff] %vm243_vm0, %v7058_v9  ;;  %10979 = vst [vmem:[#allocation90_spill] sm:$0xff] %v8574_v3  ;;  %v5186_v3 = vld [vmem:[%s10796_s1 + $0x80] sm:$0xff] }
 0x233   : > { %3664 = vst.msk [vmem:[#allocation2 + $0x40] sm:$0xff] %vm691_vm12, %v1196_v59  ;;  %3665 = vst.msk [vmem:[#allocation2 + $0x50] sm:$0xff] %vm691_vm12, %v1198_v58 }
 0x234   : > { %4576 = vst.msk [vmem:[#allocation2] sm:$0xff] %vm691_vm12, %v1196_v59  ;;  %4577 = vst.msk [vmem:[#allocation2 + $0x10] sm:$0xff] %vm691_vm12, %v1198_v58 }
 0x235   : > { %4093 = vst.msk [vmem:[#allocation2 + $0x20] sm:$0xff] %vm585_vm11, %v8378_v17  ;;  %4094 = vst.msk [vmem:[#allocation2 + $0x30] sm:$0xff] %vm585_vm11, %v8376_v12  ;;  %v3273_v17 = vrot.slane %v8183_v43, 7  ;;  %v3275_v12 = vrot.slane %v8186_v16, 7 }
 0x236   : > { %4120 = vst.msk [vmem:[#allocation2 + $0x20] sm:$0xff] %vm691_vm12, %v1196_v59  ;;  %4121 = vst.msk [vmem:[#allocation2 + $0x30] sm:$0xff] %vm691_vm12, %v1198_v58  ;;  %v3247_v58 = vsel %vm814_vm6, %v3245_v13, %v3246_v46  ;;  %v3272_v59 = vrot.slane %v8201_v52, 7  ;;  %v1252_v46 = vpop.permute.xlu1 %1251  ;;  %v3569_v13 = vrot.slane %v8553_v8, 1 }
 0x237   : > { %1868 = vst.msk [vmem:[#allocation2 + $0xd0] sm:$0xff] %vm797_vm13, %v1225_v10  ;;  %2324 = vst.msk [vmem:[#allocation2 + $0xb0] sm:$0xff] %vm797_vm13, %v1225_v10  ;;  %3250 = vrot.lane.b32.xlu0 %v3247_v58, %s6156_s28  ;;  %v3276_v6 = vsel %vm920_vm7, %v3273_v17, %v3275_v12  ;;  %v1277_v12 = vpop.permute.xlu0 %1276 }
 0x238   : > { %3236 = vst.msk [vmem:[#allocation2 + $0x70] sm:$0xff] %vm797_vm13, %v1225_v10  ;;  %1243 = vst.msk [vmem:[#allocation2 + $0xf0] sm:$0xff] %vm797_vm13, %v1225_v10  ;;  %3279 = vrot.lane.b32.xlu1 %v3276_v6, %s6157_s29  ;;  %v3572_v58 = vsel %vm284_vm2, %v3569_v13, %v3571_v26 }
 0x239   : > { %2780 = vst.msk [vmem:[#allocation2 + $0x90] sm:$0xff] %vm797_vm13, %v1225_v10  ;;  %1867 = vst.msk [vmem:[#allocation2 + $0xc0] sm:$0xff] %vm797_vm13, %v1223_v44 }
 0x23a   : > { %2323 = vst.msk [vmem:[#allocation2 + $0xa0] sm:$0xff] %vm797_vm13, %v1223_v44  ;;  %3235 = vst.msk [vmem:[#allocation2 + $0x60] sm:$0xff] %vm797_vm13, %v1223_v44 }
 0x23b   : > { %1242 = vst.msk [vmem:[#allocation2 + $0xe0] sm:$0xff] %vm797_vm13, %v1223_v44  ;;  %2779 = vst.msk [vmem:[#allocation2 + $0x80] sm:$0xff] %vm797_vm13, %v1223_v44  ;;  %v8626_v6 = vpop.permute.xlu0 %1741 }
 0x23c   : > { %3691 = vst.msk [vmem:[#allocation2 + $0x40] sm:$0xff] %vm797_vm13, %v1223_v44  ;;  %3692 = vst.msk [vmem:[#allocation2 + $0x50] sm:$0xff] %vm797_vm13, %v1225_v10  ;;  %3575 = vrot.lane.b32.xlu1 %v3572_v58, %s6152_s22 }
 0x23d   : > { %4603 = vst.msk [vmem:[#allocation2] sm:$0xff] %vm797_vm13, %v1223_v44  ;;  %4604 = vst.msk [vmem:[#allocation2 + $0x10] sm:$0xff] %vm797_vm13, %v1225_v10 }
 0x23e   : > { %4147 = vst.msk [vmem:[#allocation2 + $0x20] sm:$0xff] %vm797_vm13, %v1223_v44  ;;  %4148 = vst.msk [vmem:[#allocation2 + $0x30] sm:$0xff] %vm797_vm13, %v1225_v10  ;;  %v3274_v10 = vsel %vm920_vm7, %v3272_v59, %v3273_v17  ;;  %v3568_v44 = vrot.slane %v8565_v38, 1  ;;  %v1279_v17 = vpop.permute.xlu1 %1278  ;;  %v3596_v59 = vrot.slane %v8553_v8, 2 }
 0x23f   : > { %1895 = vst.msk [vmem:[#allocation2 + $0xd0] sm:$0xff] %vm903_vm14, %v1252_v46  ;;  %2351 = vst.msk [vmem:[#allocation2 + $0xb0] sm:$0xff] %vm903_vm14, %v1252_v46  ;;  %3277 = vrot.lane.b32.xlu0 %v3274_v10, %s6157_s29  ;;  %v3623_v10 = vrot.slane %v8553_v8, 3 }
 0x240   : > { %3263 = vst.msk [vmem:[#allocation2 + $0x70] sm:$0xff] %vm903_vm14, %v1252_v46  ;;  %1270 = vst.msk [vmem:[#allocation2 + $0xf0] sm:$0xff] %vm903_vm14, %v1252_v46  ;;  %v3570_v26 = vsel %vm284_vm2, %v3568_v44, %v3569_v13  ;;  %v3599_v13 = vsel %vm390_vm1, %v3596_v59, %v3598_v37  ;;  %v3625_v44 = vrot.slane %v8556_v39, 3 }
 0x241   : > { %2807 = vst.msk [vmem:[#allocation2 + $0x90] sm:$0xff] %vm903_vm14, %v1252_v46  ;;  %1894 = vst.msk [vmem:[#allocation2 + $0xc0] sm:$0xff] %vm903_vm14, %v1250_v36  ;;  %3602 = vrot.lane.b32.xlu1 %v3599_v13, %s6151_s21 }
 0x242   : > { %2350 = vst.msk [vmem:[#allocation2 + $0xa0] sm:$0xff] %vm903_vm14, %v1250_v36  ;;  %3262 = vst.msk [vmem:[#allocation2 + $0x60] sm:$0xff] %vm903_vm14, %v1250_v36  ;;  %v3626_v58 = vsel %vm496_vm3, %v3623_v10, %v3625_v44  ;;  %v5578_v44 = vpack.c.bf16 %v6448_v28, %v6446_v24 }
 0x243   : > { %1269 = vst.msk [vmem:[#allocation2 + $0xe0] sm:$0xff] %vm903_vm14, %v1250_v36  ;;  %2806 = vst.msk [vmem:[#allocation2 + $0x80] sm:$0xff] %vm903_vm14, %v1250_v36  ;;  %3573 = vrot.lane.b32.xlu0 %v3570_v26, %s6152_s22 }
 0x244   : > { %3718 = vst.msk [vmem:[#allocation2 + $0x40] sm:$0xff] %vm903_vm14, %v1250_v36  ;;  %3719 = vst.msk [vmem:[#allocation2 + $0x50] sm:$0xff] %vm903_vm14, %v1252_v46 }
 0x245   : > { %3763 = vst.msk [vmem:[#allocation2 + $0x68] sm:$0xff] %vm243_vm0, %v7239_v2  ;;  %3764 = vst.msk [vmem:[#allocation2 + $0x78] sm:$0xff] %vm243_vm0, %v7246_v1  ;;  %3629 = vrot.lane.b32.xlu1 %v3626_v58, %s6153_s24  ;;  %v10985_v58 = vrot.slane %v8553_v8, 4 }
 0x246   : > { %4630 = vst.msk [vmem:[#allocation2] sm:$0xff] %vm903_vm14, %v1250_v36  ;;  %4631 = vst.msk [vmem:[#allocation2 + $0x10] sm:$0xff] %vm903_vm14, %v1252_v46 }
 0x247   : > { %4174 = vst.msk [vmem:[#allocation2 + $0x20] sm:$0xff] %vm903_vm14, %v1250_v36  ;;  %4175 = vst.msk [vmem:[#allocation2 + $0x30] sm:$0xff] %vm903_vm14, %v1252_v46  ;;  %v3595_v46 = vrot.slane %v8565_v38, 2  ;;  %v8624_v36 = vpop.permute.xlu1 %1743 }
 0x248   : > { %1922 = vst.msk [vmem:[#allocation2 + $0xd0] sm:$0xff] %vm1009_vm15, %v1279_v17  ;;  %2378 = vst.msk [vmem:[#allocation2 + $0xb0] sm:$0xff] %vm1009_vm15, %v1279_v17 }
 0x249   : > { %3290 = vst.msk [vmem:[#allocation2 + $0x70] sm:$0xff] %vm1009_vm15, %v1279_v17  ;;  %1297 = vst.msk [vmem:[#allocation2 + $0xf0] sm:$0xff] %vm1009_vm15, %v1279_v17 }
 0x24a   : > { %2834 = vst.msk [vmem:[#allocation2 + $0x90] sm:$0xff] %vm1009_vm15, %v1279_v17  ;;  %1921 = vst.msk [vmem:[#allocation2 + $0xc0] sm:$0xff] %vm1009_vm15, %v1277_v12 }
 0x24b   : > { %2377 = vst.msk [vmem:[#allocation2 + $0xa0] sm:$0xff] %vm1009_vm15, %v1277_v12  ;;  %3289 = vst.msk [vmem:[#allocation2 + $0x60] sm:$0xff] %vm1009_vm15, %v1277_v12 }
 0x24c   : > { %1296 = vst.msk [vmem:[#allocation2 + $0xe0] sm:$0xff] %vm1009_vm15, %v1277_v12  ;;  %2833 = vst.msk [vmem:[#allocation2 + $0x80] sm:$0xff] %vm1009_vm15, %v1277_v12 }
 0x24d   : > { %3745 = vst.msk [vmem:[#allocation2 + $0x40] sm:$0xff] %vm1009_vm15, %v1277_v12  ;;  %3746 = vst.msk [vmem:[#allocation2 + $0x50] sm:$0xff] %vm1009_vm15, %v1279_v17 }
 0x24e   : > { %4657 = vst.msk [vmem:[#allocation2] sm:$0xff] %vm1009_vm15, %v1277_v12  ;;  %4658 = vst.msk [vmem:[#allocation2 + $0x10] sm:$0xff] %vm1009_vm15, %v1279_v17 }
 0x24f   : > { %4201 = vst.msk [vmem:[#allocation2 + $0x20] sm:$0xff] %vm1009_vm15, %v1277_v12  ;;  %4202 = vst.msk [vmem:[#allocation2 + $0x30] sm:$0xff] %vm1009_vm15, %v1279_v17  ;;  %v3597_v17 = vsel %vm390_vm1, %v3595_v46, %v3596_v59  ;;  %v3622_v12 = vrot.slane %v8565_v38, 3  ;;  %v8645_v37 = vld [vmem:[#allocation2 + $0xd0] sm:$0xff]  ;;  %v8651_v59 = vpop.permute.xlu1 %1770  ;;  %v8653_v46 = vpop.permute.xlu0 %1768 }
 0x250   : > { %10980 = vst [vmem:[#allocation91_spill] sm:$0xff] %v8632_v0  ;;  %10981 = vst [vmem:[#allocation92_spill] sm:$0xff] %v8634_v62  ;;  %v8647_v26 = vld [vmem:[#allocation2 + $0xb0] sm:$0xff]  ;;  %3600 = vrot.lane.b32.xlu0 %v3597_v17, %s6151_s21  ;;  %v3652_v0 = vrot.slane %v8556_v39, 4 }
 0x251   : > { %3765 = vst.msk [vmem:[#allocation2 + $0x88] sm:$0xff] %vm243_vm0, %v7450_v25  ;;  %3766 = vst.msk [vmem:[#allocation2 + $0x98] sm:$0xff] %vm243_vm0, %v7453_v31  ;;  %v8649_v50 = vld [vmem:[#allocation2 + $0xc0] sm:$0xff]  ;;  %v1344_v21 = vld [vmem:[#allocation2 + $0xf0] sm:$0xff]  ;;  %v3624_v17 = vsel %vm496_vm3, %v3622_v12, %v3623_v10 }
 0x252   : > { %10982 = vst [vmem:[#allocation93_spill] sm:$0xff] %v8647_v26  ;;  %10983 = vst [vmem:[#allocation94_spill] sm:$0xff] %v8649_v50  ;;  %v8665_v13 = vld [vmem:[#allocation2 + $0xa0] sm:$0xff]  ;;  %v2875_v10 = vld [vmem:[#allocation2 + $0x90] sm:$0xff]  ;;  %v3706_v50 = vrot.slane %v8556_v39, 6 }
 0x253   : > { %2188 = vst.msk [vmem:[#allocation2 + $0xd0] sm:$0xff] %vm243_vm0, %v7239_v2  ;;  %2644 = vst.msk [vmem:[#allocation2 + $0xb0] sm:$0xff] %vm243_vm0, %v7239_v2  ;;  %v1342_v62 = vld [vmem:[#allocation2 + $0xe0] sm:$0xff]  ;;  %v8685_v12 = vld [vmem:[#allocation2 + $0x70] sm:$0xff] }
 0x254   : > { %2187 = vst.msk [vmem:[#allocation2 + $0xc0] sm:$0xff] %vm243_vm0, %v7383_v7  ;;  %10984 = vst [vmem:[#allocation95_spill] sm:$0xff] %v8665_v13  ;;  %v5576_v24 = vpack.c.bf16 %v1344_v21, %v1342_v62  ;;  %v2873_v28 = vld [vmem:[#allocation2 + $0x80] sm:$0xff]  ;;  %3627 = vrot.lane.b32.xlu0 %v3624_v17, %s6153_s24  ;;  %v3679_v13 = vrot.slane %v8556_v39, 5 }
 0x255   : > { %2218 = vst.msk [vmem:[#allocation2 + $0xd0] sm:$0xff] %vm373_vm9, %v8624_v36  ;;  %2674 = vst.msk [vmem:[#allocation2 + $0xb0] sm:$0xff] %vm373_vm9, %v8624_v36  ;;  %v5721_v62 = vpack.c.bf16 %v2875_v10, %v2873_v28  ;;  %v8707_v21 = vld [vmem:[#allocation2 + $0x60] sm:$0xff]  ;;  %v8720_v28 = vpop.permute.xlu1 %1797  ;;  %v8722_v10 = vpop.permute.xlu0 %1795 }
 0x256   : > { %2643 = vst.msk [vmem:[#allocation2 + $0xa0] sm:$0xff] %vm243_vm0, %v7383_v7  ;;  %1731 = vst.msk [vmem:[#allocation2 + $0xe0] sm:$0xff] %vm243_vm0, %v7383_v7  ;;  %5577 = vmatpush1.bf16.xpose.msra.mxu1 %v5576_v24  ;;  %v3653_v24 = vsel %vm602_vm4, %v10985_v58, %v3652_v0  ;;  %v10986_v0 = vmov %v10985_v58  ;;  %v8763_v58 = vld [vmem:[#allocation2 + $0xb8] sm:$0xff] }
 0x257   : > { %2217 = vst.msk [vmem:[#allocation2 + $0xc0] sm:$0xff] %vm373_vm9, %v8626_v6  ;;  %2673 = vst.msk [vmem:[#allocation2 + $0xa0] sm:$0xff] %vm373_vm9, %v8626_v6  ;;  %5722 = vmatpush1.bf16.xpose.msra.mxu0 %v5721_v62  ;;  %5580 = vmatprep.subr.msk.bf16.mxu1 %vm6483_vm8, %v5578_v44  ;;  %v3651_v17 = vsel %vm602_vm4, %v3649_v49, %v10986_v0  ;;  %v8761_v62 = vld [vmem:[#allocation2 + $0xa8] sm:$0xff]  ;;  %v10989_v44 = vpack.c.bf16 %v7640_v30, %v7638_v40  ;;  %v3676_v49 = vrot.slane %v8565_v38, 5  ;;  %v8785_v40 = vld [vmem:[#allocation2 + $0x20] sm:$0xff] }
 0x258   : > { %1732 = vst.msk [vmem:[#allocation2 + $0xf0] sm:$0xff] %vm243_vm0, %v7239_v2  ;;  %3099 = vst.msk [vmem:[#allocation2 + $0x80] sm:$0xff] %vm243_vm0, %v7383_v7  ;;  %3656 = vrot.lane.b32.xlu1 %v3653_v24, %s6154_s25  ;;  %v8790_v30 = vld [vmem:[#allocation2 + $0x30] sm:$0xff]  ;;  %3654 = vrot.lane.b32.xlu0 %v3651_v17, %s6154_s25  ;;  %v5583_v17 = vpack.c.bf16 %v6544_v29, %v6542_v22  ;;  %v10995_v29 = vrot.slane %v8553_v8, 5 }
 0x259   : > { %2245 = vst.msk [vmem:[#allocation2 + $0xd0] sm:$0xff] %vm479_vm10, %v8651_v59  ;;  %2701 = vst.msk [vmem:[#allocation2 + $0xb0] sm:$0xff] %vm479_vm10, %v8651_v59  ;;  %5725 = vmatprep.subr.msk.bf16.mxu0 %vm6483_vm8, %v10989_v44  ;;  %v8794_v44 = vld [vmem:[#allocation2 + $0x40] sm:$0xff]  ;;  %v8796_v0 = vld [vmem:[#allocation2 + $0x50] sm:$0xff]  ;;  %v1825_v26 = vpop.permute.xlu1 %1824 }
 0x25a   : > { %2244 = vst.msk [vmem:[#allocation2 + $0xc0] sm:$0xff] %vm479_vm10, %v8653_v46  ;;  %2700 = vst.msk [vmem:[#allocation2 + $0xa0] sm:$0xff] %vm479_vm10, %v8653_v46 }
 0x25b   : > { %1761 = vst.msk [vmem:[#allocation2 + $0xe0] sm:$0xff] %vm373_vm9, %v8626_v6  ;;  %1762 = vst.msk [vmem:[#allocation2 + $0xf0] sm:$0xff] %vm373_vm9, %v8624_v36 }
 0x25c   : > { %3100 = vst.msk [vmem:[#allocation2 + $0x90] sm:$0xff] %vm243_vm0, %v7239_v2  ;;  %3556 = vst.msk [vmem:[#allocation2 + $0x70] sm:$0xff] %vm243_vm0, %v7239_v2 }
 0x25d   : > { %1788 = vst.msk [vmem:[#allocation2 + $0xe0] sm:$0xff] %vm479_vm10, %v8653_v46  ;;  %1789 = vst.msk [vmem:[#allocation2 + $0xf0] sm:$0xff] %vm479_vm10, %v8651_v59  ;;  %1500 = vmatmul.mubr.f32.vlgmr.msra.gmra.mrb[0].mxu1 %v5186_v3  ;;  %v5188_v3 = vld [vmem:[%s10796_s1 + $0x90] sm:$0xff] }
 0x25e   : > { %3129 = vst.msk [vmem:[#allocation2 + $0x80] sm:$0xff] %vm373_vm9, %v8626_v6  ;;  %3130 = vst.msk [vmem:[#allocation2 + $0x90] sm:$0xff] %vm373_vm9, %v8624_v36 }
 0x25f   : > { %3586 = vst.msk [vmem:[#allocation2 + $0x70] sm:$0xff] %vm373_vm9, %v8624_v36  ;;  %10987 = vst [vmem:[#allocation96_spill] sm:$0xff] %v8761_v62  ;;  %v10994_v62 = vrot.slane %v8553_v8, 5 }
 0x260   : > { %3555 = vst.msk [vmem:[#allocation2 + $0x60] sm:$0xff] %vm243_vm0, %v7383_v7  ;;  %10988 = vst [vmem:[#allocation97_spill] sm:$0xff] %v8763_v58  ;;  %v3704_v58 = vrot.slane %v8553_v8, 6 }
 0x261   : > { %3156 = vst.msk [vmem:[#allocation2 + $0x80] sm:$0xff] %vm479_vm10, %v8653_v46  ;;  %3157 = vst.msk [vmem:[#allocation2 + $0x90] sm:$0xff] %vm479_vm10, %v8651_v59  ;;  %v3680_v24 = vsel %vm708_vm5, %v10994_v62, %v3679_v13  ;;  %v1823_v13 = vpop.permute.xlu0 %1822  ;;  %v5189_v62 = vld [vmem:[%s10796_s1 + $0x98] sm:$0xff] }
 0x262   : > { %1816 = vst.msk [vmem:[#allocation2 + $0xf0] sm:$0xff] %vm585_vm11, %v8720_v28  ;;  %2272 = vst.msk [vmem:[#allocation2 + $0xd0] sm:$0xff] %vm585_vm11, %v8720_v28  ;;  %3683 = vrot.lane.b32.xlu1 %v3680_v24, %s6155_s26  ;;  %5219 = vmatprep.mubr.msk.f32.mxu1 %vm243_vm0, %v5189_v62  ;;  %v8894_v24 = vld [vmem:[%s6249_s11 + $0x160] sm:$0xff]  ;;  %v5197_v62 = vld [vmem:[%s10796_s1 + $0xd8] sm:$0xff] }
 0x263   : > { %2728 = vst.msk [vmem:[#allocation2 + $0xb0] sm:$0xff] %vm585_vm11, %v8720_v28  ;;  %1815 = vst.msk [vmem:[#allocation2 + $0xe0] sm:$0xff] %vm585_vm11, %v8722_v10  ;;  %1505 = vmatmul.mubr.f32.gmra.mrb[2].mxu1 %v5188_v3 }
 0x264   : > { %2271 = vst.msk [vmem:[#allocation2 + $0xc0] sm:$0xff] %vm585_vm11, %v8722_v10  ;;  %2727 = vst.msk [vmem:[#allocation2 + $0xa0] sm:$0xff] %vm585_vm11, %v8722_v10 }
 0x265   : > { %3613 = vst.msk [vmem:[#allocation2 + $0x70] sm:$0xff] %vm479_vm10, %v8651_v59  ;;  %10990 = vst [vmem:[#allocation98_spill] sm:$0xff] %v8785_v40 }
 0x266   : > { %3585 = vst.msk [vmem:[#allocation2 + $0x60] sm:$0xff] %vm373_vm9, %v8626_v6  ;;  %10991 = vst [vmem:[#allocation99_spill] sm:$0xff] %v8790_v30  ;;  %v5199_v30 = vld [vmem:[%s10796_s1 + $0xe8] sm:$0xff] }
 0x267   : > { %3184 = vst.msk [vmem:[#allocation2 + $0x90] sm:$0xff] %vm585_vm11, %v8720_v28  ;;  %3183 = vst.msk [vmem:[#allocation2 + $0x80] sm:$0xff] %vm585_vm11, %v8722_v10 }
 0x268   : > { %3640 = vst.msk [vmem:[#allocation2 + $0x70] sm:$0xff] %vm585_vm11, %v8720_v28  ;;  %10992 = vst [vmem:[#allocation100_spill] sm:$0xff] %v8794_v44  ;;  %v11008_v44 = vld [vmem:[#allocation33_spill] sm:$0xff] }
 0x269   : > { %3612 = vst.msk [vmem:[#allocation2 + $0x60] sm:$0xff] %vm479_vm10, %v8653_v46  ;;  %10993 = vst [vmem:[#allocation101_spill] sm:$0xff] %v8796_v0 }
 0x26a   : > { %3767 = vst.msk [vmem:[#allocation2 + $0xa8] sm:$0xff] %vm243_vm0, %v7879_v54  ;;  %3768 = vst.msk [vmem:[#allocation2 + $0xb8] sm:$0xff] %vm243_vm0, %v7882_v42 }
 0x26b   : > { %3639 = vst.msk [vmem:[#allocation2 + $0x60] sm:$0xff] %vm585_vm11, %v8722_v10 }
 0x26c   : > { %4467 = vst.msk [vmem:[#allocation2 + $0x20] sm:$0xff] %vm243_vm0, %v7383_v7  ;;  %4468 = vst.msk [vmem:[#allocation2 + $0x30] sm:$0xff] %vm243_vm0, %v7239_v2 }
 0x26d   : > { %4497 = vst.msk [vmem:[#allocation2 + $0x20] sm:$0xff] %vm373_vm9, %v8626_v6  ;;  %4498 = vst.msk [vmem:[#allocation2 + $0x30] sm:$0xff] %vm373_vm9, %v8624_v36 }
 0x26e   : > { %4011 = vst.msk [vmem:[#allocation2 + $0x40] sm:$0xff] %vm243_vm0, %v7383_v7  ;;  %4012 = vst.msk [vmem:[#allocation2 + $0x50] sm:$0xff] %vm243_vm0, %v7239_v2  ;;  %v3703_v7 = vrot.slane %v8565_v38, 6 }
 0x26f   : > { %1843 = vst.msk [vmem:[#allocation2 + $0xf0] sm:$0xff] %vm691_vm12, %v1825_v26  ;;  %2299 = vst.msk [vmem:[#allocation2 + $0xd0] sm:$0xff] %vm691_vm12, %v1825_v26 }
 0x270   : > { %2755 = vst.msk [vmem:[#allocation2 + $0xb0] sm:$0xff] %vm691_vm12, %v1825_v26  ;;  %3211 = vst.msk [vmem:[#allocation2 + $0x90] sm:$0xff] %vm691_vm12, %v1825_v26 }
 0x271   : > { %3667 = vst.msk [vmem:[#allocation2 + $0x70] sm:$0xff] %vm691_vm12, %v1825_v26  ;;  %1842 = vst.msk [vmem:[#allocation2 + $0xe0] sm:$0xff] %vm691_vm12, %v1823_v13 }
 0x272   : > { %4524 = vst.msk [vmem:[#allocation2 + $0x20] sm:$0xff] %vm479_vm10, %v8653_v46  ;;  %4525 = vst.msk [vmem:[#allocation2 + $0x30] sm:$0xff] %vm479_vm10, %v8651_v59 }
 0x273   : > { %4041 = vst.msk [vmem:[#allocation2 + $0x40] sm:$0xff] %vm373_vm9, %v8626_v6  ;;  %4042 = vst.msk [vmem:[#allocation2 + $0x50] sm:$0xff] %vm373_vm9, %v8624_v36  ;;  %v3678_v6 = vsel %vm708_vm5, %v3676_v49, %v10995_v29  ;;  %v10996_v36 = vpack.c.bf16 %v6790_v4, %v6792_v5  ;;  %v3731_v4 = vrot.slane %v8553_v8, 7  ;;  %v3733_v5 = vrot.slane %v8556_v39, 7  ;;  %v8891_v49 = vld [vmem:[%s6249_s11 + $0x158] sm:$0xff]  ;;  %v8919_v29 = vld [vmem:[%s6249_s11 + $0x150] sm:$0xff] }
 0x274   : > { %2298 = vst.msk [vmem:[#allocation2 + $0xc0] sm:$0xff] %vm691_vm12, %v1823_v13  ;;  %3210 = vst.msk [vmem:[#allocation2 + $0x80] sm:$0xff] %vm691_vm12, %v1823_v13  ;;  %3681 = vrot.lane.b32.xlu0 %v3678_v6, %s6155_s26  ;;  %v4054_v22 = vrot.slane %v8891_v49, 2  ;;  %v4080_v40 = vrot.slane %v8919_v29, 3 }
 0x275   : > { %2754 = vst.msk [vmem:[#allocation2 + $0xa0] sm:$0xff] %vm691_vm12, %v1823_v13  ;;  %3666 = vst.msk [vmem:[#allocation2 + $0x60] sm:$0xff] %vm691_vm12, %v1823_v13  ;;  %5582 = vmatpush1.bf16.xpose.msra.mxu1 %v10996_v36  ;;  %v4027_v36 = vrot.slane %v8891_v49, 1 }
 0x276   : > { %4551 = vst.msk [vmem:[#allocation2 + $0x20] sm:$0xff] %vm585_vm11, %v8722_v10  ;;  %4552 = vst.msk [vmem:[#allocation2 + $0x30] sm:$0xff] %vm585_vm11, %v8720_v28  ;;  %5585 = vmatprep.subr.msk.bf16.mxu1 %vm6483_vm8, %v5583_v17  ;;  %v3730_v17 = vrot.slane %v8565_v38, 7 }
 0x277   : > { %4068 = vst.msk [vmem:[#allocation2 + $0x40] sm:$0xff] %vm479_vm10, %v8653_v46  ;;  %4069 = vst.msk [vmem:[#allocation2 + $0x50] sm:$0xff] %vm479_vm10, %v8651_v59  ;;  %v1852_v46 = vpop.permute.xlu1 %1851  ;;  %v5191_v59 = vld [vmem:[%s10796_s1 + $0xa8] sm:$0xff] }
 0x278   : > { %4578 = vst.msk [vmem:[#allocation2 + $0x20] sm:$0xff] %vm691_vm12, %v1823_v13  ;;  %4579 = vst.msk [vmem:[#allocation2 + $0x30] sm:$0xff] %vm691_vm12, %v1825_v26  ;;  %5220 = vmatprep.mubr.msk.f32.mxu1 %vm243_vm0, %v5191_v59  ;;  %v5588_v59 = vpack.c.bf16 %v6619_v33, %v6617_v32  ;;  %v3732_v32 = vsel %vm920_vm7, %v3730_v17, %v3731_v4  ;;  %v4026_v33 = vrot.slane %v8919_v29, 1 }
 0x279   : > { %4095 = vst.msk [vmem:[#allocation2 + $0x40] sm:$0xff] %vm585_vm11, %v8722_v10  ;;  %4096 = vst.msk [vmem:[#allocation2 + $0x50] sm:$0xff] %vm585_vm11, %v8720_v28  ;;  %v3707_v28 = vsel %vm814_vm6, %v3704_v58, %v3706_v50  ;;  %v8877_v10 = vld [vmem:[#allocation2 + $0xc8] sm:$0xff]  ;;  %v1850_v50 = vpop.permute.xlu0 %1849 }
 0x27a   : > { %10997 = vst [vmem:[#allocation102_spill] sm:$0xff] %v8877_v10  ;;  %4122 = vst.msk [vmem:[#allocation2 + $0x40] sm:$0xff] %vm691_vm12, %v1823_v13  ;;  %v3705_v13 = vsel %vm814_vm6, %v3703_v7, %v3704_v58  ;;  %3710 = vrot.lane.b32.xlu1 %v3707_v28, %s6156_s28  ;;  %v5190_v58 = vld [vmem:[%s10796_s1 + $0xa0] sm:$0xff]  ;;  %v3734_v7 = vsel %vm920_vm7, %v3731_v4, %v3733_v5  ;;  %v5193_v28 = vld [vmem:[%s10796_s1 + $0xb8] sm:$0xff]  ;;  %v4137_v10 = vrot.slane %v8894_v24, 5 }
 0x27b   : > { %4123 = vst.msk [vmem:[#allocation2 + $0x50] sm:$0xff] %vm691_vm12, %v1825_v26  ;;  %v8896_v26 = vld [vmem:[#allocation2 + $0xd8] sm:$0xff]  ;;  %v1879_v6 = vpop.permute.xlu1 %1878  ;;  %3708 = vrot.lane.b32.xlu0 %v3705_v13, %s6156_s28  ;;  %1510 = vmatmul.mubr.f32.gmra.mrb[4].mxu1 %v5190_v58  ;;  %v10999_v5 = vld [vmem:[#allocation23_spill] sm:$0xff] }
 0x27c   : > { %1870 = vst.msk [vmem:[#allocation2 + $0xf0] sm:$0xff] %vm797_vm13, %v1852_v46  ;;  %2326 = vst.msk [vmem:[#allocation2 + $0xd0] sm:$0xff] %vm797_vm13, %v1852_v46  ;;  %5221 = vmatprep.mubr.msk.f32.mxu1 %vm243_vm0, %v5193_v28  ;;  %v5192_v4 = vld [vmem:[%s10796_s1 + $0xb0] sm:$0xff]  ;;  %v4053_v28 = vrot.slane %v8919_v29, 2 }
 0x27d   : > { %2782 = vst.msk [vmem:[#allocation2 + $0xb0] sm:$0xff] %vm797_vm13, %v1852_v46  ;;  %3238 = vst.msk [vmem:[#allocation2 + $0x90] sm:$0xff] %vm797_vm13, %v1852_v46  ;;  %v1877_v3 = vpop.permute.xlu0 %1876 }
 0x27e   : > { %3694 = vst.msk [vmem:[#allocation2 + $0x70] sm:$0xff] %vm797_vm13, %v1852_v46  ;;  %10998 = vst [vmem:[#allocation103_spill] sm:$0xff] %v8896_v26  ;;  %3737 = vrot.lane.b32.xlu1 %v3734_v7, %s6157_s29  ;;  %v5195_v7 = vld [vmem:[%s10796_s1 + $0xc8] sm:$0xff]  ;;  %v4107_v26 = vrot.slane %v8919_v29, 4 }
 0x27f   : > { %3769 = vst.msk [vmem:[#allocation2 + $0xc8] sm:$0xff] %vm243_vm0, %v8183_v43  ;;  %3770 = vst.msk [vmem:[#allocation2 + $0xd8] sm:$0xff] %vm243_vm0, %v8186_v16  ;;  %3735 = vrot.lane.b32.xlu0 %v3732_v32, %s6157_s29  ;;  %v8983_v32 = vld [vmem:[#allocation2 + $0xf8] sm:$0xff]  ;;  %1515 = vmatmul.mubr.f32.gmra.mrb[6].mxu1 %v5192_v4 }
 0x280   : > { %4606 = vst.msk [vmem:[#allocation2 + $0x30] sm:$0xff] %vm797_vm13, %v1852_v46  ;;  %4150 = vst.msk [vmem:[#allocation2 + $0x50] sm:$0xff] %vm797_vm13, %v1852_v46  ;;  %v4029_v46 = vrot.slane %v8894_v24, 1  ;;  %5222 = vmatprep.mubr.msk.f32.mxu1 %vm243_vm0, %v5195_v7  ;;  %v4055_v7 = vsel %vm390_vm1, %v4053_v28, %v4054_v22 }
 0x281   : > { %1869 = vst.msk [vmem:[#allocation2 + $0xe0] sm:$0xff] %vm797_vm13, %v1850_v50  ;;  %2325 = vst.msk [vmem:[#allocation2 + $0xc0] sm:$0xff] %vm797_vm13, %v1850_v50  ;;  %v1904_v58 = vpop.permute.xlu0 %1903 }
 0x282   : > { %2781 = vst.msk [vmem:[#allocation2 + $0xa0] sm:$0xff] %vm797_vm13, %v1850_v50  ;;  %3237 = vst.msk [vmem:[#allocation2 + $0x80] sm:$0xff] %vm797_vm13, %v1850_v50  ;;  %v4030_v17 = vsel %vm284_vm2, %v4027_v36, %v4029_v46  ;;  %v8972_v46 = vld [vmem:[#allocation2 + $0xe8] sm:$0xff] }
 0x283   : > { %3693 = vst.msk [vmem:[#allocation2 + $0x60] sm:$0xff] %vm797_vm13, %v1850_v50  ;;  %4605 = vst.msk [vmem:[#allocation2 + $0x20] sm:$0xff] %vm797_vm13, %v1850_v50  ;;  %4033 = vrot.lane.b32.xlu1 %v4030_v17, %s6152_s22  ;;  %v11004_v17 = vld [vmem:[#allocation13_spill] sm:$0xff] }
 0x284   : > { %4149 = vst.msk [vmem:[#allocation2 + $0x40] sm:$0xff] %vm797_vm13, %v1850_v50  ;;  %v11000_v50 = vld [vmem:[#allocation24_spill] sm:$0xff]  ;;  %11002 = vst [vmem:[#allocation23_spill] sm:$0xff] %v8972_v46 }
 0x285   : > { %1897 = vst.msk [vmem:[#allocation2 + $0xf0] sm:$0xff] %vm903_vm14, %v1879_v6  ;;  %2353 = vst.msk [vmem:[#allocation2 + $0xd0] sm:$0xff] %vm903_vm14, %v1879_v6  ;;  %v11001_v13 = vpack.c.bf16 %v10999_v5, %v11000_v50  ;;  %v9003_v4 = vpop.permute.xlu0 %2199 }
 0x286   : > { %3265 = vst.msk [vmem:[#allocation2 + $0x90] sm:$0xff] %vm903_vm14, %v1879_v6  ;;  %2809 = vst.msk [vmem:[#allocation2 + $0xb0] sm:$0xff] %vm903_vm14, %v1879_v6 }
 0x287   : > { %3721 = vst.msk [vmem:[#allocation2 + $0x70] sm:$0xff] %vm903_vm14, %v1879_v6  ;;  %4633 = vst.msk [vmem:[#allocation2 + $0x30] sm:$0xff] %vm903_vm14, %v1879_v6  ;;  %5587 = vmatpush1.bf16.xpose.msra.mxu1 %v11001_v13  ;;  %v4081_v13 = vrot.slane %v8891_v49, 3 }
 0x288   : > { %4177 = vst.msk [vmem:[#allocation2 + $0x50] sm:$0xff] %vm903_vm14, %v1879_v6  ;;  %1896 = vst.msk [vmem:[#allocation2 + $0xe0] sm:$0xff] %vm903_vm14, %v1877_v3  ;;  %v1906_v6 = vpop.permute.xlu1 %1905  ;;  %5590 = vmatprep.subr.msk.bf16.mxu1 %vm6483_vm8, %v5588_v59  ;;  %v4028_v59 = vsel %vm284_vm2, %v4026_v33, %v4027_v36  ;;  %v5194_v33 = vld [vmem:[%s10796_s1 + $0xc0] sm:$0xff] }
 0x289   : > { %2352 = vst.msk [vmem:[#allocation2 + $0xc0] sm:$0xff] %vm903_vm14, %v1877_v3  ;;  %3264 = vst.msk [vmem:[#allocation2 + $0x80] sm:$0xff] %vm903_vm14, %v1877_v3  ;;  %4031 = vrot.lane.b32.xlu0 %v4028_v59, %s6152_s22  ;;  %1520 = vmatmul.mubr.f32.gmra.mrb[8].mxu1 %v5194_v33  ;;  %v11007_v59 = vld [vmem:[#allocation31_spill] sm:$0xff]  ;;  %v4082_v46 = vsel %vm496_vm3, %v4080_v40, %v4081_v13 }
 0x28a   : > { %2808 = vst.msk [vmem:[#allocation2 + $0xa0] sm:$0xff] %vm903_vm14, %v1877_v3  ;;  %3720 = vst.msk [vmem:[#allocation2 + $0x60] sm:$0xff] %vm903_vm14, %v1877_v3  ;;  %5223 = vmatprep.mubr.msk.f32.mxu1 %vm243_vm0, %v5197_v62 }
 0x28b   : > { %4632 = vst.msk [vmem:[#allocation2 + $0x20] sm:$0xff] %vm903_vm14, %v1877_v3  ;;  %4176 = vst.msk [vmem:[#allocation2 + $0x40] sm:$0xff] %vm903_vm14, %v1877_v3  ;;  %v4056_v3 = vrot.slane %v8894_v24, 2 }
 0x28c   : > { %1924 = vst.msk [vmem:[#allocation2 + $0xf0] sm:$0xff] %vm1009_vm15, %v1906_v6  ;;  %2380 = vst.msk [vmem:[#allocation2 + $0xd0] sm:$0xff] %vm1009_vm15, %v1906_v6  ;;  %v8994_v36 = vpop.permute.xlu1 %2201 }
 0x28d   : > { %3292 = vst.msk [vmem:[#allocation2 + $0x90] sm:$0xff] %vm1009_vm15, %v1906_v6  ;;  %2836 = vst.msk [vmem:[#allocation2 + $0xb0] sm:$0xff] %vm1009_vm15, %v1906_v6  ;;  %v4057_v50 = vsel %vm390_vm1, %v4054_v22, %v4056_v3  ;;  %v5196_v3 = vld [vmem:[%s10796_s1 + $0xd0] sm:$0xff]  ;;  %v11009_v22 = vpack.c.bf16 %v11007_v59, %v11008_v44  ;;  %v9041_v59 = vpop.permute.xlu0 %2226  ;;  %4058 = vrot.lane.b32.xlu0 %v4055_v7, %s6151_s21 }
 0x28e   : > { %3748 = vst.msk [vmem:[#allocation2 + $0x70] sm:$0xff] %vm1009_vm15, %v1906_v6  ;;  %4660 = vst.msk [vmem:[#allocation2 + $0x30] sm:$0xff] %vm1009_vm15, %v1906_v6  ;;  %4060 = vrot.lane.b32.xlu1 %v4057_v50, %s6151_s21  ;;  %1525 = vmatmul.mubr.f32.gmra.mrb[10].mxu1 %v5196_v3  ;;  %v11014_v3 = vrot.slane %v8891_v49, 4 }
 0x28f   : > { %4204 = vst.msk [vmem:[#allocation2 + $0x50] sm:$0xff] %vm1009_vm15, %v1906_v6  ;;  %1923 = vst.msk [vmem:[#allocation2 + $0xe0] sm:$0xff] %vm1009_vm15, %v1904_v58  ;;  %v4083_v6 = vrot.slane %v8894_v24, 3  ;;  %5592 = vmatpush1.bf16.xpose.msra.mxu1 %v11009_v22  ;;  %5224 = vmatprep.mubr.msk.f32.mxu1 %vm243_vm0, %v5199_v30 }
 0x290   : > { %2379 = vst.msk [vmem:[#allocation2 + $0xc0] sm:$0xff] %vm1009_vm15, %v1904_v58  ;;  %3291 = vst.msk [vmem:[#allocation2 + $0x80] sm:$0xff] %vm1009_vm15, %v1904_v58  ;;  %v9027_v28 = vpop.permute.xlu1 %2228 }
 0x291   : > { %2835 = vst.msk [vmem:[#allocation2 + $0xa0] sm:$0xff] %vm1009_vm15, %v1904_v58  ;;  %3747 = vst.msk [vmem:[#allocation2 + $0x60] sm:$0xff] %vm1009_vm15, %v1904_v58  ;;  %v4084_v0 = vsel %vm496_vm3, %v4081_v13, %v4083_v6  ;;  %v9120_v13 = vld [vmem:[#allocation2 + $0x8] sm:$0xff]  ;;  %v2254_v30 = vpop.permute.xlu0 %2253  ;;  %4085 = vrot.lane.b32.xlu0 %v4082_v46, %s6153_s24  ;;  %v4134_v46 = vrot.slane %v8919_v29, 5 }
 0x292   : > { %11003 = vst [vmem:[#allocation24_spill] sm:$0xff] %v8983_v32  ;;  %3771 = vst.msk [vmem:[#allocation2 + $0xe8] sm:$0xff] %vm243_vm0, %v8553_v8  ;;  %v4110_v32 = vrot.slane %v8894_v24, 4  ;;  %4087 = vrot.lane.b32.xlu1 %v4084_v0, %s6153_s24  ;;  %v5198_v0 = vld [vmem:[%s10796_s1 + $0xe0] sm:$0xff] }
 0x293   : > { %4659 = vst.msk [vmem:[#allocation2 + $0x20] sm:$0xff] %vm1009_vm15, %v1904_v58  ;;  %4203 = vst.msk [vmem:[#allocation2 + $0x40] sm:$0xff] %vm1009_vm15, %v1904_v58  ;;  %v11005_v58 = vld [vmem:[#allocation14_spill] sm:$0xff]  ;;  %1530 = vmatmul.mubr.f32.gmra.mrb[12].mxu1 %v5198_v0  ;;  %v11024_v0 = vrot.slane %v8891_v49, 5 }
 0x294   : > { %3772 = vst.msk [vmem:[#allocation2 + $0xf8] sm:$0xff] %vm243_vm0, %v8556_v39  ;;  %v5593_v5 = vpack.c.bf16 %v11005_v58, %v11004_v17  ;;  %v9020_v17 = vld [vmem:[#allocation2 + $0xf0] sm:$0xff]  ;;  %4215 = vst.msk [vmem:[#allocation2 + $0x8] sm:$0xff] %vm243_vm0, %v6526_v14  ;;  %v11020_v14 = vrot.slane %v8891_v49, 4 }
 0x295   : > { %v9022_v58 = vld [vmem:[#allocation2 + $0xd0] sm:$0xff]  ;;  %2190 = vst.msk [vmem:[#allocation2 + $0xf0] sm:$0xff] %vm243_vm0, %v7450_v25 }
 0x296   : > { %11006 = vst [vmem:[#allocation13_spill] sm:$0xff] %v9022_v58  ;;  %v2879_v33 = vld [vmem:[#allocation2 + $0xb0] sm:$0xff]  ;;  %2646 = vst.msk [vmem:[#allocation2 + $0xd0] sm:$0xff] %vm243_vm0, %v7450_v25  ;;  %v9037_v50 = vld [vmem:[#allocation2 + $0xe0] sm:$0xff]  ;;  %5595 = vmatprep.subr.msk.bf16.mxu1 %vm6483_vm8, %v5593_v5 }
 0x297   : > { %11010 = vst [vmem:[#allocation14_spill] sm:$0xff] %v9037_v50  ;;  %v9039_v44 = vld [vmem:[#allocation2 + $0xc0] sm:$0xff]  ;;  %3102 = vst.msk [vmem:[#allocation2 + $0xb0] sm:$0xff] %vm243_vm0, %v7450_v25  ;;  %v9060_v5 = vld [vmem:[#allocation2 + $0x90] sm:$0xff] }
 0x298   : > { %11011 = vst [vmem:[#allocation31_spill] sm:$0xff] %v9039_v44  ;;  %v2877_v22 = vld [vmem:[#allocation2 + $0xa0] sm:$0xff]  ;;  %2220 = vst.msk [vmem:[#allocation2 + $0xf0] sm:$0xff] %vm373_vm9, %v8994_v36  ;;  %v9062_v6 = vld [vmem:[#allocation2 + $0x70] sm:$0xff] }
 0x299   : > { %2676 = vst.msk [vmem:[#allocation2 + $0xd0] sm:$0xff] %vm373_vm9, %v8994_v36  ;;  %v5726_v62 = vpack.c.bf16 %v2879_v33, %v2877_v22  ;;  %3132 = vst.msk [vmem:[#allocation2 + $0xb0] sm:$0xff] %vm373_vm9, %v8994_v36  ;;  %v9064_v7 = vld [vmem:[#allocation2 + $0x80] sm:$0xff]  ;;  %v9101_v22 = vpop.permute.xlu1 %2255  ;;  %v9122_v44 = vld [vmem:[#allocation2 + $0x18] sm:$0xff]  ;;  %v11017_v33 = vpack.c.bf16 %v7908_v27, %v7902_v23 }
 0x29a   : > { %2189 = vst.msk [vmem:[#allocation2 + $0xe0] sm:$0xff] %vm243_vm0, %v7635_v47  ;;  %2645 = vst.msk [vmem:[#allocation2 + $0xc0] sm:$0xff] %vm243_vm0, %v7635_v47  ;;  %v9088_v40 = vld [vmem:[#allocation2 + $0x60] sm:$0xff]  ;;  %v9157_v23 = vld [vmem:[#allocation2 + $0x50] sm:$0xff] }
 0x29b   : > { %3101 = vst.msk [vmem:[#allocation2 + $0xa0] sm:$0xff] %vm243_vm0, %v7635_v47  ;;  %11012 = vst [vmem:[#allocation33_spill] sm:$0xff] %v9062_v6  ;;  %5727 = vmatpush1.bf16.xpose.msra.mxu0 %v5726_v62  ;;  %v4111_v62 = vsel %vm602_vm4, %v11014_v3, %v4110_v32  ;;  %v11015_v58 = vld [vmem:[#allocation17_spill] sm:$0xff]  ;;  %v11016_v32 = vld [vmem:[#allocation18_spill] sm:$0xff] }
 0x29c   : > { %2219 = vst.msk [vmem:[#allocation2 + $0xe0] sm:$0xff] %vm373_vm9, %v9003_v4  ;;  %2675 = vst.msk [vmem:[#allocation2 + $0xc0] sm:$0xff] %vm373_vm9, %v9003_v4  ;;  %v5598_v3 = vpack.c.bf16 %v11016_v32, %v11015_v58  ;;  %5730 = vmatprep.subr.msk.bf16.mxu0 %vm6483_vm8, %v11017_v33  ;;  %v5201_v58 = vld [vmem:[%s10796_s1 + $0xf8] sm:$0xff]  ;;  %v9155_v50 = vld [vmem:[#allocation2 + $0x40] sm:$0xff]  ;;  %4114 = vrot.lane.b32.xlu1 %v4111_v62, %s6154_s25  ;;  %v4138_v62 = vsel %vm708_vm5, %v11024_v0, %v4137_v10  ;;  %v4164_v32 = vrot.slane %v8894_v24, 6  ;;  %v2281_v10 = vpop.permute.xlu0 %2280 }
 0x29d   : > { %2247 = vst.msk [vmem:[#allocation2 + $0xf0] sm:$0xff] %vm479_vm10, %v9027_v28  ;;  %2703 = vst.msk [vmem:[#allocation2 + $0xd0] sm:$0xff] %vm479_vm10, %v9027_v28  ;;  %v2283_v27 = vpop.permute.xlu1 %2282  ;;  %5225 = vmatprep.mubr.msk.f32.mxu1 %vm243_vm0, %v5201_v58  ;;  %v5200_v33 = vld [vmem:[%s10796_s1 + $0xf0] sm:$0xff] }
 0x29e   : > { %3131 = vst.msk [vmem:[#allocation2 + $0xa0] sm:$0xff] %vm373_vm9, %v9003_v4  ;;  %11013 = vst [vmem:[#allocation104_spill] sm:$0xff] %v9088_v40  ;;  %1535 = vmatmul.mubr.f32.gmra.mrb[14].mxu1 %v5200_v33  ;;  %v11026_v33 = vld [vmem:[#allocation25_spill] sm:$0xff]  ;;  %v11038_v40 = vld [vmem:[#allocation47_spill] sm:$0xff] }
 0x29f   : > { %3159 = vst.msk [vmem:[#allocation2 + $0xb0] sm:$0xff] %vm479_vm10, %v9027_v28  ;;  %2246 = vst.msk [vmem:[#allocation2 + $0xe0] sm:$0xff] %vm479_vm10, %v9041_v59 }
 0x2a0   : > { %3558 = vst.msk [vmem:[#allocation2 + $0x90] sm:$0xff] %vm243_vm0, %v7450_v25  ;;  %4014 = vst.msk [vmem:[#allocation2 + $0x70] sm:$0xff] %vm243_vm0, %v7450_v25  ;;  %4141 = vrot.lane.b32.xlu1 %v4138_v62, %s6155_s26 }
 0x2a1   : > { %3557 = vst.msk [vmem:[#allocation2 + $0x80] sm:$0xff] %vm243_vm0, %v7635_v47  ;;  %4013 = vst.msk [vmem:[#allocation2 + $0x60] sm:$0xff] %vm243_vm0, %v7635_v47 }
 0x2a2   : > { %2702 = vst.msk [vmem:[#allocation2 + $0xc0] sm:$0xff] %vm479_vm10, %v9041_v59  ;;  %3158 = vst.msk [vmem:[#allocation2 + $0xa0] sm:$0xff] %vm479_vm10, %v9041_v59 }
 0x2a3   : > { %3588 = vst.msk [vmem:[#allocation2 + $0x90] sm:$0xff] %vm373_vm9, %v8994_v36  ;;  %4044 = vst.msk [vmem:[#allocation2 + $0x70] sm:$0xff] %vm373_vm9, %v8994_v36 }
 0x2a4   : > { %3587 = vst.msk [vmem:[#allocation2 + $0x80] sm:$0xff] %vm373_vm9, %v9003_v4  ;;  %4043 = vst.msk [vmem:[#allocation2 + $0x60] sm:$0xff] %vm373_vm9, %v9003_v4 }
 0x2a5   : > { %2274 = vst.msk [vmem:[#allocation2 + $0xf0] sm:$0xff] %vm585_vm11, %v9101_v22  ;;  %2730 = vst.msk [vmem:[#allocation2 + $0xd0] sm:$0xff] %vm585_vm11, %v9101_v22 }
 0x2a6   : > { %3186 = vst.msk [vmem:[#allocation2 + $0xb0] sm:$0xff] %vm585_vm11, %v9101_v22  ;;  %11018 = vst [vmem:[#allocation17_spill] sm:$0xff] %v9155_v50  ;;  %v9201_v50 = vld [vmem:[#allocation2 + $0x38] sm:$0xff] }
 0x2a7   : > { %3615 = vst.msk [vmem:[#allocation2 + $0x90] sm:$0xff] %vm479_vm10, %v9027_v28  ;;  %4071 = vst.msk [vmem:[#allocation2 + $0x70] sm:$0xff] %vm479_vm10, %v9027_v28 }
 0x2a8   : > { %3614 = vst.msk [vmem:[#allocation2 + $0x80] sm:$0xff] %vm479_vm10, %v9041_v59  ;;  %11019 = vst [vmem:[#allocation18_spill] sm:$0xff] %v9157_v23 }
 0x2a9   : > { %4216 = vst.msk [vmem:[#allocation2 + $0x18] sm:$0xff] %vm243_vm0, %v6529_v18  ;;  %v4109_v18 = vsel %vm602_vm4, %v4107_v26, %v11020_v14  ;;  %4469 = vst.msk [vmem:[#allocation2 + $0x40] sm:$0xff] %vm243_vm0, %v7635_v47  ;;  %v11021_v26 = vld [vmem:[#allocation41_spill] sm:$0xff]  ;;  %v11022_v14 = vld [vmem:[#allocation44_spill] sm:$0xff] }
 0x2aa   : > { %2273 = vst.msk [vmem:[#allocation2 + $0xe0] sm:$0xff] %vm585_vm11, %v2254_v30  ;;  %2729 = vst.msk [vmem:[#allocation2 + $0xc0] sm:$0xff] %vm585_vm11, %v2254_v30  ;;  %v11023_v47 = vpack.c.bf16 %v11021_v26, %v11022_v14  ;;  %4112 = vrot.lane.b32.xlu0 %v4109_v18, %s6154_s25  ;;  %v4161_v18 = vrot.slane %v8919_v29, 6  ;;  %v4189_v26 = vrot.slane %v8891_v49, 7  ;;  %v9243_v14 = vld [vmem:[#allocation2 + $0x8] sm:$0xff] }
 0x2ab   : > { %3185 = vst.msk [vmem:[#allocation2 + $0xa0] sm:$0xff] %vm585_vm11, %v2254_v30  ;;  %3642 = vst.msk [vmem:[#allocation2 + $0x90] sm:$0xff] %vm585_vm11, %v9101_v22 }
 0x2ac   : > { %4098 = vst.msk [vmem:[#allocation2 + $0x70] sm:$0xff] %vm585_vm11, %v9101_v22  ;;  %3641 = vst.msk [vmem:[#allocation2 + $0x80] sm:$0xff] %vm585_vm11, %v2254_v30  ;;  %5597 = vmatpush1.bf16.xpose.msra.mxu1 %v11023_v47 }
 0x2ad   : > { %4070 = vst.msk [vmem:[#allocation2 + $0x60] sm:$0xff] %vm479_vm10, %v9041_v59  ;;  %5600 = vmatprep.subr.msk.bf16.mxu1 %vm6483_vm8, %v5598_v3  ;;  %v11025_v3 = vmov %v11024_v0  ;;  %v11027_v0 = vld [vmem:[#allocation26_spill] sm:$0xff] }
 0x2ae   : > { %4470 = vst.msk [vmem:[#allocation2 + $0x50] sm:$0xff] %vm243_vm0, %v7450_v25  ;;  %4218 = vst.msk [vmem:[#allocation2 + $0x38] sm:$0xff] %vm243_vm0, %v7058_v9  ;;  %v4136_v58 = vsel %vm708_vm5, %v4134_v46, %v11025_v3  ;;  %v4191_v46 = vrot.slane %v8894_v24, 7  ;;  %v5603_v62 = vpack.c.bf16 %v11027_v0, %v11026_v33  ;;  %v4188_v3 = vrot.slane %v8919_v29, 7 }
 0x2af   : > { %4097 = vst.msk [vmem:[#allocation2 + $0x60] sm:$0xff] %vm585_vm11, %v2254_v30  ;;  %4139 = vrot.lane.b32.xlu0 %v4136_v58, %s6155_s26 }
 0x2b0   : > { %4499 = vst.msk [vmem:[#allocation2 + $0x40] sm:$0xff] %vm373_vm9, %v9003_v4  ;;  %4500 = vst.msk [vmem:[#allocation2 + $0x50] sm:$0xff] %vm373_vm9, %v8994_v36  ;;  %v4162_v4 = vrot.slane %v8891_v49, 6  ;;  %v9199_v36 = vld [vmem:[#allocation2 + $0x28] sm:$0xff]  ;;  %v9245_v47 = vld [vmem:[#allocation2 + $0x18] sm:$0xff] }
 0x2b1   : > { %4526 = vst.msk [vmem:[#allocation2 + $0x40] sm:$0xff] %vm479_vm10, %v9041_v59  ;;  %4527 = vst.msk [vmem:[#allocation2 + $0x50] sm:$0xff] %vm479_vm10, %v9027_v28  ;;  %v1075_v59 = vld [vmem:[%s10796_s1 + $0x8] sm:$0xff] }
 0x2b2   : > { %2301 = vst.msk [vmem:[#allocation2 + $0xf0] sm:$0xff] %vm691_vm12, %v2283_v27  ;;  %2757 = vst.msk [vmem:[#allocation2 + $0xd0] sm:$0xff] %vm691_vm12, %v2283_v27  ;;  %5242 = vmatprep.mubr.msk.f32.mxu1 %vm243_vm0, %v1075_v59  ;;  %v4163_v59 = vsel %vm814_vm6, %v4161_v18, %v4162_v4  ;;  %v9349_v28 = vld [vmem:[#allocation2 + $0x68] sm:$0xff] }
 0x2b3   : > { %3213 = vst.msk [vmem:[#allocation2 + $0xb0] sm:$0xff] %vm691_vm12, %v2283_v27  ;;  %3669 = vst.msk [vmem:[#allocation2 + $0x90] sm:$0xff] %vm691_vm12, %v2283_v27  ;;  %4166 = vrot.lane.b32.xlu0 %v4163_v59, %s6156_s28 }
 0x2b4   : > { %4125 = vst.msk [vmem:[#allocation2 + $0x70] sm:$0xff] %vm691_vm12, %v2283_v27  ;;  %2300 = vst.msk [vmem:[#allocation2 + $0xe0] sm:$0xff] %vm691_vm12, %v2281_v10 }
 0x2b5   : > { %4217 = vst.msk [vmem:[#allocation2 + $0x28] sm:$0xff] %vm243_vm0, %v7052_v60  ;;  %4673 = vst.msk [vmem:[#allocation2 + $0x8] sm:$0xff] %vm243_vm0, %v7052_v60  ;;  %v9276_v60 = vld [vmem:[%s6249_s11 + $0x168] sm:$0xff]  ;;  %v9286_v18 = vld [vmem:[#allocation2 + $0x38] sm:$0xff] }
 0x2b6   : > { %4553 = vst.msk [vmem:[#allocation2 + $0x40] sm:$0xff] %vm585_vm11, %v2254_v30  ;;  %4554 = vst.msk [vmem:[#allocation2 + $0x50] sm:$0xff] %vm585_vm11, %v9101_v22  ;;  %v2310_v22 = vpop.permute.xlu1 %2309  ;;  %v4165_v30 = vsel %vm814_vm6, %v4162_v4, %v4164_v32  ;;  %v9256_v32 = vld [vmem:[%s6249_s11 + $0x170] sm:$0xff] }
 0x2b7   : > { %2756 = vst.msk [vmem:[#allocation2 + $0xc0] sm:$0xff] %vm691_vm12, %v2281_v10  ;;  %3212 = vst.msk [vmem:[#allocation2 + $0xa0] sm:$0xff] %vm691_vm12, %v2281_v10  ;;  %4168 = vrot.lane.b32.xlu1 %v4165_v30, %s6156_s28  ;;  %v4485_v33 = vrot.slane %v9256_v32, 1 }
 0x2b8   : > { %3668 = vst.msk [vmem:[#allocation2 + $0x80] sm:$0xff] %vm691_vm12, %v2281_v10  ;;  %4124 = vst.msk [vmem:[#allocation2 + $0x60] sm:$0xff] %vm691_vm12, %v2281_v10 }
 0x2b9   : > { %4580 = vst.msk [vmem:[#allocation2 + $0x40] sm:$0xff] %vm691_vm12, %v2281_v10  ;;  %4581 = vst.msk [vmem:[#allocation2 + $0x50] sm:$0xff] %vm691_vm12, %v2283_v27  ;;  %v2308_v27 = vpop.permute.xlu0 %2307  ;;  %v9259_v10 = vld [vmem:[%s6249_s11 + $0x178] sm:$0xff] }
 0x2ba   : > { %2328 = vst.msk [vmem:[#allocation2 + $0xf0] sm:$0xff] %vm797_vm13, %v2310_v22  ;;  %2784 = vst.msk [vmem:[#allocation2 + $0xd0] sm:$0xff] %vm797_vm13, %v2310_v22  ;;  %v2337_v58 = vpop.permute.xlu1 %2336  ;;  %v4487_v0 = vrot.slane %v9259_v10, 1  ;;  %v4568_v23 = vrot.slane %v9259_v10, 4 }
 0x2bb   : > { %3240 = vst.msk [vmem:[#allocation2 + $0xb0] sm:$0xff] %vm797_vm13, %v2310_v22  ;;  %3696 = vst.msk [vmem:[#allocation2 + $0x90] sm:$0xff] %vm797_vm13, %v2310_v22 }
 0x2bc   : > { %4152 = vst.msk [vmem:[#allocation2 + $0x70] sm:$0xff] %vm797_vm13, %v2310_v22  ;;  %4608 = vst.msk [vmem:[#allocation2 + $0x50] sm:$0xff] %vm797_vm13, %v2310_v22  ;;  %v4192_v22 = vsel %vm920_vm7, %v4189_v26, %v4191_v46  ;;  %v9284_v4 = vld [vmem:[#allocation2 + $0x28] sm:$0xff]  ;;  %v4190_v46 = vsel %vm920_vm7, %v4188_v3, %v4189_v26  ;;  %v4512_v26 = vrot.slane %v9256_v32, 2  ;;  %v4514_v3 = vrot.slane %v9259_v10, 2 }
 0x2bd   : > { %4674 = vst.msk [vmem:[#allocation2 + $0x18] sm:$0xff] %vm243_vm0, %v7058_v9  ;;  %v11028_v9 = vpack.c.bf16 %v7485_v15, %v7500_v20  ;;  %v2335_v30 = vpop.permute.xlu0 %2334  ;;  %4675 = vst.msk [vmem:[#allocation2 + $0x28] sm:$0xff] %vm243_vm0, %v7239_v2  ;;  %v9300_v15 = vld [vmem:[#allocation2 + $0x48] sm:$0xff]  ;;  %v9302_v20 = vld [vmem:[#allocation2 + $0x58] sm:$0xff]  ;;  %4195 = vrot.lane.b32.xlu1 %v4192_v22, %s6157_s29  ;;  %4193 = vrot.lane.b32.xlu0 %v4190_v46, %s6157_s29  ;;  %v11033_v46 = vpack.c.bf16 %v7705_v63, %v7723_v19 }
 0x2be   : > { %2327 = vst.msk [vmem:[#allocation2 + $0xe0] sm:$0xff] %vm797_vm13, %v2308_v27  ;;  %2783 = vst.msk [vmem:[#allocation2 + $0xc0] sm:$0xff] %vm797_vm13, %v2308_v27  ;;  %v2364_v59 = vpop.permute.xlu1 %2363  ;;  %v9360_v19 = vld [vmem:[#allocation2 + $0x78] sm:$0xff] }
 0x2bf   : > { %3239 = vst.msk [vmem:[#allocation2 + $0xa0] sm:$0xff] %vm797_vm13, %v2308_v27  ;;  %3695 = vst.msk [vmem:[#allocation2 + $0x80] sm:$0xff] %vm797_vm13, %v2308_v27  ;;  %5602 = vmatpush1.bf16.xpose.msra.mxu1 %v11028_v9  ;;  %v4488_v9 = vsel %vm284_vm2, %v4485_v33, %v4487_v0 }
 0x2c0   : > { %4151 = vst.msk [vmem:[#allocation2 + $0x60] sm:$0xff] %vm797_vm13, %v2308_v27  ;;  %4607 = vst.msk [vmem:[#allocation2 + $0x40] sm:$0xff] %vm797_vm13, %v2308_v27  ;;  %5605 = vmatprep.subr.msk.bf16.mxu1 %vm6483_vm8, %v5603_v62  ;;  %v4484_v27 = vrot.slane %v9276_v60, 1  ;;  %v4541_v62 = vrot.slane %v9259_v10, 3 }
 0x2c1   : > { %2355 = vst.msk [vmem:[#allocation2 + $0xf0] sm:$0xff] %vm903_vm14, %v2337_v58  ;;  %2811 = vst.msk [vmem:[#allocation2 + $0xd0] sm:$0xff] %vm903_vm14, %v2337_v58  ;;  %4491 = vrot.lane.b32.xlu1 %v4488_v9, %s6152_s22 }
 0x2c2   : > { %3267 = vst.msk [vmem:[#allocation2 + $0xb0] sm:$0xff] %vm903_vm14, %v2337_v58  ;;  %3723 = vst.msk [vmem:[#allocation2 + $0x90] sm:$0xff] %vm903_vm14, %v2337_v58  ;;  %v4486_v0 = vsel %vm284_vm2, %v4484_v27, %v4485_v33 }
 0x2c3   : > { %4179 = vst.msk [vmem:[#allocation2 + $0x70] sm:$0xff] %vm903_vm14, %v2337_v58  ;;  %11029 = vst [vmem:[#allocation41_spill] sm:$0xff] %v9300_v15  ;;  %4489 = vrot.lane.b32.xlu0 %v4486_v0, %s6152_s22  ;;  %v4565_v15 = vrot.slane %v9276_v60, 4 }
 0x2c4   : > { %4676 = vst.msk [vmem:[#allocation2 + $0x38] sm:$0xff] %vm243_vm0, %v7246_v1  ;;  %11030 = vst [vmem:[#allocation44_spill] sm:$0xff] %v9302_v20 }
 0x2c5   : > { %4635 = vst.msk [vmem:[#allocation2 + $0x50] sm:$0xff] %vm903_vm14, %v2337_v58  ;;  %2354 = vst.msk [vmem:[#allocation2 + $0xe0] sm:$0xff] %vm903_vm14, %v2335_v30  ;;  %v11032_v58 = vld [vmem:[#allocation36_spill] sm:$0xff] }
 0x2c6   : > { %2810 = vst.msk [vmem:[#allocation2 + $0xc0] sm:$0xff] %vm903_vm14, %v2335_v30  ;;  %3266 = vst.msk [vmem:[#allocation2 + $0xa0] sm:$0xff] %vm903_vm14, %v2335_v30 }
 0x2c7   : > { %3722 = vst.msk [vmem:[#allocation2 + $0x80] sm:$0xff] %vm903_vm14, %v2335_v30  ;;  %4178 = vst.msk [vmem:[#allocation2 + $0x60] sm:$0xff] %vm903_vm14, %v2335_v30  ;;  %5607 = vmatpush1.bf16.xpose.msra.mxu1 %v11033_v46  ;;  %v11039_v46 = vld [vmem:[#allocation48_spill] sm:$0xff] }
 0x2c8   : > { %4219 = vst.msk [vmem:[#allocation2 + $0x48] sm:$0xff] %vm243_vm0, %v7239_v2  ;;  %4220 = vst.msk [vmem:[#allocation2 + $0x58] sm:$0xff] %vm243_vm0, %v7246_v1  ;;  %v2362_v2 = vpop.permute.xlu0 %2361  ;;  %v11031_v1 = vld [vmem:[#allocation35_spill] sm:$0xff]  ;;  %v5613_v6 = vpack.c.bf16 %v11039_v46, %v11038_v40 }
 0x2c9   : > { %4634 = vst.msk [vmem:[#allocation2 + $0x40] sm:$0xff] %vm903_vm14, %v2335_v30  ;;  %v5608_v22 = vpack.c.bf16 %v11032_v58, %v11031_v1  ;;  %v4511_v30 = vrot.slane %v9276_v60, 2  ;;  %v4515_v1 = vsel %vm390_vm1, %v4512_v26, %v4514_v3  ;;  %v4539_v58 = vrot.slane %v9256_v32, 3  ;;  %11034 = vst [vmem:[#allocation25_spill] sm:$0xff] %v9349_v28 }
 0x2ca   : > { %2382 = vst.msk [vmem:[#allocation2 + $0xf0] sm:$0xff] %vm1009_vm15, %v2364_v59  ;;  %2838 = vst.msk [vmem:[#allocation2 + $0xd0] sm:$0xff] %vm1009_vm15, %v2364_v59  ;;  %v4538_v3 = vrot.slane %v9276_v60, 3  ;;  %4518 = vrot.lane.b32.xlu1 %v4515_v1, %s6151_s21 }
 0x2cb   : > { %3294 = vst.msk [vmem:[#allocation2 + $0xb0] sm:$0xff] %vm1009_vm15, %v2364_v59  ;;  %3750 = vst.msk [vmem:[#allocation2 + $0x90] sm:$0xff] %vm1009_vm15, %v2364_v59  ;;  %5610 = vmatprep.subr.msk.bf16.mxu1 %vm6483_vm8, %v5608_v22  ;;  %v4513_v9 = vsel %vm390_vm1, %v4511_v30, %v4512_v26 }
 0x2cc   : > { %4206 = vst.msk [vmem:[#allocation2 + $0x70] sm:$0xff] %vm1009_vm15, %v2364_v59  ;;  %4662 = vst.msk [vmem:[#allocation2 + $0x50] sm:$0xff] %vm1009_vm15, %v2364_v59  ;;  %v9344_v59 = vpop.permute.xlu1 %2659  ;;  %v9351_v33 = vpop.permute.xlu0 %2657  ;;  %4516 = vrot.lane.b32.xlu0 %v4513_v9, %s6151_s21 }
 0x2cd   : > { %2381 = vst.msk [vmem:[#allocation2 + $0xe0] sm:$0xff] %vm1009_vm15, %v2362_v2  ;;  %2837 = vst.msk [vmem:[#allocation2 + $0xc0] sm:$0xff] %vm1009_vm15, %v2362_v2 }
 0x2ce   : > { %3293 = vst.msk [vmem:[#allocation2 + $0xa0] sm:$0xff] %vm1009_vm15, %v2362_v2  ;;  %3749 = vst.msk [vmem:[#allocation2 + $0x80] sm:$0xff] %vm1009_vm15, %v2362_v2 }
 0x2cf   : > { %4205 = vst.msk [vmem:[#allocation2 + $0x60] sm:$0xff] %vm1009_vm15, %v2362_v2  ;;  %4661 = vst.msk [vmem:[#allocation2 + $0x40] sm:$0xff] %vm1009_vm15, %v2362_v2  ;;  %v9356_v27 = vld [vmem:[#allocation2 + $0x48] sm:$0xff]  ;;  %v9358_v63 = vld [vmem:[#allocation2 + $0x58] sm:$0xff] }
 0x2d0   : > { %11035 = vst [vmem:[#allocation26_spill] sm:$0xff] %v9360_v19  ;;  %4221 = vst.msk [vmem:[#allocation2 + $0x68] sm:$0xff] %vm243_vm0, %v7450_v25  ;;  %v9381_v30 = vpop.permute.xlu1 %2686  ;;  %v4540_v19 = vsel %vm496_vm3, %v4538_v3, %v4539_v58  ;;  %v11042_v3 = vrot.slane %v9256_v32, 4 }
 0x2d1   : > { %4677 = vst.msk [vmem:[#allocation2 + $0x48] sm:$0xff] %vm243_vm0, %v7450_v25  ;;  %4678 = vst.msk [vmem:[#allocation2 + $0x58] sm:$0xff] %vm243_vm0, %v7453_v31  ;;  %v9375_v22 = vld [vmem:[#allocation2 + $0xf0] sm:$0xff]  ;;  %v4542_v25 = vsel %vm496_vm3, %v4539_v58, %v4541_v62  ;;  %v2685_v62 = vpop.permute.xlu0 %2684  ;;  %4543 = vrot.lane.b32.xlu0 %v4540_v19, %s6153_s24  ;;  %v4592_v19 = vrot.slane %v9276_v60, 5 }
 0x2d2   : > { %4222 = vst.msk [vmem:[#allocation2 + $0x78] sm:$0xff] %vm243_vm0, %v7453_v31  ;;  %v9377_v0 = vld [vmem:[#allocation2 + $0xb0] sm:$0xff]  ;;  %2648 = vst.msk [vmem:[#allocation2 + $0xf0] sm:$0xff] %vm243_vm0, %v7879_v54  ;;  %4545 = vrot.lane.b32.xlu1 %v4542_v25, %s6153_s24  ;;  %v4569_v28 = vsel %vm602_vm4, %v11042_v3, %v4568_v23  ;;  %v9484_v23 = vld [vmem:[#allocation2 + $0x88] sm:$0xff] }
 0x2d3   : > { %v9379_v26 = vld [vmem:[#allocation2 + $0x90] sm:$0xff]  ;;  %3560 = vst.msk [vmem:[#allocation2 + $0xb0] sm:$0xff] %vm243_vm0, %v7879_v54  ;;  %4223 = vst.msk [vmem:[#allocation2 + $0x88] sm:$0xff] %vm243_vm0, %v7879_v54 }
 0x2d4   : > { %4016 = vst.msk [vmem:[#allocation2 + $0x90] sm:$0xff] %vm243_vm0, %v7879_v54  ;;  %v9392_v31 = vld [vmem:[#allocation2 + $0x70] sm:$0xff]  ;;  %v9394_v1 = vld [vmem:[#allocation2 + $0xe0] sm:$0xff]  ;;  %v2714_v20 = vpop.permute.xlu1 %2713 }
 0x2d5   : > { %11036 = vst [vmem:[#allocation35_spill] sm:$0xff] %v9392_v31  ;;  %11037 = vst [vmem:[#allocation36_spill] sm:$0xff] %v9394_v1  ;;  %v9396_v2 = vld [vmem:[#allocation2 + $0xa0] sm:$0xff]  ;;  %v2883_v58 = vld [vmem:[#allocation2 + $0xd0] sm:$0xff]  ;;  %v4595_v31 = vrot.slane %v9259_v10, 5 }
 0x2d6   : > { %4472 = vst.msk [vmem:[#allocation2 + $0x70] sm:$0xff] %vm243_vm0, %v7879_v54  ;;  %2647 = vst.msk [vmem:[#allocation2 + $0xe0] sm:$0xff] %vm243_vm0, %v7897_v56  ;;  %v9413_v40 = vld [vmem:[#allocation2 + $0x80] sm:$0xff]  ;;  %4572 = vrot.lane.b32.xlu1 %v4569_v28, %s6154_s25 }
 0x2d7   : > { %2678 = vst.msk [vmem:[#allocation2 + $0xf0] sm:$0xff] %vm373_vm9, %v9344_v59  ;;  %3590 = vst.msk [vmem:[#allocation2 + $0xb0] sm:$0xff] %vm373_vm9, %v9344_v59  ;;  %v9415_v9 = vld [vmem:[#allocation2 + $0x60] sm:$0xff]  ;;  %v9466_v1 = vld [vmem:[#allocation2 + $0x68] sm:$0xff] }
 0x2d8   : > { %4046 = vst.msk [vmem:[#allocation2 + $0x90] sm:$0xff] %vm373_vm9, %v9344_v59  ;;  %11040 = vst [vmem:[#allocation47_spill] sm:$0xff] %v9415_v9  ;;  %v2881_v46 = vld [vmem:[#allocation2 + $0xc0] sm:$0xff]  ;;  %v4593_v9 = vrot.slane %v9256_v32, 5 }
 0x2d9   : > { %3559 = vst.msk [vmem:[#allocation2 + $0xa0] sm:$0xff] %vm243_vm0, %v7897_v56  ;;  %4015 = vst.msk [vmem:[#allocation2 + $0x80] sm:$0xff] %vm243_vm0, %v7897_v56  ;;  %v5731_v25 = vpack.c.bf16 %v2883_v58, %v2881_v46  ;;  %v4620_v58 = vrot.slane %v9256_v32, 6 }
 0x2da   : > { %4502 = vst.msk [vmem:[#allocation2 + $0x70] sm:$0xff] %vm373_vm9, %v9344_v59  ;;  %2677 = vst.msk [vmem:[#allocation2 + $0xe0] sm:$0xff] %vm373_vm9, %v9351_v33  ;;  %v4596_v46 = vsel %vm708_vm5, %v4593_v9, %v4595_v31  ;;  %v4619_v31 = vrot.slane %v9276_v60, 6 }
 0x2db   : > { %4471 = vst.msk [vmem:[#allocation2 + $0x60] sm:$0xff] %vm243_vm0, %v7897_v56  ;;  %3103 = vst.msk [vmem:[#allocation2 + $0xc0] sm:$0xff] %vm243_vm0, %v7897_v56  ;;  %v11041_v56 = vpack.c.bf16 %v7973_v53, %v7991_v34  ;;  %v2712_v53 = vpop.permute.xlu0 %2711  ;;  %v9480_v34 = vld [vmem:[#allocation2 + $0x78] sm:$0xff]  ;;  %5732 = vmatpush1.bf16.xpose.msra.mxu0 %v5731_v25  ;;  %4599 = vrot.lane.b32.xlu1 %v4596_v46, %s6155_s26 }
 0x2dc   : > { %3589 = vst.msk [vmem:[#allocation2 + $0xa0] sm:$0xff] %vm373_vm9, %v9351_v33  ;;  %4045 = vst.msk [vmem:[#allocation2 + $0x80] sm:$0xff] %vm373_vm9, %v9351_v33 }
 0x2dd   : > { %2705 = vst.msk [vmem:[#allocation2 + $0xf0] sm:$0xff] %vm479_vm10, %v9381_v30  ;;  %3617 = vst.msk [vmem:[#allocation2 + $0xb0] sm:$0xff] %vm479_vm10, %v9381_v30  ;;  %5612 = vmatpush1.bf16.xpose.msra.mxu1 %v11041_v56 }
 0x2de   : > { %4073 = vst.msk [vmem:[#allocation2 + $0x90] sm:$0xff] %vm479_vm10, %v9381_v30  ;;  %4529 = vst.msk [vmem:[#allocation2 + $0x70] sm:$0xff] %vm479_vm10, %v9381_v30  ;;  %5615 = vmatprep.subr.msk.bf16.mxu1 %vm6483_vm8, %v5613_v6  ;;  %v11043_v6 = vmov %v11042_v3  ;;  %v11047_v3 = vpack.c.bf16 %v8293_v11, %v8310_v45  ;;  %v9547_v11 = vld [vmem:[#allocation2 + $0x88] sm:$0xff] }
 0x2df   : > { %4501 = vst.msk [vmem:[#allocation2 + $0x60] sm:$0xff] %vm373_vm9, %v9351_v33  ;;  %3133 = vst.msk [vmem:[#allocation2 + $0xc0] sm:$0xff] %vm373_vm9, %v9351_v33  ;;  %v4567_v33 = vsel %vm602_vm4, %v4565_v15, %v11043_v6  ;;  %v2741_v15 = vpop.permute.xlu1 %2740  ;;  %v4649_v6 = vrot.slane %v9259_v10, 7 }
 0x2e0   : > { %2704 = vst.msk [vmem:[#allocation2 + $0xe0] sm:$0xff] %vm479_vm10, %v2685_v62  ;;  %3616 = vst.msk [vmem:[#allocation2 + $0xa0] sm:$0xff] %vm479_vm10, %v2685_v62  ;;  %4570 = vrot.lane.b32.xlu0 %v4567_v33, %s6154_s25  ;;  %v4621_v33 = vsel %vm814_vm6, %v4619_v31, %v4620_v58 }
 0x2e1   : > { %3104 = vst.msk [vmem:[#allocation2 + $0xd0] sm:$0xff] %vm243_vm0, %v7879_v54  ;;  %4679 = vst.msk [vmem:[#allocation2 + $0x68] sm:$0xff] %vm243_vm0, %v7879_v54  ;;  %v4622_v54 = vrot.slane %v9259_v10, 6 }
 0x2e2   : > { %4072 = vst.msk [vmem:[#allocation2 + $0x80] sm:$0xff] %vm479_vm10, %v2685_v62  ;;  %4528 = vst.msk [vmem:[#allocation2 + $0x60] sm:$0xff] %vm479_vm10, %v2685_v62 }
 0x2e3   : > { %3134 = vst.msk [vmem:[#allocation2 + $0xd0] sm:$0xff] %vm373_vm9, %v9344_v59  ;;  %v9486_v59 = vld [vmem:[#allocation2 + $0x98] sm:$0xff]  ;;  %v2768_v56 = vpop.permute.xlu1 %2767  ;;  %v4623_v25 = vsel %vm814_vm6, %v4620_v58, %v4622_v54  ;;  %v1074_v54 = vld [vmem:[%s10796_s1] sm:$0xff] }
 0x2e4   : > { %3160 = vst.msk [vmem:[#allocation2 + $0xc0] sm:$0xff] %vm479_vm10, %v2685_v62  ;;  %3161 = vst.msk [vmem:[#allocation2 + $0xd0] sm:$0xff] %vm479_vm10, %v9381_v30  ;;  %v11044_v62 = vpack.c.bf16 %v8210_v41, %v8208_v61  ;;  %v11045_v61 = vld [vmem:[#allocation5_spill] sm:$0xff]  ;;  %v11046_v41 = vld [vmem:[#allocation6_spill] sm:$0xff]  ;;  %4626 = vrot.lane.b32.xlu1 %v4623_v25, %s6156_s28 }
 0x2e5   : > { %2732 = vst.msk [vmem:[#allocation2 + $0xf0] sm:$0xff] %vm585_vm11, %v2714_v20  ;;  %3644 = vst.msk [vmem:[#allocation2 + $0xb0] sm:$0xff] %vm585_vm11, %v2714_v20  ;;  %v5618_v28 = vpack.c.bf16 %v11046_v41, %v11045_v61  ;;  %5617 = vmatpush1.bf16.xpose.msra.mxu1 %v11047_v3  ;;  %v11048_v41 = vld [vmem:[#allocation7_spill] sm:$0xff]  ;;  %v11050_v3 = vld [vmem:[#allocation32_spill] sm:$0xff] }
 0x2e6   : > { %4100 = vst.msk [vmem:[#allocation2 + $0x90] sm:$0xff] %vm585_vm11, %v2714_v20  ;;  %4556 = vst.msk [vmem:[#allocation2 + $0x70] sm:$0xff] %vm585_vm11, %v2714_v20  ;;  %5735 = vmatprep.subr.msk.bf16.mxu0 %vm6483_vm8, %v11044_v62  ;;  %v9562_v62 = vld [vmem:[#allocation2 + $0xa8] sm:$0xff] }
 0x2e7   : > { %2731 = vst.msk [vmem:[#allocation2 + $0xe0] sm:$0xff] %vm585_vm11, %v2712_v53  ;;  %3187 = vst.msk [vmem:[#allocation2 + $0xc0] sm:$0xff] %vm585_vm11, %v2712_v53  ;;  %5620 = vmatprep.subr.msk.bf16.mxu1 %vm6483_vm8, %v5618_v28  ;;  %v2795_v58 = vpop.permute.xlu1 %2794 }
 0x2e8   : > { %3643 = vst.msk [vmem:[#allocation2 + $0xa0] sm:$0xff] %vm585_vm11, %v2712_v53  ;;  %4099 = vst.msk [vmem:[#allocation2 + $0x80] sm:$0xff] %vm585_vm11, %v2712_v53 }
 0x2e9   : > { %4555 = vst.msk [vmem:[#allocation2 + $0x60] sm:$0xff] %vm585_vm11, %v2712_v53  ;;  %3188 = vst.msk [vmem:[#allocation2 + $0xd0] sm:$0xff] %vm585_vm11, %v2714_v20  ;;  %v4594_v20 = vsel %vm708_vm5, %v4592_v19, %v4593_v9  ;;  %v4647_v53 = vrot.slane %v9256_v32, 7  ;;  %v4646_v19 = vrot.slane %v9276_v60, 7 }
 0x2ea   : > { %4680 = vst.msk [vmem:[#allocation2 + $0x78] sm:$0xff] %vm243_vm0, %v7882_v42  ;;  %4224 = vst.msk [vmem:[#allocation2 + $0x98] sm:$0xff] %vm243_vm0, %v7882_v42  ;;  %v2739_v42 = vpop.permute.xlu0 %2738  ;;  %4597 = vrot.lane.b32.xlu0 %v4594_v20, %s6155_s26  ;;  %v1077_v20 = vld [vmem:[%s10796_s1 + $0x18] sm:$0xff] }
 0x2eb   : > { %2759 = vst.msk [vmem:[#allocation2 + $0xf0] sm:$0xff] %vm691_vm12, %v2741_v15  ;;  %3215 = vst.msk [vmem:[#allocation2 + $0xd0] sm:$0xff] %vm691_vm12, %v2741_v15  ;;  %v4648_v31 = vsel %vm920_vm7, %v4646_v19, %v4647_v53 }
 0x2ec   : > { %3671 = vst.msk [vmem:[#allocation2 + $0xb0] sm:$0xff] %vm691_vm12, %v2741_v15  ;;  %4127 = vst.msk [vmem:[#allocation2 + $0x90] sm:$0xff] %vm691_vm12, %v2741_v15  ;;  %1677 = vmatmul.mubr.f32.vlgmr.msra.gmra.mrb[0].mxu1 %v1074_v54  ;;  %v9626_v54 = vld [vmem:[#allocation2 + $0xc8] sm:$0xff] }
 0x2ed   : > { %4583 = vst.msk [vmem:[#allocation2 + $0x70] sm:$0xff] %vm691_vm12, %v2741_v15  ;;  %2758 = vst.msk [vmem:[#allocation2 + $0xe0] sm:$0xff] %vm691_vm12, %v2739_v42  ;;  %v9564_v15 = vld [vmem:[#allocation2 + $0xb8] sm:$0xff]  ;;  %5243 = vmatprep.mubr.msk.f32.mxu1 %vm243_vm0, %v1077_v20  ;;  %v11054_v20 = vld [vmem:[#allocation10_spill] sm:$0xff] }
 0x2ee   : > { %3214 = vst.msk [vmem:[#allocation2 + $0xc0] sm:$0xff] %vm691_vm12, %v2739_v42  ;;  %3670 = vst.msk [vmem:[#allocation2 + $0xa0] sm:$0xff] %vm691_vm12, %v2739_v42  ;;  %v2766_v9 = vpop.permute.xlu0 %2765  ;;  %4624 = vrot.lane.b32.xlu0 %v4621_v33, %s6156_s28  ;;  %v1079_v33 = vld [vmem:[%s10796_s1 + $0x28] sm:$0xff] }
 0x2ef   : > { %4126 = vst.msk [vmem:[#allocation2 + $0x80] sm:$0xff] %vm691_vm12, %v2739_v42  ;;  %4582 = vst.msk [vmem:[#allocation2 + $0x60] sm:$0xff] %vm691_vm12, %v2739_v42  ;;  %v4650_v42 = vsel %vm920_vm7, %v4647_v53, %v4649_v6  ;;  %v2822_v6 = vpop.permute.xlu1 %2821 }
 0x2f0   : > { %2786 = vst.msk [vmem:[#allocation2 + $0xf0] sm:$0xff] %vm797_vm13, %v2768_v56  ;;  %3242 = vst.msk [vmem:[#allocation2 + $0xd0] sm:$0xff] %vm797_vm13, %v2768_v56  ;;  %4653 = vrot.lane.b32.xlu1 %v4650_v42, %s6157_s29  ;;  %v9628_v42 = vld [vmem:[#allocation2 + $0xd8] sm:$0xff] }
 0x2f1   : > { %3698 = vst.msk [vmem:[#allocation2 + $0xb0] sm:$0xff] %vm797_vm13, %v2768_v56  ;;  %4154 = vst.msk [vmem:[#allocation2 + $0x90] sm:$0xff] %vm797_vm13, %v2768_v56  ;;  %v9549_v45 = vld [vmem:[#allocation2 + $0x98] sm:$0xff] }
 0x2f2   : > { %4610 = vst.msk [vmem:[#allocation2 + $0x70] sm:$0xff] %vm797_vm13, %v2768_v56  ;;  %2785 = vst.msk [vmem:[#allocation2 + $0xe0] sm:$0xff] %vm797_vm13, %v2766_v9  ;;  %v2793_v61 = vpop.permute.xlu0 %2792  ;;  %v11051_v56 = vld [vmem:[#allocation34_spill] sm:$0xff]  ;;  %4651 = vrot.lane.b32.xlu0 %v4648_v31, %s6157_s29 }
 0x2f3   : > { %3241 = vst.msk [vmem:[#allocation2 + $0xc0] sm:$0xff] %vm797_vm13, %v2766_v9  ;;  %3697 = vst.msk [vmem:[#allocation2 + $0xa0] sm:$0xff] %vm797_vm13, %v2766_v9  ;;  %v11052_v25 = vpack.c.bf16 %v11050_v3, %v11051_v56  ;;  %v1081_v56 = vld [vmem:[%s10796_s1 + $0x38] sm:$0xff] }
 0x2f4   : > { %4153 = vst.msk [vmem:[#allocation2 + $0x80] sm:$0xff] %vm797_vm13, %v2766_v9  ;;  %4609 = vst.msk [vmem:[#allocation2 + $0x60] sm:$0xff] %vm797_vm13, %v2766_v9  ;;  %v1076_v9 = vld [vmem:[%s10796_s1 + $0x10] sm:$0xff] }
 0x2f5   : > { %4681 = vst.msk [vmem:[#allocation2 + $0x88] sm:$0xff] %vm243_vm0, %v8183_v43  ;;  %4682 = vst.msk [vmem:[#allocation2 + $0x98] sm:$0xff] %vm243_vm0, %v8186_v16  ;;  %5622 = vmatpush1.bf16.xpose.msra.mxu1 %v11052_v25  ;;  %v1080_v25 = vld [vmem:[%s10796_s1 + $0x30] sm:$0xff] }
 0x2f6   : > { %4225 = vst.msk [vmem:[#allocation2 + $0xa8] sm:$0xff] %vm243_vm0, %v8183_v43  ;;  %4226 = vst.msk [vmem:[#allocation2 + $0xb8] sm:$0xff] %vm243_vm0, %v8186_v16  ;;  %v11049_v16 = vld [vmem:[#allocation8_spill] sm:$0xff]  ;;  %v2820_v53 = vpop.permute.xlu0 %2819  ;;  %1682 = vmatmul.mubr.f32.gmra.mrb[2].mxu1 %v1076_v9  ;;  %v11055_v9 = vld [vmem:[#allocation42_spill] sm:$0xff] }
 0x2f7   : > { %2813 = vst.msk [vmem:[#allocation2 + $0xf0] sm:$0xff] %vm903_vm14, %v2795_v58  ;;  %3269 = vst.msk [vmem:[#allocation2 + $0xd0] sm:$0xff] %vm903_vm14, %v2795_v58  ;;  %v5623_v28 = vpack.c.bf16 %v11049_v16, %v11048_v41  ;;  %5244 = vmatprep.mubr.msk.f32.mxu1 %vm243_vm0, %v1079_v33  ;;  %v3118_v41 = vpop.permute.xlu1 %3117 }
 0x2f8   : > { %3725 = vst.msk [vmem:[#allocation2 + $0xb0] sm:$0xff] %vm903_vm14, %v2795_v58  ;;  %4181 = vst.msk [vmem:[#allocation2 + $0x90] sm:$0xff] %vm903_vm14, %v2795_v58 }
 0x2f9   : > { %4637 = vst.msk [vmem:[#allocation2 + $0x70] sm:$0xff] %vm903_vm14, %v2795_v58  ;;  %2812 = vst.msk [vmem:[#allocation2 + $0xe0] sm:$0xff] %vm903_vm14, %v2793_v61  ;;  %5625 = vmatprep.subr.msk.bf16.mxu1 %vm6483_vm8, %v5623_v28  ;;  %v11053_v28 = vld [vmem:[#allocation9_spill] sm:$0xff] }
 0x2fa   : > { %3268 = vst.msk [vmem:[#allocation2 + $0xc0] sm:$0xff] %vm903_vm14, %v2793_v61  ;;  %3724 = vst.msk [vmem:[#allocation2 + $0xa0] sm:$0xff] %vm903_vm14, %v2793_v61  ;;  %v5628_v31 = vpack.c.bf16 %v11054_v20, %v11053_v28  ;;  %v3116_v3 = vpop.permute.xlu0 %3115 }
 0x2fb   : > { %4180 = vst.msk [vmem:[#allocation2 + $0x80] sm:$0xff] %vm903_vm14, %v2793_v61  ;;  %4636 = vst.msk [vmem:[#allocation2 + $0x60] sm:$0xff] %vm903_vm14, %v2793_v61  ;;  %v1078_v61 = vld [vmem:[%s10796_s1 + $0x20] sm:$0xff] }
 0x2fc   : > { %2840 = vst.msk [vmem:[#allocation2 + $0xf0] sm:$0xff] %vm1009_vm15, %v2822_v6  ;;  %3296 = vst.msk [vmem:[#allocation2 + $0xd0] sm:$0xff] %vm1009_vm15, %v2822_v6  ;;  %1687 = vmatmul.mubr.f32.gmra.mrb[4].mxu1 %v1078_v61  ;;  %v3145_v61 = vpop.permute.xlu1 %3144 }
 0x2fd   : > { %3752 = vst.msk [vmem:[#allocation2 + $0xb0] sm:$0xff] %vm1009_vm15, %v2822_v6  ;;  %4208 = vst.msk [vmem:[#allocation2 + $0x90] sm:$0xff] %vm1009_vm15, %v2822_v6  ;;  %v9618_v19 = vld [vmem:[#allocation2 + $0xa8] sm:$0xff]  ;;  %v9620_v58 = vld [vmem:[#allocation2 + $0xb8] sm:$0xff]  ;;  %5245 = vmatprep.mubr.msk.f32.mxu1 %vm243_vm0, %v1081_v56 }
 0x2fe   : > { %4664 = vst.msk [vmem:[#allocation2 + $0x70] sm:$0xff] %vm1009_vm15, %v2822_v6  ;;  %2839 = vst.msk [vmem:[#allocation2 + $0xe0] sm:$0xff] %vm1009_vm15, %v2820_v53  ;;  %v1083_v6 = vld [vmem:[%s10796_s1 + $0x48] sm:$0xff] }
 0x2ff   : > { %3295 = vst.msk [vmem:[#allocation2 + $0xc0] sm:$0xff] %vm1009_vm15, %v2820_v53  ;;  %3751 = vst.msk [vmem:[#allocation2 + $0xa0] sm:$0xff] %vm1009_vm15, %v2820_v53 }
 0x300   : > { %4207 = vst.msk [vmem:[#allocation2 + $0x80] sm:$0xff] %vm1009_vm15, %v2820_v53  ;;  %4663 = vst.msk [vmem:[#allocation2 + $0x60] sm:$0xff] %vm1009_vm15, %v2820_v53  ;;  %v11056_v53 = vld [vmem:[#allocation45_spill] sm:$0xff]  ;;  %1692 = vmatmul.mubr.f32.gmra.mrb[6].mxu1 %v1080_v25  ;;  %v9707_v25 = vld [vmem:[#allocation2 + $0xe8] sm:$0xff] }
 0x301   : > { %4683 = vst.msk [vmem:[#allocation2 + $0xa8] sm:$0xff] %vm243_vm0, %v8553_v8  ;;  %4684 = vst.msk [vmem:[#allocation2 + $0xb8] sm:$0xff] %vm243_vm0, %v8556_v39  ;;  %5246 = vmatprep.mubr.msk.f32.mxu1 %vm243_vm0, %v1083_v6 }
 0x302   : > { %4227 = vst.msk [vmem:[#allocation2 + $0xc8] sm:$0xff] %vm243_vm0, %v8553_v8  ;;  %4228 = vst.msk [vmem:[#allocation2 + $0xd8] sm:$0xff] %vm243_vm0, %v8556_v39  ;;  %v11057_v39 = vpack.c.bf16 %v11055_v9, %v11056_v53 }
 0x303   : > { %v2887_v33 = vld [vmem:[#allocation2 + $0xf0] sm:$0xff]  ;;  %4229 = vst.msk [vmem:[#allocation2 + $0xe8] sm:$0xff] %vm243_vm0, %v8891_v49 }
 0x304   : > { %5627 = vmatpush1.bf16.xpose.msra.mxu1 %v11057_v39  ;;  %v9654_v28 = vld [vmem:[#allocation2 + $0xd0] sm:$0xff]  ;;  %3106 = vst.msk [vmem:[#allocation2 + $0xf0] sm:$0xff] %vm243_vm0, %v8183_v43  ;;  %v3143_v39 = vpop.permute.xlu0 %3142 }
 0x305   : > { %v9656_v20 = vld [vmem:[#allocation2 + $0xb0] sm:$0xff]  ;;  %v2885_v16 = vld [vmem:[#allocation2 + $0xe0] sm:$0xff]  ;;  %5630 = vmatprep.subr.msk.bf16.mxu1 %vm6483_vm8, %v5628_v31  ;;  %3562 = vst.msk [vmem:[#allocation2 + $0xd0] sm:$0xff] %vm243_vm0, %v8183_v43 }
 0x306   : > { %4018 = vst.msk [vmem:[#allocation2 + $0xb0] sm:$0xff] %vm243_vm0, %v8183_v43  ;;  %v9667_v9 = vld [vmem:[#allocation2 + $0x90] sm:$0xff]  ;;  %v9669_v53 = vld [vmem:[#allocation2 + $0xc0] sm:$0xff]  ;;  %v5736_v56 = vpack.c.bf16 %v2887_v33, %v2885_v16  ;;  %3105 = vst.msk [vmem:[#allocation2 + $0xe0] sm:$0xff] %vm243_vm0, %v8201_v52  ;;  %v3172_v16 = vpop.permute.xlu1 %3171 }
 0x307   : > { %11058 = vst [vmem:[#allocation48_spill] sm:$0xff] %v9667_v9  ;;  %4474 = vst.msk [vmem:[#allocation2 + $0x90] sm:$0xff] %vm243_vm0, %v8183_v43  ;;  %v9680_v31 = vld [vmem:[#allocation2 + $0xa0] sm:$0xff]  ;;  %v9709_v33 = vld [vmem:[#allocation2 + $0xf8] sm:$0xff] }
 0x308   : > { %3136 = vst.msk [vmem:[#allocation2 + $0xf0] sm:$0xff] %vm373_vm9, %v3118_v41  ;;  %3592 = vst.msk [vmem:[#allocation2 + $0xd0] sm:$0xff] %vm373_vm9, %v3118_v41  ;;  %v9682_v46 = vld [vmem:[#allocation2 + $0x80] sm:$0xff]  ;;  %5737 = vmatpush1.bf16.xpose.msra.mxu0 %v5736_v56  ;;  %v11060_v56 = vld [vmem:[#allocation78_spill] sm:$0xff]  ;;  %v3170_v6 = vpop.permute.xlu0 %3169 }
 0x309   : > { %4048 = vst.msk [vmem:[#allocation2 + $0xb0] sm:$0xff] %vm373_vm9, %v3118_v41  ;;  %11059 = vst [vmem:[#allocation5_spill] sm:$0xff] %v9682_v46  ;;  %v11064_v43 = vld [vmem:[#allocation16_spill] sm:$0xff]  ;;  %v11072_v46 = vld [vmem:[#allocation83_spill] sm:$0xff] }
 0x30a   : > { %3561 = vst.msk [vmem:[#allocation2 + $0xc0] sm:$0xff] %vm243_vm0, %v8201_v52  ;;  %4017 = vst.msk [vmem:[#allocation2 + $0xa0] sm:$0xff] %vm243_vm0, %v8201_v52  ;;  %v11075_v9 = vld [vmem:[#allocation22_spill] sm:$0xff] }
 0x30b   : > { %4504 = vst.msk [vmem:[#allocation2 + $0x90] sm:$0xff] %vm373_vm9, %v3118_v41  ;;  %3135 = vst.msk [vmem:[#allocation2 + $0xe0] sm:$0xff] %vm373_vm9, %v3116_v3  ;;  %v11061_v41 = vld [vmem:[#allocation77_spill] sm:$0xff] }
 0x30c   : > { %4473 = vst.msk [vmem:[#allocation2 + $0x80] sm:$0xff] %vm243_vm0, %v8201_v52  ;;  %v1082_v52 = vld [vmem:[%s10796_s1 + $0x40] sm:$0xff]  ;;  %4230 = vst.msk [vmem:[#allocation2 + $0xf8] sm:$0xff] %vm243_vm0, %v8894_v24 }
 0x30d   : > { %3591 = vst.msk [vmem:[#allocation2 + $0xc0] sm:$0xff] %vm373_vm9, %v3116_v3  ;;  %4047 = vst.msk [vmem:[#allocation2 + $0xa0] sm:$0xff] %vm373_vm9, %v3116_v3  ;;  %1697 = vmatmul.mubr.f32.gmra.mrb[8].mxu1 %v1082_v52  ;;  %v1087_v52 = vld [vmem:[%s10796_s1 + $0x68] sm:$0xff] }
 0x30e   : > { %3163 = vst.msk [vmem:[#allocation2 + $0xf0] sm:$0xff] %vm479_vm10, %v3145_v61  ;;  %3619 = vst.msk [vmem:[#allocation2 + $0xd0] sm:$0xff] %vm479_vm10, %v3145_v61 }
 0x30f   : > { %4075 = vst.msk [vmem:[#allocation2 + $0xb0] sm:$0xff] %vm479_vm10, %v3145_v61  ;;  %4531 = vst.msk [vmem:[#allocation2 + $0x90] sm:$0xff] %vm479_vm10, %v3145_v61  ;;  %v11063_v61 = vld [vmem:[#allocation15_spill] sm:$0xff] }
 0x310   : > { %4503 = vst.msk [vmem:[#allocation2 + $0x80] sm:$0xff] %vm373_vm9, %v3116_v3  ;;  %v11062_v3 = vpack.c.bf16 %v11060_v56, %v11061_v41  ;;  %v5633_v30 = vpack.c.bf16 %v11064_v43, %v11063_v61  ;;  %v1085_v41 = vld [vmem:[%s10796_s1 + $0x58] sm:$0xff]  ;;  %v1084_v61 = vld [vmem:[%s10796_s1 + $0x50] sm:$0xff]  ;;  %v3199_v43 = vpop.permute.xlu1 %3198 }
 0x311   : > { %3162 = vst.msk [vmem:[#allocation2 + $0xe0] sm:$0xff] %vm479_vm10, %v3143_v39  ;;  %3618 = vst.msk [vmem:[#allocation2 + $0xc0] sm:$0xff] %vm479_vm10, %v3143_v39  ;;  %5247 = vmatprep.mubr.msk.f32.mxu1 %vm243_vm0, %v1085_v41  ;;  %v5333_v41 = vld [vmem:[%s10796_s1 + $0x218] sm:$0xff] }
 0x312   : > { %5740 = vmatprep.subr.msk.bf16.mxu0 %vm6483_vm8, %v11062_v3  ;;  %4074 = vst.msk [vmem:[#allocation2 + $0xa0] sm:$0xff] %vm479_vm10, %v3143_v39  ;;  %4530 = vst.msk [vmem:[#allocation2 + $0x80] sm:$0xff] %vm479_vm10, %v3143_v39  ;;  %v11065_v39 = vld [vmem:[#allocation53_spill] sm:$0xff]  ;;  %1702 = vmatmul.mubr.f32.gmra.mrb[10].mxu1 %v1084_v61  ;;  %v11071_v61 = vld [vmem:[#allocation84_spill] sm:$0xff] }
 0x313   : > { %3190 = vst.msk [vmem:[#allocation2 + $0xf0] sm:$0xff] %vm585_vm11, %v3172_v16  ;;  %3646 = vst.msk [vmem:[#allocation2 + $0xd0] sm:$0xff] %vm585_vm11, %v3172_v16  ;;  %v5330_v3 = vld [vmem:[%s10796_s1 + $0x200] sm:$0xff]  ;;  %5248 = vmatprep.mubr.msk.f32.mxu1 %vm243_vm0, %v1087_v52 }
 0x314   : > { %4102 = vst.msk [vmem:[#allocation2 + $0xb0] sm:$0xff] %vm585_vm11, %v3172_v16  ;;  %4558 = vst.msk [vmem:[#allocation2 + $0x90] sm:$0xff] %vm585_vm11, %v3172_v16  ;;  %v11066_v16 = vld [vmem:[#allocation55_spill] sm:$0xff]  ;;  %3043 = vmatmul.mubr.f32.vlgmr.msra.gmra.mrb[0].mxu0 %v5330_v3  ;;  %v3226_v52 = vpop.permute.xlu1 %3225 }
 0x315   : > { %3189 = vst.msk [vmem:[#allocation2 + $0xe0] sm:$0xff] %vm585_vm11, %v3170_v6  ;;  %3645 = vst.msk [vmem:[#allocation2 + $0xc0] sm:$0xff] %vm585_vm11, %v3170_v6  ;;  %v11067_v56 = vpack.c.bf16 %v11065_v39, %v11066_v16  ;;  %v11068_v39 = vld [vmem:[#allocation64_spill] sm:$0xff]  ;;  %v5332_v3 = vld [vmem:[%s10796_s1 + $0x210] sm:$0xff]  ;;  %5363 = vmatprep.mubr.msk.f32.mxu0 %vm243_vm0, %v5333_v41 }
 0x316   : > { %4101 = vst.msk [vmem:[#allocation2 + $0xa0] sm:$0xff] %vm585_vm11, %v3170_v6  ;;  %4557 = vst.msk [vmem:[#allocation2 + $0x80] sm:$0xff] %vm585_vm11, %v3170_v6  ;;  %v3197_v6 = vpop.permute.xlu0 %3196  ;;  %v11076_v41 = vld [vmem:[#allocation59_spill] sm:$0xff] }
 0x317   : > { %5632 = vmatpush1.bf16.xpose.msra.mxu1 %v11067_v56  ;;  %3217 = vst.msk [vmem:[#allocation2 + $0xf0] sm:$0xff] %vm691_vm12, %v3199_v43  ;;  %3673 = vst.msk [vmem:[#allocation2 + $0xd0] sm:$0xff] %vm691_vm12, %v3199_v43  ;;  %v1086_v56 = vld [vmem:[%s10796_s1 + $0x60] sm:$0xff] }
 0x318   : > { %5635 = vmatprep.subr.msk.bf16.mxu1 %vm6483_vm8, %v5633_v30  ;;  %4129 = vst.msk [vmem:[#allocation2 + $0xb0] sm:$0xff] %vm691_vm12, %v3199_v43  ;;  %4585 = vst.msk [vmem:[#allocation2 + $0x90] sm:$0xff] %vm691_vm12, %v3199_v43  ;;  %v11069_v43 = vld [vmem:[#allocation63_spill] sm:$0xff]  ;;  %v11074_v30 = vld [vmem:[#allocation21_spill] sm:$0xff]  ;;  %1707 = vmatmul.mubr.f32.gmra.mrb[12].mxu1 %v1086_v56 }
 0x319   : > { %3216 = vst.msk [vmem:[#allocation2 + $0xe0] sm:$0xff] %vm691_vm12, %v3197_v6  ;;  %3672 = vst.msk [vmem:[#allocation2 + $0xc0] sm:$0xff] %vm691_vm12, %v3197_v6  ;;  %v11070_v16 = vpack.c.bf16 %v11068_v39, %v11069_v43  ;;  %v5638_v39 = vpack.c.bf16 %v11075_v9, %v11074_v30  ;;  %v1089_v43 = vld [vmem:[%s10796_s1 + $0x78] sm:$0xff]  ;;  %v5335_v9 = vld [vmem:[%s10796_s1 + $0x228] sm:$0xff]  ;;  %3048 = vmatmul.mubr.f32.gmra.mrb[2].mxu0 %v5332_v3  ;;  %v3253_v3 = vpop.permute.xlu1 %3252 }
 0x31a   : > { %4128 = vst.msk [vmem:[#allocation2 + $0xa0] sm:$0xff] %vm691_vm12, %v3197_v6  ;;  %4584 = vst.msk [vmem:[#allocation2 + $0x80] sm:$0xff] %vm691_vm12, %v3197_v6  ;;  %v11073_v6 = vpack.c.bf16 %v11071_v61, %v11072_v46  ;;  %v3224_v46 = vpop.permute.xlu0 %3223  ;;  %v11077_v30 = vld [vmem:[#allocation61_spill] sm:$0xff]  ;;  %5249 = vmatprep.mubr.msk.f32.mxu1 %vm243_vm0, %v1089_v43  ;;  %v1088_v61 = vld [vmem:[%s10796_s1 + $0x70] sm:$0xff]  ;;  %5364 = vmatprep.mubr.msk.f32.mxu0 %vm243_vm0, %v5335_v9 }
 0x31b   : > { %5742 = vmatpush1.bf16.xpose.msra.mxu0 %v11070_v16  ;;  %3244 = vst.msk [vmem:[#allocation2 + $0xf0] sm:$0xff] %vm797_vm13, %v3226_v52  ;;  %3700 = vst.msk [vmem:[#allocation2 + $0xd0] sm:$0xff] %vm797_vm13, %v3226_v52  ;;  %v11078_v16 = vpack.c.bf16 %v11076_v41, %v11077_v30  ;;  %v5334_v56 = vld [vmem:[%s10796_s1 + $0x220] sm:$0xff]  ;;  %v11080_v9 = vld [vmem:[#allocation71_spill] sm:$0xff] }
 0x31c   : > { %5745 = vmatprep.subr.msk.bf16.mxu0 %vm6483_vm8, %v11073_v6  ;;  %4156 = vst.msk [vmem:[#allocation2 + $0xb0] sm:$0xff] %vm797_vm13, %v3226_v52  ;;  %4612 = vst.msk [vmem:[#allocation2 + $0x90] sm:$0xff] %vm797_vm13, %v3226_v52  ;;  %v5251_v6 = vld [vmem:[%s10796_s1 + $0x108] sm:$0xff]  ;;  %1712 = vmatmul.mubr.f32.gmra.mrb[14].mxu1 %v1088_v61  ;;  %v5336_v30 = vld [vmem:[%s10796_s1 + $0x230] sm:$0xff] }
 0x31d   : > { %3243 = vst.msk [vmem:[#allocation2 + $0xe0] sm:$0xff] %vm797_vm13, %v3224_v46  ;;  %3699 = vst.msk [vmem:[#allocation2 + $0xc0] sm:$0xff] %vm797_vm13, %v3224_v46  ;;  %3053 = vmatmul.mubr.f32.gmra.mrb[4].mxu0 %v5334_v56  ;;  %5282 = vmatprep.mubr.msk.f32.mxu1 %vm243_vm0, %v5251_v6  ;;  %v11083_v61 = vld [vmem:[#allocation29_spill] sm:$0xff]  ;;  %v11084_v56 = vld [vmem:[#allocation30_spill] sm:$0xff] }
 0x31e   : > { %4155 = vst.msk [vmem:[#allocation2 + $0xa0] sm:$0xff] %vm797_vm13, %v3224_v46  ;;  %4611 = vst.msk [vmem:[#allocation2 + $0x80] sm:$0xff] %vm797_vm13, %v3224_v46  ;;  %v3251_v52 = vpop.permute.xlu0 %3250  ;;  %v11079_v46 = vld [vmem:[#allocation72_spill] sm:$0xff]  ;;  %v5339_v6 = vld [vmem:[%s10796_s1 + $0x248] sm:$0xff] }
 0x31f   : > { %5637 = vmatpush1.bf16.xpose.msra.mxu1 %v11078_v16  ;;  %3271 = vst.msk [vmem:[#allocation2 + $0xf0] sm:$0xff] %vm903_vm14, %v3253_v3  ;;  %3727 = vst.msk [vmem:[#allocation2 + $0xd0] sm:$0xff] %vm903_vm14, %v3253_v3  ;;  %v11081_v41 = vpack.c.bf16 %v11079_v46, %v11080_v9  ;;  %v11082_v16 = vpack.c.bf16 %v8489_v51, %v8487_v35  ;;  %v11085_v35 = vld [vmem:[#allocation67_spill] sm:$0xff]  ;;  %v5338_v9 = vld [vmem:[%s10796_s1 + $0x240] sm:$0xff] }
 0x320   : > { %5640 = vmatprep.subr.msk.bf16.mxu1 %vm6483_vm8, %v5638_v39  ;;  %4183 = vst.msk [vmem:[#allocation2 + $0xb0] sm:$0xff] %vm903_vm14, %v3253_v3  ;;  %4639 = vst.msk [vmem:[#allocation2 + $0x90] sm:$0xff] %vm903_vm14, %v3253_v3  ;;  %v5337_v39 = vld [vmem:[%s10796_s1 + $0x238] sm:$0xff]  ;;  %v5643_v3 = vpack.c.bf16 %v11084_v56, %v11083_v61  ;;  %v11088_v56 = vpack.c.bf16 %v8390_v55, %v8388_v57 }
 0x321   : > { %3270 = vst.msk [vmem:[#allocation2 + $0xe0] sm:$0xff] %vm903_vm14, %v3251_v52  ;;  %3726 = vst.msk [vmem:[#allocation2 + $0xc0] sm:$0xff] %vm903_vm14, %v3251_v52  ;;  %5365 = vmatprep.mubr.msk.f32.mxu0 %vm243_vm0, %v5337_v39  ;;  %v11086_v39 = vld [vmem:[#allocation69_spill] sm:$0xff] }
 0x322   : > { %4182 = vst.msk [vmem:[#allocation2 + $0xa0] sm:$0xff] %vm903_vm14, %v3251_v52  ;;  %4638 = vst.msk [vmem:[#allocation2 + $0x80] sm:$0xff] %vm903_vm14, %v3251_v52  ;;  %v3280_v52 = vpop.permute.xlu1 %3279  ;;  %v3278_v51 = vpop.permute.xlu0 %3277  ;;  %3058 = vmatmul.mubr.f32.gmra.mrb[6].mxu0 %v5336_v30  ;;  %v11087_v46 = vpack.c.bf16 %v11085_v35, %v11086_v39  ;;  %v5341_v30 = vld [vmem:[%s10796_s1 + $0x258] sm:$0xff]  ;;  %v11092_v39 = vld [vmem:[#allocation39_spill] sm:$0xff] }
 0x323   : > { %5747 = vmatpush1.bf16.xpose.msra.mxu0 %v11081_v41  ;;  %3298 = vst.msk [vmem:[#allocation2 + $0xf0] sm:$0xff] %vm1009_vm15, %v3280_v52  ;;  %3754 = vst.msk [vmem:[#allocation2 + $0xd0] sm:$0xff] %vm1009_vm15, %v3280_v52  ;;  %5366 = vmatprep.mubr.msk.f32.mxu0 %vm243_vm0, %v5339_v6  ;;  %v11089_v6 = vld [vmem:[#allocation90_spill] sm:$0xff] }
 0x324   : > { %5750 = vmatprep.subr.msk.bf16.mxu0 %vm6483_vm8, %v11082_v16  ;;  %4210 = vst.msk [vmem:[#allocation2 + $0xb0] sm:$0xff] %vm1009_vm15, %v3280_v52  ;;  %4666 = vst.msk [vmem:[#allocation2 + $0x90] sm:$0xff] %vm1009_vm15, %v3280_v52  ;;  %v5340_v52 = vld [vmem:[%s10796_s1 + $0x250] sm:$0xff] }
 0x325   : > { %3297 = vst.msk [vmem:[#allocation2 + $0xe0] sm:$0xff] %vm1009_vm15, %v3278_v51  ;;  %3753 = vst.msk [vmem:[#allocation2 + $0xc0] sm:$0xff] %vm1009_vm15, %v3278_v51 }
 0x326   : > { %4209 = vst.msk [vmem:[#allocation2 + $0xa0] sm:$0xff] %vm1009_vm15, %v3278_v51  ;;  %4665 = vst.msk [vmem:[#allocation2 + $0x80] sm:$0xff] %vm1009_vm15, %v3278_v51  ;;  %v3576_v16 = vpop.permute.xlu1 %3575  ;;  %v3574_v61 = vpop.permute.xlu0 %3573  ;;  %3063 = vmatmul.mubr.f32.gmra.mrb[8].mxu0 %v5338_v9  ;;  %v11090_v51 = vld [vmem:[#allocation89_spill] sm:$0xff] }
 0x327   : > { %5642 = vmatpush1.bf16.xpose.msra.mxu1 %v11087_v46  ;;  %5367 = vmatprep.mubr.msk.f32.mxu0 %vm243_vm0, %v5341_v30  ;;  %v11091_v35 = vpack.c.bf16 %v11089_v6, %v11090_v51  ;;  %v11093_v46 = vld [vmem:[#allocation40_spill] sm:$0xff] }
 0x328   : > { %5645 = vmatprep.subr.msk.bf16.mxu1 %vm6483_vm8, %v5643_v3  ;;  %v5343_v3 = vld [vmem:[%s10796_s1 + $0x268] sm:$0xff]  ;;  %v5648_v57 = vpack.c.bf16 %v11093_v46, %v11092_v39  ;;  %v11094_v39 = vld [vmem:[#allocation79_spill] sm:$0xff]  ;;  %v11095_v46 = vld [vmem:[#allocation81_spill] sm:$0xff] }
 0x329   : > { %v11096_v43 = vpack.c.bf16 %v11094_v39, %v11095_v46  ;;  %v11098_v39 = vld [vmem:[#allocation92_spill] sm:$0xff]  ;;  %v11099_v46 = vld [vmem:[#allocation91_spill] sm:$0xff] }
 0x32a   : > { %v9883_v55 = vld [vmem:[#allocation2 + $0xf0] sm:$0xff]  ;;  %3068 = vmatmul.mubr.f32.gmra.mrb[10].mxu0 %v5340_v52 }
 0x32b   : > { %5752 = vmatpush1.bf16.xpose.msra.mxu0 %v11088_v56  ;;  %v9885_v9 = vld [vmem:[#allocation2 + $0xd0] sm:$0xff]  ;;  %v3603_v56 = vpop.permute.xlu1 %3602  ;;  %3564 = vst.msk [vmem:[#allocation2 + $0xf0] sm:$0xff] %vm243_vm0, %v8553_v8  ;;  %5368 = vmatprep.mubr.msk.f32.mxu0 %vm243_vm0, %v5343_v3 }
 0x32c   : > { %5755 = vmatprep.subr.msk.bf16.mxu0 %vm6483_vm8, %v11091_v35  ;;  %v9887_v30 = vld [vmem:[#allocation2 + $0xb0] sm:$0xff]  ;;  %v9889_v41 = vld [vmem:[#allocation2 + $0xe0] sm:$0xff]  ;;  %4020 = vst.msk [vmem:[#allocation2 + $0xd0] sm:$0xff] %vm243_vm0, %v8553_v8  ;;  %v3601_v35 = vpop.permute.xlu0 %3600 }
 0x32d   : > { %4476 = vst.msk [vmem:[#allocation2 + $0xb0] sm:$0xff] %vm243_vm0, %v8553_v8  ;;  %v9897_v6 = vld [vmem:[#allocation2 + $0xc0] sm:$0xff]  ;;  %3563 = vst.msk [vmem:[#allocation2 + $0xe0] sm:$0xff] %vm243_vm0, %v8565_v38 }
 0x32e   : > { %v9899_v51 = vld [vmem:[#allocation2 + $0xa0] sm:$0xff]  ;;  %3594 = vst.msk [vmem:[#allocation2 + $0xf0] sm:$0xff] %vm373_vm9, %v3576_v16  ;;  %4050 = vst.msk [vmem:[#allocation2 + $0xd0] sm:$0xff] %vm373_vm9, %v3576_v16  ;;  %v5811_v8 = vpack.c.bf16 %v9885_v9, %v9897_v6  ;;  %v5296_v6 = vld [vmem:[%s10796_s1 + $0x1b0] sm:$0xff] }
 0x32f   : > { %4506 = vst.msk [vmem:[#allocation2 + $0xb0] sm:$0xff] %vm373_vm9, %v3576_v16  ;;  %5647 = vmatpush1.bf16.xpose.msra.mxu1 %v11096_v43  ;;  %v5342_v16 = vld [vmem:[%s10796_s1 + $0x260] sm:$0xff]  ;;  %3593 = vst.msk [vmem:[#allocation2 + $0xe0] sm:$0xff] %vm373_vm9, %v3574_v61  ;;  %v5345_v43 = vld [vmem:[%s10796_s1 + $0x278] sm:$0xff] }
 0x330   : > { %4019 = vst.msk [vmem:[#allocation2 + $0xc0] sm:$0xff] %vm243_vm0, %v8565_v38  ;;  %4475 = vst.msk [vmem:[#allocation2 + $0xa0] sm:$0xff] %vm243_vm0, %v8565_v38  ;;  %v5833_v38 = vpack.c.bf16 %v9480_v34, %v9466_v1  ;;  %5650 = vmatprep.subr.msk.bf16.mxu1 %vm6483_vm8, %v5648_v57  ;;  %v3628_v3 = vpop.permute.xlu0 %3627  ;;  %3073 = vmatmul.mubr.f32.gmra.mrb[12].mxu0 %v5342_v16  ;;  %v11097_v57 = vpack.c.bf16 %v8685_v12, %v8707_v21  ;;  %v5371_v12 = vld [vmem:[%s10796_s1 + $0x288] sm:$0xff]  ;;  %v5422_v1 = vld [vmem:[%s10796_s1 + $0x360] sm:$0xff] }
 0x331   : > { %4049 = vst.msk [vmem:[#allocation2 + $0xc0] sm:$0xff] %vm373_vm9, %v3574_v61  ;;  %4505 = vst.msk [vmem:[#allocation2 + $0xa0] sm:$0xff] %vm373_vm9, %v3574_v61  ;;  %v3630_v61 = vpop.permute.xlu1 %3629  ;;  %5369 = vmatprep.mubr.msk.f32.mxu0 %vm243_vm0, %v5345_v43  ;;  %v11100_v16 = vpack.c.bf16 %v11098_v39, %v11099_v46 }
 0x332   : > { %3621 = vst.msk [vmem:[#allocation2 + $0xf0] sm:$0xff] %vm479_vm10, %v3603_v56  ;;  %4077 = vst.msk [vmem:[#allocation2 + $0xd0] sm:$0xff] %vm479_vm10, %v3603_v56 }
 0x333   : > { %4533 = vst.msk [vmem:[#allocation2 + $0xb0] sm:$0xff] %vm479_vm10, %v3603_v56  ;;  %3620 = vst.msk [vmem:[#allocation2 + $0xe0] sm:$0xff] %vm479_vm10, %v3601_v35  ;;  %5757 = vmatpush1.bf16.xpose.msra.mxu0 %v11097_v57  ;;  %v5344_v56 = vld [vmem:[%s10796_s1 + $0x270] sm:$0xff]  ;;  %v11103_v57 = vld [vmem:[#allocation94_spill] sm:$0xff] }
 0x334   : > { %4076 = vst.msk [vmem:[#allocation2 + $0xc0] sm:$0xff] %vm479_vm10, %v3601_v35  ;;  %4532 = vst.msk [vmem:[#allocation2 + $0xa0] sm:$0xff] %vm479_vm10, %v3601_v35  ;;  %v5838_v35 = vpack.c.bf16 %v9549_v45, %v9547_v11  ;;  %5760 = vmatprep.subr.msk.bf16.mxu0 %vm6483_vm8, %v11100_v16  ;;  %v3655_v43 = vpop.permute.xlu0 %3654  ;;  %3078 = vmatmul.mubr.f32.gmra.mrb[14].mxu0 %v5344_v56  ;;  %v11104_v39 = vpack.c.bf16 %v8645_v37, %v11103_v57  ;;  %v11111_v57 = vld [vmem:[#allocation14_spill] sm:$0xff]  ;;  %v11198_v45 = vld [vmem:[#allocation48_spill] sm:$0xff] }
 0x335   : > { %3648 = vst.msk [vmem:[#allocation2 + $0xf0] sm:$0xff] %vm585_vm11, %v3630_v61  ;;  %4104 = vst.msk [vmem:[#allocation2 + $0xd0] sm:$0xff] %vm585_vm11, %v3630_v61  ;;  %v3657_v21 = vpop.permute.xlu1 %3656  ;;  %5402 = vmatprep.mubr.msk.f32.mxu0 %vm243_vm0, %v5371_v12  ;;  %v11105_v16 = vpack.c.bf16 %v9060_v5, %v9064_v7  ;;  %v5843_v37 = vpack.c.bf16 %v9620_v58, %v9618_v19  ;;  %v11109_v12 = vld [vmem:[#allocation11_spill] sm:$0xff]  ;;  %v5501_v19 = vld [vmem:[%s10796_s1 + $0x458] sm:$0xff] }
 0x336   : > { %4560 = vst.msk [vmem:[#allocation2 + $0xb0] sm:$0xff] %vm585_vm11, %v3630_v61  ;;  %3647 = vst.msk [vmem:[#allocation2 + $0xe0] sm:$0xff] %vm585_vm11, %v3628_v3  ;;  %v11101_v61 = vld [vmem:[#allocation51_spill] sm:$0xff] }
 0x337   : > { %4103 = vst.msk [vmem:[#allocation2 + $0xc0] sm:$0xff] %vm585_vm11, %v3628_v3  ;;  %4559 = vst.msk [vmem:[#allocation2 + $0xa0] sm:$0xff] %vm585_vm11, %v3628_v3  ;;  %v11102_v3 = vld [vmem:[#allocation52_spill] sm:$0xff]  ;;  %5652 = vmatpush1.bf16.xpose.msra.mxu1 %v11104_v39  ;;  %v11112_v39 = vpack.c.bf16 %v9020_v17, %v11111_v57  ;;  %v11113_v17 = vpack.c.bf16 %v9377_v0, %v9396_v2  ;;  %v5500_v58 = vld [vmem:[%s10796_s1 + $0x450] sm:$0xff] }
 0x338   : > { %v5653_v52 = vpack.c.bf16 %v11102_v3, %v11101_v61  ;;  %3675 = vst.msk [vmem:[#allocation2 + $0xf0] sm:$0xff] %vm691_vm12, %v3657_v21  ;;  %4131 = vst.msk [vmem:[#allocation2 + $0xd0] sm:$0xff] %vm691_vm12, %v3657_v21  ;;  %v3682_v56 = vpop.permute.xlu0 %3681  ;;  %v11107_v61 = vld [vmem:[#allocation96_spill] sm:$0xff] }
 0x339   : > { %4587 = vst.msk [vmem:[#allocation2 + $0xb0] sm:$0xff] %vm691_vm12, %v3657_v21  ;;  %3674 = vst.msk [vmem:[#allocation2 + $0xe0] sm:$0xff] %vm691_vm12, %v3655_v43  ;;  %v3684_v46 = vpop.permute.xlu1 %3683  ;;  %v11110_v21 = vld [vmem:[#allocation12_spill] sm:$0xff] }
 0x33a   : > { %4130 = vst.msk [vmem:[#allocation2 + $0xc0] sm:$0xff] %vm691_vm12, %v3655_v43  ;;  %4586 = vst.msk [vmem:[#allocation2 + $0xa0] sm:$0xff] %vm691_vm12, %v3655_v43  ;;  %5655 = vmatprep.subr.msk.bf16.mxu1 %vm6483_vm8, %v5653_v52  ;;  %v11106_v52 = vld [vmem:[#allocation97_spill] sm:$0xff]  ;;  %v5658_v43 = vpack.c.bf16 %v11110_v21, %v11109_v12  ;;  %v11117_v12 = vld [vmem:[#allocation19_spill] sm:$0xff] }
 0x33b   : > { %3702 = vst.msk [vmem:[#allocation2 + $0xf0] sm:$0xff] %vm797_vm13, %v3684_v46  ;;  %4158 = vst.msk [vmem:[#allocation2 + $0xd0] sm:$0xff] %vm797_vm13, %v3684_v46  ;;  %5762 = vmatpush1.bf16.xpose.msra.mxu0 %v11105_v16  ;;  %v11108_v3 = vpack.c.bf16 %v11106_v52, %v11107_v61  ;;  %v5250_v16 = vld [vmem:[%s10796_s1 + $0x100] sm:$0xff]  ;;  %v11114_v52 = vld [vmem:[#allocation103_spill] sm:$0xff] }
 0x33c   : > { %4614 = vst.msk [vmem:[#allocation2 + $0xb0] sm:$0xff] %vm797_vm13, %v3684_v46  ;;  %3701 = vst.msk [vmem:[#allocation2 + $0xe0] sm:$0xff] %vm797_vm13, %v3682_v56  ;;  %v3709_v7 = vpop.permute.xlu0 %3708  ;;  %v11115_v61 = vld [vmem:[#allocation102_spill] sm:$0xff]  ;;  %v11118_v21 = vld [vmem:[#allocation20_spill] sm:$0xff] }
 0x33d   : > { %4157 = vst.msk [vmem:[#allocation2 + $0xc0] sm:$0xff] %vm797_vm13, %v3682_v56  ;;  %4613 = vst.msk [vmem:[#allocation2 + $0xa0] sm:$0xff] %vm797_vm13, %v3682_v56  ;;  %5765 = vmatprep.subr.msk.bf16.mxu0 %vm6483_vm8, %v11108_v3  ;;  %v3711_v5 = vpop.permute.xlu1 %3710  ;;  %v11116_v3 = vpack.c.bf16 %v11114_v52, %v11115_v61  ;;  %v5663_v2 = vpack.c.bf16 %v11118_v21, %v11117_v12  ;;  %v5253_v0 = vld [vmem:[%s10796_s1 + $0x118] sm:$0xff]  ;;  %v5252_v52 = vld [vmem:[%s10796_s1 + $0x110] sm:$0xff]  ;;  %v5771_v12 = vpack.c.bf16 %v9654_v28, %v9669_v53 }
 0x33e   : > { %3729 = vst.msk [vmem:[#allocation2 + $0xf0] sm:$0xff] %vm903_vm14, %v3711_v5  ;;  %4185 = vst.msk [vmem:[#allocation2 + $0xd0] sm:$0xff] %vm903_vm14, %v3711_v5  ;;  %v5255_v61 = vld [vmem:[%s10796_s1 + $0x128] sm:$0xff]  ;;  %v5254_v28 = vld [vmem:[%s10796_s1 + $0x120] sm:$0xff] }
 0x33f   : > { %4641 = vst.msk [vmem:[#allocation2 + $0xb0] sm:$0xff] %vm903_vm14, %v3711_v5  ;;  %5657 = vmatpush1.bf16.xpose.msra.mxu1 %v11112_v39  ;;  %3728 = vst.msk [vmem:[#allocation2 + $0xe0] sm:$0xff] %vm903_vm14, %v3709_v7  ;;  %v10025_v5 = vld [vmem:[#allocation2 + $0xc8] sm:$0xff]  ;;  %v10091_v53 = vld [vmem:[#allocation2 + $0xf8] sm:$0xff] }
 0x340   : > { %4184 = vst.msk [vmem:[#allocation2 + $0xc0] sm:$0xff] %vm903_vm14, %v3709_v7  ;;  %4640 = vst.msk [vmem:[#allocation2 + $0xa0] sm:$0xff] %vm903_vm14, %v3709_v7  ;;  %5660 = vmatprep.subr.msk.bf16.mxu1 %vm6483_vm8, %v5658_v43  ;;  %v3736_v56 = vpop.permute.xlu0 %3735  ;;  %v10027_v7 = vld [vmem:[#allocation2 + $0xd8] sm:$0xff] }
 0x341   : > { %v3738_v46 = vpop.permute.xlu1 %3737  ;;  %3755 = vst.msk [vmem:[#allocation2 + $0xe0] sm:$0xff] %vm1009_vm15, %v3736_v56  ;;  %4211 = vst.msk [vmem:[#allocation2 + $0xc0] sm:$0xff] %vm1009_vm15, %v3736_v56  ;;  %v5848_v57 = vpack.c.bf16 %v10027_v7, %v10025_v5  ;;  %v5505_v5 = vld [vmem:[%s10796_s1 + $0x478] sm:$0xff]  ;;  %v5504_v7 = vld [vmem:[%s10796_s1 + $0x470] sm:$0xff] }
 0x342   : > { %3756 = vst.msk [vmem:[#allocation2 + $0xf0] sm:$0xff] %vm1009_vm15, %v3738_v46  ;;  %4212 = vst.msk [vmem:[#allocation2 + $0xd0] sm:$0xff] %vm1009_vm15, %v3738_v46 }
 0x343   : > { %4668 = vst.msk [vmem:[#allocation2 + $0xb0] sm:$0xff] %vm1009_vm15, %v3738_v46  ;;  %5767 = vmatpush1.bf16.xpose.msra.mxu0 %v11113_v17  ;;  %4667 = vst.msk [vmem:[#allocation2 + $0xa0] sm:$0xff] %vm1009_vm15, %v3736_v56  ;;  %v11119_v46 = vld [vmem:[#allocation43_spill] sm:$0xff]  ;;  %v11120_v56 = vld [vmem:[#allocation46_spill] sm:$0xff] }
 0x344   : > { %5770 = vmatprep.subr.msk.bf16.mxu0 %vm6483_vm8, %v11116_v3  ;;  %4685 = vst.msk [vmem:[#allocation2 + $0xc8] sm:$0xff] %vm243_vm0, %v8891_v49  ;;  %4686 = vst.msk [vmem:[#allocation2 + $0xd8] sm:$0xff] %vm243_vm0, %v8894_v24  ;;  %v4032_v39 = vpop.permute.xlu0 %4031  ;;  %v11121_v17 = vpack.c.bf16 %v11119_v46, %v11120_v56  ;;  %v11123_v46 = vld [vmem:[#allocation23_spill] sm:$0xff] }
 0x345   : > { %v4034_v43 = vpop.permute.xlu1 %4033  ;;  %4688 = vst.msk [vmem:[#allocation2 + $0xf8] sm:$0xff] %vm243_vm0, %v9259_v10  ;;  %v5259_v10 = vld [vmem:[%s10796_s1 + $0x148] sm:$0xff] }
 0x346   : > { %2127 = vmatmul.mubr.f32.vlgmr.msra.gmra.mrb[0].mxu1 %v5250_v16 }
 0x347   : > { %5662 = vmatpush1.bf16.xpose.msra.mxu1 %v11121_v17  ;;  %5283 = vmatprep.mubr.msk.f32.mxu1 %vm243_vm0, %v5253_v0  ;;  %v11125_v17 = vld [vmem:[#allocation27_spill] sm:$0xff] }
 0x348   : > { %5665 = vmatprep.subr.msk.bf16.mxu1 %vm6483_vm8, %v5663_v2  ;;  %v10057_v21 = vld [vmem:[#allocation2 + $0xe0] sm:$0xff]  ;;  %v4059_v0 = vpop.permute.xlu0 %4058 }
 0x349   : > { %v10047_v24 = vld [vmem:[#allocation2 + $0xf0] sm:$0xff]  ;;  %v4061_v3 = vpop.permute.xlu1 %4060  ;;  %v10061_v2 = vld [vmem:[#allocation2 + $0xc0] sm:$0xff]  ;;  %4021 = vst.msk [vmem:[#allocation2 + $0xe0] sm:$0xff] %vm243_vm0, %v8919_v29 }
 0x34a   : > { %v10049_v16 = vld [vmem:[#allocation2 + $0xd0] sm:$0xff]  ;;  %4022 = vst.msk [vmem:[#allocation2 + $0xf0] sm:$0xff] %vm243_vm0, %v8891_v49  ;;  %2132 = vmatmul.mubr.f32.gmra.mrb[2].mxu1 %v5252_v52  ;;  %4477 = vst.msk [vmem:[#allocation2 + $0xc0] sm:$0xff] %vm243_vm0, %v8919_v29  ;;  %v11126_v52 = vld [vmem:[#allocation28_spill] sm:$0xff] }
 0x34b   : > { %4478 = vst.msk [vmem:[#allocation2 + $0xd0] sm:$0xff] %vm243_vm0, %v8891_v49  ;;  %5772 = vmatpush1.bf16.xpose.msra.mxu0 %v5771_v12  ;;  %5284 = vmatprep.mubr.msk.f32.mxu1 %vm243_vm0, %v5255_v61  ;;  %v5816_v49 = vpack.c.bf16 %v10047_v24, %v10057_v21  ;;  %v5668_v61 = vpack.c.bf16 %v11126_v52, %v11125_v17  ;;  %v5257_v29 = vld [vmem:[%s10796_s1 + $0x138] sm:$0xff]  ;;  %v10089_v12 = vld [vmem:[#allocation2 + $0xe8] sm:$0xff]  ;;  %v5256_v52 = vld [vmem:[%s10796_s1 + $0x130] sm:$0xff] }
 0x34c   : > { %4052 = vst.msk [vmem:[#allocation2 + $0xf0] sm:$0xff] %vm373_vm9, %v4034_v43  ;;  %4508 = vst.msk [vmem:[#allocation2 + $0xd0] sm:$0xff] %vm373_vm9, %v4034_v43  ;;  %v11122_v43 = vld [vmem:[#allocation24_spill] sm:$0xff]  ;;  %v5300_v21 = vld [vmem:[%s10796_s1 + $0x1d0] sm:$0xff] }
 0x34d   : > { %4079 = vst.msk [vmem:[#allocation2 + $0xf0] sm:$0xff] %vm479_vm10, %v4061_v3  ;;  %4535 = vst.msk [vmem:[#allocation2 + $0xd0] sm:$0xff] %vm479_vm10, %v4061_v3  ;;  %v11124_v56 = vpack.c.bf16 %v11122_v43, %v11123_v46  ;;  %v4088_v3 = vpop.permute.xlu1 %4087  ;;  %v5853_v43 = vpack.c.bf16 %v10091_v53, %v10089_v12  ;;  %v11127_v46 = vld [vmem:[#allocation54_spill] sm:$0xff]  ;;  %v5454_v12 = vld [vmem:[%s10796_s1 + $0x3a0] sm:$0xff] }
 0x34e   : > { %4051 = vst.msk [vmem:[#allocation2 + $0xe0] sm:$0xff] %vm373_vm9, %v4032_v39  ;;  %4507 = vst.msk [vmem:[#allocation2 + $0xc0] sm:$0xff] %vm373_vm9, %v4032_v39  ;;  %2137 = vmatmul.mubr.f32.gmra.mrb[4].mxu1 %v5254_v28  ;;  %v4086_v39 = vpop.permute.xlu0 %4085  ;;  %v5455_v53 = vld [vmem:[%s10796_s1 + $0x3a8] sm:$0xff] }
 0x34f   : > { %5775 = vmatprep.subr.msk.bf16.mxu0 %vm6483_vm8, %v11124_v56  ;;  %4078 = vst.msk [vmem:[#allocation2 + $0xe0] sm:$0xff] %vm479_vm10, %v4059_v0  ;;  %4534 = vst.msk [vmem:[#allocation2 + $0xc0] sm:$0xff] %vm479_vm10, %v4059_v0  ;;  %v11128_v56 = vld [vmem:[#allocation56_spill] sm:$0xff]  ;;  %v5776_v0 = vpack.c.bf16 %v9883_v55, %v9889_v41  ;;  %5285 = vmatprep.mubr.msk.f32.mxu1 %vm243_vm0, %v5257_v29  ;;  %v5258_v55 = vld [vmem:[%s10796_s1 + $0x140] sm:$0xff] }
 0x350   : > { %4106 = vst.msk [vmem:[#allocation2 + $0xf0] sm:$0xff] %vm585_vm11, %v4088_v3  ;;  %4562 = vst.msk [vmem:[#allocation2 + $0xd0] sm:$0xff] %vm585_vm11, %v4088_v3  ;;  %v11129_v17 = vpack.c.bf16 %v11127_v46, %v11128_v56  ;;  %v11131_v29 = vld [vmem:[#allocation37_spill] sm:$0xff]  ;;  %v11132_v3 = vld [vmem:[#allocation38_spill] sm:$0xff] }
 0x351   : > { %4687 = vst.msk [vmem:[#allocation2 + $0xe8] sm:$0xff] %vm243_vm0, %v9256_v32  ;;  %v4115_v28 = vpop.permute.xlu1 %4114  ;;  %v5261_v46 = vld [vmem:[%s10796_s1 + $0x158] sm:$0xff] }
 0x352   : > { %5667 = vmatpush1.bf16.xpose.msra.mxu1 %v11129_v17  ;;  %4105 = vst.msk [vmem:[#allocation2 + $0xe0] sm:$0xff] %vm585_vm11, %v4086_v39  ;;  %4561 = vst.msk [vmem:[#allocation2 + $0xc0] sm:$0xff] %vm585_vm11, %v4086_v39  ;;  %v4113_v41 = vpop.permute.xlu0 %4112  ;;  %v5673_v39 = vpack.c.bf16 %v11132_v3, %v11131_v29  ;;  %v11136_v29 = vld [vmem:[#allocation74_spill] sm:$0xff]  ;;  %v11137_v3 = vld [vmem:[#allocation73_spill] sm:$0xff] }
 0x353   : > { %5670 = vmatprep.subr.msk.bf16.mxu1 %vm6483_vm8, %v5668_v61  ;;  %4133 = vst.msk [vmem:[#allocation2 + $0xf0] sm:$0xff] %vm691_vm12, %v4115_v28  ;;  %4589 = vst.msk [vmem:[#allocation2 + $0xd0] sm:$0xff] %vm691_vm12, %v4115_v28  ;;  %2142 = vmatmul.mubr.f32.gmra.mrb[6].mxu1 %v5256_v52  ;;  %v11130_v61 = vpack.c.bf16 %v9122_v44, %v9120_v13  ;;  %v11134_v52 = vld [vmem:[#allocation62_spill] sm:$0xff]  ;;  %v5370_v13 = vld [vmem:[%s10796_s1 + $0x280] sm:$0xff] }
 0x354   : > { %5777 = vmatpush1.bf16.xpose.msra.mxu0 %v5776_v0  ;;  %5286 = vmatprep.mubr.msk.f32.mxu1 %vm243_vm0, %v5259_v10  ;;  %4132 = vst.msk [vmem:[#allocation2 + $0xe0] sm:$0xff] %vm691_vm12, %v4113_v41  ;;  %4588 = vst.msk [vmem:[#allocation2 + $0xc0] sm:$0xff] %vm691_vm12, %v4113_v41  ;;  %v11133_v0 = vld [vmem:[#allocation60_spill] sm:$0xff]  ;;  %v5260_v10 = vld [vmem:[%s10796_s1 + $0x150] sm:$0xff] }
 0x355   : > { %5780 = vmatprep.subr.msk.bf16.mxu0 %vm6483_vm8, %v11130_v61  ;;  %v4142_v56 = vpop.permute.xlu1 %4141  ;;  %v11135_v44 = vpack.c.bf16 %v11133_v0, %v11134_v52  ;;  %v5263_v28 = vld [vmem:[%s10796_s1 + $0x168] sm:$0xff]  ;;  %v11140_v0 = vld [vmem:[#allocation49_spill] sm:$0xff] }
 0x356   : > { %4160 = vst.msk [vmem:[#allocation2 + $0xf0] sm:$0xff] %vm797_vm13, %v4142_v56  ;;  %4616 = vst.msk [vmem:[#allocation2 + $0xd0] sm:$0xff] %vm797_vm13, %v4142_v56  ;;  %v4140_v17 = vpop.permute.xlu0 %4139  ;;  %v5372_v56 = vld [vmem:[%s10796_s1 + $0x290] sm:$0xff]  ;;  %v11141_v52 = vld [vmem:[#allocation50_spill] sm:$0xff] }
 0x357   : > { %2147 = vmatmul.mubr.f32.gmra.mrb[8].mxu1 %v5258_v55  ;;  %4159 = vst.msk [vmem:[#allocation2 + $0xe0] sm:$0xff] %vm797_vm13, %v4140_v17  ;;  %4615 = vst.msk [vmem:[#allocation2 + $0xc0] sm:$0xff] %vm797_vm13, %v4140_v17  ;;  %v5373_v55 = vld [vmem:[%s10796_s1 + $0x298] sm:$0xff]  ;;  %v11139_v17 = vpack.c.bf16 %v9201_v50, %v9199_v36 }
 0x358   : > { %5287 = vmatprep.mubr.msk.f32.mxu1 %vm243_vm0, %v5261_v46  ;;  %v11138_v46 = vpack.c.bf16 %v11136_v29, %v11137_v3  ;;  %v11142_v36 = vld [vmem:[#allocation68_spill] sm:$0xff]  ;;  %v5374_v29 = vld [vmem:[%s10796_s1 + $0x2a0] sm:$0xff]  ;;  %v5291_v3 = vld [vmem:[%s10796_s1 + $0x188] sm:$0xff] }
 0x359   : > { %v4169_v41 = vpop.permute.xlu1 %4168 }
 0x35a   : > { %5672 = vmatpush1.bf16.xpose.msra.mxu1 %v11135_v44  ;;  %4187 = vst.msk [vmem:[#allocation2 + $0xf0] sm:$0xff] %vm903_vm14, %v4169_v41  ;;  %4643 = vst.msk [vmem:[#allocation2 + $0xd0] sm:$0xff] %vm903_vm14, %v4169_v41  ;;  %v4167_v61 = vpop.permute.xlu0 %4166  ;;  %v5678_v44 = vpack.c.bf16 %v11141_v52, %v11140_v0  ;;  %v11143_v41 = vld [vmem:[#allocation70_spill] sm:$0xff]  ;;  %v11146_v0 = vld [vmem:[#allocation87_spill] sm:$0xff] }
 0x35b   : > { %5675 = vmatprep.subr.msk.bf16.mxu1 %vm6483_vm8, %v5673_v39  ;;  %3501 = vmatmul.mubr.f32.vlgmr.msra.gmra.mrb[0].mxu0 %v5370_v13  ;;  %v5262_v39 = vld [vmem:[%s10796_s1 + $0x160] sm:$0xff]  ;;  %4186 = vst.msk [vmem:[#allocation2 + $0xe0] sm:$0xff] %vm903_vm14, %v4167_v61  ;;  %4642 = vst.msk [vmem:[#allocation2 + $0xc0] sm:$0xff] %vm903_vm14, %v4167_v61  ;;  %v5265_v13 = vld [vmem:[%s10796_s1 + $0x178] sm:$0xff]  ;;  %v11144_v61 = vpack.c.bf16 %v11142_v36, %v11143_v41 }
 0x35c   : > { %2152 = vmatmul.mubr.f32.gmra.mrb[10].mxu1 %v5260_v10  ;;  %5782 = vmatpush1.bf16.xpose.msra.mxu0 %v11138_v46  ;;  %v11152_v36 = vld [vmem:[#allocation58_spill] sm:$0xff] }
 0x35d   : > { %5288 = vmatprep.mubr.msk.f32.mxu1 %vm243_vm0, %v5263_v28  ;;  %5785 = vmatprep.subr.msk.bf16.mxu0 %vm6483_vm8, %v11139_v17  ;;  %v4196_v10 = vpop.permute.xlu1 %4195  ;;  %v5375_v28 = vld [vmem:[%s10796_s1 + $0x2a8] sm:$0xff]  ;;  %v11145_v17 = vld [vmem:[#allocation88_spill] sm:$0xff] }
 0x35e   : > { %5403 = vmatprep.mubr.msk.f32.mxu0 %vm243_vm0, %v5373_v55  ;;  %4214 = vst.msk [vmem:[#allocation2 + $0xf0] sm:$0xff] %vm1009_vm15, %v4196_v10  ;;  %4670 = vst.msk [vmem:[#allocation2 + $0xd0] sm:$0xff] %vm1009_vm15, %v4196_v10  ;;  %v4194_v50 = vpop.permute.xlu0 %4193  ;;  %v5264_v55 = vld [vmem:[%s10796_s1 + $0x170] sm:$0xff]  ;;  %v11147_v52 = vpack.c.bf16 %v11145_v17, %v11146_v0  ;;  %v11149_v10 = vld [vmem:[#allocation41_spill] sm:$0xff] }
 0x35f   : > { %3506 = vmatmul.mubr.f32.gmra.mrb[2].mxu0 %v5372_v56  ;;  %4213 = vst.msk [vmem:[#allocation2 + $0xe0] sm:$0xff] %vm1009_vm15, %v4194_v50  ;;  %4669 = vst.msk [vmem:[#allocation2 + $0xc0] sm:$0xff] %vm1009_vm15, %v4194_v50  ;;  %v11151_v50 = vld [vmem:[#allocation57_spill] sm:$0xff]  ;;  %v11153_v0 = vld [vmem:[#allocation80_spill] sm:$0xff] }
 0x360   : > { %2157 = vmatmul.mubr.f32.gmra.mrb[12].mxu1 %v5262_v39  ;;  %5404 = vmatprep.mubr.msk.f32.mxu0 %vm243_vm0, %v5375_v28  ;;  %v5377_v39 = vld [vmem:[%s10796_s1 + $0x2b8] sm:$0xff]  ;;  %v5683_v41 = vpack.c.bf16 %v11152_v36, %v11151_v50  ;;  %v5380_v36 = vld [vmem:[%s10796_s1 + $0x2d0] sm:$0xff] }
 0x361   : > { %5289 = vmatprep.mubr.msk.f32.mxu1 %vm243_vm0, %v5265_v13  ;;  %v4492_v46 = vpop.permute.xlu1 %4491  ;;  %v11148_v13 = vld [vmem:[#allocation44_spill] sm:$0xff] }
 0x362   : > { %5677 = vmatpush1.bf16.xpose.msra.mxu1 %v11144_v61  ;;  %v4490_v56 = vpop.permute.xlu0 %4489  ;;  %v11150_v28 = vpack.c.bf16 %v11148_v13, %v11149_v10  ;;  %v5379_v61 = vld [vmem:[%s10796_s1 + $0x2c8] sm:$0xff]  ;;  %v11156_v10 = vld [vmem:[#allocation101_spill] sm:$0xff] }
 0x363   : > { %5680 = vmatprep.subr.msk.bf16.mxu1 %vm6483_vm8, %v5678_v44  ;;  %3511 = vmatmul.mubr.f32.gmra.mrb[4].mxu0 %v5374_v29  ;;  %v5376_v44 = vld [vmem:[%s10796_s1 + $0x2b0] sm:$0xff] }
 0x364   : > { %2162 = vmatmul.mubr.f32.gmra.mrb[14].mxu1 %v5264_v55  ;;  %5787 = vmatpush1.bf16.xpose.msra.mxu0 %v11147_v52  ;;  %v11154_v52 = vld [vmem:[#allocation82_spill] sm:$0xff] }
 0x365   : > { %5322 = vmatprep.mubr.msk.f32.mxu1 %vm243_vm0, %v5291_v3  ;;  %5790 = vmatprep.subr.msk.bf16.mxu0 %vm6483_vm8, %v11150_v28  ;;  %v10228_v55 = vld [vmem:[#allocation2 + $0xf0] sm:$0xff]  ;;  %v4519_v29 = vpop.permute.xlu1 %4518  ;;  %v11155_v13 = vpack.c.bf16 %v11153_v0, %v11154_v52  ;;  %v11157_v28 = vld [vmem:[#allocation100_spill] sm:$0xff]  ;;  %v5383_v52 = vld [vmem:[%s10796_s1 + $0x2e8] sm:$0xff] }
 0x366   : > { %5405 = vmatprep.mubr.msk.f32.mxu0 %vm243_vm0, %v5377_v39  ;;  %4480 = vst.msk [vmem:[#allocation2 + $0xf0] sm:$0xff] %vm243_vm0, %v9256_v32  ;;  %v10233_v3 = vld [vmem:[#allocation2 + $0xe0] sm:$0xff]  ;;  %v4517_v17 = vpop.permute.xlu0 %4516  ;;  %v11158_v50 = vpack.c.bf16 %v11156_v10, %v11157_v28  ;;  %v5385_v28 = vld [vmem:[%s10796_s1 + $0x2f8] sm:$0xff] }
 0x367   : > { %3516 = vmatmul.mubr.f32.gmra.mrb[6].mxu0 %v5376_v44  ;;  %4510 = vst.msk [vmem:[#allocation2 + $0xf0] sm:$0xff] %vm373_vm9, %v4492_v46  ;;  %v5378_v39 = vld [vmem:[%s10796_s1 + $0x2c0] sm:$0xff]  ;;  %v5856_v32 = vpack.c.bf16 %v10228_v55, %v10233_v3  ;;  %v5381_v46 = vld [vmem:[%s10796_s1 + $0x2d8] sm:$0xff]  ;;  %v5456_v55 = vld [vmem:[%s10796_s1 + $0x3b0] sm:$0xff] }
 0x368   : > { %5406 = vmatprep.mubr.msk.f32.mxu0 %vm243_vm0, %v5379_v61  ;;  %4479 = vst.msk [vmem:[#allocation2 + $0xe0] sm:$0xff] %vm243_vm0, %v9276_v60  ;;  %v5382_v10 = vld [vmem:[%s10796_s1 + $0x2e0] sm:$0xff]  ;;  %v5459_v3 = vld [vmem:[%s10796_s1 + $0x3c8] sm:$0xff] }
 0x369   : > { %4537 = vst.msk [vmem:[#allocation2 + $0xf0] sm:$0xff] %vm479_vm10, %v4519_v29  ;;  %v4546_v44 = vpop.permute.xlu1 %4545  ;;  %v11162_v29 = vld [vmem:[#allocation65_spill] sm:$0xff] }
 0x36a   : > { %5682 = vmatpush1.bf16.xpose.msra.mxu1 %v11155_v13  ;;  %4509 = vst.msk [vmem:[#allocation2 + $0xe0] sm:$0xff] %vm373_vm9, %v4490_v56  ;;  %v4544_v60 = vpop.permute.xlu0 %4543  ;;  %v11159_v56 = vld [vmem:[#allocation26_spill] sm:$0xff]  ;;  %v4713_v34 = vld [vmem:[#allocation2 + $0xc0] sm:$0xff] }
 0x36b   : > { %5685 = vmatprep.subr.msk.bf16.mxu1 %vm6483_vm8, %v5683_v41  ;;  %4536 = vst.msk [vmem:[#allocation2 + $0xe0] sm:$0xff] %vm479_vm10, %v4517_v17  ;;  %3521 = vmatmul.mubr.f32.gmra.mrb[8].mxu0 %v5378_v39  ;;  %v11160_v41 = vld [vmem:[#allocation25_spill] sm:$0xff]  ;;  %v11163_v17 = vld [vmem:[#allocation66_spill] sm:$0xff] }
 0x36c   : > { %4564 = vst.msk [vmem:[#allocation2 + $0xf0] sm:$0xff] %vm585_vm11, %v4546_v44  ;;  %5792 = vmatpush1.bf16.xpose.msra.mxu0 %v11158_v50  ;;  %5407 = vmatprep.mubr.msk.f32.mxu0 %vm243_vm0, %v5381_v46  ;;  %4563 = vst.msk [vmem:[#allocation2 + $0xe0] sm:$0xff] %vm585_vm11, %v4544_v60  ;;  %v11161_v61 = vpack.c.bf16 %v11159_v56, %v11160_v41  ;;  %v5688_v0 = vpack.c.bf16 %v11163_v17, %v11162_v29  ;;  %v11164_v46 = vld [vmem:[#allocation93_spill] sm:$0xff]  ;;  %v11165_v44 = vld [vmem:[#allocation95_spill] sm:$0xff] }
 0x36d   : > { %v4573_v13 = vpop.permute.xlu1 %4572  ;;  %v11166_v60 = vpack.c.bf16 %v11164_v46, %v11165_v44  ;;  %v11167_v56 = vld [vmem:[#allocation33_spill] sm:$0xff]  ;;  %v11168_v41 = vld [vmem:[#allocation104_spill] sm:$0xff]  ;;  %v5384_v29 = vld [vmem:[%s10796_s1 + $0x2f0] sm:$0xff]  ;;  %v11170_v17 = vpack.c.bf16 %v9486_v59, %v9484_v23 }
 0x36e   : > { %5795 = vmatprep.subr.msk.bf16.mxu0 %vm6483_vm8, %v11161_v61  ;;  %4591 = vst.msk [vmem:[#allocation2 + $0xf0] sm:$0xff] %vm691_vm12, %v4573_v13  ;;  %v4571_v39 = vpop.permute.xlu0 %4570  ;;  %v11169_v61 = vpack.c.bf16 %v11167_v56, %v11168_v41  ;;  %v4690_v59 = vld [vmem:[#allocation2 + $0x8] sm:$0xff]  ;;  %v11176_v56 = vpack.c.bf16 %v9379_v26, %v9413_v40  ;;  %v11177_v41 = vpack.c.bf16 %v9564_v15, %v9562_v62  ;;  %v4696_v40 = vld [vmem:[#allocation2 + $0x38] sm:$0xff]  ;;  %v5290_v15 = vld [vmem:[%s10796_s1 + $0x180] sm:$0xff] }
 0x36f   : > { %3526 = vmatmul.mubr.f32.gmra.mrb[10].mxu0 %v5380_v36  ;;  %4590 = vst.msk [vmem:[#allocation2 + $0xe0] sm:$0xff] %vm691_vm12, %v4571_v39  ;;  %v5411_v39 = vld [vmem:[%s10796_s1 + $0x308] sm:$0xff]  ;;  %v11180_v62 = vpack.c.bf16 %v9656_v20, %v9680_v31  ;;  %v5292_v20 = vld [vmem:[%s10796_s1 + $0x190] sm:$0xff]  ;;  %v4700_v31 = vld [vmem:[#allocation2 + $0x58] sm:$0xff] }
 0x370   : > { %5408 = vmatprep.mubr.msk.f32.mxu0 %vm243_vm0, %v5383_v52  ;;  %v11172_v52 = vld [vmem:[#allocation76_spill] sm:$0xff]  ;;  %v4694_v26 = vld [vmem:[#allocation2 + $0x28] sm:$0xff] }
 0x371   : > { %v4600_v50 = vpop.permute.xlu1 %4599 }
 0x372   : > { %5687 = vmatpush1.bf16.xpose.msra.mxu1 %v11166_v60  ;;  %4618 = vst.msk [vmem:[#allocation2 + $0xf0] sm:$0xff] %vm797_vm13, %v4600_v50  ;;  %v4598_v36 = vpop.permute.xlu0 %4597  ;;  %v11173_v60 = vld [vmem:[#allocation13_spill] sm:$0xff]  ;;  %v4692_v50 = vld [vmem:[#allocation2 + $0x18] sm:$0xff] }
 0x373   : > { %5690 = vmatprep.subr.msk.bf16.mxu1 %vm6483_vm8, %v5688_v0  ;;  %3531 = vmatmul.mubr.f32.gmra.mrb[12].mxu0 %v5382_v10  ;;  %4617 = vst.msk [vmem:[#allocation2 + $0xe0] sm:$0xff] %vm797_vm13, %v4598_v36  ;;  %v11171_v0 = vld [vmem:[#allocation75_spill] sm:$0xff] }
 0x374   : > { %5797 = vmatpush1.bf16.xpose.msra.mxu0 %v11169_v61  ;;  %5409 = vmatprep.mubr.msk.f32.mxu0 %vm243_vm0, %v5385_v28  ;;  %v5693_v13 = vpack.c.bf16 %v11172_v52, %v11171_v0  ;;  %v11174_v10 = vld [vmem:[#allocation31_spill] sm:$0xff]  ;;  %v10324_v61 = vpack.c.bf16 %v4692_v50, %v4690_v59  ;;  %v4689_v0 = vld [vmem:[#allocation2] sm:$0xff] }
 0x375   : > { %5800 = vmatprep.subr.msk.bf16.mxu0 %vm6483_vm8, %v11170_v17  ;;  %v4627_v46 = vpop.permute.xlu1 %4626  ;;  %v11175_v28 = vpack.c.bf16 %v11173_v60, %v11174_v10  ;;  %v4691_v52 = vld [vmem:[#allocation2 + $0x10] sm:$0xff]  ;;  %v5294_v10 = vld [vmem:[%s10796_s1 + $0x1a0] sm:$0xff] }
 0x376   : > { %4645 = vst.msk [vmem:[#allocation2 + $0xf0] sm:$0xff] %vm903_vm14, %v4627_v46  ;;  %v4625_v44 = vpop.permute.xlu0 %4624  ;;  %v10348_v46 = vpack.c.bf16 %v4691_v52, %v4689_v0  ;;  %v4695_v60 = vld [vmem:[#allocation2 + $0x30] sm:$0xff]  ;;  %v4697_v50 = vld [vmem:[#allocation2 + $0x40] sm:$0xff] }
 0x377   : > { %3536 = vmatmul.mubr.f32.gmra.mrb[14].mxu0 %v5384_v29  ;;  %4644 = vst.msk [vmem:[#allocation2 + $0xe0] sm:$0xff] %vm903_vm14, %v4625_v44  ;;  %v11178_v29 = vld [vmem:[#allocation36_spill] sm:$0xff]  ;;  %v4693_v44 = vld [vmem:[#allocation2 + $0x20] sm:$0xff]  ;;  %v4703_v52 = vld [vmem:[#allocation2 + $0x70] sm:$0xff] }
 0x378   : > { %5442 = vmatprep.mubr.msk.f32.mxu0 %vm243_vm0, %v5411_v39  ;;  %v11179_v17 = vpack.c.bf16 %v9375_v22, %v11178_v29  ;;  %v5293_v22 = vld [vmem:[%s10796_s1 + $0x198] sm:$0xff]  ;;  %v10346_v39 = vpack.c.bf16 %v4696_v40, %v4694_v26  ;;  %v10378_v9 = vpack.c.bf16 %v4695_v60, %v4693_v44  ;;  %v11183_v29 = vpack.c.bf16 %v9245_v47, %v9243_v14  ;;  %v5410_v14 = vld [vmem:[%s10796_s1 + $0x300] sm:$0xff]  ;;  %v5303_v47 = vld [vmem:[%s10796_s1 + $0x1e8] sm:$0xff] }
 0x379   : > { %v4654_v23 = vpop.permute.xlu1 %4653  ;;  %v4708_v26 = vld [vmem:[#allocation2 + $0x98] sm:$0xff]  ;;  %v4701_v0 = vld [vmem:[#allocation2 + $0x60] sm:$0xff]  ;;  %v5415_v60 = vld [vmem:[%s10796_s1 + $0x328] sm:$0xff] }
 0x37a   : > { %5692 = vmatpush1.bf16.xpose.msra.mxu1 %v11175_v28  ;;  %4672 = vst.msk [vmem:[#allocation2 + $0xf0] sm:$0xff] %vm1009_vm15, %v4654_v23  ;;  %v4652_v36 = vpop.permute.xlu0 %4651  ;;  %v5297_v28 = vld [vmem:[%s10796_s1 + $0x1b8] sm:$0xff]  ;;  %v11182_v23 = vpack.c.bf16 %v9709_v33, %v9707_v25  ;;  %v5299_v25 = vld [vmem:[%s10796_s1 + $0x1c8] sm:$0xff]  ;;  %v10448_v44 = vpack.c.bf16 %v4703_v52, %v4701_v0  ;;  %v11193_v52 = vld [vmem:[#allocation17_spill] sm:$0xff] }
 0x37b   : > { %5695 = vmatprep.subr.msk.bf16.mxu1 %vm6483_vm8, %v5693_v13  ;;  %4671 = vst.msk [vmem:[#allocation2 + $0xe0] sm:$0xff] %vm1009_vm15, %v4652_v36  ;;  %v11181_v13 = vpack.c.bf16 %v9628_v42, %v9626_v54  ;;  %v5295_v54 = vld [vmem:[%s10796_s1 + $0x1a8] sm:$0xff]  ;;  %v4699_v36 = vld [vmem:[#allocation2 + $0x50] sm:$0xff]  ;;  %v5413_v40 = vld [vmem:[%s10796_s1 + $0x318] sm:$0xff] }
 0x37c   : > { %5802 = vmatpush1.bf16.xpose.msra.mxu0 %v11176_v56  ;;  %v4698_v42 = vld [vmem:[#allocation2 + $0x48] sm:$0xff]  ;;  %v5298_v56 = vld [vmem:[%s10796_s1 + $0x1c0] sm:$0xff]  ;;  %v10408_v24 = vpack.c.bf16 %v4699_v36, %v4697_v50 }
 0x37d   : > { %5805 = vmatprep.subr.msk.bf16.mxu0 %vm6483_vm8, %v11177_v41  ;;  %v10376_v59 = vpack.c.bf16 %v4700_v31, %v4698_v42  ;;  %v4702_v33 = vld [vmem:[#allocation2 + $0x68] sm:$0xff]  ;;  %v5301_v41 = vld [vmem:[%s10796_s1 + $0x1d8] sm:$0xff]  ;;  %v11187_v42 = vpack.c.bf16 %v9286_v18, %v9284_v4  ;;  %v5304_v4 = vld [vmem:[%s10796_s1 + $0x1f0] sm:$0xff] }
 0x37e   : > { %v5414_v18 = vld [vmem:[%s10796_s1 + $0x320] sm:$0xff]  ;;  %v11189_v50 = vld [vmem:[#allocation98_spill] sm:$0xff] }
 0x37f   : > { %v11192_v0 = vld [vmem:[#allocation18_spill] sm:$0xff] }
 0x381   : > { %v4719_v11 = vld [vmem:[#allocation2 + $0xf0] sm:$0xff] }
 0x382   : > { %5697 = vmatpush1.bf16.xpose.msra.mxu1 %v11179_v17 }
 0x383   : > { %5898 = vmatprep.subr.msk.bf16.mxu1 %vm6483_vm8, %v10324_v61 }
 0x384   : > { %5807 = vmatpush1.bf16.xpose.msra.mxu0 %v11180_v62  ;;  %v11184_v62 = vld [vmem:[#allocation86_spill] sm:$0xff] }
 0x385   : > { %5810 = vmatprep.subr.msk.bf16.mxu0 %vm6483_vm8, %v11181_v13  ;;  %v5302_v13 = vld [vmem:[%s10796_s1 + $0x1e0] sm:$0xff] }
 0x389   : > { %2585 = vmatmul.mubr.f32.vlgmr.msra.gmra.mrb[0].mxu1 %v5290_v15  ;;  %v11185_v15 = vld [vmem:[#allocation85_spill] sm:$0xff] }
 0x38a   : > { %5906 = vmatpush1.bf16.xpose.msra.mxu1 %v10348_v46  ;;  %5323 = vmatprep.mubr.msk.f32.mxu1 %vm243_vm0, %v5293_v22  ;;  %v11186_v22 = vpack.c.bf16 %v11184_v62, %v11185_v15  ;;  %v11194_v62 = vpack.c.bf16 %v11192_v0, %v11193_v52  ;;  %v5420_v15 = vld [vmem:[%s10796_s1 + $0x350] sm:$0xff] }
 0x38b   : > { %5899 = vmatprep.subr.msk.bf16.mxu1 %vm6483_vm8, %v10346_v39 }
 0x38c   : > { %5812 = vmatpush1.bf16.xpose.msra.mxu0 %v5811_v8  ;;  %v4704_v8 = vld [vmem:[#allocation2 + $0x78] sm:$0xff] }
 0x38d   : > { %2590 = vmatmul.mubr.f32.gmra.mrb[2].mxu1 %v5292_v20  ;;  %5815 = vmatprep.subr.msk.bf16.mxu0 %vm6483_vm8, %v11182_v23  ;;  %v10406_v17 = vpack.c.bf16 %v4704_v8, %v4702_v33  ;;  %v5412_v20 = vld [vmem:[%s10796_s1 + $0x310] sm:$0xff]  ;;  %v4712_v23 = vld [vmem:[#allocation2 + $0xb8] sm:$0xff] }
 0x38e   : > { %5324 = vmatprep.mubr.msk.f32.mxu1 %vm243_vm0, %v5295_v54  ;;  %v5305_v54 = vld [vmem:[%s10796_s1 + $0x1f8] sm:$0xff]  ;;  %v4707_v33 = vld [vmem:[#allocation2 + $0x90] sm:$0xff] }
 0x38f   : > { %v11188_v8 = vld [vmem:[#allocation99_spill] sm:$0xff] }
 0x390   : > { %v11190_v36 = vpack.c.bf16 %v11188_v8, %v11189_v50  ;;  %v11199_v8 = vld [vmem:[#allocation5_spill] sm:$0xff] }
 0x391   : > { %2595 = vmatmul.mubr.f32.gmra.mrb[4].mxu1 %v5294_v10  ;;  %v5417_v10 = vld [vmem:[%s10796_s1 + $0x338] sm:$0xff] }
 0x392   : > { %5907 = vmatpush1.bf16.xpose.msra.mxu1 %v10378_v9  ;;  %5325 = vmatprep.mubr.msk.f32.mxu1 %vm243_vm0, %v5297_v28  ;;  %v4710_v28 = vld [vmem:[#allocation2 + $0xa8] sm:$0xff] }
 0x393   : > { %5900 = vmatprep.subr.msk.bf16.mxu1 %vm6483_vm8, %v10376_v59 }
 0x394   : > { %5817 = vmatpush1.bf16.xpose.msra.mxu0 %v5816_v49  ;;  %v4706_v49 = vld [vmem:[#allocation2 + $0x88] sm:$0xff] }
 0x395   : > { %2600 = vmatmul.mubr.f32.gmra.mrb[6].mxu1 %v5296_v6  ;;  %5820 = vmatprep.subr.msk.bf16.mxu0 %vm6483_vm8, %v11183_v29  ;;  %v10445_v31 = vpack.c.bf16 %v4708_v26, %v4706_v49  ;;  %v5499_v6 = vld [vmem:[%s10796_s1 + $0x448] sm:$0xff]  ;;  %v10483_v29 = vpack.c.bf16 %v4712_v23, %v4710_v28  ;;  %v4716_v49 = vld [vmem:[#allocation2 + $0xd8] sm:$0xff]  ;;  %v4709_v26 = vld [vmem:[#allocation2 + $0xa0] sm:$0xff] }
 0x396   : > { %5326 = vmatprep.mubr.msk.f32.mxu1 %vm243_vm0, %v5299_v25  ;;  %v4705_v25 = vld [vmem:[#allocation2 + $0x80] sm:$0xff]  ;;  %v5424_v23 = vld [vmem:[%s10796_s1 + $0x370] sm:$0xff] }
 0x399   : > { %2605 = vmatmul.mubr.f32.gmra.mrb[8].mxu1 %v5298_v56  ;;  %v5416_v56 = vld [vmem:[%s10796_s1 + $0x330] sm:$0xff] }
 0x39a   : > { %5908 = vmatpush1.bf16.xpose.msra.mxu1 %v10408_v24  ;;  %5327 = vmatprep.mubr.msk.f32.mxu1 %vm243_vm0, %v5301_v41  ;;  %v11191_v41 = vpack.c.bf16 %v9358_v63, %v9356_v27  ;;  %v5418_v27 = vld [vmem:[%s10796_s1 + $0x340] sm:$0xff]  ;;  %v5421_v63 = vld [vmem:[%s10796_s1 + $0x358] sm:$0xff] }
 0x39b   : > { %5901 = vmatprep.subr.msk.bf16.mxu1 %vm6483_vm8, %v10406_v17  ;;  %3959 = vmatmul.mubr.f32.vlgmr.msra.gmra.mrb[0].mxu0 %v5410_v14  ;;  %v10489_v14 = vpack.c.bf16 %v4707_v33, %v4705_v25  ;;  %v4717_v33 = vld [vmem:[#allocation2 + $0xe0] sm:$0xff] }
 0x39c   : > { %5822 = vmatpush1.bf16.xpose.msra.mxu0 %v11186_v22  ;;  %5443 = vmatprep.mubr.msk.f32.mxu0 %vm243_vm0, %v5413_v40  ;;  %v4711_v40 = vld [vmem:[#allocation2 + $0xb0] sm:$0xff]  ;;  %v5423_v22 = vld [vmem:[%s10796_s1 + $0x368] sm:$0xff]  ;;  %v10559_v50 = vpack.c.bf16 %v4719_v11, %v4717_v33 }
 0x39d   : > { %2610 = vmatmul.mubr.f32.gmra.mrb[10].mxu1 %v5300_v21  ;;  %5825 = vmatprep.subr.msk.bf16.mxu0 %vm6483_vm8, %v11187_v42  ;;  %v5419_v21 = vld [vmem:[%s10796_s1 + $0x348] sm:$0xff] }
 0x39e   : > { %5328 = vmatprep.mubr.msk.f32.mxu1 %vm243_vm0, %v5303_v47  ;;  %v4714_v47 = vld [vmem:[#allocation2 + $0xc8] sm:$0xff] }
 0x39f   : > { %3964 = vmatmul.mubr.f32.gmra.mrb[2].mxu0 %v5412_v20  ;;  %v10519_v20 = vpack.c.bf16 %v4711_v40, %v4709_v26  ;;  %v4718_v42 = vld [vmem:[#allocation2 + $0xe8] sm:$0xff] }
 0x3a0   : > { %5444 = vmatprep.mubr.msk.f32.mxu0 %vm243_vm0, %v5415_v60  ;;  %v4720_v60 = vld [vmem:[#allocation2 + $0xf8] sm:$0xff] }
 0x3a1   : > { %2615 = vmatmul.mubr.f32.gmra.mrb[12].mxu1 %v5302_v13  ;;  %v10517_v13 = vpack.c.bf16 %v4716_v49, %v4714_v47  ;;  %v10549_v25 = vpack.c.bf16 %v4720_v60, %v4718_v42 }
 0x3a2   : > { %5909 = vmatpush1.bf16.xpose.msra.mxu1 %v10448_v44  ;;  %5329 = vmatprep.mubr.msk.f32.mxu1 %vm243_vm0, %v5305_v54  ;;  %v5425_v54 = vld [vmem:[%s10796_s1 + $0x378] sm:$0xff] }
 0x3a3   : > { %5902 = vmatprep.subr.msk.bf16.mxu1 %vm6483_vm8, %v10445_v31  ;;  %3969 = vmatmul.mubr.f32.gmra.mrb[4].mxu0 %v5414_v18  ;;  %v11196_v18 = vld [vmem:[#allocation47_spill] sm:$0xff] }
 0x3a4   : > { %5827 = vmatpush1.bf16.xpose.msra.mxu0 %v11190_v36  ;;  %5445 = vmatprep.mubr.msk.f32.mxu0 %vm243_vm0, %v5417_v10  ;;  %v11201_v36 = vpack.c.bf16 %v9887_v30, %v9899_v51  ;;  %v5503_v30 = vld [vmem:[%s10796_s1 + $0x468] sm:$0xff]  ;;  %v11202_v51 = vpack.c.bf16 %v10049_v16, %v10061_v2  ;;  %v5453_v16 = vld [vmem:[%s10796_s1 + $0x398] sm:$0xff]  ;;  %v5452_v2 = vld [vmem:[%s10796_s1 + $0x390] sm:$0xff] }
 0x3a5   : > { %2620 = vmatmul.mubr.f32.gmra.mrb[14].mxu1 %v5304_v4  ;;  %5830 = vmatprep.subr.msk.bf16.mxu0 %vm6483_vm8, %v11191_v41  ;;  %v11195_v4 = vld [vmem:[#allocation35_spill] sm:$0xff] }
 0x3a6   : > { %5526 = vmatprep.mubr.msk.f32.mxu1 %vm243_vm0, %v5499_v6  ;;  %v11197_v10 = vpack.c.bf16 %v11195_v4, %v11196_v18  ;;  %v5451_v6 = vld [vmem:[%s10796_s1 + $0x388] sm:$0xff]  ;;  %v5492_v41 = vld [vmem:[%s10796_s1 + $0x410] sm:$0xff] }
 0x3a7   : > { %3974 = vmatmul.mubr.f32.gmra.mrb[6].mxu0 %v5416_v56  ;;  %v5498_v56 = vld [vmem:[%s10796_s1 + $0x440] sm:$0xff] }
 0x3a8   : > { %5446 = vmatprep.mubr.msk.f32.mxu0 %vm243_vm0, %v5419_v21  ;;  %v5497_v21 = vld [vmem:[%s10796_s1 + $0x438] sm:$0xff] }
 0x3aa   : > { %5910 = vmatpush1.bf16.xpose.msra.mxu1 %v10489_v14 }
 0x3ab   : > { %5903 = vmatprep.subr.msk.bf16.mxu1 %vm6483_vm8, %v10483_v29  ;;  %3979 = vmatmul.mubr.f32.gmra.mrb[8].mxu0 %v5418_v27 }
 0x3ac   : > { %5832 = vmatpush1.bf16.xpose.msra.mxu0 %v11194_v62  ;;  %5447 = vmatprep.mubr.msk.f32.mxu0 %vm243_vm0, %v5421_v63 }
 0x3ad   : > { %5835 = vmatprep.subr.msk.bf16.mxu0 %vm6483_vm8, %v5833_v38  ;;  %v4715_v38 = vld [vmem:[#allocation2 + $0xd0] sm:$0xff] }
 0x3ae   : > { %v10535_v28 = vpack.c.bf16 %v4715_v38, %v4713_v34 }
 0x3af   : > { %3984 = vmatmul.mubr.f32.gmra.mrb[10].mxu0 %v5420_v15 }
 0x3b0   : > { %5448 = vmatprep.mubr.msk.f32.mxu0 %vm243_vm0, %v5423_v22 }
 0x3b2   : > { %5911 = vmatpush1.bf16.xpose.msra.mxu1 %v10519_v20 }
 0x3b3   : > { %5904 = vmatprep.subr.msk.bf16.mxu1 %vm6483_vm8, %v10517_v13  ;;  %3989 = vmatmul.mubr.f32.gmra.mrb[12].mxu0 %v5422_v1 }
 0x3b4   : > { %5837 = vmatpush1.bf16.xpose.msra.mxu0 %v11197_v10  ;;  %5449 = vmatprep.mubr.msk.f32.mxu0 %vm243_vm0, %v5425_v54 }
 0x3b5   : > { %5840 = vmatprep.subr.msk.bf16.mxu0 %vm6483_vm8, %v5838_v35  ;;  %v11200_v35 = vpack.c.bf16 %v11198_v45, %v11199_v8 }
 0x3b7   : > { %3994 = vmatmul.mubr.f32.gmra.mrb[14].mxu0 %v5424_v23 }
 0x3b8   : > { %5482 = vmatprep.mubr.msk.f32.mxu0 %vm243_vm0, %v5451_v6 }
 0x3ba   : > { %5912 = vmatpush1.bf16.xpose.msra.mxu1 %v10535_v28 }
 0x3bb   : > { %5905 = vmatprep.subr.msk.bf16.mxu1 %vm6483_vm8, %v10549_v25 }
 0x3bc   : > { %5842 = vmatpush1.bf16.xpose.msra.mxu0 %v11200_v35 }
 0x3bd   : > { %5845 = vmatprep.subr.msk.bf16.mxu0 %vm6483_vm8, %v5843_v37  ;;  %v5502_v37 = vld [vmem:[%s10796_s1 + $0x460] sm:$0xff] }
 0x3c2   : > { %5913 = vmatpush1.bf16.xpose.msra.mxu1 %v10559_v50 }
 0x3c4   : > { %5847 = vmatpush1.bf16.xpose.msra.mxu0 %v11201_v36 }
 0x3c5   : > { %5850 = vmatprep.subr.msk.bf16.mxu0 %vm6483_vm8, %v5848_v57  ;;  %v5450_v57 = vld [vmem:[%s10796_s1 + $0x380] sm:$0xff] }
 0x3c9   : > { %4895 = vmatmul.mubr.f32.vlgmr.msra.gmra.mrb[16].mxu1 %v5498_v56 }
 0x3ca   : > { %5527 = vmatprep.mubr.msk.f32.mxu1 %vm243_vm0, %v5501_v19 }
 0x3cc   : > { %5852 = vmatpush1.bf16.xpose.msra.mxu0 %v11202_v51 }
 0x3cd   : > { %4900 = vmatmul.mubr.f32.gmra.mrb[18].mxu1 %v5500_v58  ;;  %5855 = vmatprep.subr.msk.bf16.mxu0 %vm6483_vm8, %v5853_v43  ;;  %v5457_v43 = vld [vmem:[%s10796_s1 + $0x3b8] sm:$0xff] }
 0x3ce   : > { %5528 = vmatprep.mubr.msk.f32.mxu1 %vm243_vm0, %v5503_v30 }
 0x3d1   : > { %4905 = vmatmul.mubr.f32.gmra.mrb[20].mxu1 %v5502_v37 }
 0x3d2   : > { %5529 = vmatprep.mubr.msk.f32.mxu1 %vm243_vm0, %v5505_v5 }
 0x3d4   : > { %5857 = vmatpush1.bf16.xpose.msra.mxu0 %v5856_v32  ;;  %v5458_v32 = vld [vmem:[%s10796_s1 + $0x3c0] sm:$0xff] }
 0x3d5   : > { %4910 = vmatmul.mubr.f32.gmra.mrb[22].mxu1 %v5504_v7  ;;  %5860 = vmatprep.subr.msk.bf16.mxu0 %vm6483_vm8, %v10324_v61  ;;  %v5461_v61 = vld [vmem:[%s10796_s1 + $0x3d8] sm:$0xff] }
 0x3db   : > { %4417 = vmatmul.mubr.f32.vlgmr.msra.gmra.mrb[0].mxu0 %v5450_v57 }
 0x3dc   : > { %5862 = vmatpush1.bf16.xpose.msra.mxu0 %v10348_v46  ;;  %5483 = vmatprep.mubr.msk.f32.mxu0 %vm243_vm0, %v5453_v16  ;;  %v5463_v46 = vld [vmem:[%s10796_s1 + $0x3e8] sm:$0xff] }
 0x3dd   : > { %5865 = vmatprep.subr.msk.bf16.mxu0 %vm6483_vm8, %v10346_v39  ;;  %v5460_v39 = vld [vmem:[%s10796_s1 + $0x3d0] sm:$0xff] }
 0x3df   : > { %4422 = vmatmul.mubr.f32.gmra.mrb[2].mxu0 %v5452_v2 }
 0x3e0   : > { %5484 = vmatprep.mubr.msk.f32.mxu0 %vm243_vm0, %v5455_v53 }
 0x3e3   : > { %4427 = vmatmul.mubr.f32.gmra.mrb[4].mxu0 %v5454_v12 }
 0x3e4   : > { %5867 = vmatpush1.bf16.xpose.msra.mxu0 %v10378_v9  ;;  %5485 = vmatprep.mubr.msk.f32.mxu0 %vm243_vm0, %v5457_v43  ;;  %v5465_v9 = vld [vmem:[%s10796_s1 + $0x3f8] sm:$0xff] }
 0x3e5   : > { %5870 = vmatprep.subr.msk.bf16.mxu0 %vm6483_vm8, %v10376_v59  ;;  %v5462_v59 = vld [vmem:[%s10796_s1 + $0x3e0] sm:$0xff] }
 0x3e7   : > { %4432 = vmatmul.mubr.f32.gmra.mrb[6].mxu0 %v5456_v55 }
 0x3e8   : > { %5486 = vmatprep.mubr.msk.f32.mxu0 %vm243_vm0, %v5459_v3 }
 0x3eb   : > { %4437 = vmatmul.mubr.f32.gmra.mrb[8].mxu0 %v5458_v32 }
 0x3ec   : > { %5872 = vmatpush1.bf16.xpose.msra.mxu0 %v10408_v24  ;;  %5487 = vmatprep.mubr.msk.f32.mxu0 %vm243_vm0, %v5461_v61  ;;  %v5491_v24 = vld [vmem:[%s10796_s1 + $0x408] sm:$0xff] }
 0x3ed   : > { %5875 = vmatprep.subr.msk.bf16.mxu0 %vm6483_vm8, %v10406_v17  ;;  %v5464_v17 = vld [vmem:[%s10796_s1 + $0x3f0] sm:$0xff] }
 0x3ef   : > { %4442 = vmatmul.mubr.f32.gmra.mrb[10].mxu0 %v5460_v39 }
 0x3f0   : > { %5488 = vmatprep.mubr.msk.f32.mxu0 %vm243_vm0, %v5463_v46 }
 0x3f3   : > { %4447 = vmatmul.mubr.f32.gmra.mrb[12].mxu0 %v5462_v59 }
 0x3f4   : > { %5877 = vmatpush1.bf16.xpose.msra.mxu0 %v10448_v44  ;;  %5489 = vmatprep.mubr.msk.f32.mxu0 %vm243_vm0, %v5465_v9  ;;  %v5493_v44 = vld [vmem:[%s10796_s1 + $0x418] sm:$0xff] }
 0x3f5   : > { %5880 = vmatprep.subr.msk.bf16.mxu0 %vm6483_vm8, %v10445_v31  ;;  %v5490_v31 = vld [vmem:[%s10796_s1 + $0x400] sm:$0xff] }
 0x3f7   : > { %4452 = vmatmul.mubr.f32.gmra.mrb[14].mxu0 %v5464_v17 }
 0x3f8   : > { %5522 = vmatprep.mubr.msk.f32.mxu0 %vm243_vm0, %v5491_v24 }
 0x3fc   : > { %5882 = vmatpush1.bf16.xpose.msra.mxu0 %v10489_v14  ;;  %v5496_v14 = vld [vmem:[%s10796_s1 + $0x430] sm:$0xff] }
 0x3fd   : > { %5885 = vmatprep.subr.msk.bf16.mxu0 %vm6483_vm8, %v10483_v29  ;;  %v5494_v29 = vld [vmem:[%s10796_s1 + $0x420] sm:$0xff] }
 0x404   : > { %5887 = vmatpush1.bf16.xpose.msra.mxu0 %v10519_v20 }
 0x405   : > { %5890 = vmatprep.subr.msk.bf16.mxu0 %vm6483_vm8, %v10517_v13 }
 0x40c   : > { %5892 = vmatpush1.bf16.xpose.msra.mxu0 %v10535_v28 }
 0x40d   : > { %5895 = vmatprep.subr.msk.bf16.mxu0 %vm6483_vm8, %v10549_v25 }
 0x414   : > { %5897 = vmatpush1.bf16.xpose.msra.mxu0 %v10559_v50 }
 0x41b   : > { %4875 = vmatmul.mubr.f32.vlgmr.msra.gmra.mrb[0].mxu0 %v5490_v31 }
 0x41c   : > { %5523 = vmatprep.mubr.msk.f32.mxu0 %vm243_vm0, %v5493_v44 }
 0x41f   : > { %4880 = vmatmul.mubr.f32.gmra.mrb[2].mxu0 %v5492_v41 }
 0x420   : > { %5524 = vmatprep.mubr.msk.f32.mxu0 %vm243_vm0, %v5495_v48  ;;  %v6158_v48 = vmov (!%p5530_p10), 0.0  }
 0x423   : > { %4885 = vmatmul.mubr.f32.gmra.mrb[4].mxu0 %v5494_v29 }
 0x424   : > { %5525 = vmatprep.mubr.msk.f32.mxu0 %vm243_vm0, %v5497_v21  ;;  %vm4951_vm0 = vcmask (!%p5530_p10), 7168  }
 0x425   : > { %4952 = vst.msk [vmem:[#allocation3] sm:$0xff] (!%p5530_p10), %vm4951_vm0, %v6158_v48  ;;  %4953 = vst.msk [vmem:[#allocation3 + $0x8] sm:$0xff] (!%p5530_p10), %vm4951_vm0, %v6158_v48 }
 0x426   : > { %4954 = vst.msk [vmem:[#allocation3 + $0x10] sm:$0xff] (!%p5530_p10), %vm4951_vm0, %v6158_v48  ;;  %4955 = vst.msk [vmem:[#allocation3 + $0x18] sm:$0xff] (!%p5530_p10), %vm4951_vm0, %v6158_v48 }
 0x427   : > { %4890 = vmatmul.mubr.f32.gmra.mrb[6].mxu0 %v5496_v14  ;;  %4956 = vst.msk [vmem:[#allocation3 + $0x20] sm:$0xff] (!%p5530_p10), %vm4951_vm0, %v6158_v48  ;;  %4957 = vst.msk [vmem:[#allocation3 + $0x28] sm:$0xff] (!%p5530_p10), %vm4951_vm0, %v6158_v48 }
 0x428   : > { %4958 = vst.msk [vmem:[#allocation3 + $0x30] sm:$0xff] (!%p5530_p10), %vm4951_vm0, %v6158_v48  ;;  %4959 = vst.msk [vmem:[#allocation3 + $0x38] sm:$0xff] (!%p5530_p10), %vm4951_vm0, %v6158_v48 }
 0x45c   : > { %v2586_v27 = vpop.f32.mrb[0].mxu1 }
 0x45d   : > { %v2588_v63 = vpop.f32.mrb[1].mxu1 }
 0x460   : > { %v2591_v47 = vpop.f32.mrb[2].mxu1 }
 0x461   : > { %v2593_v49 = vpop.f32.mrb[3].mxu1 }
 0x464   : > { %v2596_v26 = vpop.f32.mrb[4].mxu1 }
 0x465   : > { %v2598_v40 = vpop.f32.mrb[5].mxu1 }
 0x468   : > { %v2601_v0 = vpop.f32.mrb[6].mxu1 }
 0x469   : > { %v2603_v52 = vpop.f32.mrb[7].mxu1 }
 0x46c   : > { %v2606_v62 = vpop.f32.mrb[8].mxu1 }
 0x46d   : > { %v2608_v15 = vpop.f32.mrb[9].mxu1 }
 0x470   : > { %v2611_v22 = vpop.f32.mrb[10].mxu1 }
 0x471   : > { %v2613_v13 = vpop.f32.mrb[11].mxu1 }
 0x474   : > { %v2616_v20 = vpop.f32.mrb[12].mxu1 }
 0x475   : > { %v2618_v1 = vpop.f32.mrb[13].mxu1 }
 0x478   : > { %v2621_v34 = vpop.f32.mrb[14].mxu1 }
 0x479   : > { %v2623_v38 = vpop.f32.mrb[15].mxu1 }
 0x49c   : > { %v4896_v54 = vpop.f32.mrb[16].mxu1 }
 0x49d   : > { %v4898_v42 = vpop.f32.mrb[17].mxu1 }
 0x4a0   : > { %v4901_v60 = vpop.f32.mrb[18].mxu1 }
 0x4a1   : > { %v4903_v4 = vpop.f32.mrb[19].mxu1 }
 0x4a4   : > { %v4906_v18 = vpop.f32.mrb[20].mxu1 }
 0x4a5   : > { %v4908_v10 = vpop.f32.mrb[21].mxu1 }
 0x4a8   : > { %v4911_v28 = vpop.f32.mrb[22].mxu1 }
 0x4a9   : > { %v4913_v23 = vpop.f32.mrb[23].mxu1 }
 0x4be   : > { %v4438_v6 = vpop.f32.mrb[8].mxu0 }
 0x4bf   : > { %v5918_v25 = vadd.f32 %v4438_v6, %v2606_v62  ;;  %v4440_v33 = vpop.f32.mrb[9].mxu0 }
 0x4c1   : > { %v5919_v11 = vadd.f32 %v5918_v25, %v4896_v54 }
 0x4c2   : > { %v4443_v45 = vpop.f32.mrb[10].mxu0 }
 0x4c3   : > { %4927 = vst [vmem:[%s10723_s30 + $0x20] sm:$0xff] %v5919_v11  ;;  %v5920_v8 = vadd.f32 %v4443_v45, %v2611_v22  ;;  %v4445_v35 = vpop.f32.mrb[11].mxu0  ;;  %4939 = vadd.xlane.f32.xlu1 %v5919_v11 }
 0x4c5   : > { %v5921_v50 = vadd.f32 %v5920_v8, %v4901_v60 }
 0x4c6   : > { %v4448_v36 = vpop.f32.mrb[12].mxu0 }
 0x4c7   : > { %4928 = vst [vmem:[%s10723_s30 + $0x28] sm:$0xff] %v5921_v50  ;;  %v5922_v56 = vadd.f32 %v4448_v36, %v2616_v20  ;;  %v4450_v19 = vpop.f32.mrb[13].mxu0  ;;  %4941 = vadd.xlane.f32.xlu0 %v5921_v50 }
 0x4c9   : > { %v5923_v58 = vadd.f32 %v5922_v56, %v4906_v18 }
 0x4ca   : > { %v4453_v30 = vpop.f32.mrb[14].mxu0 }
 0x4cb   : > { %4929 = vst [vmem:[%s10723_s30 + $0x30] sm:$0xff] %v5923_v58  ;;  %v5924_v51 = vadd.f32 %v4453_v30, %v2621_v34  ;;  %v4455_v37 = vpop.f32.mrb[15].mxu0 }
 0x4cd   : > { %v5925_v5 = vadd.f32 %v5924_v51, %v4911_v28 }
 0x4cf   : > { %4930 = vst [vmem:[%s10723_s30 + $0x38] sm:$0xff] %v5925_v5 }
 0x4ee   : > { %v4876_v7 = vpop.f32.mrb[0].mxu0 }
 0x4ef   : > { %v5914_v57 = vadd.f32 %v4876_v7, %v2586_v27  ;;  %v4878_v16 = vpop.f32.mrb[1].mxu0 }
 0x4f1   : > { %4923 = vst [vmem:[%s10723_s30] sm:$0xff] %v5914_v57  ;;  %4931 = vadd.xlane.f32.xlu0 %v5914_v57 }
 0x4f2   : > { %v4881_v2 = vpop.f32.mrb[2].mxu0 }
 0x4f3   : > { %v5915_v53 = vadd.f32 %v4881_v2, %v2591_v47  ;;  %v4883_v12 = vpop.f32.mrb[3].mxu0 }
 0x4f5   : > { %4924 = vst [vmem:[%s10723_s30 + $0x8] sm:$0xff] %v5915_v53  ;;  %4933 = vadd.xlane.f32.xlu1 %v5915_v53 }
 0x4f6   : > { %v4886_v43 = vpop.f32.mrb[4].mxu0 }
 0x4f7   : > { %v5916_v55 = vadd.f32 %v4886_v43, %v2596_v26  ;;  %v4888_v3 = vpop.f32.mrb[5].mxu0 }
 0x4f9   : > { %4925 = vst [vmem:[%s10723_s30 + $0x10] sm:$0xff] %v5916_v55  ;;  %4935 = vadd.xlane.f32.xlu0 %v5916_v55  ;;  %4943 = vadd.xlane.f32.xlu1 %v5923_v58 }
 0x4fa   : > { %v4891_v32 = vpop.f32.mrb[6].mxu0 }
 0x4fb   : > { %v5917_v61 = vadd.f32 %v4891_v32, %v2601_v0  ;;  %v4893_v39 = vpop.f32.mrb[7].mxu0 }
 0x4fd   : > { %4926 = vst [vmem:[%s10723_s30 + $0x18] sm:$0xff] %v5917_v61  ;;  %4937 = vadd.xlane.f32.xlu0 %v5917_v61 }
 0x501   : > { %4945 = vadd.xlane.f32.xlu0 %v5925_v5 }
 0x550   : > { %v4940_v46 = vpop.xlane.xlu1 %4939 }
 0x554   : > { %v4942_v59 = vpop.xlane.xlu0 %4941 }
 0x57e   : > { %v4932_v9 = vpop.xlane.xlu0 %4931 }
 0x582   : > { %v4934_v17 = vpop.xlane.xlu1 %4933 }
 0x586   : > { %v4936_v24 = vpop.xlane.xlu0 %4935  ;;  %v4944_v31 = vpop.xlane.xlu1 %4943 }
 0x588   : > { %4950 = sbr.rel (%p5530_p10) target bundleno = 1423 (0x58f), region = 32 }
 0x58a   : > { %v4938_v44 = vpop.xlane.xlu0 %4937 }
 0x58e   : > { %v4946_v41 = vpop.xlane.xlu0 %4945 }
 0x58f PF: > { %v4960_v29 = vld [vmem:[#allocation3] sm:$0xff]  ;;  %vm4976_vm1 = vcmask 7168   ;;  %v4961_v21 = vld [vmem:[#allocation3 + $0x8] sm:$0xff]  ;;  %v4962_v14 = vld [vmem:[#allocation3 + $0x10] sm:$0xff]  ;;  %p5531_p11 = scmp.ne.s32.totalorder %s6133_s14, 1 }
 0x590   : > { %v4968_v27 = vadd.f32 %v4960_v29, %v4932_v9  ;;  %v4969_v63 = vadd.f32 %v4961_v21, %v4934_v17  ;;  %v4970_v47 = vadd.f32 %v4962_v14, %v4936_v24  ;;  %v4963_v49 = vld [vmem:[#allocation3 + $0x18] sm:$0xff]  ;;  %v4964_v26 = vld [vmem:[#allocation3 + $0x20] sm:$0xff]  ;;  %v4965_v40 = vld [vmem:[#allocation3 + $0x28] sm:$0xff] }
 0x591   : > { %v4971_v0 = vadd.f32 %v4963_v49, %v4938_v44  ;;  %v4972_v52 = vadd.f32 %v4964_v26, %v4940_v46  ;;  %v4973_v62 = vadd.f32 %v4965_v40, %v4942_v59  ;;  %v4966_v15 = vld [vmem:[#allocation3 + $0x30] sm:$0xff]  ;;  %v4967_v22 = vld [vmem:[#allocation3 + $0x38] sm:$0xff]  ;;  %4988 = sbr.rel (%p5531_p11) target bundleno = 1438 (0x59e), region = 36 }
 0x592   : > { %4977 = vst.msk [vmem:[#allocation3] sm:$0xff] %vm4976_vm1, %v4968_v27  ;;  %4978 = vst.msk [vmem:[#allocation3 + $0x8] sm:$0xff] %vm4976_vm1, %v4969_v63  ;;  %v4974_v13 = vadd.f32 %v4966_v15, %v4944_v31  ;;  %v4975_v20 = vadd.f32 %v4967_v22, %v4946_v41 }
 0x593   : > { %4979 = vst.msk [vmem:[#allocation3 + $0x10] sm:$0xff] %vm4976_vm1, %v4970_v47  ;;  %4980 = vst.msk [vmem:[#allocation3 + $0x18] sm:$0xff] %vm4976_vm1, %v4971_v0 }
 0x594   : > { %4981 = vst.msk [vmem:[#allocation3 + $0x20] sm:$0xff] %vm4976_vm1, %v4972_v52  ;;  %4982 = vst.msk [vmem:[#allocation3 + $0x28] sm:$0xff] %vm4976_vm1, %v4973_v62 }
 0x595   : > { %4983 = vst.msk [vmem:[#allocation3 + $0x30] sm:$0xff] %vm4976_vm1, %v4974_v13  ;;  %4984 = vst.msk [vmem:[#allocation3 + $0x38] sm:$0xff] %vm4976_vm1, %v4975_v20 }
 0x599   : > { %v4989_v1 = vld [vmem:[#allocation3] sm:$0xff]  ;;  %v4990_v34 = vld [vmem:[#allocation3 + $0x8] sm:$0xff] }
 0x59a   : > { %v4991_v38 = vld [vmem:[#allocation3 + $0x10] sm:$0xff]  ;;  %4997 = vst.msk [vmem:[%s6244_s7] sm:$0xff] %vm4976_vm1, %v4989_v1  ;;  %4998 = vst.msk [vmem:[%s6244_s7 + $0x8] sm:$0xff] %vm4976_vm1, %v4990_v34  ;;  %v4992_v54 = vld [vmem:[#allocation3 + $0x18] sm:$0xff] }
 0x59b   : > { %4999 = vst.msk [vmem:[%s6244_s7 + $0x10] sm:$0xff] %vm4976_vm1, %v4991_v38  ;;  %v4993_v42 = vld [vmem:[#allocation3 + $0x20] sm:$0xff]  ;;  %v4994_v60 = vld [vmem:[#allocation3 + $0x28] sm:$0xff]  ;;  %5000 = vst.msk [vmem:[%s6244_s7 + $0x18] sm:$0xff] %vm4976_vm1, %v4992_v54 }
 0x59c   : > { %5001 = vst.msk [vmem:[%s6244_s7 + $0x20] sm:$0xff] %vm4976_vm1, %v4993_v42  ;;  %5002 = vst.msk [vmem:[%s6244_s7 + $0x28] sm:$0xff] %vm4976_vm1, %v4994_v60  ;;  %v4995_v4 = vld [vmem:[#allocation3 + $0x30] sm:$0xff]  ;;  %v4996_v18 = vld [vmem:[#allocation3 + $0x38] sm:$0xff] }
 0x59d   : > { %5003 = vst.msk [vmem:[%s6244_s7 + $0x30] sm:$0xff] %vm4976_vm1, %v4995_v4  ;;  %5004 = vst.msk [vmem:[%s6244_s7 + $0x38] sm:$0xff] %vm4976_vm1, %v4996_v18 }
 0x59e PF: > { %5016 = sbr.rel (!%p6225_p5) target bundleno = 1446 (0x5a6), region = 40  ;;  %s5533_s12 = sshll.u32 (%p6225_p5), %s6137_s15, 4  ;;  %v5062_v10 = vld [vmem:[%s10723_s30] sm:$0xff] (%p6225_p5)  ;;  %v5064_v28 = vld [vmem:[%s10723_s30 + $0x8] sm:$0xff] (%p6225_p5)  ;;  %v5066_v23 = vld [vmem:[%s10723_s30 + $0x10] sm:$0xff] (%p6225_p5) }
 0x59f   : > { %s5018_s11 = sadd.s32 (%p6225_p5), %s6133_s14, %s5533_s12  ;;  %v5068_v6 = vld [vmem:[%s10723_s30 + $0x18] sm:$0xff] (%p6225_p5)  ;;  %v5070_v25 = vld [vmem:[%s10723_s30 + $0x20] sm:$0xff] (%p6225_p5)  ;;  %v5072_v33 = vld [vmem:[%s10723_s30 + $0x28] sm:$0xff] (%p6225_p5) }
 0x5a0   : > { %s5534_s23 = sshll.u32 (%p6225_p5), %s5018_s11, 3  ;;  %v5074_v11 = vld [vmem:[%s10723_s30 + $0x30] sm:$0xff] (%p6225_p5)  ;;  %v5076_v45 = vld [vmem:[%s10723_s30 + $0x38] sm:$0xff] (%p6225_p5) }
 0x5a1   : > { %s5020_s22 = scalar_lea.vmem (%p6225_p5), %s10797_s2, %s5534_s23 }
 0x5a2   : > { %5063 = vst [vmem:[%s5020_s22] sm:$0xff] (%p6225_p5), %v5062_v10  ;;  %5065 = vst [vmem:[%s5020_s22 + $0x10] sm:$0xff] (%p6225_p5), %v5064_v28 }
 0x5a3   : > { %5067 = vst [vmem:[%s5020_s22 + $0x20] sm:$0xff] (%p6225_p5), %v5066_v23  ;;  %5069 = vst [vmem:[%s5020_s22 + $0x30] sm:$0xff] (%p6225_p5), %v5068_v6 }
 0x5a4   : > { %5071 = vst [vmem:[%s5020_s22 + $0x40] sm:$0xff] (%p6225_p5), %v5070_v25  ;;  %5073 = vst [vmem:[%s5020_s22 + $0x50] sm:$0xff] (%p6225_p5), %v5072_v33 }
 0x5a5   : > { %5075 = vst [vmem:[%s5020_s22 + $0x60] sm:$0xff] %v5074_v11  ;;  %5077 = vst [vmem:[%s5020_s22 + $0x70] sm:$0xff] %v5076_v45 }
 0x5a6 PF: > { %s14_s18 = sadd.s32 1, %s6149_s18   ;;  %s11203_s12 = smov %s6129_s13 }
 0x5a7   : > { %p11_p12 = scmp.ge.s32.totalorder %s14_s18, 6   ;;  %s11204_s13 = smov %s6236_s27 }
 0x5a8   : > { %s11205_s14 = smov %s6141_s16  ;;  %s11206_s15 = smov %s6145_s17 }
 0x5a9   : > { %s11207_s16 = smov %s11210_s19  ;;  %s11208_s17 = smov %s11214_s20 }
 0x5aa   :  { %13 = sbr.rel (!%p11_p12) target bundleno = 4 (0x4), region = 125 }

</bundles_post_ra>
